<compile_context>
chip_gen: v7x
topology: tpu7x:2x2x1
jax: 0.10.0
libtpu: 0.0.40
codegen_flags: <defaults>
</compile_context>

<pallas_src>
import functools

import jax
import jax.numpy as jnp
from jax import lax
from jax.experimental import pallas as pl
from jax.experimental.pallas import tpu as pltpu

EPS = 1e-15


def ctnet_kernel(n_orig, x_ref, adj_ref, mask_ref,
                 w1_ref, b1_ref, wcat1_ref, bcat1_ref, wr1_ref, br1_ref,
                 wp2_ref, bp2_ref, wcat2_ref, br2_ref,
                 w2_ref, b2_ref, w3_ref, b3_ref,
                 out_ref):
    f32 = jnp.float32
    eps = f32(EPS)
    tiny = f32(1e-20)

    x0 = x_ref[...]          # (Bt, N, Cin)
    adj0 = adj_ref[...]      # (Bt, N, N)
    mask = mask_ref[...]     # (Bt, N, 1)

    Bt, N, Cin = x0.shape
    H = w1_ref.shape[1]
    K1 = wcat1_ref.shape[1] - H
    K2 = wp2_ref.shape[1]
    Cout = w3_ref.shape[1]

    def mm(a, b):            # fused 2-D MXU matmul over all Bt*N rows
        return jnp.dot(a, b, preferred_element_type=f32)

    def bmm(eq, a, b):       # per-graph batched matmul (NN / NT forms)
        return jnp.einsum(eq, a, b, preferred_element_type=f32)

    def eye(n):
        r = lax.broadcasted_iota(jnp.int32, (n, n), 0)
        c = lax.broadcasted_iota(jnp.int32, (n, n), 1)
        return (r == c).astype(f32)

    def bsum(t):             # sum over all non-batch axes -> (Bt, 1)
        while t.ndim > 2:
            t = jnp.sum(t, axis=-1)
        return jnp.sum(t, axis=-1, keepdims=True)

    # ---- fused per-node linears --------------------------------------------
    # lin1 over all Bt*N rows, then ONE shared-LHS MXU pass producing both the
    # conv1 lin_root term (x1 @ wo1, no bias) and the pool1 logits (x1 @ wp1).
    x_flat = x0.reshape(Bt * N, Cin)
    x1 = mm(x_flat, w1_ref[...]) + b1_ref[...]            # (Bt*N, H)
    pr = mm(x1, wcat1_ref[...]) + bcat1_ref[...]          # (Bt*N, H+K1)
    root1 = pr[:, :H]                                     # conv1 lin_root term
    s1 = pr[:, H:]                                        # pool1 logits

    # ---- dense_CT_rewiring ---------------------------------------------------
    s = jnp.tanh(s1).reshape(Bt, N, K1) * mask            # (Bt, N, K1)
    s_sq = s * s

    # Gram matrix is needed for cdist anyway; reuse it for trace(s^T adj s).
    gram = bmm('bnk,bmk->bnm', s, s)                      # (Bt, N, N)

    d_flat = jnp.sum(adj0, axis=-1, keepdims=True)        # (Bt, N, 1) degrees
    term_ds = bsum(d_flat * s_sq)                         # trace(s^T diag(d) s)
    colsum = jnp.sum(s, axis=1)                           # (Bt, K1)
    # reference adds EPS to EVERY entry of diag_embed(d): contributes
    # EPS * ||colsum(s)||^2 to both the L-trace and d-trace terms.
    eps_col = eps * jnp.sum(colsum * colsum, axis=-1, keepdims=True)
    term_adj = bsum(adj0 * gram)                          # trace(s^T adj s), no matmul

    ct_num = term_ds + eps_col - term_adj                 # trace(s^T L s)
    ct_den = term_ds + eps_col + eps                      # trace(s^T d s) + EPS
    ct_ratio = ct_num / ct_den                            # (Bt, 1)

    ssq = jnp.sum(s_sq, axis=-1)                          # (Bt, N)
    dist2 = jnp.maximum(ssq[:, :, None] + ssq[:, None, :] - 2.0 * gram, 0.0)
    vol = bsum(d_flat) + f32(n_orig) * eps                # trace(diag(d)+EPS), orig N
    adj1 = (jnp.sqrt(dist2) / vol[:, :, None]) * adj0     # rewired adjacency

    sT = jnp.swapaxes(s, 1, 2)                            # (Bt, K1, N) tiny copy
    ss1 = bmm('bkn,bnl->bkl', sT, s)                      # (Bt, K1, K1)
    fro1 = jnp.maximum(jnp.sqrt(bsum(ss1 * ss1)), tiny)   # guard padded graphs
    eye_k1 = eye(K1)
    ortho1_sq = bsum((ss1 / fro1[:, :, None] - eye_k1[None]) ** 2)   # (Bt, 1)

    # ---- conv1: lin_rel(adj1 @ x1) + br1 + lin_root(x1) ----------------------
    x1_3d = x1.reshape(Bt, N, H)
    agg = bmm('bij,bjh->bih', adj1, x1_3d)                # (Bt, N, H)
    xc = mm(agg.reshape(Bt * N, H), wr1_ref[...]) + br1_ref[...] + root1

    # ---- pool2 + dense_mincut_pool -------------------------------------------
    s2 = mm(xc, wp2_ref[...]) + bp2_ref[...]              # (Bt*N, K2)
    s2 = s2 - jnp.max(s2, axis=-1, keepdims=True)
    es = jnp.exp(s2)
    sm = (es / jnp.sum(es, axis=-1, keepdims=True)).reshape(Bt, N, K2) * mask
    xm = xc.reshape(Bt, N, H) * mask

    smT = jnp.swapaxes(sm, 1, 2)                          # (Bt, K2, N) tiny copy
    out_x = bmm('bkn,bnh->bkh', smT, xm)                  # (Bt, K2, H)
    sa = bmm('bkn,bnj->bkj', smT, adj1)                   # s^T adj  (Bt, K2, N)
    out_adj2 = bmm('bkj,bjl->bkl', sa, sm)                # (Bt, K2, K2)

    eye_k2 = eye(K2)
    mincut_num = bsum(out_adj2 * eye_k2[None])            # trace
    d_flat2 = jnp.sum(adj1, axis=-1, keepdims=True) + eps  # (Bt, N, 1)
    mincut_den = bsum(d_flat2 * sm * sm)                  # trace(s^T diag(d) s)
    mincut_ratio = -(mincut_num / mincut_den)             # (Bt, 1)

    ss2 = bmm('bkn,bnl->bkl', smT, sm)                    # (Bt, K2, K2)
    fro2 = jnp.maximum(jnp.sqrt(bsum(ss2 * ss2)), tiny)
    i_n = eye_k2 / jnp.sqrt(f32(K2))
    ortho2 = jnp.sqrt(bsum((ss2 / fro2[:, :, None] - i_n[None]) ** 2))  # (Bt,1)

    # zero diagonal + symmetric degree-normalize pooled adjacency (exact div)
    out_adj2 = out_adj2 * (1.0 - eye_k2[None])
    dd = jnp.sqrt(jnp.sum(out_adj2, axis=-1) + eps) + eps  # (Bt, K2)
    out_adj2 = out_adj2 / dd[:, :, None] / dd[:, None, :]

    # ---- conv2 (fused [agg2 | out_x] @ [wr2 ; wo2]) + readout ----------------
    agg2 = bmm('bkl,blh->bkh', out_adj2, out_x)           # (Bt, K2, H)
    cat2 = jnp.concatenate([agg2, out_x], axis=-1).reshape(Bt * K2, 2 * H)
    x2 = mm(cat2, wcat2_ref[...]) + br2_ref[...]          # (Bt*K2, H)
    xg = jnp.sum(x2.reshape(Bt, K2, H), axis=1)           # (Bt, H)
    h = jnp.maximum(mm(xg, w2_ref[...]) + b2_ref[...], 0.0)
    logits = mm(h, w3_ref[...]) + b3_ref[...]             # (Bt, Cout)
    z = logits - jnp.max(logits, axis=-1, keepdims=True)
    logp = z - jnp.log(jnp.sum(jnp.exp(z), axis=-1, keepdims=True))

    # ---- single packed store: [logp | ct | ortho1_sq | mincut | ortho2] ------
    out_ref[...] = jnp.concatenate(
        [logp, ct_ratio, ortho1_sq, mincut_ratio, ortho2], axis=-1)


def _vmem_capacity_bytes():
    try:
        return int(pltpu.get_tpu_info().vmem_capacity_bytes)
    except Exception:
        return 64 * 1024 * 1024          # conservative (v7x) fallback


def _derive_block_b(B, N_pad, Cin, H, vmem_cap):
    """Pick the batch-block size from the per-graph VMEM footprint."""
    # ~6x N^2 f32 live per graph (double-buffered adj input + adj1 + gram +
    # dist2 + slack) plus the per-node activation slabs.
    per_graph = (6 * N_pad * N_pad + 10 * N_pad * max(128, Cin + 4 * H)) * 4
    budget = int(vmem_cap * 0.70)
    bt = int(max(1, min(budget // per_graph, 32)))
    if bt >= B:
        # Whole batch fits in one block.  For B > 8 split into two blocks so
        # dimension_semantics=("parallel",) can shard the grid over v7x's two
        # TensorCores (no-op on single-core v5e/v6e); for tiny B the padding
        # cost of splitting outweighs that.
        return B if B <= 8 else -(-B // 2)
    return bt


def ctnet_forward(x_dense, adj, mask, params, block_b=None):
    """x_dense: (B,N,Cin), adj: (B,N,N), mask: (B,N) -> (logp, ct_loss, mincut_loss)."""
    f32 = jnp.float32
    B, N, Cin = x_dense.shape
    H = params["w1"].shape[1]
    K1 = params["wp1"].shape[1]
    K2 = params["wp2"].shape[1]
    Cout = params["w3"].shape[1]
    C_pack = Cout + 4

    x_dense = x_dense.astype(f32)
    adj = adj.astype(f32)
    mask3 = mask.reshape(B, N, 1).astype(f32)

    # Pad N to a multiple of 128: lane-dense adj/gram/dist2 and relayout-free
    # (Bt,N,.) <-> (Bt*N,.) reshapes.  Padded nodes have mask=0 and zero
    # adjacency rows/cols, so they drop out of every trace/loss term; the
    # reference's N*EPS volume term uses the original N (closed over below).
    N_pad = ((N + 127) // 128) * 128
    if N_pad != N:
        pn = N_pad - N
        x_dense = jnp.pad(x_dense, ((0, 0), (0, pn), (0, 0)))
        adj = jnp.pad(adj, ((0, 0), (0, pn), (0, pn)))
        mask3 = jnp.pad(mask3, ((0, 0), (0, pn), (0, 0)))

    vmem_cap = _vmem_capacity_bytes()
    if block_b is None:
        block_b = _derive_block_b(B, N_pad, Cin, H, vmem_cap)
    Bt = max(1, min(int(block_b), B))
    G = -(-B // Bt)
    B_pad = G * Bt
    if B_pad != B:
        pb = B_pad - B
        x_dense = jnp.pad(x_dense, ((0, pb), (0, 0), (0, 0)))
        adj = jnp.pad(adj, ((0, pb), (0, 0), (0, 0)))
        mask3 = jnp.pad(mask3, ((0, pb), (0, 0), (0, 0)))

    # Host-side weight fusion:
    #   wcat1 = [wo1 | wp1]: one shared-LHS pass over x1 -> conv1 lin_root + pool1
    #   wcat2 = [wr2 ; wo2]: conv2 lin_rel/lin_root fused (contraction depth 2H)
    wcat1 = jnp.concatenate([params["wo1"], params["wp1"]], axis=1).astype(f32)
    bcat1 = jnp.concatenate(
        [jnp.zeros((1, H), f32), params["bp1"].astype(f32)], axis=1)
    wcat2 = jnp.concatenate([params["wr2"], params["wo2"]], axis=0).astype(f32)

    weight_args = [params["w1"], params["b1"], wcat1, bcat1,
                   params["wr1"], params["br1"],
                   params["wp2"], params["bp2"], wcat2, params["br2"],
                   params["w2"], params["b2"], params["w3"], params["b3"]]
    weight_args = [jnp.asarray(w, f32) for w in weight_args]

    def const_spec(shape):
        nd = len(shape)
        return pl.BlockSpec(shape, lambda b, _nd=nd: (0,) * _nd)

    in_specs = [
        pl.BlockSpec((Bt, N_pad, Cin), lambda b: (b, 0, 0)),
        pl.BlockSpec((Bt, N_pad, N_pad), lambda b: (b, 0, 0)),
        pl.BlockSpec((Bt, N_pad, 1), lambda b: (b, 0, 0)),
    ] + [const_spec(w.shape) for w in weight_args]

    # Scoped-VMEM limit: generation aware (v5e/v6e 128 MiB physical, v7x 64 MiB),
    # sized from the actual block footprint with headroom.
    adj_blk = Bt * N_pad * N_pad * 4
    node_blk = Bt * N_pad * max(128, Cin + 6 * H + K1 + K2) * 4
    est = 6 * adj_blk + 3 * node_blk + (8 << 20)
    vmem_limit = int(min(vmem_cap * 0.9, max(32 << 20, est)))

    out = pl.pallas_call(
        functools.partial(ctnet_kernel, N),
        out_shape=jax.ShapeDtypeStruct((G, Bt, C_pack), f32),
        grid_spec=pltpu.PrefetchScalarGridSpec(
            num_scalar_prefetch=0,
            grid=(G,),
            in_specs=in_specs,
            out_specs=pl.BlockSpec((None, Bt, C_pack), lambda b: (b, 0, 0)),
        ),
        compiler_params=pltpu.CompilerParams(
            dimension_semantics=("parallel",),   # v7x: shard batch over 2 TCs
            vmem_limit_bytes=vmem_limit),
    )(x_dense, adj, mask3, *weight_args)

    out = out.reshape(B_pad, C_pack)
    logp = out[:B, :Cout]
    ct_ratio = out[:B, Cout]
    ortho1_sq = out[:B, Cout + 1]
    mincut_ratio = out[:B, Cout + 2]
    ortho2 = out[:B, Cout + 3]

    # torch.norm over the full (B,k,k) tensor == sqrt of summed per-graph sq-norms
    ct_loss = jnp.mean(ct_ratio) + jnp.sqrt(jnp.sum(ortho1_sq))
    mincut_loss = jnp.mean(mincut_ratio) + jnp.mean(ortho2)
    return logp, ct_loss, mincut_loss


def init_params(key, in_channels, hidden, k_centers, out_channels):
    ks = jax.random.split(key, 16)
    n = lambda k, shape: (jax.random.normal(k, shape, jnp.float32) * 0.1)
    H, K1, K2 = hidden, k_centers, 16
    return {
        "w1": n(ks[0], (in_channels, H)), "b1": n(ks[1], (1, H)),
        "wp1": n(ks[2], (H, K1)), "bp1": n(ks[3], (1, K1)),
        "wr1": n(ks[4], (H, H)), "br1": n(ks[5], (1, H)), "wo1": n(ks[6], (H, H)),
        "wp2": n(ks[7], (H, K2)), "bp2": n(ks[8], (1, K2)),
        "wr2": n(ks[9], (H, H)), "br2": n(ks[10], (1, H)), "wo2": n(ks[11], (H, H)),
        "w2": n(ks[12], (H, H)), "b2": n(ks[13], (1, H)),
        "w3": n(ks[14], (H, out_channels)), "b3": n(ks[15], (1, out_channels)),
    }


if __name__ == "__main__":
    key = jax.random.PRNGKey(0)
    kx, ka, kp = jax.random.split(key, 3)

    B, N = 2, 16
    in_channels, hidden, k_centers, out_channels = 4, 32, 8, 4
    n_nodes = jnp.array([13, 16], dtype=jnp.int32)     # ragged graph sizes

    # Dense-batched graph construction (equivalent to to_dense_batch/to_dense_adj
    # output).  TODO(synk): sparse edge_index/batch -> dense conversion is
    # host-side data prep, kept in plain JAX.
    node_idx = lax.broadcasted_iota(jnp.int32, (B, N), 1)
    mask = (node_idx < n_nodes[:, None]).astype(jnp.float32)      # (B, N)

    x_dense = jax.random.normal(kx, (B, N, in_channels), jnp.float32)
    x_dense = x_dense * mask[:, :, None]

    a_raw = (jax.random.uniform(ka, (B, N, N)) < 0.3).astype(jnp.float32)
    adj = jnp.clip(a_raw + jnp.swapaxes(a_raw, 1, 2), 0.0, 1.0)   # symmetric 0/1
    eye = jnp.eye(N, dtype=jnp.float32)[None]
    adj = adj * (1.0 - eye)                                        # no self-loops
    adj = adj * mask[:, :, None] * mask[:, None, :]                # drop padded nodes

    params = init_params(kp, in_channels, hidden, k_centers, out_channels)

    logp, ct_loss, mincut_loss = ctnet_forward(x_dense, adj, mask, params)
    jax.block_until_ready((logp, ct_loss, mincut_loss))
    print("KERNEL_OK")
</pallas_src>

<mosaic_0001>
module attributes {stable_mosaic.version = 11 : i64} {
  func.func @ctnet_kernel(%arg0: i32, %arg1: memref<2x128x4xf32, #tpu.memory_space<vmem>>, %arg2: memref<2x128x128xf32, #tpu.memory_space<vmem>>, %arg3: memref<2x128x1xf32, #tpu.memory_space<vmem>>, %arg4: memref<4x32xf32, #tpu.memory_space<vmem>>, %arg5: memref<1x32xf32, #tpu.memory_space<vmem>>, %arg6: memref<32x40xf32, #tpu.memory_space<vmem>>, %arg7: memref<1x40xf32, #tpu.memory_space<vmem>>, %arg8: memref<32x32xf32, #tpu.memory_space<vmem>>, %arg9: memref<1x32xf32, #tpu.memory_space<vmem>>, %arg10: memref<32x16xf32, #tpu.memory_space<vmem>>, %arg11: memref<1x16xf32, #tpu.memory_space<vmem>>, %arg12: memref<64x32xf32, #tpu.memory_space<vmem>>, %arg13: memref<1x32xf32, #tpu.memory_space<vmem>>, %arg14: memref<32x32xf32, #tpu.memory_space<vmem>>, %arg15: memref<1x32xf32, #tpu.memory_space<vmem>>, %arg16: memref<32x4xf32, #tpu.memory_space<vmem>>, %arg17: memref<1x4xf32, #tpu.memory_space<vmem>>, %arg18: memref<1x2x8xf32, #tpu.memory_space<vmem>>) attributes {dimension_semantics = [#tpu.dimension_semantics<parallel>], iteration_bounds = array<i64: 1>, scalar_prefetch = 0 : i64, scratch_operands = 0 : i64, tpu.core_type = #tpu.core_type<tc>, window_params = [{transform_indices = @transform_0, window_bounds = array<i64: 2, 128, 4>}, {transform_indices = @transform_1, window_bounds = array<i64: 2, 128, 128>}, {transform_indices = @transform_2, window_bounds = array<i64: 2, 128, 1>}, {pipeline_mode = #tpu.pipeline_mode<synchronous>, transform_indices = @transform_3, window_bounds = array<i64: 4, 32>}, {pipeline_mode = #tpu.pipeline_mode<synchronous>, transform_indices = @transform_4, window_bounds = array<i64: 1, 32>}, {pipeline_mode = #tpu.pipeline_mode<synchronous>, transform_indices = @transform_5, window_bounds = array<i64: 32, 40>}, {pipeline_mode = #tpu.pipeline_mode<synchronous>, transform_indices = @transform_6, window_bounds = array<i64: 1, 40>}, {pipeline_mode = #tpu.pipeline_mode<synchronous>, transform_indices = @transform_7, window_bounds = array<i64: 32, 32>}, {pipeline_mode = #tpu.pipeline_mode<synchronous>, transform_indices = @transform_8, window_bounds = array<i64: 1, 32>}, {pipeline_mode = #tpu.pipeline_mode<synchronous>, transform_indices = @transform_9, window_bounds = array<i64: 32, 16>}, {pipeline_mode = #tpu.pipeline_mode<synchronous>, transform_indices = @transform_10, window_bounds = array<i64: 1, 16>}, {pipeline_mode = #tpu.pipeline_mode<synchronous>, transform_indices = @transform_11, window_bounds = array<i64: 64, 32>}, {pipeline_mode = #tpu.pipeline_mode<synchronous>, transform_indices = @transform_12, window_bounds = array<i64: 1, 32>}, {pipeline_mode = #tpu.pipeline_mode<synchronous>, transform_indices = @transform_13, window_bounds = array<i64: 32, 32>}, {pipeline_mode = #tpu.pipeline_mode<synchronous>, transform_indices = @transform_14, window_bounds = array<i64: 1, 32>}, {pipeline_mode = #tpu.pipeline_mode<synchronous>, transform_indices = @transform_15, window_bounds = array<i64: 32, 4>}, {pipeline_mode = #tpu.pipeline_mode<synchronous>, transform_indices = @transform_16, window_bounds = array<i64: 1, 4>}, {transform_indices = @transform_17, window_bounds = array<i64: 1, 2, 8>}]} {
    %c0 = arith.constant 0 : index
    %c0_0 = arith.constant 0 : index
    %c0_1 = arith.constant 0 : index
    %0 = vector.load %arg1[%c0, %c0_0, %c0_1] : memref<2x128x4xf32, #tpu.memory_space<vmem>>, vector<2x128x4xf32>
    %c0_2 = arith.constant 0 : index
    %c0_3 = arith.constant 0 : index
    %c0_4 = arith.constant 0 : index
    %1 = vector.load %arg2[%c0_2, %c0_3, %c0_4] : memref<2x128x128xf32, #tpu.memory_space<vmem>>, vector<2x128x128xf32>
    %c0_5 = arith.constant 0 : index
    %c0_6 = arith.constant 0 : index
    %c0_7 = arith.constant 0 : index
    %2 = vector.load %arg3[%c0_5, %c0_6, %c0_7] : memref<2x128x1xf32, #tpu.memory_space<vmem>>, vector<2x128x1xf32>
    %3 = vector.shape_cast %0 : vector<2x128x4xf32> to vector<256x4xf32>
    %c0_8 = arith.constant 0 : index
    %c0_9 = arith.constant 0 : index
    %4 = vector.load %arg4[%c0_8, %c0_9] : memref<4x32xf32, #tpu.memory_space<vmem>>, vector<4x32xf32>
    %cst = arith.constant dense<0.000000e+00> : vector<256x32xf32>
    %5 = tpu.matmul %3, %4, %cst {dimension_numbers = #tpu.dot_dimension_numbers<[1], [0], [0], [1], [0, 0, 1, 1], [], []>} : vector<256x4xf32>, vector<4x32xf32>, vector<256x32xf32> -> vector<256x32xf32>
    %c0_10 = arith.constant 0 : index
    %c0_11 = arith.constant 0 : index
    %6 = vector.load %arg5[%c0_10, %c0_11] : memref<1x32xf32, #tpu.memory_space<vmem>>, vector<1x32xf32>
    %7 = vector.broadcast %6 : vector<1x32xf32> to vector<256x32xf32>
    %8 = arith.addf %5, %7 : vector<256x32xf32>
    %c0_12 = arith.constant 0 : index
    %c0_13 = arith.constant 0 : index
    %9 = vector.load %arg6[%c0_12, %c0_13] : memref<32x40xf32, #tpu.memory_space<vmem>>, vector<32x40xf32>
    %cst_14 = arith.constant dense<0.000000e+00> : vector<256x40xf32>
    %10 = tpu.matmul %8, %9, %cst_14 {dimension_numbers = #tpu.dot_dimension_numbers<[1], [0], [0], [1], [0, 0, 1, 1], [], []>} : vector<256x32xf32>, vector<32x40xf32>, vector<256x40xf32> -> vector<256x40xf32>
    %c0_15 = arith.constant 0 : index
    %c0_16 = arith.constant 0 : index
    %11 = vector.load %arg7[%c0_15, %c0_16] : memref<1x40xf32, #tpu.memory_space<vmem>>, vector<1x40xf32>
    %12 = vector.broadcast %11 : vector<1x40xf32> to vector<256x40xf32>
    %13 = arith.addf %10, %12 : vector<256x40xf32>
    %14 = vector.extract_strided_slice %13 {offsets = [0, 0], sizes = [256, 32], strides = [1, 1]} : vector<256x40xf32> to vector<256x32xf32>
    %15 = vector.extract_strided_slice %13 {offsets = [0, 32], sizes = [256, 8], strides = [1, 1]} : vector<256x40xf32> to vector<256x8xf32>
    %16 = math.tanh %15 : vector<256x8xf32>
    %17 = vector.shape_cast %16 : vector<256x8xf32> to vector<2x128x8xf32>
    %18 = vector.broadcast %2 : vector<2x128x1xf32> to vector<2x128x8xf32>
    %19 = arith.mulf %17, %18 : vector<2x128x8xf32>
    %20 = arith.mulf %19, %19 : vector<2x128x8xf32>
    "tpu.trace_start"() <{level = 10 : i32, message = "bnk,bmk->bnm"}> : () -> ()
    %cst_17 = arith.constant dense<0.000000e+00> : vector<2x128x128xf32>
    %21 = tpu.matmul %19, %19, %cst_17 {dimension_numbers = #tpu.dot_dimension_numbers<[2], [2], [1], [1], [0, 0, 0, 1, 1, 1], [0], [0]>} : vector<2x128x8xf32>, vector<2x128x8xf32>, vector<2x128x128xf32> -> vector<2x128x128xf32>
    "tpu.trace_stop"() : () -> ()
    %cst_18 = arith.constant dense<0.000000e+00> : vector<2x128xf32>
    %22 = vector.multi_reduction <add>, %1, %cst_18 [2] : vector<2x128x128xf32> to vector<2x128xf32>
    %23 = vector.shape_cast %22 : vector<2x128xf32> to vector<2x128x1xf32>
    %24 = vector.broadcast %23 : vector<2x128x1xf32> to vector<2x128x8xf32>
    %25 = arith.mulf %24, %20 : vector<2x128x8xf32>
    %cst_19 = arith.constant dense<0.000000e+00> : vector<2x128xf32>
    %26 = vector.multi_reduction <add>, %25, %cst_19 [2] : vector<2x128x8xf32> to vector<2x128xf32>
    %cst_20 = arith.constant dense<0.000000e+00> : vector<2xf32>
    %27 = vector.multi_reduction <add>, %26, %cst_20 [1] : vector<2x128xf32> to vector<2xf32>
    %28 = vector.shape_cast %27 : vector<2xf32> to vector<2x1xf32>
    %cst_21 = arith.constant dense<0.000000e+00> : vector<2x8xf32>
    %29 = vector.multi_reduction <add>, %19, %cst_21 [1] : vector<2x128x8xf32> to vector<2x8xf32>
    %30 = arith.mulf %29, %29 : vector<2x8xf32>
    %cst_22 = arith.constant dense<0.000000e+00> : vector<2xf32>
    %31 = vector.multi_reduction <add>, %30, %cst_22 [1] : vector<2x8xf32> to vector<2xf32>
    %32 = vector.shape_cast %31 : vector<2xf32> to vector<2x1xf32>
    %cst_23 = arith.constant 1.000000e-15 : f32
    %33 = vector.broadcast %cst_23 : f32 to vector<2x1xf32>
    %34 = arith.mulf %33, %32 : vector<2x1xf32>
    %35 = arith.mulf %1, %21 : vector<2x128x128xf32>
    %cst_24 = arith.constant dense<0.000000e+00> : vector<2x128xf32>
    %36 = vector.multi_reduction <add>, %35, %cst_24 [2] : vector<2x128x128xf32> to vector<2x128xf32>
    %cst_25 = arith.constant dense<0.000000e+00> : vector<2xf32>
    %37 = vector.multi_reduction <add>, %36, %cst_25 [1] : vector<2x128xf32> to vector<2xf32>
    %38 = vector.shape_cast %37 : vector<2xf32> to vector<2x1xf32>
    %39 = arith.addf %28, %34 : vector<2x1xf32>
    %40 = arith.subf %39, %38 : vector<2x1xf32>
    %41 = arith.addf %28, %34 : vector<2x1xf32>
    %cst_26 = arith.constant 1.000000e-15 : f32
    %42 = vector.broadcast %cst_26 : f32 to vector<2x1xf32>
    %43 = arith.addf %41, %42 : vector<2x1xf32>
    %44 = arith.divf %40, %43 : vector<2x1xf32>
    %cst_27 = arith.constant dense<0.000000e+00> : vector<2x128xf32>
    %45 = vector.multi_reduction <add>, %20, %cst_27 [2] : vector<2x128x8xf32> to vector<2x128xf32>
    %46 = vector.shape_cast %45 : vector<2x128xf32> to vector<2x128x1xf32>
    %47 = vector.shape_cast %45 : vector<2x128xf32> to vector<2x1x128xf32>
    %48 = vector.broadcast %46 : vector<2x128x1xf32> to vector<2x128x128xf32>
    %49 = vector.broadcast %47 : vector<2x1x128xf32> to vector<2x128x128xf32>
    %50 = arith.addf %48, %49 : vector<2x128x128xf32>
    %cst_28 = arith.constant 2.000000e+00 : f32
    %51 = vector.broadcast %cst_28 : f32 to vector<2x128x128xf32>
    %52 = arith.mulf %51, %21 : vector<2x128x128xf32>
    %53 = arith.subf %50, %52 : vector<2x128x128xf32>
    %cst_29 = arith.constant 0.000000e+00 : f32
    %54 = vector.broadcast %cst_29 : f32 to vector<2x128x128xf32>
    %55 = arith.maximumf %53, %54 : vector<2x128x128xf32>
    %cst_30 = arith.constant dense<0.000000e+00> : vector<2x128xf32>
    %56 = vector.multi_reduction <add>, %23, %cst_30 [2] : vector<2x128x1xf32> to vector<2x128xf32>
    %cst_31 = arith.constant dense<0.000000e+00> : vector<2xf32>
    %57 = vector.multi_reduction <add>, %56, %cst_31 [1] : vector<2x128xf32> to vector<2xf32>
    %58 = vector.shape_cast %57 : vector<2xf32> to vector<2x1xf32>
    %cst_32 = arith.constant 1.600000e+01 : f32
    %cst_33 = arith.constant 1.000000e-15 : f32
    %59 = arith.mulf %cst_32, %cst_33 : f32
    %60 = vector.broadcast %59 : f32 to vector<2x1xf32>
    %61 = arith.addf %58, %60 : vector<2x1xf32>
    %62 = math.sqrt %55 : vector<2x128x128xf32>
    %63 = vector.shape_cast %61 : vector<2x1xf32> to vector<2x1x1xf32>
    %64 = vector.broadcast %63 : vector<2x1x1xf32> to vector<2x128x128xf32>
    %65 = arith.divf %62, %64 : vector<2x128x128xf32>
    %66 = arith.mulf %65, %1 : vector<2x128x128xf32>
    %67 = tpu.transpose %19, [0, 2, 1] : vector<2x128x8xf32> -> vector<2x8x128xf32>
    "tpu.trace_start"() <{level = 10 : i32, message = "bkn,bnl->bkl"}> : () -> ()
    %cst_34 = arith.constant dense<0.000000e+00> : vector<2x8x8xf32>
    %68 = tpu.matmul %67, %19, %cst_34 {dimension_numbers = #tpu.dot_dimension_numbers<[2], [1], [1], [2], [0, 0, 0, 1, 1, 2], [0], [0]>} : vector<2x8x128xf32>, vector<2x128x8xf32>, vector<2x8x8xf32> -> vector<2x8x8xf32>
    "tpu.trace_stop"() : () -> ()
    %69 = arith.mulf %68, %68 : vector<2x8x8xf32>
    %cst_35 = arith.constant dense<0.000000e+00> : vector<2x8xf32>
    %70 = vector.multi_reduction <add>, %69, %cst_35 [2] : vector<2x8x8xf32> to vector<2x8xf32>
    %cst_36 = arith.constant dense<0.000000e+00> : vector<2xf32>
    %71 = vector.multi_reduction <add>, %70, %cst_36 [1] : vector<2x8xf32> to vector<2xf32>
    %72 = vector.shape_cast %71 : vector<2xf32> to vector<2x1xf32>
    %73 = math.sqrt %72 : vector<2x1xf32>
    %cst_37 = arith.constant 9.99999968E-21 : f32
    %74 = vector.broadcast %cst_37 : f32 to vector<2x1xf32>
    %75 = arith.maximumf %73, %74 : vector<2x1xf32>
    %76 = tpu.iota {dimensions = array<i32: 0>} : vector<8x8xi32>
    %77 = tpu.iota {dimensions = array<i32: 1>} : vector<8x8xi32>
    %78 = arith.cmpi eq, %76, %77 : vector<8x8xi32>
    %79 = arith.extui %78 : vector<8x8xi1> to vector<8x8xi32>
    %80 = arith.sitofp %79 : vector<8x8xi32> to vector<8x8xf32>
    %81 = vector.shape_cast %75 : vector<2x1xf32> to vector<2x1x1xf32>
    %82 = vector.broadcast %81 : vector<2x1x1xf32> to vector<2x8x8xf32>
    %83 = arith.divf %68, %82 : vector<2x8x8xf32>
    %84 = vector.shape_cast %80 : vector<8x8xf32> to vector<1x8x8xf32>
    %85 = vector.broadcast %84 : vector<1x8x8xf32> to vector<2x8x8xf32>
    %86 = arith.subf %83, %85 : vector<2x8x8xf32>
    %87 = arith.mulf %86, %86 : vector<2x8x8xf32>
    %cst_38 = arith.constant dense<0.000000e+00> : vector<2x8xf32>
    %88 = vector.multi_reduction <add>, %87, %cst_38 [2] : vector<2x8x8xf32> to vector<2x8xf32>
    %cst_39 = arith.constant dense<0.000000e+00> : vector<2xf32>
    %89 = vector.multi_reduction <add>, %88, %cst_39 [1] : vector<2x8xf32> to vector<2xf32>
    %90 = vector.shape_cast %89 : vector<2xf32> to vector<2x1xf32>
    %91 = vector.shape_cast %8 : vector<256x32xf32> to vector<2x128x32xf32>
    "tpu.trace_start"() <{level = 10 : i32, message = "bij,bjh->bih"}> : () -> ()
    %cst_40 = arith.constant dense<0.000000e+00> : vector<2x128x32xf32>
    %92 = tpu.matmul %66, %91, %cst_40 {dimension_numbers = #tpu.dot_dimension_numbers<[2], [1], [1], [2], [0, 0, 0, 1, 1, 2], [0], [0]>} : vector<2x128x128xf32>, vector<2x128x32xf32>, vector<2x128x32xf32> -> vector<2x128x32xf32>
    "tpu.trace_stop"() : () -> ()
    %93 = vector.shape_cast %92 : vector<2x128x32xf32> to vector<256x32xf32>
    %c0_41 = arith.constant 0 : index
    %c0_42 = arith.constant 0 : index
    %94 = vector.load %arg8[%c0_41, %c0_42] : memref<32x32xf32, #tpu.memory_space<vmem>>, vector<32x32xf32>
    %cst_43 = arith.constant dense<0.000000e+00> : vector<256x32xf32>
    %95 = tpu.matmul %93, %94, %cst_43 {dimension_numbers = #tpu.dot_dimension_numbers<[1], [0], [0], [1], [0, 0, 1, 1], [], []>} : vector<256x32xf32>, vector<32x32xf32>, vector<256x32xf32> -> vector<256x32xf32>
    %c0_44 = arith.constant 0 : index
    %c0_45 = arith.constant 0 : index
    %96 = vector.load %arg9[%c0_44, %c0_45] : memref<1x32xf32, #tpu.memory_space<vmem>>, vector<1x32xf32>
    %97 = vector.broadcast %96 : vector<1x32xf32> to vector<256x32xf32>
    %98 = arith.addf %95, %97 : vector<256x32xf32>
    %99 = arith.addf %98, %14 : vector<256x32xf32>
    %c0_46 = arith.constant 0 : index
    %c0_47 = arith.constant 0 : index
    %100 = vector.load %arg10[%c0_46, %c0_47] : memref<32x16xf32, #tpu.memory_space<vmem>>, vector<32x16xf32>
    %cst_48 = arith.constant dense<0.000000e+00> : vector<256x16xf32>
    %101 = tpu.matmul %99, %100, %cst_48 {dimension_numbers = #tpu.dot_dimension_numbers<[1], [0], [0], [1], [0, 0, 1, 1], [], []>} : vector<256x32xf32>, vector<32x16xf32>, vector<256x16xf32> -> vector<256x16xf32>
    %c0_49 = arith.constant 0 : index
    %c0_50 = arith.constant 0 : index
    %102 = vector.load %arg11[%c0_49, %c0_50] : memref<1x16xf32, #tpu.memory_space<vmem>>, vector<1x16xf32>
    %103 = vector.broadcast %102 : vector<1x16xf32> to vector<256x16xf32>
    %104 = arith.addf %101, %103 : vector<256x16xf32>
    %cst_51 = arith.constant dense<0xFF800000> : vector<256xf32>
    %105 = vector.multi_reduction <maximumf>, %104, %cst_51 [1] : vector<256x16xf32> to vector<256xf32>
    %106 = vector.shape_cast %105 : vector<256xf32> to vector<256x1xf32>
    %107 = vector.broadcast %106 : vector<256x1xf32> to vector<256x16xf32>
    %108 = arith.subf %104, %107 : vector<256x16xf32>
    %109 = math.exp %108 : vector<256x16xf32>
    %cst_52 = arith.constant dense<0.000000e+00> : vector<256xf32>
    %110 = vector.multi_reduction <add>, %109, %cst_52 [1] : vector<256x16xf32> to vector<256xf32>
    %111 = vector.shape_cast %110 : vector<256xf32> to vector<256x1xf32>
    %112 = vector.broadcast %111 : vector<256x1xf32> to vector<256x16xf32>
    %113 = arith.divf %109, %112 : vector<256x16xf32>
    %114 = vector.shape_cast %113 : vector<256x16xf32> to vector<2x128x16xf32>
    %115 = vector.broadcast %2 : vector<2x128x1xf32> to vector<2x128x16xf32>
    %116 = arith.mulf %114, %115 : vector<2x128x16xf32>
    %117 = vector.shape_cast %99 : vector<256x32xf32> to vector<2x128x32xf32>
    %118 = vector.broadcast %2 : vector<2x128x1xf32> to vector<2x128x32xf32>
    %119 = arith.mulf %117, %118 : vector<2x128x32xf32>
    %120 = tpu.transpose %116, [0, 2, 1] : vector<2x128x16xf32> -> vector<2x16x128xf32>
    "tpu.trace_start"() <{level = 10 : i32, message = "bkn,bnh->bkh"}> : () -> ()
    %cst_53 = arith.constant dense<0.000000e+00> : vector<2x16x32xf32>
    %121 = tpu.matmul %120, %119, %cst_53 {dimension_numbers = #tpu.dot_dimension_numbers<[2], [1], [1], [2], [0, 0, 0, 1, 1, 2], [0], [0]>} : vector<2x16x128xf32>, vector<2x128x32xf32>, vector<2x16x32xf32> -> vector<2x16x32xf32>
    "tpu.trace_stop"() : () -> ()
    "tpu.trace_start"() <{level = 10 : i32, message = "bkn,bnj->bkj"}> : () -> ()
    %cst_54 = arith.constant dense<0.000000e+00> : vector<2x16x128xf32>
    %122 = tpu.matmul %120, %66, %cst_54 {dimension_numbers = #tpu.dot_dimension_numbers<[2], [1], [1], [2], [0, 0, 0, 1, 1, 2], [0], [0]>} : vector<2x16x128xf32>, vector<2x128x128xf32>, vector<2x16x128xf32> -> vector<2x16x128xf32>
    "tpu.trace_stop"() : () -> ()
    "tpu.trace_start"() <{level = 10 : i32, message = "bkj,bjl->bkl"}> : () -> ()
    %cst_55 = arith.constant dense<0.000000e+00> : vector<2x16x16xf32>
    %123 = tpu.matmul %122, %116, %cst_55 {dimension_numbers = #tpu.dot_dimension_numbers<[2], [1], [1], [2], [0, 0, 0, 1, 1, 2], [0], [0]>} : vector<2x16x128xf32>, vector<2x128x16xf32>, vector<2x16x16xf32> -> vector<2x16x16xf32>
    "tpu.trace_stop"() : () -> ()
    %124 = tpu.iota {dimensions = array<i32: 0>} : vector<16x16xi32>
    %125 = tpu.iota {dimensions = array<i32: 1>} : vector<16x16xi32>
    %126 = arith.cmpi eq, %124, %125 : vector<16x16xi32>
    %127 = arith.extui %126 : vector<16x16xi1> to vector<16x16xi32>
    %128 = arith.sitofp %127 : vector<16x16xi32> to vector<16x16xf32>
    %129 = vector.shape_cast %128 : vector<16x16xf32> to vector<1x16x16xf32>
    %130 = vector.broadcast %129 : vector<1x16x16xf32> to vector<2x16x16xf32>
    %131 = arith.mulf %123, %130 : vector<2x16x16xf32>
    %cst_56 = arith.constant dense<0.000000e+00> : vector<2x16xf32>
    %132 = vector.multi_reduction <add>, %131, %cst_56 [2] : vector<2x16x16xf32> to vector<2x16xf32>
    %cst_57 = arith.constant dense<0.000000e+00> : vector<2xf32>
    %133 = vector.multi_reduction <add>, %132, %cst_57 [1] : vector<2x16xf32> to vector<2xf32>
    %134 = vector.shape_cast %133 : vector<2xf32> to vector<2x1xf32>
    %cst_58 = arith.constant dense<0.000000e+00> : vector<2x128xf32>
    %135 = vector.multi_reduction <add>, %66, %cst_58 [2] : vector<2x128x128xf32> to vector<2x128xf32>
    %136 = vector.shape_cast %135 : vector<2x128xf32> to vector<2x128x1xf32>
    %cst_59 = arith.constant 1.000000e-15 : f32
    %137 = vector.broadcast %cst_59 : f32 to vector<2x128x1xf32>
    %138 = arith.addf %136, %137 : vector<2x128x1xf32>
    %139 = vector.broadcast %138 : vector<2x128x1xf32> to vector<2x128x16xf32>
    %140 = arith.mulf %139, %116 : vector<2x128x16xf32>
    %141 = arith.mulf %140, %116 : vector<2x128x16xf32>
    %cst_60 = arith.constant dense<0.000000e+00> : vector<2x128xf32>
    %142 = vector.multi_reduction <add>, %141, %cst_60 [2] : vector<2x128x16xf32> to vector<2x128xf32>
    %cst_61 = arith.constant dense<0.000000e+00> : vector<2xf32>
    %143 = vector.multi_reduction <add>, %142, %cst_61 [1] : vector<2x128xf32> to vector<2xf32>
    %144 = vector.shape_cast %143 : vector<2xf32> to vector<2x1xf32>
    %145 = arith.divf %134, %144 : vector<2x1xf32>
    %cst_62 = arith.constant 0.000000e+00 : f32
    %146 = vector.broadcast %cst_62 : f32 to vector<2x1xf32>
    %147 = arith.subf %146, %145 : vector<2x1xf32>
    "tpu.trace_start"() <{level = 10 : i32, message = "bkn,bnl->bkl"}> : () -> ()
    %cst_63 = arith.constant dense<0.000000e+00> : vector<2x16x16xf32>
    %148 = tpu.matmul %120, %116, %cst_63 {dimension_numbers = #tpu.dot_dimension_numbers<[2], [1], [1], [2], [0, 0, 0, 1, 1, 2], [0], [0]>} : vector<2x16x128xf32>, vector<2x128x16xf32>, vector<2x16x16xf32> -> vector<2x16x16xf32>
    "tpu.trace_stop"() : () -> ()
    %149 = arith.mulf %148, %148 : vector<2x16x16xf32>
    %cst_64 = arith.constant dense<0.000000e+00> : vector<2x16xf32>
    %150 = vector.multi_reduction <add>, %149, %cst_64 [2] : vector<2x16x16xf32> to vector<2x16xf32>
    %cst_65 = arith.constant dense<0.000000e+00> : vector<2xf32>
    %151 = vector.multi_reduction <add>, %150, %cst_65 [1] : vector<2x16xf32> to vector<2xf32>
    %152 = vector.shape_cast %151 : vector<2xf32> to vector<2x1xf32>
    %153 = math.sqrt %152 : vector<2x1xf32>
    %cst_66 = arith.constant 9.99999968E-21 : f32
    %154 = vector.broadcast %cst_66 : f32 to vector<2x1xf32>
    %155 = arith.maximumf %153, %154 : vector<2x1xf32>
    %cst_67 = arith.constant 1.600000e+01 : f32
    %156 = math.sqrt %cst_67 : f32
    %157 = vector.broadcast %156 : f32 to vector<16x16xf32>
    %158 = arith.divf %128, %157 : vector<16x16xf32>
    %159 = vector.shape_cast %155 : vector<2x1xf32> to vector<2x1x1xf32>
    %160 = vector.broadcast %159 : vector<2x1x1xf32> to vector<2x16x16xf32>
    %161 = arith.divf %148, %160 : vector<2x16x16xf32>
    %162 = vector.shape_cast %158 : vector<16x16xf32> to vector<1x16x16xf32>
    %163 = vector.broadcast %162 : vector<1x16x16xf32> to vector<2x16x16xf32>
    %164 = arith.subf %161, %163 : vector<2x16x16xf32>
    %165 = arith.mulf %164, %164 : vector<2x16x16xf32>
    %cst_68 = arith.constant dense<0.000000e+00> : vector<2x16xf32>
    %166 = vector.multi_reduction <add>, %165, %cst_68 [2] : vector<2x16x16xf32> to vector<2x16xf32>
    %cst_69 = arith.constant dense<0.000000e+00> : vector<2xf32>
    %167 = vector.multi_reduction <add>, %166, %cst_69 [1] : vector<2x16xf32> to vector<2xf32>
    %168 = vector.shape_cast %167 : vector<2xf32> to vector<2x1xf32>
    %169 = math.sqrt %168 : vector<2x1xf32>
    %170 = vector.shape_cast %128 : vector<16x16xf32> to vector<1x16x16xf32>
    %cst_70 = arith.constant 1.000000e+00 : f32
    %171 = vector.broadcast %cst_70 : f32 to vector<1x16x16xf32>
    %172 = arith.subf %171, %170 : vector<1x16x16xf32>
    %173 = vector.broadcast %172 : vector<1x16x16xf32> to vector<2x16x16xf32>
    %174 = arith.mulf %123, %173 : vector<2x16x16xf32>
    %cst_71 = arith.constant dense<0.000000e+00> : vector<2x16xf32>
    %175 = vector.multi_reduction <add>, %174, %cst_71 [2] : vector<2x16x16xf32> to vector<2x16xf32>
    %cst_72 = arith.constant 1.000000e-15 : f32
    %176 = vector.broadcast %cst_72 : f32 to vector<2x16xf32>
    %177 = arith.addf %175, %176 : vector<2x16xf32>
    %178 = math.sqrt %177 : vector<2x16xf32>
    %cst_73 = arith.constant 1.000000e-15 : f32
    %179 = vector.broadcast %cst_73 : f32 to vector<2x16xf32>
    %180 = arith.addf %178, %179 : vector<2x16xf32>
    %181 = vector.shape_cast %180 : vector<2x16xf32> to vector<2x16x1xf32>
    %182 = vector.broadcast %181 : vector<2x16x1xf32> to vector<2x16x16xf32>
    %183 = arith.divf %174, %182 : vector<2x16x16xf32>
    %184 = vector.shape_cast %180 : vector<2x16xf32> to vector<2x1x16xf32>
    %185 = vector.broadcast %184 : vector<2x1x16xf32> to vector<2x16x16xf32>
    %186 = arith.divf %183, %185 : vector<2x16x16xf32>
    "tpu.trace_start"() <{level = 10 : i32, message = "bkl,blh->bkh"}> : () -> ()
    %cst_74 = arith.constant dense<0.000000e+00> : vector<2x16x32xf32>
    %187 = tpu.matmul %186, %121, %cst_74 {dimension_numbers = #tpu.dot_dimension_numbers<[2], [1], [1], [2], [0, 0, 0, 1, 1, 2], [0], [0]>} : vector<2x16x16xf32>, vector<2x16x32xf32>, vector<2x16x32xf32> -> vector<2x16x32xf32>
    "tpu.trace_stop"() : () -> ()
    %188 = tpu.concatenate %187, %121 in 2 : vector<2x16x32xf32>, vector<2x16x32xf32> -> vector<2x16x64xf32>
    %189 = vector.shape_cast %188 : vector<2x16x64xf32> to vector<32x64xf32>
    %c0_75 = arith.constant 0 : index
    %c0_76 = arith.constant 0 : index
    %190 = vector.load %arg12[%c0_75, %c0_76] : memref<64x32xf32, #tpu.memory_space<vmem>>, vector<64x32xf32>
    %cst_77 = arith.constant dense<0.000000e+00> : vector<32x32xf32>
    %191 = tpu.matmul %189, %190, %cst_77 {dimension_numbers = #tpu.dot_dimension_numbers<[1], [0], [0], [1], [0, 0, 1, 1], [], []>} : vector<32x64xf32>, vector<64x32xf32>, vector<32x32xf32> -> vector<32x32xf32>
    %c0_78 = arith.constant 0 : index
    %c0_79 = arith.constant 0 : index
    %192 = vector.load %arg13[%c0_78, %c0_79] : memref<1x32xf32, #tpu.memory_space<vmem>>, vector<1x32xf32>
    %193 = vector.broadcast %192 : vector<1x32xf32> to vector<32x32xf32>
    %194 = arith.addf %191, %193 : vector<32x32xf32>
    %195 = vector.shape_cast %194 : vector<32x32xf32> to vector<2x16x32xf32>
    %cst_80 = arith.constant dense<0.000000e+00> : vector<2x32xf32>
    %196 = vector.multi_reduction <add>, %195, %cst_80 [1] : vector<2x16x32xf32> to vector<2x32xf32>
    %c0_81 = arith.constant 0 : index
    %c0_82 = arith.constant 0 : index
    %197 = vector.load %arg14[%c0_81, %c0_82] : memref<32x32xf32, #tpu.memory_space<vmem>>, vector<32x32xf32>
    %cst_83 = arith.constant dense<0.000000e+00> : vector<2x32xf32>
    %198 = tpu.matmul %196, %197, %cst_83 {dimension_numbers = #tpu.dot_dimension_numbers<[1], [0], [0], [1], [0, 0, 1, 1], [], []>} : vector<2x32xf32>, vector<32x32xf32>, vector<2x32xf32> -> vector<2x32xf32>
    %c0_84 = arith.constant 0 : index
    %c0_85 = arith.constant 0 : index
    %199 = vector.load %arg15[%c0_84, %c0_85] : memref<1x32xf32, #tpu.memory_space<vmem>>, vector<1x32xf32>
    %200 = vector.broadcast %199 : vector<1x32xf32> to vector<2x32xf32>
    %201 = arith.addf %198, %200 : vector<2x32xf32>
    %cst_86 = arith.constant 0.000000e+00 : f32
    %202 = vector.broadcast %cst_86 : f32 to vector<2x32xf32>
    %203 = arith.maximumf %201, %202 : vector<2x32xf32>
    %c0_87 = arith.constant 0 : index
    %c0_88 = arith.constant 0 : index
    %204 = vector.load %arg16[%c0_87, %c0_88] : memref<32x4xf32, #tpu.memory_space<vmem>>, vector<32x4xf32>
    %cst_89 = arith.constant dense<0.000000e+00> : vector<2x4xf32>
    %205 = tpu.matmul %203, %204, %cst_89 {dimension_numbers = #tpu.dot_dimension_numbers<[1], [0], [0], [1], [0, 0, 1, 1], [], []>} : vector<2x32xf32>, vector<32x4xf32>, vector<2x4xf32> -> vector<2x4xf32>
    %c0_90 = arith.constant 0 : index
    %c0_91 = arith.constant 0 : index
    %206 = vector.load %arg17[%c0_90, %c0_91] : memref<1x4xf32, #tpu.memory_space<vmem>>, vector<1x4xf32>
    %207 = vector.broadcast %206 : vector<1x4xf32> to vector<2x4xf32>
    %208 = arith.addf %205, %207 : vector<2x4xf32>
    %cst_92 = arith.constant dense<0xFF800000> : vector<2xf32>
    %209 = vector.multi_reduction <maximumf>, %208, %cst_92 [1] : vector<2x4xf32> to vector<2xf32>
    %210 = vector.shape_cast %209 : vector<2xf32> to vector<2x1xf32>
    %211 = vector.broadcast %210 : vector<2x1xf32> to vector<2x4xf32>
    %212 = arith.subf %208, %211 : vector<2x4xf32>
    %213 = math.exp %212 : vector<2x4xf32>
    %cst_93 = arith.constant dense<0.000000e+00> : vector<2xf32>
    %214 = vector.multi_reduction <add>, %213, %cst_93 [1] : vector<2x4xf32> to vector<2xf32>
    %215 = vector.shape_cast %214 : vector<2xf32> to vector<2x1xf32>
    %216 = math.log %215 : vector<2x1xf32>
    %217 = vector.broadcast %216 : vector<2x1xf32> to vector<2x4xf32>
    %218 = arith.subf %212, %217 : vector<2x4xf32>
    %219 = tpu.concatenate %218, %44, %90, %147, %169 in 1 : vector<2x4xf32>, vector<2x1xf32>, vector<2x1xf32>, vector<2x1xf32>, vector<2x1xf32> -> vector<2x8xf32>
    %c0_94 = arith.constant 0 : index
    %c0_95 = arith.constant 0 : index
    %c0_96 = arith.constant 0 : index
    %220 = vector.load %arg18[%c0_94, %c0_95, %c0_96] : memref<1x2x8xf32, #tpu.memory_space<vmem>>, vector<1x2x8xf32>
    %221 = vector.shape_cast %220 : vector<1x2x8xf32> to vector<2x8xf32>
    %222 = vector.shape_cast %219 : vector<2x8xf32> to vector<1x2x8xf32>
    tpu.vector_store %arg18[%c0_94, %c0_95, %c0_96], %222 {strides = array<i32>} : memref<1x2x8xf32, #tpu.memory_space<vmem>>, vector<1x2x8xf32>,
    return
  }
  func.func @transform_0(%arg0: i32) -> (i32, i32, i32) {
    %c0_i32 = arith.constant 0 : i32
    %c0_i32_0 = arith.constant 0 : i32
    %c0_i32_1 = arith.constant 0 : i32
    return %arg0, %c0_i32, %c0_i32_0 : i32, i32, i32
  }
  func.func @transform_1(%arg0: i32) -> (i32, i32, i32) {
    %c0_i32 = arith.constant 0 : i32
    %c0_i32_0 = arith.constant 0 : i32
    %c0_i32_1 = arith.constant 0 : i32
    return %arg0, %c0_i32, %c0_i32_0 : i32, i32, i32
  }
  func.func @transform_2(%arg0: i32) -> (i32, i32, i32) {
    %c0_i32 = arith.constant 0 : i32
    %c0_i32_0 = arith.constant 0 : i32
    %c0_i32_1 = arith.constant 0 : i32
    return %arg0, %c0_i32, %c0_i32_0 : i32, i32, i32
  }
  func.func @transform_3(%arg0: i32) -> (i32, i32) {
    %c0_i32 = arith.constant 0 : i32
    %c0_i32_0 = arith.constant 0 : i32
    %c0_i32_1 = arith.constant 0 : i32
    return %c0_i32, %c0_i32_0 : i32, i32
  }
  func.func @transform_4(%arg0: i32) -> (i32, i32) {
    %c0_i32 = arith.constant 0 : i32
    %c0_i32_0 = arith.constant 0 : i32
    %c0_i32_1 = arith.constant 0 : i32
    return %c0_i32, %c0_i32_0 : i32, i32
  }
  func.func @transform_5(%arg0: i32) -> (i32, i32) {
    %c0_i32 = arith.constant 0 : i32
    %c0_i32_0 = arith.constant 0 : i32
    %c0_i32_1 = arith.constant 0 : i32
    return %c0_i32, %c0_i32_0 : i32, i32
  }
  func.func @transform_6(%arg0: i32) -> (i32, i32) {
    %c0_i32 = arith.constant 0 : i32
    %c0_i32_0 = arith.constant 0 : i32
    %c0_i32_1 = arith.constant 0 : i32
    return %c0_i32, %c0_i32_0 : i32, i32
  }
  func.func @transform_7(%arg0: i32) -> (i32, i32) {
    %c0_i32 = arith.constant 0 : i32
    %c0_i32_0 = arith.constant 0 : i32
    %c0_i32_1 = arith.constant 0 : i32
    return %c0_i32, %c0_i32_0 : i32, i32
  }
  func.func @transform_8(%arg0: i32) -> (i32, i32) {
    %c0_i32 = arith.constant 0 : i32
    %c0_i32_0 = arith.constant 0 : i32
    %c0_i32_1 = arith.constant 0 : i32
    return %c0_i32, %c0_i32_0 : i32, i32
  }
  func.func @transform_9(%arg0: i32) -> (i32, i32) {
    %c0_i32 = arith.constant 0 : i32
    %c0_i32_0 = arith.constant 0 : i32
    %c0_i32_1 = arith.constant 0 : i32
    return %c0_i32, %c0_i32_0 : i32, i32
  }
  func.func @transform_10(%arg0: i32) -> (i32, i32) {
    %c0_i32 = arith.constant 0 : i32
    %c0_i32_0 = arith.constant 0 : i32
    %c0_i32_1 = arith.constant 0 : i32
    return %c0_i32, %c0_i32_0 : i32, i32
  }
  func.func @transform_11(%arg0: i32) -> (i32, i32) {
    %c0_i32 = arith.constant 0 : i32
    %c0_i32_0 = arith.constant 0 : i32
    %c0_i32_1 = arith.constant 0 : i32
    return %c0_i32, %c0_i32_0 : i32, i32
  }
  func.func @transform_12(%arg0: i32) -> (i32, i32) {
    %c0_i32 = arith.constant 0 : i32
    %c0_i32_0 = arith.constant 0 : i32
    %c0_i32_1 = arith.constant 0 : i32
    return %c0_i32, %c0_i32_0 : i32, i32
  }
  func.func @transform_13(%arg0: i32) -> (i32, i32) {
    %c0_i32 = arith.constant 0 : i32
    %c0_i32_0 = arith.constant 0 : i32
    %c0_i32_1 = arith.constant 0 : i32
    return %c0_i32, %c0_i32_0 : i32, i32
  }
  func.func @transform_14(%arg0: i32) -> (i32, i32) {
    %c0_i32 = arith.constant 0 : i32
    %c0_i32_0 = arith.constant 0 : i32
    %c0_i32_1 = arith.constant 0 : i32
    return %c0_i32, %c0_i32_0 : i32, i32
  }
  func.func @transform_15(%arg0: i32) -> (i32, i32) {
    %c0_i32 = arith.constant 0 : i32
    %c0_i32_0 = arith.constant 0 : i32
    %c0_i32_1 = arith.constant 0 : i32
    return %c0_i32, %c0_i32_0 : i32, i32
  }
  func.func @transform_16(%arg0: i32) -> (i32, i32) {
    %c0_i32 = arith.constant 0 : i32
    %c0_i32_0 = arith.constant 0 : i32
    %c0_i32_1 = arith.constant 0 : i32
    return %c0_i32, %c0_i32_0 : i32, i32
  }
  func.func @transform_17(%arg0: i32) -> (i32, i32, i32) {
    %c0_i32 = arith.constant 0 : i32
    %c0_i32_0 = arith.constant 0 : i32
    %c0_i32_1 = arith.constant 0 : i32
    return %arg0, %c0_i32, %c0_i32_0 : i32, i32, i32
  }
}

</mosaic_0001>

<bundles_post_ra>
// kernel: tpu_custom_call.1
= control target key start
LH: loop header
LB: loop body
LE: loop exit
PB: predicated region body
PF: predicated region fallthrough
CT: control target
= control target key end

     0   :  { %s14297_s0 = inlined_call_operand.vmem [shape: f32[2,128,4], index: 0, kind: input, shape index: {}]   ;;  %s14298_s1 = inlined_call_operand.vmem [shape: f32[2,128,128], index: 1, kind: input, shape index: {}]   ;;  %s14299_s2 = inlined_call_operand.vmem [shape: f32[2,128,1], index: 2, kind: input, shape index: {}]   ;;  %s14300_s3 = inlined_call_operand.vmem [shape: f32[4,32], index: 3, kind: input, shape index: {}]   ;;  %s14301_s4 = inlined_call_operand.vmem [shape: f32[1,32], index: 4, kind: input, shape index: {}]   ;;  %s14302_s5 = inlined_call_operand.vmem [shape: f32[32,40], index: 5, kind: input, shape index: {}]   ;;  %s14303_s6 = inlined_call_operand.vmem [shape: f32[1,40], index: 6, kind: input, shape index: {}]   ;;  %s14304_s7 = inlined_call_operand.vmem [shape: f32[32,32], index: 7, kind: input, shape index: {}]   ;;  %s14305_s8 = inlined_call_operand.vmem [shape: f32[1,32], index: 8, kind: input, shape index: {}]   ;;  %s14306_s9 = inlined_call_operand.vmem [shape: f32[32,16], index: 9, kind: input, shape index: {}]   ;;  %s14307_s10 = inlined_call_operand.vmem [shape: f32[1,16], index: 10, kind: input, shape index: {}]   ;;  %s14308_s11 = inlined_call_operand.vmem [shape: f32[64,32], index: 11, kind: input, shape index: {}]   ;;  %s14309_s12 = inlined_call_operand.vmem [shape: f32[1,32], index: 12, kind: input, shape index: {}]   ;;  %s14310_s13 = inlined_call_operand.vmem [shape: f32[32,32], index: 13, kind: input, shape index: {}]   ;;  %s14311_s14 = inlined_call_operand.vmem [shape: f32[1,32], index: 14, kind: input, shape index: {}]   ;;  %s14312_s15 = inlined_call_operand.vmem [shape: f32[32,4], index: 15, kind: input, shape index: {}]   ;;  %s14313_s16 = inlined_call_operand.vmem [shape: f32[1,4], index: 16, kind: input, shape index: {}]   ;;  %s14314_s17 = inlined_call_operand.hbm [shape: f32[1,2,8], index: 17, kind: output, shape index: {}]  }
   0x1   :  { %14727 = sst [smem:[#allocation220_spill]] %s14297_s0 }
   0x2   :  { %14728 = sst [smem:[#allocation221_spill]] %s14298_s1 }
   0x3   :  { %v153_v0 = vld [vmem:[%s14300_s3] sm:$0xf]  ;;  %vm258_vm0 = vcmask 1043456   ;;  %s14729_s28 = sld [smem:[#allocation220_spill]]  ;;  %vm14500_vm1 = vcmask 31744   ;;  %v9683_v4 = vmov 0  }
   0x4   :  { %7868 = vmatprep.subr.msk.mxu0 %vm258_vm0, %v153_v0  ;;  %9249 = vset.pattern.permute.xlu0 %v9683_v4  ;;  %v121_v9 = vld [vmem:[%s14299_s2] sm:$0xff]  ;;  %v123_v11 = vld [vmem:[%s14299_s2 + $0x10] sm:$0xff]  ;;  %v122_v13 = vld [vmem:[%s14299_s2 + $0x8] sm:$0xff] }
   0x5   :  { %7869 = vmatpush3.msk.msra.mxu0 %vm258_vm0, %v153_v0  ;;  %9250 = vset.pattern.permute.xlu1 %v9683_v4  ;;  %v124_v14 = vld [vmem:[%s14299_s2 + $0x18] sm:$0xff]  ;;  %v487_v16 = vld [vmem:[%s14302_s5] sm:$0xff]  ;;  %v488_v17 = vld [vmem:[%s14302_s5 + $0x8] sm:$0xff] }
   0x6   :  { %854 = vperm.xlu0 %9249, %v121_v9   ;;  %864 = vperm.xlu1 %9250, %v123_v11   ;;  %v125_v19 = vld [vmem:[%s14299_s2 + $0x20] sm:$0xff]  ;;  %v8718_v20 = vpack.c.bf16 %v488_v17, %v487_v16 }
   0x9   :  { %v57_v1 = vld [vmem:[%s14729_s28] sm:$0xff]  ;;  %v58_v2 = vld [vmem:[%s14729_s28 + $0x8] sm:$0xff]  ;;  %v59_v3 = vld [vmem:[%s14729_s28 + $0x10] sm:$0xff] }
   0xa   :  { %7870 = vmatprep.mubr.msk.f32.mxu0 %vm14500_vm1, %v57_v1  ;;  %v60_v5 = vld [vmem:[%s14729_s28 + $0x18] sm:$0xff]  ;;  %v61_v6 = vld [vmem:[%s14729_s28 + $0x20] sm:$0xff]  ;;  %v62_v7 = vld [vmem:[%s14729_s28 + $0x28] sm:$0xff]  ;;  %859 = vperm.xlu0 %9249, %v122_v13  }
   0xb   :  { %7871 = vmatmul.mubr.msk.f32.vlgmr.msra.gmra.mrb[0].mxu0 %vm14500_vm1, %v58_v2  ;;  %v63_v8 = vld [vmem:[%s14729_s28 + $0x30] sm:$0xff]  ;;  %v64_v10 = vld [vmem:[%s14729_s28 + $0x38] sm:$0xff]  ;;  %v65_v12 = vld [vmem:[%s14729_s28 + $0x40] sm:$0xff]  ;;  %869 = vperm.xlu1 %9250, %v124_v14  }
   0xc   :  { %7873 = vmatprep.mubr.msk.f32.mxu0 %vm14500_vm1, %v59_v3  ;;  %v66_v15 = vld [vmem:[%s14729_s28 + $0x48] sm:$0xff]  ;;  %v67_v18 = vld [vmem:[%s14729_s28 + $0x50] sm:$0xff] }
   0xf   :  { %7874 = vmatmul.mubr.msk.f32.gmra.mrb[2].mxu0 %vm14500_vm1, %v60_v5 }
  0x10   :  { %7876 = vmatprep.mubr.msk.f32.mxu0 %vm14500_vm1, %v61_v6 }
  0x13   :  { %7877 = vmatmul.mubr.msk.f32.gmra.mrb[4].mxu0 %vm14500_vm1, %v62_v7 }
  0x14   :  { %7879 = vmatprep.mubr.msk.f32.mxu0 %vm14500_vm1, %v63_v8 }
  0x17   :  { %7880 = vmatmul.mubr.msk.f32.gmra.mrb[6].mxu0 %vm14500_vm1, %v64_v10 }
  0x18   :  { %7882 = vmatprep.mubr.msk.f32.mxu0 %vm14500_vm1, %v65_v12 }
  0x19   :  { %22 = vsyncpa [#allocation3], 0  ;;  %v126_v21 = vld [vmem:[%s14299_s2 + $0x28] sm:$0xff]  ;;  %8719 = vmatprep.subr.bf16.mxu1 %v8718_v20  ;;  %v68_v22 = vld [vmem:[%s14729_s28 + $0x58] sm:$0xff]  ;;  %874 = vperm.xlu0 %9249, %v125_v19   ;;  %s14730_s25 = sld [smem:[#allocation221_spill]]  ;;  %vm14503_vm2 = vcmask 261120  }
  0x1a   :  { %v69_v23 = vld [vmem:[%s14729_s28 + $0x60] sm:$0xff]  ;;  %v127_v24 = vld [vmem:[%s14299_s2 + $0x30] sm:$0xff]  ;;  %879 = vperm.xlu1 %9250, %v126_v21   ;;  %8721 = vmatpush3.bf16.msra.mxu1 %v8718_v20  ;;  %v128_v25 = vld [vmem:[%s14299_s2 + $0x38] sm:$0xff]  ;;  %vm1911_vm3 = vcmask 326912   ;;  %vm14538_vm4 = vcmask 1041409   ;;  %vm1124_vm5 = vcmask 64512  }
  0x1b   :  { %7883 = vmatmul.mubr.msk.f32.gmra.mrb[8].mxu0 %vm14500_vm1, %v66_v15  ;;  %v70_v26 = vld [vmem:[%s14729_s28 + $0x68] sm:$0xff]  ;;  %v71_v27 = vld [vmem:[%s14729_s28 + $0x70] sm:$0xff]  ;;  %v129_v28 = vld [vmem:[%s14299_s2 + $0x40] sm:$0xff]  ;;  %vm1890_vm7 = vcmask 130112   ;;  %vm1897_vm8 = vcmask 195712   ;;  %vm14565_vm9 = vcmask 261312  }
  0x1c   :  { %7885 = vmatprep.mubr.msk.f32.mxu0 %vm14500_vm1, %v67_v18  ;;  %v130_v29 = vld [vmem:[%s14299_s2 + $0x48] sm:$0xff]  ;;  %v72_v30 = vld [vmem:[%s14729_s28 + $0x78] sm:$0xff]  ;;  %v73_v31 = vld [vmem:[%s14729_s28 + $0x80] sm:$0xff]  ;;  %vm1918_vm10 = vcmask 392512   ;;  %vm1925_vm11 = vcmask 458112   ;;  %vm14599_vm12 = vcmask 523712  }
  0x1d   :  { %884 = vperm.xlu0 %9249, %v127_v24   ;;  %v137_v32 = vld [vmem:[%s14299_s2 + $0x80] sm:$0xff]  ;;  %v138_v33 = vld [vmem:[%s14299_s2 + $0x88] sm:$0xff]  ;;  %v75_v35 = vld [vmem:[%s14729_s28 + $0x90] sm:$0xff]  ;;  %vm14598_vm13 = vcmask 589312   ;;  %vm14597_vm14 = vcmask 654912   ;;  %vm14509_vm15 = vcmask 720512  }
  0x1e   :  { %889 = vperm.xlu1 %9250, %v128_v25   ;;  %v74_v34 = vld [vmem:[%s14729_s28 + $0x88] sm:$0xff]  ;;  %v131_v36 = vld [vmem:[%s14299_s2 + $0x50] sm:$0xff]  ;;  %v132_v37 = vld [vmem:[%s14299_s2 + $0x58] sm:$0xff]  ;;  %vm14508_vm0 = vcmask 786112  }
  0x1f   :  { %7886 = vmatmul.mubr.msk.f32.gmra.mrb[10].mxu0 %vm14500_vm1, %v68_v22  ;;  %v76_v38 = vld [vmem:[%s14729_s28 + $0x98] sm:$0xff]  ;;  %v77_v39 = vld [vmem:[%s14729_s28 + $0xa0] sm:$0xff]  ;;  %v139_v40 = vld [vmem:[%s14299_s2 + $0x90] sm:$0xff] }
  0x20   :  { %7888 = vmatprep.mubr.msk.f32.mxu0 %vm14500_vm1, %v69_v23  ;;  %v78_v41 = vld [vmem:[%s14729_s28 + $0xa8] sm:$0xff]  ;;  %v79_v42 = vld [vmem:[%s14729_s28 + $0xb0] sm:$0xff]  ;;  %v133_v43 = vld [vmem:[%s14299_s2 + $0x60] sm:$0xff] }
  0x21   :  { %894 = vperm.xlu0 %9249, %v129_v28   ;;  %v80_v44 = vld [vmem:[%s14729_s28 + $0xb8] sm:$0xff]  ;;  %v81_v45 = vld [vmem:[%s14729_s28 + $0xc0] sm:$0xff]  ;;  %v82_v47 = vld [vmem:[%s14729_s28 + $0xc8] sm:$0xff] }
  0x22   :  { %899 = vperm.xlu1 %9250, %v130_v29   ;;  %v141_v46 = vld [vmem:[%s14299_s2 + $0xa0] sm:$0xff]  ;;  %v83_v48 = vld [vmem:[%s14729_s28 + $0xd0] sm:$0xff]  ;;  %v84_v50 = vld [vmem:[%s14729_s28 + $0xd8] sm:$0xff] }
  0x23   :  { %7889 = vmatmul.mubr.msk.f32.gmra.mrb[12].mxu0 %vm14500_vm1, %v70_v26  ;;  %v135_v49 = vld [vmem:[%s14299_s2 + $0x70] sm:$0xff]  ;;  %v85_v51 = vld [vmem:[%s14729_s28 + $0xe0] sm:$0xff]  ;;  %v86_v52 = vld [vmem:[%s14729_s28 + $0xe8] sm:$0xff] }
  0x24   :  { %7891 = vmatprep.mubr.msk.f32.mxu0 %vm14500_vm1, %v71_v27  ;;  %v87_v53 = vld [vmem:[%s14729_s28 + $0xf0] sm:$0xff]  ;;  %v88_v54 = vld [vmem:[%s14729_s28 + $0xf8] sm:$0xff]  ;;  %v145_v60 = vld [vmem:[%s14299_s2 + $0xc0] sm:$0xff] }
  0x25   :  { %934 = vperm.xlu0 %9249, %v137_v32   ;;  %v489_v55 = vld [vmem:[%s14302_s5 + $0x10] sm:$0xff]  ;;  %v490_v56 = vld [vmem:[%s14302_s5 + $0x18] sm:$0xff]  ;;  %v134_v61 = vld [vmem:[%s14299_s2 + $0x68] sm:$0xff] }
  0x26   :  { %939 = vperm.xlu1 %9250, %v138_v33   ;;  %v8722_v57 = vpack.c.bf16 %v490_v56, %v489_v55  ;;  %v143_v58 = vld [vmem:[%s14299_s2 + $0xb0] sm:$0xff]  ;;  %v140_v59 = vld [vmem:[%s14299_s2 + $0x98] sm:$0xff]  ;;  %v142_v63 = vld [vmem:[%s14299_s2 + $0xa8] sm:$0xff] }
  0x27   :  { %7892 = vmatmul.mubr.msk.f32.gmra.mrb[14].mxu0 %vm14500_vm1, %v72_v30  ;;  %v147_v62 = vld [vmem:[%s14299_s2 + $0xd0] sm:$0xff]  ;;  %v149_v0 = vld [vmem:[%s14299_s2 + $0xe0] sm:$0xff]  ;;  %v136_v1 = vld [vmem:[%s14299_s2 + $0x78] sm:$0xff] }
  0x28   :  { %7894 = vmatprep.mubr.msk.f32.mxu0 %vm14500_vm1, %v73_v31  ;;  %8723 = vmatprep.subr.bf16.mxu1 %v8722_v57  ;;  %v151_v2 = vld [vmem:[%s14299_s2 + $0xf0] sm:$0xff]  ;;  %v144_v3 = vld [vmem:[%s14299_s2 + $0xb8] sm:$0xff]  ;;  %v146_v4 = vld [vmem:[%s14299_s2 + $0xc8] sm:$0xff] }
  0x29   :  { %904 = vperm.xlu0 %9249, %v131_v36   ;;  %8725 = vmatpush3.bf16.msra.mxu1 %v8722_v57  ;;  %v148_v5 = vld [vmem:[%s14299_s2 + $0xd8] sm:$0xff]  ;;  %v150_v6 = vld [vmem:[%s14299_s2 + $0xe8] sm:$0xff]  ;;  %v89_v8 = vld [vmem:[%s14730_s25] sm:$0xff] }
  0x2a   :  { %909 = vperm.xlu1 %9250, %v132_v37   ;;  %v152_v7 = vld [vmem:[%s14299_s2 + $0xf8] sm:$0xff]  ;;  %v105_v9 = vld [vmem:[%s14730_s25 + $0x80] sm:$0xff]  ;;  %v106_v10 = vld [vmem:[%s14730_s25 + $0x88] sm:$0xff] }
  0x2b   :  { %7895 = vmatmul.mubr.msk.f32.gmra.mrb[16].mxu0 %vm14500_vm1, %v74_v34  ;;  %v107_v11 = vld [vmem:[%s14730_s25 + $0x90] sm:$0xff]  ;;  %v108_v12 = vld [vmem:[%s14730_s25 + $0x98] sm:$0xff]  ;;  %v109_v13 = vld [vmem:[%s14730_s25 + $0xa0] sm:$0xff] }
  0x2c   :  { %7897 = vmatprep.mubr.msk.f32.mxu0 %vm14500_vm1, %v75_v35  ;;  %v90_v14 = vld [vmem:[%s14730_s25 + $0x8] sm:$0xff]  ;;  %v91_v16 = vld [vmem:[%s14730_s25 + $0x10] sm:$0xff]  ;;  %v92_v18 = vld [vmem:[%s14730_s25 + $0x18] sm:$0xff] }
  0x2d   :  { %944 = vperm.xlu0 %9249, %v139_v40   ;;  %v110_v15 = vld [vmem:[%s14730_s25 + $0xa8] sm:$0xff]  ;;  %v111_v17 = vld [vmem:[%s14730_s25 + $0xb0] sm:$0xff]  ;;  %v112_v19 = vld [vmem:[%s14730_s25 + $0xb8] sm:$0xff] }
  0x2e   :  { %949 = vperm.xlu1 %9250, %v140_v59   ;;  %v93_v20 = vld [vmem:[%s14730_s25 + $0x20] sm:$0xff]  ;;  %v94_v22 = vld [vmem:[%s14730_s25 + $0x28] sm:$0xff]  ;;  %v95_v24 = vld [vmem:[%s14730_s25 + $0x30] sm:$0xff] }
  0x2f   :  { %7898 = vmatmul.mubr.msk.f32.gmra.mrb[18].mxu0 %vm14500_vm1, %v76_v38  ;;  %v113_v21 = vld [vmem:[%s14730_s25 + $0xc0] sm:$0xff]  ;;  %v114_v23 = vld [vmem:[%s14730_s25 + $0xc8] sm:$0xff]  ;;  %v115_v25 = vld [vmem:[%s14730_s25 + $0xd0] sm:$0xff] }
  0x30   :  { %7900 = vmatprep.mubr.msk.f32.mxu0 %vm14500_vm1, %v77_v39  ;;  %v96_v26 = vld [vmem:[%s14730_s25 + $0x38] sm:$0xff]  ;;  %v97_v28 = vld [vmem:[%s14730_s25 + $0x40] sm:$0xff]  ;;  %v98_v30 = vld [vmem:[%s14730_s25 + $0x48] sm:$0xff] }
  0x31   :  { %914 = vperm.xlu0 %9249, %v133_v43   ;;  %v116_v27 = vld [vmem:[%s14730_s25 + $0xd8] sm:$0xff]  ;;  %v101_v29 = vld [vmem:[%s14730_s25 + $0x60] sm:$0xff]  ;;  %v99_v32 = vld [vmem:[%s14730_s25 + $0x50] sm:$0xff] }
  0x32   :  { %919 = vperm.xlu1 %9250, %v134_v61   ;;  %v117_v31 = vld [vmem:[%s14730_s25 + $0xe0] sm:$0xff]  ;;  %v118_v33 = vld [vmem:[%s14730_s25 + $0xe8] sm:$0xff]  ;;  %v100_v34 = vld [vmem:[%s14730_s25 + $0x58] sm:$0xff] }
  0x33   :  { %7901 = vmatmul.mubr.msk.f32.gmra.mrb[20].mxu0 %vm14500_vm1, %v78_v41  ;;  %v103_v35 = vld [vmem:[%s14730_s25 + $0x70] sm:$0xff]  ;;  %v102_v36 = vld [vmem:[%s14730_s25 + $0x68] sm:$0xff]  ;;  %v104_v38 = vld [vmem:[%s14730_s25 + $0x78] sm:$0xff] }
  0x34   :  { %7903 = vmatprep.mubr.msk.f32.mxu0 %vm14500_vm1, %v79_v42  ;;  %v119_v37 = vld [vmem:[%s14730_s25 + $0xf0] sm:$0xff]  ;;  %v10115_v39 = vld [vmem:[%s14301_s4] ss:$0 sm:$0xff]  ;;  %vm10790_vm6 = vmpackc.low %vm1124_vm5, %vm1124_vm5 }
  0x35   :  { %954 = vperm.xlu0 %9249, %v141_v46  }
  0x36   :  { %959 = vperm.xlu1 %9250, %v142_v63  }
  0x37   :  { %7904 = vmatmul.mubr.msk.f32.gmra.mrb[22].mxu0 %vm14500_vm1, %v80_v44 }
  0x38   :  { %7906 = vmatprep.mubr.msk.f32.mxu0 %vm14500_vm1, %v81_v45 }
  0x39   :  { %924 = vperm.xlu0 %9249, %v135_v49  }
  0x3a   :  { %929 = vperm.xlu1 %9250, %v136_v1  }
  0x3b   :  { %7907 = vmatmul.mubr.msk.f32.gmra.mrb[24].mxu0 %vm14500_vm1, %v82_v47 }
  0x3c   :  { %7909 = vmatprep.mubr.msk.f32.mxu0 %vm14500_vm1, %v83_v48 }
  0x3d   :  { %964 = vperm.xlu0 %9249, %v143_v58  }
  0x3e   :  { %969 = vperm.xlu1 %9250, %v144_v3  }
  0x3f   :  { %7910 = vmatmul.mubr.msk.f32.gmra.mrb[26].mxu0 %vm14500_vm1, %v84_v50 }
  0x40   :  { %7912 = vmatprep.mubr.msk.f32.mxu0 %vm14500_vm1, %v85_v51 }
  0x41   :  { %974 = vperm.xlu0 %9249, %v145_v60  }
  0x42   :  { %979 = vperm.xlu1 %9250, %v146_v4  }
  0x43   :  { %7913 = vmatmul.mubr.msk.f32.gmra.mrb[28].mxu0 %vm14500_vm1, %v86_v52 }
  0x44   :  { %7915 = vmatprep.mubr.msk.f32.mxu0 %vm14500_vm1, %v87_v53 }
  0x45   :  { %984 = vperm.xlu0 %9249, %v147_v62  }
  0x46   :  { %989 = vperm.xlu1 %9250, %v148_v5  }
  0x47   :  { %7916 = vmatmul.mubr.msk.f32.gmra.mrb[30].mxu0 %vm14500_vm1, %v88_v54  ;;  %vm14510_vm1 = vcmask 851712  }
  0x49   :  { %994 = vperm.xlu0 %9249, %v149_v0  }
  0x4a   :  { %999 = vperm.xlu1 %9250, %v150_v6  }
  0x4d   :  { %1004 = vperm.xlu0 %9249, %v151_v2  }
  0x4e   :  { %1009 = vperm.xlu1 %9250, %v152_v7  }
  0x6c   :  { %1527 = vadd.xlane.f32.xlu0 %v89_v8 }
  0x70   :  { %1559 = vadd.xlane.f32.xlu0 %v105_v9 }
  0x72   :  { %1529 = vadd.xlane.f32.xlu1 %v90_v14 }
  0x74   :  { %1561 = vadd.xlane.f32.xlu0 %v106_v10 }
  0x76   :  { %1531 = vadd.xlane.f32.xlu1 %v91_v16 }
  0x78   :  { %1563 = vadd.xlane.f32.xlu0 %v107_v11 }
  0x7a   :  { %1533 = vadd.xlane.f32.xlu1 %v92_v18 }
  0x7c   :  { %1565 = vadd.xlane.f32.xlu0 %v108_v12 }
  0x7e   :  { %1535 = vadd.xlane.f32.xlu1 %v93_v20 }
  0x80   :  { %1567 = vadd.xlane.f32.xlu0 %v109_v13 }
  0x82   :  { %1537 = vadd.xlane.f32.xlu1 %v94_v22 }
  0x84   :  { %1569 = vadd.xlane.f32.xlu0 %v110_v15 }
  0x86   :  { %1539 = vadd.xlane.f32.xlu1 %v95_v24 }
  0x88   :  { %1571 = vadd.xlane.f32.xlu0 %v111_v17 }
  0x8a   :  { %1541 = vadd.xlane.f32.xlu1 %v96_v26 }
  0x8c   :  { %1573 = vadd.xlane.f32.xlu0 %v112_v19 }
  0x8e   :  { %1543 = vadd.xlane.f32.xlu1 %v97_v28 }
  0x90   :  { %1575 = vadd.xlane.f32.xlu0 %v113_v21 }
  0x92   :  { %1545 = vadd.xlane.f32.xlu1 %v98_v30 }
  0x94   :  { %1577 = vadd.xlane.f32.xlu0 %v114_v23 }
  0x96   :  { %1547 = vadd.xlane.f32.xlu1 %v99_v32 }
  0x98   :  { %1579 = vadd.xlane.f32.xlu0 %v115_v25 }
  0x9a   :  { %1549 = vadd.xlane.f32.xlu1 %v100_v34 }
  0x9c   :  { %1581 = vadd.xlane.f32.xlu0 %v116_v27 }
  0x9e   :  { %1553 = vadd.xlane.f32.xlu1 %v102_v36 }
  0xa0   :  { %1551 = vadd.xlane.f32.xlu0 %v101_v29 }
  0xa4   :  { %1583 = vadd.xlane.f32.xlu0 %v117_v31 }
  0xa8   :  { %1585 = vadd.xlane.f32.xlu0 %v118_v33 }
  0xac   :  { %1555 = vadd.xlane.f32.xlu0 %v103_v35 }
  0xb0   :  { %1587 = vadd.xlane.f32.xlu0 %v119_v37 }
  0xb4   :  { %1557 = vadd.xlane.f32.xlu0 %v104_v38 }
  0xde   :  { %v7872_v40 = vpop.f32.mrb[0].mxu0 }
  0xdf   :  { %v334_v41 = vadd.f32 %v7872_v40, %v10115_v39  ;;  %v328_v42 = vpop.f32.mrb[1].mxu0 }
  0xe0   :  { %v329_v43 = vadd.f32 %v10115_v39, %v328_v42 }
  0xe2   :  { %v10119_v44 = vpack.c.bf16 %v334_v41, %v329_v43  ;;  %v7875_v45 = vpop.f32.mrb[2].mxu0  ;;  %7926 = vmatprep.mubr.msk.f32.mxu1 %vm14503_vm2, %v329_v43 }
  0xe3   :  { %v344_v46 = vadd.f32 %v7875_v45, %v10115_v39  ;;  %v338_v47 = vpop.f32.mrb[3].mxu0  ;;  %7927 = vmatmul.mubr.msk.f32.vlgmr.msra.gmra.mrb[0].mxu1 %vm14503_vm2, %v334_v41 }
  0xe4   :  { %v339_v48 = vadd.f32 %v10115_v39, %v338_v47 }
  0xe6   :  { %v10125_v49 = vpack.c.bf16 %v344_v46, %v339_v48  ;;  %v7878_v50 = vpop.f32.mrb[4].mxu0  ;;  %7929 = vmatprep.mubr.msk.f32.mxu1 %vm14503_vm2, %v339_v48 }
  0xe7   :  { %v354_v51 = vadd.f32 %v7878_v50, %v10115_v39  ;;  %v348_v52 = vpop.f32.mrb[5].mxu0  ;;  %7930 = vmatmul.mubr.msk.f32.gmra.mrb[2].mxu1 %vm14503_vm2, %v344_v46 }
  0xe8   :  { %14731 = vst [vmem:[#allocation5_spill] sm:$0xff] %v10125_v49  ;;  %v349_v53 = vadd.f32 %v10115_v39, %v348_v52 }
  0xea   :  { %v10131_v54 = vpack.c.bf16 %v354_v51, %v349_v53  ;;  %v7881_v55 = vpop.f32.mrb[6].mxu0  ;;  %7932 = vmatprep.mubr.msk.f32.mxu1 %vm14503_vm2, %v349_v53 }
  0xeb   :  { %v364_v56 = vadd.f32 %v7881_v55, %v10115_v39  ;;  %v358_v57 = vpop.f32.mrb[7].mxu0  ;;  %7933 = vmatmul.mubr.msk.f32.gmra.mrb[4].mxu1 %vm14503_vm2, %v354_v51 }
  0xec   :  { %14732 = vst [vmem:[#allocation6_spill] sm:$0xff] %v10131_v54  ;;  %v359_v58 = vadd.f32 %v10115_v39, %v358_v57 }
  0xee   :  { %v10137_v59 = vpack.c.bf16 %v364_v56, %v359_v58  ;;  %v7884_v60 = vpop.f32.mrb[8].mxu0  ;;  %7935 = vmatprep.mubr.msk.f32.mxu1 %vm14503_vm2, %v359_v58 }
  0xef   :  { %v374_v61 = vadd.f32 %v7884_v60, %v10115_v39  ;;  %v368_v62 = vpop.f32.mrb[9].mxu0  ;;  %7936 = vmatmul.mubr.msk.f32.gmra.mrb[6].mxu1 %vm14503_vm2, %v364_v56 }
  0xf0   :  { %14733 = vst [vmem:[#allocation7_spill] sm:$0xff] %v10137_v59  ;;  %v369_v63 = vadd.f32 %v10115_v39, %v368_v62 }
  0xf2   :  { %v10143_v0 = vpack.c.bf16 %v374_v61, %v369_v63  ;;  %v7887_v1 = vpop.f32.mrb[10].mxu0  ;;  %7938 = vmatprep.mubr.msk.f32.mxu1 %vm14503_vm2, %v369_v63 }
  0xf3   :  { %v384_v2 = vadd.f32 %v7887_v1, %v10115_v39  ;;  %v378_v3 = vpop.f32.mrb[11].mxu0  ;;  %7939 = vmatmul.mubr.msk.f32.gmra.mrb[8].mxu1 %vm14503_vm2, %v374_v61  ;;  %v10213_v61 = vpop.permute.xlu0 %854 }
  0xf4   :  { %14734 = vst [vmem:[#allocation8_spill] sm:$0xff] %v10143_v0  ;;  %v379_v4 = vadd.f32 %v10115_v39, %v378_v3  ;;  %14746 = vst [vmem:[#allocation20_spill] sm:$0xff] %v10213_v61 }
  0xf6   :  { %v10149_v5 = vpack.c.bf16 %v384_v2, %v379_v4  ;;  %v7890_v6 = vpop.f32.mrb[12].mxu0  ;;  %7941 = vmatprep.mubr.msk.f32.mxu1 %vm14503_vm2, %v379_v4 }
  0xf7   :  { %v394_v7 = vadd.f32 %v7890_v6, %v10115_v39  ;;  %v388_v8 = vpop.f32.mrb[13].mxu0  ;;  %7942 = vmatmul.mubr.msk.f32.gmra.mrb[10].mxu1 %vm14503_vm2, %v384_v2  ;;  %v10215_v62 = vpop.permute.xlu0 %859 }
  0xf8   :  { %14735 = vst [vmem:[#allocation9_spill] sm:$0xff] %v10149_v5  ;;  %v389_v9 = vadd.f32 %v10115_v39, %v388_v8  ;;  %14747 = vst [vmem:[#allocation21_spill] sm:$0xff] %v10215_v62  ;;  %v10229_v6 = vpop.permute.xlu1 %864 }
  0xf9   :  { %14754 = vst [vmem:[#allocation28_spill] sm:$0xff] %v10229_v6 }
  0xfa   :  { %v10155_v10 = vpack.c.bf16 %v394_v7, %v389_v9  ;;  %v7893_v11 = vpop.f32.mrb[14].mxu0  ;;  %7944 = vmatprep.mubr.msk.f32.mxu1 %vm14503_vm2, %v389_v9 }
  0xfb   :  { %v404_v12 = vadd.f32 %v7893_v11, %v10115_v39  ;;  %v398_v13 = vpop.f32.mrb[15].mxu0  ;;  %7945 = vmatmul.mubr.msk.f32.gmra.mrb[12].mxu1 %vm14503_vm2, %v394_v7  ;;  %v10217_v63 = vpop.permute.xlu0 %874 }
  0xfc   :  { %14736 = vst [vmem:[#allocation10_spill] sm:$0xff] %v10155_v10  ;;  %v399_v14 = vadd.f32 %v10115_v39, %v398_v13  ;;  %14748 = vst [vmem:[#allocation22_spill] sm:$0xff] %v10217_v63  ;;  %v10233_v8 = vpop.permute.xlu1 %869 }
  0xfd   :  { %14756 = vst [vmem:[#allocation30_spill] sm:$0xff] %v10233_v8 }
  0xfe   :  { %v10161_v15 = vpack.c.bf16 %v404_v12, %v399_v14  ;;  %v7896_v16 = vpop.f32.mrb[16].mxu0  ;;  %7947 = vmatprep.mubr.msk.f32.mxu1 %vm14503_vm2, %v399_v14 }
  0xff   :  { %v414_v17 = vadd.f32 %v7896_v16, %v10115_v39  ;;  %v408_v18 = vpop.f32.mrb[17].mxu0  ;;  %7948 = vmatmul.mubr.msk.f32.gmra.mrb[14].mxu1 %vm14503_vm2, %v404_v12  ;;  %v10219_v1 = vpop.permute.xlu0 %884 }
 0x100   :  { %14737 = vst [vmem:[#allocation11_spill] sm:$0xff] %v10161_v15  ;;  %v409_v19 = vadd.f32 %v10115_v39, %v408_v18  ;;  %14749 = vst [vmem:[#allocation23_spill] sm:$0xff] %v10219_v1  ;;  %v10237_v11 = vpop.permute.xlu1 %879 }
 0x101   :  { %14758 = vst [vmem:[#allocation32_spill] sm:$0xff] %v10237_v11 }
 0x102   :  { %v10167_v20 = vpack.c.bf16 %v414_v17, %v409_v19  ;;  %v7899_v21 = vpop.f32.mrb[18].mxu0  ;;  %7950 = vmatprep.mubr.msk.f32.mxu1 %vm14503_vm2, %v409_v19  ;;  %v10254_v19 = vld [vmem:[%s14303_s6] ss:$0 sm:$0xff]  ;;  %s9684_s6 = smov 96  }
 0x103   :  { %v424_v22 = vadd.f32 %v7899_v21, %v10115_v39  ;;  %v418_v23 = vpop.f32.mrb[19].mxu0  ;;  %7951 = vmatmul.mubr.msk.f32.gmra.mrb[16].mxu1 %vm14503_vm2, %v414_v17  ;;  %v10221_v2 = vpop.permute.xlu0 %894 }
 0x104   :  { %14738 = vst [vmem:[#allocation12_spill] sm:$0xff] %v10167_v20  ;;  %v419_v24 = vadd.f32 %v10115_v39, %v418_v23  ;;  %14750 = vst [vmem:[#allocation24_spill] sm:$0xff] %v10221_v2  ;;  %v10241_v13 = vpop.permute.xlu1 %889 }
 0x105   :  { %14760 = vst [vmem:[#allocation34_spill] sm:$0xff] %v10241_v13 }
 0x106   :  { %v10173_v25 = vpack.c.bf16 %v424_v22, %v419_v24  ;;  %v7902_v26 = vpop.f32.mrb[20].mxu0  ;;  %7953 = vmatprep.mubr.msk.f32.mxu1 %vm14503_vm2, %v419_v24 }
 0x107   :  { %v434_v27 = vadd.f32 %v7902_v26, %v10115_v39  ;;  %v428_v28 = vpop.f32.mrb[21].mxu0  ;;  %7954 = vmatmul.mubr.msk.f32.gmra.mrb[18].mxu1 %vm14503_vm2, %v424_v22  ;;  %v10223_v3 = vpop.permute.xlu0 %934 }
 0x108   :  { %14739 = vst [vmem:[#allocation13_spill] sm:$0xff] %v10173_v25  ;;  %v429_v29 = vadd.f32 %v10115_v39, %v428_v28  ;;  %14751 = vst [vmem:[#allocation25_spill] sm:$0xff] %v10223_v3  ;;  %v10245_v16 = vpop.permute.xlu1 %899 }
 0x109   :  { %14762 = vst [vmem:[#allocation36_spill] sm:$0xff] %v10245_v16 }
 0x10a   :  { %v10179_v30 = vpack.c.bf16 %v434_v27, %v429_v29  ;;  %v7905_v31 = vpop.f32.mrb[22].mxu0  ;;  %7956 = vmatprep.mubr.msk.f32.mxu1 %vm14503_vm2, %v429_v29 }
 0x10b   :  { %v444_v32 = vadd.f32 %v7905_v31, %v10115_v39  ;;  %v438_v33 = vpop.f32.mrb[23].mxu0  ;;  %7957 = vmatmul.mubr.msk.f32.gmra.mrb[20].mxu1 %vm14503_vm2, %v434_v27  ;;  %v10225_v4 = vpop.permute.xlu0 %904 }
 0x10c   :  { %14740 = vst [vmem:[#allocation14_spill] sm:$0xff] %v10179_v30  ;;  %v439_v34 = vadd.f32 %v10115_v39, %v438_v33  ;;  %14752 = vst [vmem:[#allocation26_spill] sm:$0xff] %v10225_v4  ;;  %v10249_v18 = vpop.permute.xlu1 %939 }
 0x10d   :  { %14764 = vst [vmem:[#allocation38_spill] sm:$0xff] %v10249_v18 }
 0x10e   :  { %v10185_v35 = vpack.c.bf16 %v444_v32, %v439_v34  ;;  %v7908_v36 = vpop.f32.mrb[24].mxu0  ;;  %7959 = vmatprep.mubr.msk.f32.mxu1 %vm14503_vm2, %v439_v34 }
 0x10f   :  { %v454_v37 = vadd.f32 %v7908_v36, %v10115_v39  ;;  %v448_v38 = vpop.f32.mrb[25].mxu0  ;;  %7960 = vmatmul.mubr.msk.f32.gmra.mrb[22].mxu1 %vm14503_vm2, %v444_v32 }
 0x110   :  { %14741 = vst [vmem:[#allocation15_spill] sm:$0xff] %v10185_v35  ;;  %v449_v40 = vadd.f32 %v10115_v39, %v448_v38  ;;  %v10261_v26 = vpop.permute.xlu1 %909 }
 0x111   :  { %14767 = vst [vmem:[#allocation41_spill] sm:$0xff] %v10261_v26 }
 0x112   :  { %v10191_v41 = vpack.c.bf16 %v454_v37, %v449_v40  ;;  %v7911_v42 = vpop.f32.mrb[26].mxu0  ;;  %7962 = vmatprep.mubr.msk.f32.mxu1 %vm14503_vm2, %v449_v40 }
 0x113   :  { %v464_v43 = vadd.f32 %v7911_v42, %v10115_v39  ;;  %v458_v45 = vpop.f32.mrb[27].mxu0  ;;  %7963 = vmatmul.mubr.msk.f32.gmra.mrb[24].mxu1 %vm14503_vm2, %v454_v37 }
 0x114   :  { %14742 = vst [vmem:[#allocation16_spill] sm:$0xff] %v10191_v41  ;;  %v459_v46 = vadd.f32 %v10115_v39, %v458_v45  ;;  %v10277_v34 = vpop.permute.xlu1 %949 }
 0x115   :  { %14772 = vst [vmem:[#allocation46_spill] sm:$0xff] %v10277_v34 }
 0x116   :  { %v10197_v47 = vpack.c.bf16 %v464_v43, %v459_v46  ;;  %v7914_v48 = vpop.f32.mrb[28].mxu0  ;;  %7965 = vmatprep.mubr.msk.f32.mxu1 %vm14503_vm2, %v459_v46 }
 0x117   :  { %v474_v50 = vadd.f32 %v7914_v48, %v10115_v39  ;;  %v468_v51 = vpop.f32.mrb[29].mxu0  ;;  %7966 = vmatmul.mubr.msk.f32.gmra.mrb[26].mxu1 %vm14503_vm2, %v464_v43 }
 0x118   :  { %14743 = vst [vmem:[#allocation17_spill] sm:$0xff] %v10197_v47  ;;  %v469_v52 = vadd.f32 %v10115_v39, %v468_v51  ;;  %v10293_v51 = vpop.permute.xlu1 %919 }
 0x119   :  { %14777 = vst [vmem:[#allocation51_spill] sm:$0xff] %v10293_v51 }
 0x11a   :  { %v10203_v53 = vpack.c.bf16 %v474_v50, %v469_v52  ;;  %v7917_v55 = vpop.f32.mrb[30].mxu0  ;;  %7968 = vmatprep.mubr.msk.f32.mxu1 %vm14503_vm2, %v469_v52 }
 0x11b   :  { %v484_v56 = vadd.f32 %v7917_v55, %v10115_v39  ;;  %v478_v57 = vpop.f32.mrb[31].mxu0  ;;  %7969 = vmatmul.mubr.msk.f32.gmra.mrb[28].mxu1 %vm14503_vm2, %v474_v50 }
 0x11c   :  { %14744 = vst [vmem:[#allocation18_spill] sm:$0xff] %v10203_v53  ;;  %v479_v58 = vadd.f32 %v10115_v39, %v478_v57  ;;  %v10227_v39 = vpop.permute.xlu0 %944 }
 0x11d   :  { %14753 = vst [vmem:[#allocation27_spill] sm:$0xff] %v10227_v39 }
 0x11e   :  { %v10209_v60 = vpack.c.bf16 %v484_v56, %v479_v58  ;;  %7971 = vmatprep.mubr.msk.f32.mxu1 %vm14503_vm2, %v479_v58 }
 0x11f   :  { %7972 = vmatmul.mubr.msk.f32.gmra.mrb[30].mxu1 %vm14503_vm2, %v484_v56  ;;  %vm14606_vm2 = vcmask 917312  }
 0x120   :  { %14745 = vst [vmem:[#allocation19_spill] sm:$0xff] %v10209_v60  ;;  %v10231_v7 = vpop.permute.xlu0 %914 }
 0x121   :  { %14755 = vst [vmem:[#allocation29_spill] sm:$0xff] %v10231_v7 }
 0x124   :  { %v10235_v9 = vpop.permute.xlu0 %954 }
 0x125   :  { %14757 = vst [vmem:[#allocation31_spill] sm:$0xff] %v10235_v9 }
 0x128   :  { %v10239_v12 = vpop.permute.xlu0 %924 }
 0x129   :  { %14759 = vst [vmem:[#allocation33_spill] sm:$0xff] %v10239_v12 }
 0x12c   :  { %v10243_v14 = vpop.permute.xlu0 %964 }
 0x12d   :  { %14761 = vst [vmem:[#allocation35_spill] sm:$0xff] %v10243_v14 }
 0x130   :  { %v10247_v17 = vpop.permute.xlu0 %974 }
 0x131   :  { %14763 = vst [vmem:[#allocation37_spill] sm:$0xff] %v10247_v17 }
 0x134   :  { %v10256_v22 = vpop.permute.xlu0 %984 }
 0x135   :  { %14765 = vst [vmem:[#allocation39_spill] sm:$0xff] %v10256_v22 }
 0x138   :  { %v10274_v33 = vpop.permute.xlu0 %994 }
 0x139   :  { %14771 = vst [vmem:[#allocation45_spill] sm:$0xff] %v10274_v33 }
 0x13c   :  { %v10288_v45 = vpop.permute.xlu0 %1004 }
 0x13d   :  { %14775 = vst [vmem:[#allocation49_spill] sm:$0xff] %v10288_v45 }
 0x1b6   :  { %v7928_v21 = vpop.f32.mrb[0].mxu1 }
 0x1b7   :  { %v10259_v23 = vadd.f32 %v7928_v21, %v10254_v19  ;;  %v661_v24 = vpop.f32.mrb[1].mxu1 }
 0x1b8   :  { %v10264_v27 = vadd.f32 %v10254_v19, %v661_v24 }
 0x1b9   :  { %14766 = vst [vmem:[#allocation40_spill] sm:$0xff] %v10259_v23  ;;  %9293 = vtanh.f32 %v10259_v23 }
 0x1ba   :  { %14768 = vst [vmem:[#allocation42_spill] sm:$0xff] %v10264_v27  ;;  %9295 = vtanh.f32 %v10264_v27  ;;  %v7931_v28 = vpop.f32.mrb[2].mxu1 }
 0x1bb   :  { %v10269_v29 = vadd.f32 %v7931_v28, %v10254_v19  ;;  %v671_v31 = vpop.f32.mrb[3].mxu1 }
 0x1bc   :  { %v10272_v32 = vadd.f32 %v10254_v19, %v671_v31 }
 0x1bd   :  { %14769 = vst [vmem:[#allocation43_spill] sm:$0xff] %v10269_v29  ;;  %9297 = vtanh.f32 %v10269_v29 }
 0x1be   :  { %14770 = vst [vmem:[#allocation44_spill] sm:$0xff] %v10272_v32  ;;  %9299 = vtanh.f32 %v10272_v32  ;;  %v7934_v36 = vpop.f32.mrb[4].mxu1 }
 0x1bf   :  { %v10281_v37 = vadd.f32 %v7934_v36, %v10254_v19  ;;  %v681_v38 = vpop.f32.mrb[5].mxu1 }
 0x1c0   :  { %v10284_v40 = vadd.f32 %v10254_v19, %v681_v38 }
 0x1c1   :  { %14773 = vst [vmem:[#allocation47_spill] sm:$0xff] %v10281_v37  ;;  %9301 = vtanh.f32 %v10281_v37 }
 0x1c2   :  { %14774 = vst [vmem:[#allocation48_spill] sm:$0xff] %v10284_v40  ;;  %9303 = vtanh.f32 %v10284_v40  ;;  %v7937_v42 = vpop.f32.mrb[6].mxu1 }
 0x1c3   :  { %v9294_v43 = vpop.eup %9293  ;;  %v10291_v46 = vadd.f32 %v7937_v42, %v10254_v19  ;;  %v691_v48 = vpop.f32.mrb[7].mxu1 }
 0x1c4   :  { %v9296_v50 = vpop.eup %9295  ;;  %v10296_v52 = vadd.f32 %v10254_v19, %v691_v48  ;;  %v1013_v55 = vmul.f32 %v9294_v43, %v10215_v62  ;;  %v10314_v48 = vpop.xlane.xlu0 %1527 }
 0x1c5   :  { %14776 = vst [vmem:[#allocation50_spill] sm:$0xff] %v10291_v46  ;;  %9305 = vtanh.f32 %v10291_v46  ;;  %v1012_v56 = vmul.f32 %v9296_v50, %v10213_v61  ;;  %14782 = vst [vmem:[#allocation56_spill] sm:$0xff] %v10314_v48  ;;  %v10321_v46 = vpop.permute.xlu1 %959 }
 0x1c6   :  { %14778 = vst [vmem:[#allocation52_spill] sm:$0xff] %v10296_v52  ;;  %9307 = vtanh.f32 %v10296_v52  ;;  %1094 = vrot.lane.b32.xlu1 %v1013_v55, %s9684_s6  ;;  %v2077_v57 = vsel %vm1911_vm3, %v1013_v55, 0.0  ;;  %v7940_v58 = vpop.f32.mrb[8].mxu1  ;;  %14784 = vst [vmem:[#allocation58_spill] sm:$0xff] %v10321_v46 }
 0x1c7   :  { %v9298_v21 = vpop.eup %9297  ;;  %v10305_v24 = vadd.f32 %v7940_v58, %v10254_v19  ;;  %v701_v28 = vpop.f32.mrb[9].mxu1  ;;  %1092 = vrot.lane.b32.xlu0 %v1012_v56, %s9684_s6  ;;  %v2076_v31 = vsel %vm1911_vm3, %v1012_v56, 0.0  ;;  %v10309_v36 = vmul.f32 %v1012_v56, %v1012_v56  ;;  %v10318_v58 = vmul.f32 %v1013_v55, %v1013_v55 }
 0x1c8   :  { %v9300_v38 = vpop.eup %9299  ;;  %v10312_v42 = vadd.f32 %v10254_v19, %v701_v28  ;;  %v2078_v43 = vadd.f32 %v2077_v57, %v2076_v31  ;;  %v1015_v50 = vmul.f32 %v9298_v21, %v10233_v8 }
 0x1c9   :  { %14779 = vst [vmem:[#allocation53_spill] sm:$0xff] %v10305_v24  ;;  %14780 = vst [vmem:[#allocation54_spill] sm:$0xff] %v10309_v36  ;;  %9309 = vtanh.f32 %v10305_v24  ;;  %v1014_v52 = vmul.f32 %v9300_v38, %v10229_v6  ;;  %v10343_v6 = vpop.xlane.xlu0 %1559 }
 0x1ca   :  { %14781 = vst [vmem:[#allocation55_spill] sm:$0xff] %v10312_v42  ;;  %14783 = vst [vmem:[#allocation57_spill] sm:$0xff] %v10318_v58  ;;  %9311 = vtanh.f32 %v10312_v42  ;;  %v7943_v56 = vpop.f32.mrb[10].mxu1  ;;  %2491 = vrot.lane.b32.xlu1 %v10309_v36, %s9684_s6 }
 0x1cb   :  { %v9302_v28 = vpop.eup %9301  ;;  %v10327_v57 = vadd.f32 %v7943_v56, %v10254_v19  ;;  %v711_v31 = vpop.f32.mrb[11].mxu1  ;;  %2493 = vrot.lane.b32.xlu0 %v10318_v58, %s9684_s6  ;;  %v2079_v55 = vsel %vm1911_vm3, %v1014_v52, 0.0  ;;  %v2081_v56 = vsel %vm1911_vm3, %v1015_v50, 0.0  ;;  %14787 = vst [vmem:[#allocation61_spill] sm:$0xff] %v10343_v6 }
 0x1cc   :  { %v9304_v21 = vpop.eup %9303  ;;  %v10333_v38 = vadd.f32 %v10254_v19, %v711_v31  ;;  %v2080_v24 = vadd.f32 %v2079_v55, %v2078_v43  ;;  %v1017_v42 = vmul.f32 %v9302_v28, %v10237_v11 }
 0x1cd   :  { %14785 = vst [vmem:[#allocation59_spill] sm:$0xff] %v10327_v57  ;;  %9313 = vtanh.f32 %v10327_v57  ;;  %v10338_v36 = vmul.f32 %v9304_v21, %v10217_v63  ;;  %v10351_v21 = vpop.permute.xlu1 %929 }
 0x1ce   :  { %14786 = vst [vmem:[#allocation60_spill] sm:$0xff] %v10333_v38  ;;  %9315 = vtanh.f32 %v10333_v38  ;;  %v7946_v40 = vpop.f32.mrb[12].mxu1  ;;  %1098 = vrot.lane.b32.xlu1 %v1015_v50, %s9684_s6  ;;  %v2082_v58 = vadd.f32 %v2081_v56, %v2080_v24  ;;  %14789 = vst [vmem:[#allocation63_spill] sm:$0xff] %v10351_v21  ;;  %v10353_v38 = vmul.f32 %v1015_v50, %v1015_v50  ;;  %v2085_v11 = vsel %vm1911_vm3, %v1017_v42, 0.0 }
 0x1cf   :  { %v9306_v37 = vpop.eup %9305  ;;  %v10346_v43 = vadd.f32 %v7946_v40, %v10254_v19  ;;  %v721_v28 = vpop.f32.mrb[13].mxu1  ;;  %1096 = vrot.lane.b32.xlu0 %v1014_v52, %s9684_s6  ;;  %v2083_v31 = vsel %vm1911_vm3, %v10338_v36, 0.0  ;;  %v10358_v24 = vmul.f32 %v1014_v52, %v1014_v52 }
 0x1d0   :  { %v9308_v55 = vpop.eup %9307  ;;  %14790 = vst [vmem:[#allocation64_spill] sm:$0xff] %v10353_v38  ;;  %v10356_v57 = vadd.f32 %v10254_v19, %v721_v28  ;;  %v2084_v56 = vadd.f32 %v2083_v31, %v2082_v58  ;;  %v10364_v63 = vmul.f32 %v9306_v37, %v10241_v13 }
 0x1d1   :  { %14788 = vst [vmem:[#allocation62_spill] sm:$0xff] %v10346_v43  ;;  %14792 = vst [vmem:[#allocation66_spill] sm:$0xff] %v10358_v24  ;;  %v10361_v40 = vmul.f32 %v9308_v55, %v10219_v1  ;;  %9317 = vtanh.f32 %v10346_v43  ;;  %v10381_v1 = vpop.xlane.xlu0 %1561 }
 0x1d2   :  { %14791 = vst [vmem:[#allocation65_spill] sm:$0xff] %v10356_v57  ;;  %9319 = vtanh.f32 %v10356_v57  ;;  %v7949_v50 = vpop.f32.mrb[14].mxu1  ;;  %2495 = vrot.lane.b32.xlu1 %v10358_v24, %s9684_s6  ;;  %v2086_v28 = vadd.f32 %v2085_v11, %v2084_v56  ;;  %14795 = vst [vmem:[#allocation69_spill] sm:$0xff] %v10381_v1  ;;  %v2089_v11 = vsel %vm1911_vm3, %v10364_v63, 0.0 }
 0x1d3   :  { %v9310_v52 = vpop.eup %9309  ;;  %v10372_v58 = vadd.f32 %v7949_v50, %v10254_v19  ;;  %v731_v31 = vpop.f32.mrb[15].mxu1  ;;  %2497 = vrot.lane.b32.xlu0 %v10353_v38, %s9684_s6  ;;  %v2087_v37 = vsel %vm1911_vm3, %v10361_v40, 0.0 }
 0x1d4   :  { %v9312_v55 = vpop.eup %9311  ;;  %v10379_v43 = vadd.f32 %v10254_v19, %v731_v31  ;;  %v2088_v57 = vadd.f32 %v2087_v37, %v2086_v28  ;;  %v10390_v50 = vmul.f32 %v9310_v52, %v10245_v16  ;;  %v10392_v38 = vpop.permute.xlu1 %969 }
 0x1d5   :  { %14793 = vst [vmem:[#allocation67_spill] sm:$0xff] %v10372_v58  ;;  %v10386_v56 = vmul.f32 %v9312_v55, %v10221_v2  ;;  %9321 = vtanh.f32 %v10372_v58  ;;  %14796 = vst [vmem:[#allocation70_spill] sm:$0xff] %v10392_v38  ;;  %v10403_v58 = vmul.f32 %v1017_v42, %v1017_v42 }
 0x1d6   :  { %14794 = vst [vmem:[#allocation68_spill] sm:$0xff] %v10379_v43  ;;  %9323 = vtanh.f32 %v10379_v43  ;;  %v7952_v31 = vpop.f32.mrb[16].mxu1  ;;  %1102 = vrot.lane.b32.xlu1 %v1017_v42, %s9684_s6  ;;  %v2090_v28 = vadd.f32 %v2089_v11, %v2088_v57  ;;  %v2093_v57 = vsel %vm1911_vm3, %v10390_v50, 0.0 }
 0x1d7   :  { %v9314_v37 = vpop.eup %9313  ;;  %v2091_v24 = vsel %vm1911_vm3, %v10386_v56, 0.0  ;;  %v10399_v55 = vadd.f32 %v7952_v31, %v10254_v19  ;;  %v741_v2 = vpop.f32.mrb[17].mxu1  ;;  %1100 = vrot.lane.b32.xlu0 %v10338_v36, %s9684_s6  ;;  %14798 = vst [vmem:[#allocation72_spill] sm:$0xff] %v10403_v58 }
 0x1d8   :  { %v9316_v52 = vpop.eup %9315  ;;  %v10406_v43 = vadd.f32 %v10254_v19, %v741_v2  ;;  %v2092_v16 = vadd.f32 %v2091_v24, %v2090_v28  ;;  %v10415_v31 = vmul.f32 %v9314_v37, %v10261_v26  ;;  %v10420_v24 = vpop.xlane.xlu0 %1563 }
 0x1d9   :  { %14797 = vst [vmem:[#allocation71_spill] sm:$0xff] %v10399_v55  ;;  %9325 = vtanh.f32 %v10399_v55  ;;  %v10412_v11 = vmul.f32 %v9316_v52, %v10225_v4  ;;  %14800 = vst [vmem:[#allocation74_spill] sm:$0xff] %v10420_v24 }
 0x1da   :  { %14799 = vst [vmem:[#allocation73_spill] sm:$0xff] %v10406_v43  ;;  %9327 = vtanh.f32 %v10406_v43  ;;  %v7955_v13 = vpop.f32.mrb[18].mxu1  ;;  %2501 = vrot.lane.b32.xlu1 %v10403_v58, %s9684_s6  ;;  %v2094_v2 = vadd.f32 %v2093_v57, %v2092_v16  ;;  %v10429_v43 = vpop.permute.xlu1 %979  ;;  %v10436_v16 = vmul.f32 %v10338_v36, %v10338_v36  ;;  %v2097_v26 = vsel %vm1911_vm3, %v10415_v31, 0.0 }
 0x1db   :  { %v9318_v42 = vpop.eup %9317  ;;  %v10423_v28 = vadd.f32 %v7955_v13, %v10254_v19  ;;  %v751_v55 = vpop.f32.mrb[19].mxu1  ;;  %1104 = vrot.lane.b32.xlu0 %v10361_v40, %s9684_s6  ;;  %v2095_v37 = vsel %vm1911_vm3, %v10412_v11, 0.0  ;;  %14802 = vst [vmem:[#allocation76_spill] sm:$0xff] %v10429_v43 }
 0x1dc   :  { %v9320_v52 = vpop.eup %9319  ;;  %v10432_v4 = vadd.f32 %v10254_v19, %v751_v55  ;;  %14804 = vst [vmem:[#allocation78_spill] sm:$0xff] %v10436_v16  ;;  %v2096_v57 = vadd.f32 %v2095_v37, %v2094_v2  ;;  %v10440_v13 = vmul.f32 %v9318_v42, %v10293_v51 }
 0x1dd   :  { %14801 = vst [vmem:[#allocation75_spill] sm:$0xff] %v10423_v28  ;;  %9329 = vtanh.f32 %v10423_v28  ;;  %v10443_v58 = vmul.f32 %v9320_v52, %v10231_v7  ;;  %v10460_v7 = vpop.xlane.xlu0 %1565 }
 0x1de   :  { %14803 = vst [vmem:[#allocation77_spill] sm:$0xff] %v10432_v4  ;;  %9331 = vtanh.f32 %v10432_v4  ;;  %v7958_v55 = vpop.f32.mrb[20].mxu1  ;;  %2499 = vrot.lane.b32.xlu1 %v10436_v16, %s9684_s6  ;;  %v2098_v36 = vadd.f32 %v2097_v26, %v2096_v57  ;;  %14807 = vst [vmem:[#allocation81_spill] sm:$0xff] %v10460_v7  ;;  %v10471_v16 = vpop.permute.xlu1 %989 }
 0x1df   :  { %v9322_v8 = vpop.eup %9321  ;;  %v10451_v2 = vadd.f32 %v7958_v55, %v10254_v19  ;;  %v761_v37 = vpop.f32.mrb[21].mxu1  ;;  %1108 = vrot.lane.b32.xlu0 %v10386_v56, %s9684_s6  ;;  %v2099_v42 = vsel %vm1911_vm3, %v10443_v58, 0.0  ;;  %v2101_v55 = vsel %vm1911_vm3, %v10440_v13, 0.0  ;;  %14808 = vst [vmem:[#allocation82_spill] sm:$0xff] %v10471_v16 }
 0x1e0   :  { %v9324_v52 = vpop.eup %9323  ;;  %v10458_v28 = vadd.f32 %v10254_v19, %v761_v37  ;;  %v2100_v4 = vadd.f32 %v2099_v42, %v2098_v36  ;;  %v10467_v57 = vmul.f32 %v9322_v8, %v10351_v21 }
 0x1e1   :  { %14805 = vst [vmem:[#allocation79_spill] sm:$0xff] %v10451_v2  ;;  %v10463_v26 = vmul.f32 %v9324_v52, %v10239_v12  ;;  %9333 = vtanh.f32 %v10451_v2 }
 0x1e2   :  { %14806 = vst [vmem:[#allocation80_spill] sm:$0xff] %v10458_v28  ;;  %9335 = vtanh.f32 %v10458_v28  ;;  %v7961_v37 = vpop.f32.mrb[22].mxu1  ;;  %1106 = vrot.lane.b32.xlu1 %v10364_v63, %s9684_s6  ;;  %v2102_v36 = vadd.f32 %v2101_v55, %v2100_v4  ;;  %v2105_v4 = vsel %vm1911_vm3, %v10467_v57, 0.0 }
 0x1e3   :  { %v9326_v42 = vpop.eup %9325  ;;  %v10477_v52 = vadd.f32 %v7961_v37, %v10254_v19  ;;  %v771_v2 = vpop.f32.mrb[23].mxu1  ;;  %1112 = vrot.lane.b32.xlu0 %v10412_v11, %s9684_s6  ;;  %v2103_v8 = vsel %vm1911_vm3, %v10463_v26, 0.0 }
 0x1e4   :  { %v9328_v12 = vpop.eup %9327  ;;  %v10484_v21 = vadd.f32 %v10254_v19, %v771_v2  ;;  %v2104_v28 = vadd.f32 %v2103_v8, %v2102_v36  ;;  %v10487_v51 = vmul.f32 %v9326_v42, %v10249_v18  ;;  %v10502_v8 = vpop.xlane.xlu0 %1567 }
 0x1e5   :  { %14809 = vst [vmem:[#allocation83_spill] sm:$0xff] %v10477_v52  ;;  %9337 = vtanh.f32 %v10477_v52  ;;  %v10493_v55 = vmul.f32 %v9328_v12, %v10223_v3  ;;  %14811 = vst [vmem:[#allocation85_spill] sm:$0xff] %v10502_v8  ;;  %v10511_v3 = vpop.permute.xlu1 %999 }
 0x1e6   :  { %14810 = vst [vmem:[#allocation84_spill] sm:$0xff] %v10484_v21  ;;  %9339 = vtanh.f32 %v10484_v21  ;;  %v7964_v37 = vpop.f32.mrb[24].mxu1  ;;  %1110 = vrot.lane.b32.xlu1 %v10390_v50, %s9684_s6  ;;  %v2114_v2 = vsel %vm1911_vm3, %v10487_v51, 0.0  ;;  %v10500_v36 = vadd.f32 %v2105_v4, %v2104_v28  ;;  %14813 = vst [vmem:[#allocation87_spill] sm:$0xff] %v10511_v3 }
 0x1e7   :  { %v9330_v42 = vpop.eup %9329  ;;  %v10505_v52 = vadd.f32 %v7964_v37, %v10254_v19  ;;  %v781_v18 = vpop.f32.mrb[25].mxu1  ;;  %1116 = vrot.lane.b32.xlu0 %v10443_v58, %s9684_s6  ;;  %v2113_v12 = vsel %vm1911_vm3, %v10493_v55, 0.0  ;;  %v10832_v30 = vmul.f32 %v10493_v55, %v10493_v55 }
 0x1e8   :  { %v9332_v21 = vpop.eup %9331  ;;  %v10514_v32 = vadd.f32 %v10254_v19, %v781_v18  ;;  %v2115_v28 = vadd.f32 %v2114_v2, %v2113_v12  ;;  %v10521_v37 = vmul.f32 %v9330_v42, %v10277_v34 }
 0x1e9   :  { %14812 = vst [vmem:[#allocation86_spill] sm:$0xff] %v10505_v52  ;;  %9341 = vtanh.f32 %v10505_v52  ;;  %v10518_v4 = vmul.f32 %v9332_v21, %v10227_v39  ;;  %v10547_v34 = vpop.permute.xlu1 %1009  ;;  %14872 = vst [vmem:[#allocation144_spill] sm:$0xff] %v10832_v30 }
 0x1ea   :  { %14814 = vst [vmem:[#allocation88_spill] sm:$0xff] %v10514_v32  ;;  %9343 = vtanh.f32 %v10514_v32  ;;  %v7967_v29 = vpop.f32.mrb[26].mxu1  ;;  %1114 = vrot.lane.b32.xlu1 %v10415_v31, %s9684_s6  ;;  %v10536_v32 = vpop.xlane.xlu0 %1569  ;;  %14818 = vst [vmem:[#allocation92_spill] sm:$0xff] %v10547_v34 }
 0x1eb   :  { %v9334_v61 = vpop.eup %9333  ;;  %v10527_v62 = vadd.f32 %v7967_v29, %v10254_v19  ;;  %v791_v18 = vpop.f32.mrb[27].mxu1  ;;  %1120 = vrot.lane.b32.xlu0 %v10463_v26, %s9684_s6  ;;  %v2116_v21 = vsel %vm1911_vm3, %v10518_v4, 0.0  ;;  %14817 = vst [vmem:[#allocation91_spill] sm:$0xff] %v10536_v32  ;;  %v2118_v29 = vsel %vm1911_vm3, %v10521_v37, 0.0  ;;  %v10866_v25 = vmul.f32 %v10518_v4, %v10518_v4 }
 0x1ec   :  { %v9336_v2 = vpop.eup %9335  ;;  %v10534_v42 = vadd.f32 %v10254_v19, %v791_v18  ;;  %v2117_v12 = vadd.f32 %v2116_v21, %v2115_v28  ;;  %v10545_v39 = vmul.f32 %v9334_v61, %v10321_v46 }
 0x1ed   :  { %14815 = vst [vmem:[#allocation89_spill] sm:$0xff] %v10527_v62  ;;  %9345 = vtanh.f32 %v10527_v62  ;;  %v10540_v52 = vmul.f32 %v9336_v2, %v10235_v9  ;;  %v10571_v27 = vpop.xlane.xlu1 %1529  ;;  %14877 = vst [vmem:[#allocation149_spill] sm:$0xff] %v10866_v25 }
 0x1ee   :  { %14816 = vst [vmem:[#allocation90_spill] sm:$0xff] %v10534_v42  ;;  %9347 = vtanh.f32 %v10534_v42  ;;  %v7970_v18 = vpop.f32.mrb[28].mxu1  ;;  %1118 = vrot.lane.b32.xlu1 %v10440_v13, %s9684_s6  ;;  %v2119_v28 = vadd.f32 %v2118_v29, %v2117_v12  ;;  %v2122_v12 = vsel %vm1911_vm3, %v10545_v39, 0.0  ;;  %14821 = vst [vmem:[#allocation95_spill] sm:$0xff] %v10571_v27 }
 0x1ef   :  { %v9338_v21 = vpop.eup %9337  ;;  %v10553_v62 = vadd.f32 %v7970_v18, %v10254_v19  ;;  %v801_v2 = vpop.f32.mrb[29].mxu1  ;;  %1318 = vrot.lane.b32.xlu0 %v10493_v55, %s9684_s6  ;;  %v2120_v61 = vsel %vm1911_vm3, %v10540_v52, 0.0 }
 0x1f0   :  { %v9340_v9 = vpop.eup %9339  ;;  %v10560_v46 = vadd.f32 %v10254_v19, %v801_v2  ;;  %v2121_v42 = vadd.f32 %v2120_v61, %v2119_v28  ;;  %v10566_v29 = vmul.f32 %v9338_v21, %v10392_v38  ;;  %v10576_v61 = vpop.xlane.xlu0 %1571 }
 0x1f1   :  { %14819 = vst [vmem:[#allocation93_spill] sm:$0xff] %v10553_v62  ;;  %9349 = vtanh.f32 %v10553_v62  ;;  %v10569_v18 = vmul.f32 %v9340_v9, %v10243_v14  ;;  %14822 = vst [vmem:[#allocation96_spill] sm:$0xff] %v10576_v61 }
 0x1f2   :  { %14820 = vst [vmem:[#allocation94_spill] sm:$0xff] %v10560_v46  ;;  %9351 = vtanh.f32 %v10560_v46  ;;  %v7973_v23 = vpop.f32.mrb[30].mxu1  ;;  %1122 = vrot.lane.b32.xlu1 %v10467_v57, %s9684_s6  ;;  %v2123_v28 = vadd.f32 %v2122_v12, %v2121_v42  ;;  %v2126_v42 = vsel %vm1911_vm3, %v10566_v29, 0.0 }
 0x1f3   :  { %v9342_v2 = vpop.eup %9341  ;;  %v10579_v62 = vadd.f32 %v7973_v23, %v10254_v19  ;;  %v811_v21 = vpop.f32.mrb[31].mxu1  ;;  %1322 = vrot.lane.b32.xlu0 %v10518_v4, %s9684_s6  ;;  %v2124_v9 = vsel %vm1911_vm3, %v10569_v18, 0.0  ;;  %v10908_v54 = vmul.f32 %v10569_v18, %v10569_v18 }
 0x1f4   :  { %v9344_v14 = vpop.eup %9343  ;;  %v10586_v46 = vadd.f32 %v10254_v19, %v811_v21  ;;  %v2125_v38 = vadd.f32 %v2124_v9, %v2123_v28  ;;  %v10595_v12 = vmul.f32 %v9342_v2, %v10429_v43  ;;  %v10604_v9 = vpop.xlane.xlu1 %1531  ;;  %v10610_v2 = vmul.f32 %v10361_v40, %v10361_v40 }
 0x1f5   :  { %14823 = vst [vmem:[#allocation97_spill] sm:$0xff] %v10579_v62  ;;  %9353 = vtanh.f32 %v10579_v62  ;;  %v10592_v23 = vmul.f32 %v9344_v14, %v10247_v17  ;;  %14825 = vst [vmem:[#allocation99_spill] sm:$0xff] %v10604_v9  ;;  %v10606_v62 = vpop.xlane.xlu0 %1573  ;;  %v10629_v43 = vmul.f32 %v10364_v63, %v10364_v63 }
 0x1f6   :  { %14824 = vst [vmem:[#allocation98_spill] sm:$0xff] %v10586_v46  ;;  %9355 = vtanh.f32 %v10586_v46  ;;  %1320 = vrot.lane.b32.xlu1 %v10487_v51, %s9684_s6  ;;  %v2127_v60 = vadd.f32 %v2126_v42, %v2125_v38  ;;  %14826 = vst [vmem:[#allocation100_spill] sm:$0xff] %v10606_v62  ;;  %v2130_v38 = vsel %vm1911_vm3, %v10595_v12, 0.0  ;;  %v10816_v41 = vmul.f32 %v10595_v12, %v10595_v12 }
 0x1f7   :  { %v9346_v19 = vpop.eup %9345  ;;  %1326 = vrot.lane.b32.xlu0 %v10540_v52, %s9684_s6  ;;  %v2128_v28 = vsel %vm1911_vm3, %v10592_v23, 0.0  ;;  %14827 = vst [vmem:[#allocation101_spill] sm:$0xff] %v10610_v2  ;;  %14828 = vst [vmem:[#allocation102_spill] sm:$0xff] %v10629_v43 }
 0x1f8   :  { %v9348_v21 = vpop.eup %9347  ;;  %v2129_v14 = vadd.f32 %v2128_v28, %v2127_v60  ;;  %v10618_v42 = vmul.f32 %v9346_v19, %v10471_v16  ;;  %14868 = vst [vmem:[#allocation140_spill] sm:$0xff] %v10816_v41  ;;  %14881 = vst [vmem:[#allocation153_spill] sm:$0xff] %v10908_v54 }
 0x1f9   :  { %v10613_v46 = vmul.f32 %v9348_v21, %v10256_v22  ;;  %v2107_v22 = vrot.slane %v10500_v36, 4  ;;  %v10643_v16 = vpop.xlane.xlu0 %1575 }
 0x1fa   :  { %1324 = vrot.lane.b32.xlu1 %v10521_v37, %s9684_s6  ;;  %v2131_v17 = vadd.f32 %v2130_v38, %v2129_v14  ;;  %v2134_v14 = vsel %vm1911_vm3, %v10618_v42, 0.0  ;;  %14830 = vst [vmem:[#allocation104_spill] sm:$0xff] %v10643_v16  ;;  %v10828_v35 = vmul.f32 %v10618_v42, %v10618_v42 }
 0x1fb   :  { %v9350_v60 = vpop.eup %9349  ;;  %2503 = vrot.lane.b32.xlu0 %v10610_v2, %s9684_s6  ;;  %v2132_v40 = vsel %vm1911_vm3, %v10613_v46, 0.0  ;;  %v10639_v2 = vpop.xlane.xlu1 %1533  ;;  %v10941_v20 = vmul.f32 %v10613_v46, %v10613_v46 }
 0x1fc   :  { %v9352_v28 = vpop.eup %9351  ;;  %v2133_v21 = vadd.f32 %v2132_v40, %v2131_v17  ;;  %v10637_v38 = vmul.f32 %v9350_v60, %v10511_v3  ;;  %14829 = vst [vmem:[#allocation103_spill] sm:$0xff] %v10639_v2  ;;  %v2108_v60 = vadd.f32 %v2107_v22, %v10500_v36  ;;  %v10652_v3 = vmul.f32 %v10386_v56, %v10386_v56 }
 0x1fd   :  { %v10632_v19 = vmul.f32 %v9352_v28, %v10274_v33  ;;  %14871 = vst [vmem:[#allocation143_spill] sm:$0xff] %v10828_v35  ;;  %14883 = vst [vmem:[#allocation155_spill] sm:$0xff] %v10941_v20 }
 0x1fe   :  { %1328 = vrot.lane.b32.xlu1 %v10545_v39, %s9684_s6  ;;  %v2135_v17 = vadd.f32 %v2134_v14, %v2133_v21  ;;  %14831 = vst [vmem:[#allocation105_spill] sm:$0xff] %v10652_v3  ;;  %v2138_v21 = vsel %vm1911_vm3, %v10637_v38, 0.0 }
 0x1ff   :  { %v9354_v40 = vpop.eup %9353  ;;  %2505 = vrot.lane.b32.xlu0 %v10629_v43, %s9684_s6  ;;  %v2136_v63 = vsel %vm1911_vm3, %v10632_v19, 0.0  ;;  %v10668_v56 = vpop.xlane.xlu1 %1535 }
 0x200   :  { %v9356_v28 = vpop.eup %9355  ;;  %v2137_v33 = vadd.f32 %v2136_v63, %v2135_v17  ;;  %v10660_v14 = vmul.f32 %v9354_v40, %v10547_v34  ;;  %14833 = vst [vmem:[#allocation107_spill] sm:$0xff] %v10668_v56  ;;  %v2109_v17 = vrot.slane %v2108_v60, 2  ;;  %v10670_v63 = vpop.xlane.xlu0 %1577  ;;  %v10674_v40 = vmul.f32 %v10390_v50, %v10390_v50 }
 0x201   :  { %v10655_v53 = vmul.f32 %v9356_v28, %v10288_v45  ;;  %14834 = vst [vmem:[#allocation108_spill] sm:$0xff] %v10670_v63  ;;  %v10682_v45 = vmul.f32 %v10412_v11, %v10412_v11 }
 0x202   :  { %14832 = vst [vmem:[#allocation106_spill] sm:$0xff] %v10660_v14  ;;  %1332 = vrot.lane.b32.xlu1 %v10566_v29, %s9684_s6  ;;  %v2139_v43 = vadd.f32 %v2138_v21, %v2137_v33  ;;  %14835 = vst [vmem:[#allocation109_spill] sm:$0xff] %v10674_v40  ;;  %v2142_v28 = vsel %vm1911_vm3, %v10660_v14, 0.0  ;;  %v2110_v21 = vadd.f32 %v2109_v17, %v2108_v60 }
 0x203   :  { %2507 = vrot.lane.b32.xlu0 %v10652_v3, %s9684_s6  ;;  %v2140_v22 = vsel %vm1911_vm3, %v10655_v53, 0.0  ;;  %14836 = vst [vmem:[#allocation110_spill] sm:$0xff] %v10682_v45 }
 0x204   :  { %v2141_v36 = vadd.f32 %v2140_v22, %v2139_v43  ;;  %v10684_v43 = vpop.xlane.xlu1 %1537  ;;  %v10686_v34 = vpop.xlane.xlu0 %1579  ;;  %v2111_v50 = vrot.slane %v2110_v21, 1 }
 0x205   :  { %14837 = vst [vmem:[#allocation111_spill] sm:$0xff] %v10684_v43  ;;  %14838 = vst [vmem:[#allocation112_spill] sm:$0xff] %v10686_v34 }
 0x206   :  { %v2143_v33 = vadd.f32 %v2142_v28, %v2141_v36  ;;  %v2112_v17 = vadd.f32 %v2111_v50, %v2110_v21 }
 0x207   :  { %2509 = vrot.lane.b32.xlu0 %v10674_v40, %s9684_s6 }
 0x208   :  { %v2144_v3 = vrot.slane %v2143_v33, 4  ;;  %v10692_v60 = vpop.xlane.xlu1 %1539  ;;  %v10694_v11 = vpop.xlane.xlu0 %1581 }
 0x209   :  { %14839 = vst [vmem:[#allocation113_spill] sm:$0xff] %v10692_v60  ;;  %14840 = vst [vmem:[#allocation114_spill] sm:$0xff] %v10694_v11 }
 0x20a   :  { %v2145_v22 = vadd.f32 %v2144_v3, %v2143_v33  ;;  %v10698_v3 = vmul.f32 %v10443_v58, %v10443_v58  ;;  %v10717_v58 = vmul.f32 %v10463_v26, %v10463_v26  ;;  %v120_v26 = vld [vmem:[%s14730_s25 + $0xf8] sm:$0xff] }
 0x20b   :  { %2511 = vrot.lane.b32.xlu0 %v10682_v45, %s9684_s6  ;;  %v2150_v45 = vmul.f32 %v2112_v17, %v2112_v17 }
 0x20c   :  { %v2146_v47 = vrot.slane %v2145_v22, 2  ;;  %14841 = vst [vmem:[#allocation115_spill] sm:$0xff] %v10698_v3  ;;  %v10706_v40 = vpop.xlane.xlu1 %1541  ;;  %v10711_v50 = vpop.xlane.xlu0 %1551  ;;  %14846 = vst [vmem:[#allocation120_spill] sm:$0xff] %v10717_v58 }
 0x20d   :  { %14843 = vst [vmem:[#allocation117_spill] sm:$0xff] %v10706_v40  ;;  %14845 = vst [vmem:[#allocation119_spill] sm:$0xff] %v10711_v50 }
 0x20e   :  { %v2147_v36 = vadd.f32 %v2146_v47, %v2145_v22  ;;  %v10704_v22 = vmul.f32 %v10440_v13, %v10440_v13 }
 0x20f   :  { %1330 = vrot.lane.b32.xlu0 %v10569_v18, %s9684_s6  ;;  %v10928_v18 = vmul.f32 %v10592_v23, %v10592_v23 }
 0x210   :  { %v2148_v28 = vrot.slane %v2147_v36, 1  ;;  %14842 = vst [vmem:[#allocation116_spill] sm:$0xff] %v10704_v22  ;;  %v10723_v13 = vpop.xlane.xlu0 %1583 }
 0x211   :  { %14848 = vst [vmem:[#allocation122_spill] sm:$0xff] %v10723_v13  ;;  %14882 = vst [vmem:[#allocation154_spill] sm:$0xff] %v10928_v18  ;;  %v14899_v13 = vmov 0.0|0.0  }
 0x212   :  { %v2149_v33 = vadd.f32 %v2148_v28, %v2147_v36  ;;  %v10721_v36 = vpop.xlane.xlu1 %1543 }
 0x213   :  { %2515 = vrot.lane.b32.xlu0 %v10698_v3, %s9684_s6  ;;  %14847 = vst [vmem:[#allocation121_spill] sm:$0xff] %v10721_v36 }
 0x214   :  { %v2151_v47 = vmul.f32 %v2149_v33, %v2149_v33  ;;  %v10733_v28 = vpop.xlane.xlu0 %1585  ;;  %v10742_v33 = vmul.f32 %v10487_v51, %v10487_v51 }
 0x215   :  { %14851 = vst [vmem:[#allocation125_spill] sm:$0xff] %v10733_v28  ;;  %v14478_v28 = vmov 0.0|0.0  }
 0x216   :  { %v10709_v21 = vsel %vm14538_vm4, %v2151_v47, %v2150_v45  ;;  %v10727_v45 = vmul.f32 %v10467_v57, %v10467_v57  ;;  %v10731_v17 = vpop.xlane.xlu1 %1545  ;;  %14852 = vst [vmem:[#allocation126_spill] sm:$0xff] %v10742_v33 }
 0x217   :  { %14844 = vst [vmem:[#allocation118_spill] sm:$0xff] %v10709_v21  ;;  %2517 = vrot.lane.b32.xlu0 %v10704_v22, %s9684_s6  ;;  %14850 = vst [vmem:[#allocation124_spill] sm:$0xff] %v10731_v17  ;;  %v10754_v21 = vmul.f32 %v10521_v37, %v10521_v37  ;;  %v10770_v22 = vmul.f32 %v10545_v39, %v10545_v39 }
 0x218   :  { %14849 = vst [vmem:[#allocation123_spill] sm:$0xff] %v10727_v45  ;;  %v10748_v47 = vpop.xlane.xlu0 %1555 }
 0x219   :  { %14854 = vst [vmem:[#allocation128_spill] sm:$0xff] %v10748_v47  ;;  %14855 = vst [vmem:[#allocation129_spill] sm:$0xff] %v10754_v21 }
 0x21a   :  { %v10746_v57 = vpop.xlane.xlu1 %1547  ;;  %14860 = vst [vmem:[#allocation134_spill] sm:$0xff] %v10770_v22 }
 0x21b   :  { %2519 = vrot.lane.b32.xlu0 %v10717_v58, %s9684_s6  ;;  %14853 = vst [vmem:[#allocation127_spill] sm:$0xff] %v10746_v57 }
 0x21c   :  { %v10758_v58 = vpop.xlane.xlu0 %1587 }
 0x21d   :  { %14857 = vst [vmem:[#allocation131_spill] sm:$0xff] %v10758_v58 }
 0x21f   :  { %2521 = vrot.lane.b32.xlu0 %v10727_v45, %s9684_s6  ;;  %v10756_v45 = vpop.xlane.xlu1 %1549 }
 0x220   :  { %14856 = vst [vmem:[#allocation130_spill] sm:$0xff] %v10756_v45 }
 0x223   :  { %1334 = vrot.lane.b32.xlu0 %v10592_v23, %s9684_s6  ;;  %v10764_v51 = vpop.xlane.xlu1 %1553 }
 0x224   :  { %14858 = vst [vmem:[#allocation132_spill] sm:$0xff] %v10764_v51 }
 0x226   :  { %1589 = vadd.xlane.f32.xlu1 %v120_v26  ;;  %v10766_v26 = vpop.xlane.xlu0 %1557 }
 0x227   :  { %2525 = vrot.lane.b32.xlu0 %v10742_v33, %s9684_s6  ;;  %14859 = vst [vmem:[#allocation133_spill] sm:$0xff] %v10766_v26  ;;  %v10786_v33 = vmul.f32 %v10566_v29, %v10566_v29 }
 0x229   :  { %14864 = vst [vmem:[#allocation138_spill] sm:$0xff] %v10786_v33 }
 0x22b   :  { %1338 = vrot.lane.b32.xlu0 %v10613_v46, %s9684_s6  ;;  %v10961_v46 = vmul.f32 %v10632_v19, %v10632_v19 }
 0x22d   :  { %14885 = vst [vmem:[#allocation157_spill] sm:$0xff] %v10961_v46 }
 0x22f   :  { %2529 = vrot.lane.b32.xlu0 %v10754_v21, %s9684_s6  ;;  %v10780_v21 = vmul.f32 %v10415_v31, %v10415_v31 }
 0x231   :  { %14862 = vst [vmem:[#allocation136_spill] sm:$0xff] %v10780_v21 }
 0x233   :  { %1342 = vrot.lane.b32.xlu0 %v10632_v19, %s9684_s6 }
 0x237   :  { %2533 = vrot.lane.b32.xlu0 %v10770_v22, %s9684_s6  ;;  %1336 = vrot.lane.b32.xlu1 %v10595_v12, %s9684_s6 }
 0x238   :  { %v10776_v37 = vpop.permute.xlu1 %1094 }
 0x239   :  { %14861 = vst [vmem:[#allocation135_spill] sm:$0xff] %v10776_v37  ;;  %v10782_v3 = vpop.permute.xlu0 %1092 }
 0x23a   :  { %14863 = vst [vmem:[#allocation137_spill] sm:$0xff] %v10782_v3  ;;  %v10796_v22 = vpack.c.bf16 %v10776_v37, %v10782_v3  ;;  %8006 = vmatprep.mubr.msk.f32.mxu0 %vm1124_vm5, %v10782_v3 }
 0x23b   :  { %2537 = vrot.lane.b32.xlu0 %v10786_v33, %s9684_s6  ;;  %2513 = vrot.lane.b32.xlu1 %v10780_v21, %s9684_s6 }
 0x23c   :  { %8728 = vmatprep.subr.msk.bf16.mxu0 %vm10790_vm6, %v10796_v22  ;;  %v10807_v31 = vpop.permute.xlu1 %2491 }
 0x23d   :  { %8731 = vmatpush3.bf16.xpose.msk.msra.mxu0 %vm10790_vm6, %v10796_v22  ;;  %v10812_v29 = vpop.permute.xlu0 %2493 }
 0x23e   :  { %14867 = vst [vmem:[#allocation139_spill] sm:$0xff] %v10812_v29  ;;  %v10973_v29 = vmul.f32 %v10655_v53, %v10655_v53 }
 0x23f   :  { %2541 = vrot.lane.b32.xlu0 %v10816_v41, %s9684_s6  ;;  %1340 = vrot.lane.b32.xlu1 %v10618_v42, %s9684_s6 }
 0x240   :  { %v10822_v33 = vpop.permute.xlu1 %1098  ;;  %14887 = vst [vmem:[#allocation159_spill] sm:$0xff] %v10973_v29 }
 0x241   :  { %14869 = vst [vmem:[#allocation141_spill] sm:$0xff] %v10822_v33  ;;  %v10824_v21 = vpop.permute.xlu0 %1096 }
 0x242   :  { %14870 = vst [vmem:[#allocation142_spill] sm:$0xff] %v10824_v21  ;;  %v10836_v12 = vpack.c.bf16 %v10822_v33, %v10824_v21 }
 0x243   :  { %2545 = vrot.lane.b32.xlu0 %v10828_v35, %s9684_s6  ;;  %2523 = vrot.lane.b32.xlu1 %v10832_v30, %s9684_s6  ;;  %v10862_v30 = vmul.f32 %v10637_v38, %v10637_v38 }
 0x244   :  { %8734 = vmatprep.subr.msk.bf16.mxu0 %vm10790_vm6, %v10836_v12  ;;  %v10845_v42 = vpop.permute.xlu1 %2495 }
 0x245   :  { %14873 = vst [vmem:[#allocation145_spill] sm:$0xff] %v10845_v42  ;;  %v10847_v41 = vpop.permute.xlu0 %2497  ;;  %8737 = vmatpush3.bf16.xpose.msk.msra.mxu0 %vm10790_vm6, %v10836_v12  ;;  %14876 = vst [vmem:[#allocation148_spill] sm:$0xff] %v10862_v30 }
 0x247   :  { %1346 = vrot.lane.b32.xlu0 %v10655_v53, %s9684_s6  ;;  %1344 = vrot.lane.b32.xlu1 %v10637_v38, %s9684_s6 }
 0x248   :  { %v10856_v55 = vpop.permute.xlu1 %1102 }
 0x249   :  { %14874 = vst [vmem:[#allocation146_spill] sm:$0xff] %v10856_v55  ;;  %v10858_v35 = vpop.permute.xlu0 %1100 }
 0x24a   :  { %14875 = vst [vmem:[#allocation147_spill] sm:$0xff] %v10858_v35  ;;  %v10870_v15 = vpack.c.bf16 %v10856_v55, %v10858_v35 }
 0x24b   :  { %2549 = vrot.lane.b32.xlu0 %v10862_v30, %s9684_s6  ;;  %2527 = vrot.lane.b32.xlu1 %v10866_v25, %s9684_s6  ;;  %v10894_v25 = vmul.f32 %v10540_v52, %v10540_v52 }
 0x24c   :  { %8740 = vmatprep.subr.msk.bf16.mxu0 %vm10790_vm6, %v10870_v15  ;;  %v10879_v38 = vpop.permute.xlu1 %2501 }
 0x24d   :  { %v10881_v10 = vpop.permute.xlu0 %1104  ;;  %8743 = vmatpush3.bf16.xpose.msk.msra.mxu0 %vm10790_vm6, %v10870_v15  ;;  %14880 = vst [vmem:[#allocation152_spill] sm:$0xff] %v10894_v25 }
 0x24e   :  { %14878 = vst [vmem:[#allocation150_spill] sm:$0xff] %v10881_v10 }
 0x24f   :  { %1348 = vrot.lane.b32.xlu1 %v10660_v14, %s9684_s6 }
 0x250   :  { %v10888_v4 = vpop.permute.xlu1 %2499 }
 0x251   :  { %14879 = vst [vmem:[#allocation151_spill] sm:$0xff] %v10888_v4  ;;  %v10890_v30 = vpop.permute.xlu0 %1108 }
 0x253   :  { %2531 = vrot.lane.b32.xlu1 %v10894_v25, %s9684_s6 }
 0x254   :  { %v10898_v5 = vpop.permute.xlu1 %1106 }
 0x255   :  { %v10902_v0 = vpack.c.bf16 %v10898_v5, %v10881_v10  ;;  %v10904_v59 = vpop.permute.xlu0 %1112 }
 0x257   :  { %2535 = vrot.lane.b32.xlu1 %v10908_v54, %s9684_s6  ;;  %8746 = vmatprep.subr.msk.bf16.mxu0 %vm10790_vm6, %v10902_v0 }
 0x258   :  { %8749 = vmatpush3.bf16.xpose.msk.msra.mxu0 %vm10790_vm6, %v10902_v0  ;;  %v10918_v52 = vpop.permute.xlu1 %1110 }
 0x259   :  { %v10922_v25 = vpack.c.bf16 %v10918_v52, %v10890_v30  ;;  %v10924_v49 = vpop.permute.xlu0 %1116 }
 0x25b   :  { %2539 = vrot.lane.b32.xlu1 %v10928_v18, %s9684_s6  ;;  %8752 = vmatprep.subr.msk.bf16.mxu0 %vm10790_vm6, %v10922_v25 }
 0x25c   :  { %v10935_v54 = vpop.permute.xlu1 %1114 }
 0x25d   :  { %v10937_v3 = vpop.permute.xlu0 %1120  ;;  %v10945_v4 = vpack.c.bf16 %v10935_v54, %v10904_v59 }
 0x25f   :  { %2543 = vrot.lane.b32.xlu1 %v10941_v20, %s9684_s6 }
 0x260   :  { %8755 = vmatpush3.bf16.xpose.msk.msra.mxu0 %vm10790_vm6, %v10922_v25  ;;  %v10952_v23 = vpop.permute.xlu1 %1118 }
 0x261   :  { %v10954_v18 = vpop.permute.xlu0 %1318  ;;  %8758 = vmatprep.subr.msk.bf16.mxu0 %vm10790_vm6, %v10945_v4  ;;  %v10977_v14 = vpack.c.bf16 %v10952_v23, %v10924_v49 }
 0x262   :  { %14884 = vst [vmem:[#allocation156_spill] sm:$0xff] %v10954_v18  ;;  %8062 = vmatprep.mubr.msk.f32.mxu1 %vm1124_vm5, %v10954_v18 }
 0x263   :  { %2547 = vrot.lane.b32.xlu1 %v10961_v46, %s9684_s6 }
 0x264   :  { %v10967_v20 = vpop.permute.xlu1 %1122 }
 0x265   :  { %v10969_v42 = vpop.permute.xlu0 %1322 }
 0x266   :  { %14886 = vst [vmem:[#allocation158_spill] sm:$0xff] %v10969_v42 }
 0x267   :  { %2551 = vrot.lane.b32.xlu1 %v10973_v29, %s9684_s6 }
 0x268   :  { %8761 = vmatpush3.bf16.xpose.msk.msra.mxu0 %vm10790_vm6, %v10945_v4  ;;  %v10984_v19 = vpop.permute.xlu1 %1320 }
 0x269   :  { %14888 = vst [vmem:[#allocation160_spill] sm:$0xff] %v10984_v19  ;;  %v10988_v46 = vpack.c.bf16 %v10984_v19, %v10954_v18  ;;  %v10990_v26 = vpop.permute.xlu0 %1326  ;;  %8764 = vmatprep.subr.msk.bf16.mxu0 %vm10790_vm6, %v10977_v14  ;;  %v11011_v19 = vpack.c.bf16 %v10967_v20, %v10937_v3 }
 0x26a   :  { %14890 = vst [vmem:[#allocation162_spill] sm:$0xff] %v10990_v26 }
 0x26b   :  { %14889 = vst [vmem:[#allocation161_spill] sm:$0xff] %v10988_v46  ;;  %8776 = vmatprep.subr.msk.bf16.mxu1 %vm10790_vm6, %v10988_v46 }
 0x26c   :  { %8779 = vmatpush3.bf16.xpose.msk.msra.mxu1 %vm10790_vm6, %v10988_v46  ;;  %v11001_v53 = vpop.permute.xlu1 %1324 }
 0x26d   :  { %14891 = vst [vmem:[#allocation163_spill] sm:$0xff] %v11001_v53  ;;  %v11005_v29 = vpack.c.bf16 %v11001_v53, %v10969_v42  ;;  %v11007_v18 = vpop.permute.xlu0 %2503  ;;  %v1879_v42 = vlaneseq }
 0x26e   :  { %14893 = vst [vmem:[#allocation165_spill] sm:$0xff] %v11007_v18 }
 0x26f   :  { %14892 = vst [vmem:[#allocation164_spill] sm:$0xff] %v11005_v29  ;;  %8782 = vmatprep.subr.msk.bf16.mxu1 %vm10790_vm6, %v11005_v29 }
 0x270   :  { %8767 = vmatpush3.bf16.xpose.msk.msra.mxu0 %vm10790_vm6, %v10977_v14  ;;  %v11019_v46 = vpop.permute.xlu1 %1328 }
 0x271   :  { %14894 = vst [vmem:[#allocation166_spill] sm:$0xff] %v11019_v46  ;;  %v11021_v58 = vpop.permute.xlu0 %2505  ;;  %8770 = vmatprep.subr.msk.bf16.mxu0 %vm10790_vm6, %v11011_v19  ;;  %v11028_v18 = vpack.c.bf16 %v11019_v46, %v10990_v26  ;;  %v11044_v46 = vand.u32 127, %v1879_v42 }
 0x273   :  { %14896 = vst [vmem:[#allocation168_spill] sm:$0xff] %v11044_v46  ;;  %v1885_v26 = vadd.s32 4294967288, %v11044_v46 }
 0x274   :  { %8785 = vmatpush3.bf16.xpose.msk.msra.mxu1 %vm10790_vm6, %v11005_v29  ;;  %v11053_v29 = vshrl.u32 %v1879_v42, 7  ;;  %v1892_v42 = vadd.s32 4294967280, %v11044_v46 }
 0x275   :  { %v11033_v53 = vpop.permute.xlu0 %2507  ;;  %8788 = vmatprep.subr.msk.bf16.mxu1 %vm10790_vm6, %v11028_v18 }
 0x276   :  { %14895 = vst [vmem:[#allocation167_spill] sm:$0xff] %v11033_v53  ;;  %14898 = vst [vmem:[#allocation170_spill] sm:$0xff] %v11053_v29 }
 0x278   :  { %8773 = vmatpush3.bf16.xpose.msk.msra.mxu0 %vm10790_vm6, %v11011_v19 }
 0x279   :  { %v11041_v47 = vpop.permute.xlu0 %2509  ;;  %8822 = vmatprep.subr.bf16.mxu0 %v14478_v28  ;;  %v11059_v28 = vpop.permute.xlu1 %1332 }
 0x27c   :  { %8791 = vmatpush3.bf16.xpose.msk.msra.mxu1 %vm10790_vm6, %v11028_v18 }
 0x27d   :  { %v11049_v53 = vpop.permute.xlu0 %2511 }
 0x27e   :  { %14897 = vst [vmem:[#allocation169_spill] sm:$0xff] %v11049_v53 }
 0x27f   :  { %8007 = vmatmul.mubr.msk.f32.vlgmr.msra.gmra.mrb[32].mxu0 %vm1124_vm5, %v10776_v37 }
 0x280   :  { %8009 = vmatprep.mubr.msk.f32.mxu0 %vm1124_vm5, %v10824_v21  ;;  %8824 = vmatpush3.bf16.msra.mxu0 %v10796_v22  ;;  %v11073_v21 = vsub.s32 %v11044_v46, %v11053_v29  ;;  %v11076_v22 = vsub.s32 %v1885_v26, %v11053_v29  ;;  %v11092_v26 = vsub.s32 %v1892_v42, %v11053_v29 }
 0x281   :  { %v11061_v51 = vpop.permute.xlu0 %1330  ;;  %8825 = vmatprep.subr.bf16.mxu0 %v14899_v13 }
 0x282   :  { %v11066_v53 = vpack.c.bf16 %v11059_v28, %v11061_v51  ;;  %14901 = vst [vmem:[#allocation172_spill] sm:$0xff] %v11073_v21  ;;  %14902 = vst [vmem:[#allocation173_spill] sm:$0xff] %v11076_v22  ;;  %v3167_v42 = vrot.slane %v10343_v6, %v11073_v21  ;;  %v1913_v6 = vadd.s32 4294967256, %v11044_v46 }
 0x283   :  { %8010 = vmatmul.mubr.msk.f32.gmra.mrb[34].mxu0 %vm1124_vm5, %v10822_v33  ;;  %v1899_v33 = vadd.s32 4294967272, %v11044_v46  ;;  %14904 = vst [vmem:[#allocation175_spill] sm:$0xff] %v11092_v26 }
 0x284   :  { %14900 = vst [vmem:[#allocation171_spill] sm:$0xff] %v11066_v53  ;;  %8012 = vmatprep.mubr.msk.f32.mxu0 %vm1124_vm5, %v10858_v35  ;;  %8794 = vmatprep.subr.msk.bf16.mxu1 %vm10790_vm6, %v11066_v53  ;;  %v3088_v35 = vrot.slane %v10314_v48, %v11073_v21 }
 0x285   :  { %8827 = vmatpush3.bf16.msra.mxu0 %v10836_v12  ;;  %v11084_v37 = vpop.permute.xlu0 %2515  ;;  %8797 = vmatpush3.bf16.xpose.msk.msra.mxu1 %vm10790_vm6, %v11066_v53  ;;  %v3092_v12 = vrot.slane %v10571_v27, %v11076_v22  ;;  %v11111_v48 = vsub.s32 %v1899_v33, %v11053_v29  ;;  %v2587_v27 = vsel %vm1124_vm5, %v10807_v31, 0.0  ;;  %v3176_v33 = vrot.slane %v10420_v24, %v11092_v26 }
 0x286   :  { %14903 = vst [vmem:[#allocation174_spill] sm:$0xff] %v11084_v37  ;;  %8828 = vmatprep.subr.bf16.mxu0 %v14899_v13  ;;  %v1906_v37 = vadd.s32 4294967264, %v11044_v46 }
 0x287   :  { %8013 = vmatmul.mubr.msk.f32.gmra.mrb[36].mxu0 %vm1124_vm5, %v10856_v55  ;;  %v3171_v55 = vrot.slane %v10381_v1, %v11076_v22  ;;  %14905 = vst [vmem:[#allocation176_spill] sm:$0xff] %v11111_v48 }
 0x288   :  { %8015 = vmatprep.mubr.msk.f32.mxu0 %vm1124_vm5, %v10881_v10  ;;  %v3097_v10 = vrot.slane %v10604_v9, %v11092_v26  ;;  %v11127_v31 = vsub.s32 %v1906_v37, %v11053_v29  ;;  %v1920_v37 = vadd.s32 4294967248, %v11044_v46 }
 0x289   :  { %8830 = vmatpush3.bf16.msra.mxu0 %v10870_v15  ;;  %v11104_v53 = vpop.permute.xlu0 %2517  ;;  %v3093_v15 = vsel %vm1890_vm7, %v3092_v12, %v3088_v35  ;;  %v3172_v1 = vsel %vm1890_vm7, %v3171_v55, %v3167_v42  ;;  %v3102_v35 = vrot.slane %v10639_v2, %v11111_v48  ;;  %v2596_v12 = vsel %vm1124_vm5, %v10847_v41, 0.0  ;;  %v14969_v2 = vld [vmem:[#allocation156_spill] sm:$0xff] }
 0x28a   :  { %8831 = vmatprep.subr.bf16.mxu0 %v14899_v13  ;;  %14906 = vst [vmem:[#allocation177_spill] sm:$0xff] %v11127_v31  ;;  %v3098_v24 = vsel %vm1897_vm8, %v3097_v10, %v3093_v15  ;;  %v11145_v55 = vsub.s32 %v1913_v6, %v11053_v29  ;;  %v3177_v41 = vsel %vm1897_vm8, %v3176_v33, %v3172_v1  ;;  %v1927_v15 = vadd.s32 4294967240, %v11044_v46 }
 0x28b   :  { %2588 = vadd.xlane.f32.xlu1 %v2587_v27  ;;  %8016 = vmatmul.mubr.msk.f32.gmra.mrb[38].mxu0 %vm1124_vm5, %v10898_v5  ;;  %v3107_v10 = vrot.slane %v10668_v56, %v11127_v31  ;;  %v3103_v42 = vsel %vm14565_vm9, %v3102_v35, %v3098_v24  ;;  %v3186_v6 = vrot.slane %v10502_v8, %v11127_v31  ;;  %v1934_v33 = vadd.s32 4294967232, %v11044_v46 }
 0x28c   :  { %8018 = vmatprep.mubr.msk.f32.mxu0 %vm1124_vm5, %v10890_v30  ;;  %14907 = vst [vmem:[#allocation178_spill] sm:$0xff] %v11145_v55  ;;  %v3112_v24 = vrot.slane %v10684_v43, %v11145_v55  ;;  %v3191_v35 = vrot.slane %v10536_v32, %v11145_v55 }
 0x28d   :  { %8833 = vmatpush3.bf16.msra.mxu0 %v10902_v0  ;;  %v11130_v27 = vpop.permute.xlu0 %2519  ;;  %v3181_v0 = vrot.slane %v10460_v7, %v11111_v48  ;;  %v11161_v7 = vsub.s32 %v1920_v37, %v11053_v29  ;;  %v11178_v37 = vsub.s32 %v1927_v15, %v11053_v29  ;;  %v11195_v15 = vsub.s32 %v1934_v33, %v11053_v29 }
 0x28e   :  { %8834 = vmatprep.subr.bf16.mxu0 %v14899_v13  ;;  %v1948_v33 = vadd.s32 4294967216, %v11044_v46 }
 0x28f   :  { %2597 = vadd.xlane.f32.xlu1 %v2596_v12  ;;  %8019 = vmatmul.mubr.msk.f32.gmra.mrb[40].mxu0 %vm1124_vm5, %v10918_v52  ;;  %v2602_v12 = vsel %vm1124_vm5, %v10879_v38, 0.0  ;;  %14908 = vst [vmem:[#allocation179_spill] sm:$0xff] %v11161_v7  ;;  %v3108_v38 = vsel %vm1911_vm3, %v3107_v10, %v3103_v42  ;;  %14909 = vst [vmem:[#allocation180_spill] sm:$0xff] %v11178_v37  ;;  %v3117_v10 = vrot.slane %v10692_v60, %v11161_v7  ;;  %v14932_v60 = vld [vmem:[#allocation161_spill] sm:$0xff] }
 0x290   :  { %8021 = vmatprep.mubr.msk.f32.mxu0 %vm1124_vm5, %v10904_v59  ;;  %v1941_v42 = vadd.s32 4294967224, %v11044_v46  ;;  %14910 = vst [vmem:[#allocation181_spill] sm:$0xff] %v11195_v15 }
 0x291   :  { %8836 = vmatpush3.bf16.msra.mxu0 %v10922_v25  ;;  %v11163_v1 = vpop.permute.xlu0 %2521  ;;  %v3182_v25 = vsel %vm14565_vm9, %v3181_v0, %v3177_v41  ;;  %v2608_v0 = vsel %vm1124_vm5, %v11021_v58, 0.0  ;;  %v3196_v58 = vrot.slane %v10576_v61, %v11161_v7 }
 0x292   :  { %8837 = vmatprep.subr.bf16.mxu0 %v14899_v13  ;;  %v3187_v41 = vsel %vm1911_vm3, %v3186_v6, %v3182_v25  ;;  %v3122_v25 = vrot.slane %v10706_v40, %v11178_v37  ;;  %v14931_v40 = vld [vmem:[#allocation158_spill] sm:$0xff] }
 0x293   :  { %2603 = vadd.xlane.f32.xlu1 %v2602_v12  ;;  %8022 = vmatmul.mubr.msk.f32.gmra.mrb[42].mxu0 %vm1124_vm5, %v10935_v54  ;;  %v3192_v6 = vsel %vm1918_vm10, %v3191_v35, %v3187_v41  ;;  %v11213_v35 = vsub.s32 %v1941_v42, %v11053_v29  ;;  %v11225_v42 = vsub.s32 %v1948_v33, %v11053_v29 }
 0x294   :  { %8024 = vmatprep.mubr.msk.f32.mxu0 %vm1124_vm5, %v10924_v49 }
 0x295   :  { %8839 = vmatpush3.bf16.msra.mxu0 %v10945_v4  ;;  %v3113_v4 = vsel %vm1918_vm10, %v3112_v24, %v3108_v38  ;;  %v11197_v12 = vpop.permute.xlu0 %1334  ;;  %v2614_v24 = vsel %vm1124_vm5, %v11041_v47, 0.0  ;;  %14911 = vst [vmem:[#allocation182_spill] sm:$0xff] %v11213_v35  ;;  %v3127_v47 = vrot.slane %v10721_v36, %v11195_v15  ;;  %14912 = vst [vmem:[#allocation183_spill] sm:$0xff] %v11225_v42  ;;  %v14930_v36 = vld [vmem:[#allocation160_spill] sm:$0xff] }
 0x296   :  { %8840 = vmatprep.subr.bf16.mxu0 %v14899_v13  ;;  %v3118_v38 = vsel %vm1925_vm11, %v3117_v10, %v3113_v4  ;;  %v1955_v10 = vadd.s32 4294967208, %v11044_v46  ;;  %v3206_v4 = vrot.slane %v10643_v16, %v11195_v15 }
 0x297   :  { %2609 = vadd.xlane.f32.xlu1 %v2608_v0  ;;  %8025 = vmatmul.mubr.msk.f32.gmra.mrb[44].mxu0 %vm1124_vm5, %v10952_v23  ;;  %v3197_v0 = vsel %vm1925_vm11, %v3196_v58, %v3192_v6  ;;  %v3123_v41 = vsel %vm14599_vm12, %v3122_v25, %v3118_v38  ;;  %v1962_v25 = vadd.s32 4294967200, %v11044_v46  ;;  %v3211_v38 = vrot.slane %v10670_v63, %v11213_v35 }
 0x298   :  { %8027 = vmatprep.mubr.msk.f32.mxu0 %vm1124_vm5, %v10937_v3  ;;  %v3128_v6 = vsel %vm14598_vm13, %v3127_v47, %v3123_v41  ;;  %v11237_v16 = vsub.s32 %v1955_v10, %v11053_v29  ;;  %v3216_v47 = vrot.slane %v10686_v34, %v11225_v42 }
 0x299   :  { %8842 = vmatpush3.bf16.msra.mxu0 %v10977_v14  ;;  %v3201_v14 = vrot.slane %v10606_v62, %v11178_v37  ;;  %v3137_v62 = vrot.slane %v10746_v57, %v11225_v42  ;;  %v11247_v41 = vsub.s32 %v1962_v25, %v11053_v29 }
 0x29a   :  { %8843 = vmatprep.subr.bf16.mxu0 %v14899_v13  ;;  %14913 = vst [vmem:[#allocation184_spill] sm:$0xff] %v11237_v16 }
 0x29b   :  { %2615 = vadd.xlane.f32.xlu1 %v2614_v24  ;;  %8028 = vmatmul.mubr.msk.f32.gmra.mrb[46].mxu0 %vm1124_vm5, %v10967_v20  ;;  %v11227_v24 = vpop.permute.xlu0 %2525  ;;  %v3202_v58 = vsel %vm14599_vm12, %v3201_v14, %v3197_v0  ;;  %v1969_v0 = vadd.s32 4294967192, %v11044_v46  ;;  %14914 = vst [vmem:[#allocation185_spill] sm:$0xff] %v11247_v41  ;;  %v3147_v61 = vrot.slane %v10711_v50, %v11247_v41 }
 0x29c   :  { %v3207_v33 = vsel %vm14598_vm13, %v3206_v4, %v3202_v58  ;;  %v3142_v4 = vrot.slane %v10756_v45, %v11237_v16 }
 0x29d   :  { %8845 = vmatpush3.bf16.msra.mxu0 %v11011_v19  ;;  %v3132_v19 = vrot.slane %v10731_v17, %v11213_v35  ;;  %v3212_v10 = vsel %vm14597_vm14, %v3211_v38, %v3207_v33  ;;  %v11259_v34 = vsub.s32 %v1969_v0, %v11053_v29  ;;  %v1983_v33 = vadd.s32 4294967176, %v11044_v46 }
 0x29e   :  { %8871 = vmatprep.subr.bf16.mxu0 %v10119_v44  ;;  %v3217_v25 = vsel %vm14509_vm15, %v3216_v47, %v3212_v10  ;;  %v14918_v47 = vld [vmem:[#allocation132_spill] sm:$0xff] }
 0x29f   :  { %v3133_v14 = vsel %vm14597_vm14, %v3132_v19, %v3128_v6  ;;  %v11249_v63 = vpop.permute.xlu0 %1338  ;;  %v1976_v19 = vadd.s32 4294967184, %v11044_v46  ;;  %v3221_v6 = vrot.slane %v10694_v11, %v11237_v16  ;;  %14915 = vst [vmem:[#allocation186_spill] sm:$0xff] %v11259_v34  ;;  %v3152_v10 = vrot.slane %v14918_v47, %v11259_v34 }
 0x2a0   :  { %v3138_v58 = vsel %vm14509_vm15, %v3137_v62, %v3133_v14  ;;  %v14916_v62 = vld [vmem:[#allocation122_spill] sm:$0xff]  ;;  %v11280_v45 = vsub.s32 %v1983_v33, %v11053_v29  ;;  %vm14604_vm15 = vcmask 1048512  }
 0x2a1   :  { %v3143_v38 = vsel %vm14508_vm0, %v3142_v4, %v3138_v58  ;;  %v3226_v14 = vrot.slane %v14916_v62, %v11247_v41  ;;  %v11269_v32 = vsub.s32 %v1976_v19, %v11053_v29  ;;  %v3222_v0 = vsel %vm14508_vm0, %v3221_v6, %v3217_v25  ;;  %v14919_v4 = vld [vmem:[#allocation125_spill] sm:$0xff]  ;;  %v14921_v19 = vld [vmem:[#allocation128_spill] sm:$0xff]  ;;  %v14922_v6 = vld [vmem:[#allocation131_spill] sm:$0xff] }
 0x2a2   :  { %v3148_v50 = vsel %vm14510_vm1, %v3147_v61, %v3143_v38  ;;  %v3231_v58 = vrot.slane %v14919_v4, %v11259_v34  ;;  %14920 = vst [vmem:[#allocation188_spill] sm:$0xff] %v11280_v45  ;;  %vm14605_vm0 = vcmask 982912   ;;  %v14923_v38 = vld [vmem:[#allocation133_spill] sm:$0xff] }
 0x2a3   :  { %14917 = vst [vmem:[#allocation187_spill] sm:$0xff] %v11269_v32  ;;  %v11271_v11 = vpop.permute.xlu0 %2529  ;;  %v3227_v62 = vsel %vm14510_vm1, %v3226_v14, %v3222_v0  ;;  %v3157_v57 = vrot.slane %v14921_v19, %v11269_v32  ;;  %v3153_v17 = vsel %vm14606_vm2, %v3152_v10, %v3148_v50  ;;  %v3236_v25 = vrot.slane %v14922_v6, %v11269_v32 }
 0x2a4   :  { %v3232_v61 = vsel %vm14606_vm2, %v3231_v58, %v3227_v62  ;;  %v3162_v4 = vrot.slane %v14923_v38, %v11280_v45  ;;  %vm14537_vm1 = vcmask 1041408  }
 0x2a5   :  { %v3158_v14 = vsel %vm14605_vm0, %v3157_v57, %v3153_v17  ;;  %v3237_v50 = vsel %vm14605_vm0, %v3236_v25, %v3232_v61 }
 0x2a6   :  { %v3163_v10 = vsel %vm14604_vm15, %v3162_v4, %v3158_v14  ;;  %v2626_v14 = vsel %vm1124_vm5, %v11104_v53, 0.0 }
 0x2a7   :  { %v11288_v47 = vpop.permute.xlu0 %1342 }
 0x2ab   :  { %v11301_v19 = vpop.permute.xlu0 %2533 }
 0x2af   :  { %v11318_v25 = vpop.permute.xlu0 %2537 }
 0x2b3   :  { %v11293_v33 = vpop.xlane.xlu1 %1589 }
 0x2b4   :  { %14924 = vst [vmem:[#allocation189_spill] sm:$0xff] %v11293_v33  ;;  %v3241_v0 = vrot.slane %v11293_v33, %v11280_v45 }
 0x2b6   :  { %v3242_v6 = vsel %vm14604_vm15, %v3241_v0, %v3237_v50  ;;  %v11331_v0 = vpop.permute.xlu0 %2541 }
 0x2b7   :  { %v11303_v62 = vpop.permute.xlu1 %1336  ;;  %v3243_v58 = vsel %vm14538_vm4, %v3242_v6, %v3163_v10  ;;  %v2632_v10 = vsel %vm1124_vm5, %v11163_v1, 0.0  ;;  %vm14974_vm4 = vcmask 786112  }
 0x2b8   :  { %v11308_v38 = vpack.c.bf16 %v11303_v62, %v11197_v12  ;;  %v3245_v17 = vsel %vm14537_vm1, %v3243_v58, 0.0  ;;  %vm14973_vm1 = vcmask 720512  }
 0x2b9   :  { %3246 = vadd.xlane.f32.xlu0 %v3245_v17 }
 0x2ba   :  { %8800 = vmatprep.subr.msk.bf16.mxu1 %vm10790_vm6, %v11308_v38 }
 0x2bb   :  { %8803 = vmatpush3.bf16.xpose.msk.msra.mxu1 %vm10790_vm6, %v11308_v38  ;;  %v2514_v57 = vpop.permute.xlu1 %2513 }
 0x2bc   :  { %v2620_v4 = vsel %vm1124_vm5, %v2514_v57, 0.0  ;;  %v11345_v57 = vpop.permute.xlu0 %2545 }
 0x2bd   :  { %2621 = vadd.xlane.f32.xlu1 %v2620_v4 }
 0x2bf   :  { %v11320_v6 = vpop.permute.xlu1 %1340 }
 0x2c0   :  { %v11324_v61 = vpack.c.bf16 %v11320_v6, %v11249_v63 }
 0x2c1   :  { %2627 = vadd.xlane.f32.xlu1 %v2626_v14  ;;  %v14926_v14 = vld [vmem:[#allocation106_spill] sm:$0xff] }
 0x2c2   :  { %8806 = vmatprep.subr.msk.bf16.mxu1 %vm10790_vm6, %v11324_v61 }
 0x2c3   :  { %8809 = vmatpush3.bf16.xpose.msk.msra.mxu1 %vm10790_vm6, %v11324_v61  ;;  %v2524_v50 = vpop.permute.xlu1 %2523 }
 0x2c4   :  { %v2635_v17 = vsel %vm1124_vm5, %v2524_v50, 0.0  ;;  %v11358_v50 = vpop.permute.xlu0 %1346 }
 0x2c5   :  { %2633 = vadd.xlane.f32.xlu1 %v2632_v10  ;;  %v11356_v10 = vmul.f32 %v14926_v14, %v14926_v14  ;;  %14928 = vst [vmem:[#allocation191_spill] sm:$0xff] %v11358_v50 }
 0x2c7   :  { %v11338_v58 = vpop.permute.xlu1 %1344  ;;  %14927 = vst [vmem:[#allocation106_spill] sm:$0xff] %v11356_v10 }
 0x2c8   :  { %14925 = vst [vmem:[#allocation190_spill] sm:$0xff] %v11338_v58  ;;  %v11342_v53 = vpack.c.bf16 %v11338_v58, %v11288_v47 }
 0x2c9   :  { %2636 = vadd.xlane.f32.xlu1 %v2635_v17 }
 0x2ca   :  { %8812 = vmatprep.subr.msk.bf16.mxu1 %vm10790_vm6, %v11342_v53 }
 0x2cb   :  { %8815 = vmatpush3.bf16.xpose.msk.msra.mxu1 %vm10790_vm6, %v11342_v53  ;;  %v2528_v1 = vpop.permute.xlu1 %2527 }
 0x2cc   :  { %v2641_v4 = vsel %vm1124_vm5, %v2528_v1, 0.0 }
 0x2cd   :  { %2642 = vadd.xlane.f32.xlu1 %v2641_v4 }
 0x2cf   :  { %2553 = vrot.lane.b32.xlu0 %v11356_v10, %s9684_s6  ;;  %v11362_v17 = vpop.permute.xlu1 %1348 }
 0x2d0   :  { %14929 = vst [vmem:[#allocation192_spill] sm:$0xff] %v11362_v17  ;;  %v8816_v33 = vpack.c.bf16 %v11362_v17, %v11358_v50 }
 0x2d2   :  { %8818 = vmatprep.subr.msk.bf16.mxu1 %vm10790_vm6, %v8816_v33 }
 0x2d3   :  { %8821 = vmatpush3.bf16.xpose.msk.msra.mxu1 %vm10790_vm6, %v8816_v33  ;;  %v2532_v1 = vpop.permute.xlu1 %2531  ;;  %vm14539_vm6 = vmmov 0  }
 0x2d4   :  { %v2647_v14 = vsel %vm1124_vm5, %v2532_v1, 0.0  ;;  %8846 = vmatprep.subr.bf16.mxu1 %v14899_v13  ;;  %v14933_v1 = vld [vmem:[#allocation163_spill] sm:$0xff] }
 0x2d5   :  { %2648 = vadd.xlane.f32.xlu1 %v2647_v14  ;;  %v14934_v14 = vld [vmem:[#allocation162_spill] sm:$0xff] }
 0x2d7   :  { %v2536_v4 = vpop.permute.xlu1 %2535 }
 0x2d8   :  { %v2653_v10 = vsel %vm1124_vm5, %v2536_v4, 0.0 }
 0x2d9   :  { %2654 = vadd.xlane.f32.xlu1 %v2653_v10  ;;  %v14935_v10 = vld [vmem:[#allocation164_spill] sm:$0xff] }
 0x2da   :  { %8063 = vmatmul.mubr.msk.f32.vlgmr.msra.gmra.mrb[32].mxu1 %vm1124_vm5, %v14930_v36 }
 0x2db   :  { %8065 = vmatprep.mubr.msk.f32.mxu1 %vm1124_vm5, %v14931_v40  ;;  %8848 = vmatpush3.bf16.msra.mxu1 %v14932_v60  ;;  %v2540_v39 = vpop.permute.xlu1 %2539  ;;  %v14936_v60 = vld [vmem:[#allocation166_spill] sm:$0xff] }
 0x2dc   :  { %v2659_v8 = vsel %vm1124_vm5, %v2540_v39, 0.0  ;;  %8849 = vmatprep.subr.bf16.mxu1 %v14899_v13 }
 0x2dd   :  { %2660 = vadd.xlane.f32.xlu1 %v2659_v8 }
 0x2de   :  { %8066 = vmatmul.mubr.msk.f32.gmra.mrb[34].mxu1 %vm1124_vm5, %v14933_v1 }
 0x2df   :  { %8068 = vmatprep.mubr.msk.f32.mxu1 %vm1124_vm5, %v14934_v14  ;;  %8851 = vmatpush3.bf16.msra.mxu1 %v14935_v10  ;;  %v2544_v4 = vpop.permute.xlu1 %2543 }
 0x2e0   :  { %v2665_v43 = vsel %vm1124_vm5, %v2544_v4, 0.0  ;;  %8852 = vmatprep.subr.bf16.mxu1 %v14899_v13 }
 0x2e1   :  { %2666 = vadd.xlane.f32.xlu1 %v2665_v43  ;;  %v14937_v43 = vld [vmem:[#allocation171_spill] sm:$0xff] }
 0x2e2   :  { %8069 = vmatmul.mubr.msk.f32.gmra.mrb[36].mxu1 %vm1124_vm5, %v14936_v60 }
 0x2e3   :  { %8071 = vmatprep.mubr.msk.f32.mxu1 %vm1124_vm5, %v11061_v51  ;;  %8854 = vmatpush3.bf16.msra.mxu1 %v11028_v18  ;;  %v2548_v8 = vpop.permute.xlu1 %2547  ;;  %v14938_v18 = vld [vmem:[#allocation139_spill] sm:$0xff] }
 0x2e4   :  { %v2671_v39 = vsel %vm1124_vm5, %v2548_v8, 0.0  ;;  %8855 = vmatprep.subr.bf16.mxu1 %v14899_v13  ;;  %v2590_v8 = vsel %vm1124_vm5, %v14938_v18, 0.0 }
 0x2e5   :  { %2672 = vadd.xlane.f32.xlu1 %v2671_v39  ;;  %v14939_v39 = vld [vmem:[#allocation145_spill] sm:$0xff] }
 0x2e6   :  { %8072 = vmatmul.mubr.msk.f32.gmra.mrb[38].mxu1 %vm1124_vm5, %v11059_v28 }
 0x2e7   :  { %8074 = vmatprep.mubr.msk.f32.mxu1 %vm1124_vm5, %v11197_v12  ;;  %8857 = vmatpush3.bf16.msra.mxu1 %v14937_v43  ;;  %v2552_v10 = vpop.permute.xlu1 %2551  ;;  %v2593_v43 = vsel %vm1124_vm5, %v14939_v39, 0.0 }
 0x2e8   :  { %v2677_v4 = vsel %vm1124_vm5, %v2552_v10, 0.0  ;;  %8858 = vmatprep.subr.bf16.mxu1 %v14899_v13 }
 0x2e9   :  { %2678 = vadd.xlane.f32.xlu1 %v2677_v4  ;;  %v14942_v4 = vld [vmem:[#allocation165_spill] sm:$0xff] }
 0x2ea   :  { %8075 = vmatmul.mubr.msk.f32.gmra.mrb[40].mxu1 %vm1124_vm5, %v11303_v62  ;;  %v2605_v18 = vsel %vm1124_vm5, %v14942_v4, 0.0  ;;  %v2638_v4 = vsel %vm1124_vm5, %v11227_v24, 0.0  ;;  %v14518_v24 = vmov 0.0  }
 0x2eb   :  { %8077 = vmatprep.mubr.msk.f32.mxu1 %vm1124_vm5, %v11249_v63  ;;  %8860 = vmatpush3.bf16.msra.mxu1 %v11308_v38  ;;  %v14940_v38 = vld [vmem:[#allocation151_spill] sm:$0xff] }
 0x2ec   :  { %8861 = vmatprep.subr.bf16.mxu1 %v14899_v13  ;;  %v2599_v10 = vsel %vm1124_vm5, %v14940_v38, 0.0  ;;  %v14945_v38 = vld [vmem:[#allocation174_spill] sm:$0xff]  ;;  %8118 = vmatprep.mubr.msk.f32.mxu0 %vm14539_vm6, %v14518_v24 }
 0x2ee   :  { %2591 = vadd.xlane.f32.xlu0 %v2590_v8  ;;  %8078 = vmatmul.mubr.msk.f32.gmra.mrb[42].mxu1 %vm1124_vm5, %v11320_v6  ;;  %v14943_v8 = vld [vmem:[#allocation167_spill] sm:$0xff] }
 0x2ef   :  { %8080 = vmatprep.mubr.msk.f32.mxu1 %vm1124_vm5, %v11288_v47  ;;  %8863 = vmatpush3.bf16.msra.mxu1 %v11324_v61  ;;  %v14941_v61 = vld [vmem:[#allocation12_spill] sm:$0xff]  ;;  %v2611_v39 = vsel %vm1124_vm5, %v14943_v8, 0.0  ;;  %v2650_v8 = vsel %vm1124_vm5, %v11301_v19, 0.0  ;;  %v2668_v19 = vsel %vm1124_vm5, %v11345_v57, 0.0 }
 0x2f0   :  { %8864 = vmatprep.subr.bf16.mxu1 %v14899_v13 }
 0x2f2   :  { %2594 = vadd.xlane.f32.xlu0 %v2593_v43  ;;  %8081 = vmatmul.mubr.msk.f32.gmra.mrb[44].mxu1 %vm1124_vm5, %v11338_v58 }
 0x2f3   :  { %8083 = vmatprep.mubr.msk.f32.mxu1 %vm1124_vm5, %v11358_v50  ;;  %8866 = vmatpush3.bf16.msra.mxu1 %v11342_v53  ;;  %v14944_v53 = vld [vmem:[#allocation169_spill] sm:$0xff] }
 0x2f4   :  { %8867 = vmatprep.subr.bf16.mxu1 %v14899_v13  ;;  %v2617_v43 = vsel %vm1124_vm5, %v14944_v53, 0.0  ;;  %v14946_v53 = vld [vmem:[#allocation137_spill] sm:$0xff] }
 0x2f6   :  { %2600 = vadd.xlane.f32.xlu0 %v2599_v10  ;;  %8084 = vmatmul.mubr.msk.f32.gmra.mrb[46].mxu1 %vm1124_vm5, %v11362_v17  ;;  %v2623_v10 = vsel %vm1124_vm5, %v14945_v38, 0.0  ;;  %v14949_v38 = vld [vmem:[#allocation141_spill] sm:$0xff] }
 0x2f7   :  { %8869 = vmatpush3.bf16.msra.mxu1 %v8816_v33  ;;  %v2629_v33 = vsel %vm1124_vm5, %v11130_v27, 0.0  ;;  %v2662_v27 = vsel %vm1124_vm5, %v11331_v0, 0.0  ;;  %8153 = vmatprep.mubr.msk.f32.mxu1 %vm14539_vm6, %v14518_v24  ;;  %vm14975_vm6 = vcmask 851712  }
 0x2f8   :  { %8903 = vmatprep.subr.bf16.mxu1 %v14941_v61 }
 0x2fa   :  { %2606 = vadd.xlane.f32.xlu0 %v2605_v18  ;;  %v2644_v18 = vsel %vm1124_vm5, %v11271_v11, 0.0  ;;  %v14947_v11 = vld [vmem:[#allocation135_spill] sm:$0xff] }
 0x2fe   :  { %2612 = vadd.xlane.f32.xlu0 %v2611_v39  ;;  %v2656_v39 = vsel %vm1124_vm5, %v11318_v25, 0.0  ;;  %v2550_v25 = vpop.permute.xlu0 %2549 }
 0x2ff   :  { %v2674_v0 = vsel %vm1124_vm5, %v2550_v25, 0.0 }
 0x302   :  { %2618 = vadd.xlane.f32.xlu0 %v2617_v43  ;;  %v14948_v43 = vld [vmem:[#allocation142_spill] sm:$0xff] }
 0x306   :  { %2624 = vadd.xlane.f32.xlu0 %v2623_v10  ;;  %v14950_v10 = vld [vmem:[#allocation147_spill] sm:$0xff] }
 0x30a   :  { %2630 = vadd.xlane.f32.xlu0 %v2629_v33  ;;  %v14951_v33 = vld [vmem:[#allocation146_spill] sm:$0xff] }
 0x30e   :  { %2639 = vadd.xlane.f32.xlu0 %v2638_v4  ;;  %v14952_v4 = vld [vmem:[#allocation150_spill] sm:$0xff] }
 0x312   :  { %2645 = vadd.xlane.f32.xlu0 %v2644_v18 }
 0x316   :  { %2651 = vadd.xlane.f32.xlu0 %v2650_v8 }
 0x318   :  { %v11465_v57 = vpop.xlane.xlu1 %2588 }
 0x31a   :  { %2657 = vadd.xlane.f32.xlu0 %v2656_v39 }
 0x31c   :  { %3582 = vxpose.xlu1.b32.start [1/16] (narrow) %v14946_v53, 8  ;;  %v11470_v8 = vpop.xlane.xlu1 %2597 }
 0x31d   :  { %v2732_v50 = vrot.slane %v11470_v8, %v11111_v48 }
 0x31e   :  { %2663 = vadd.xlane.f32.xlu0 %v2662_v27 }
 0x320   :  { %3583 = vxpose.xlu1.b32.cont [2/16] (narrow) %v14947_v11, 8 }
 0x322   :  { %2669 = vadd.xlane.f32.xlu0 %v2668_v19 }
 0x324   :  { %3584 = vxpose.xlu1.b32.cont [3/16] (narrow) %v14948_v43, 8 }
 0x326   :  { %2675 = vadd.xlane.f32.xlu0 %v2674_v0 }
 0x328   :  { %3585 = vxpose.xlu1.b32.cont [4/16] (narrow) %v14949_v38, 8 }
 0x32c   :  { %3586 = vxpose.xlu1.b32.cont [5/16] (narrow) %v14950_v10, 8 }
 0x330   :  { %3587 = vxpose.xlu1.b32.cont [6/16] (narrow) %v14951_v33, 8 }
 0x334   :  { %3588 = vxpose.xlu1.b32.cont [7/16] (narrow) %v14952_v4, 8 }
 0x338   :  { %3589 = vxpose.xlu1.b32.cont [8/16] (narrow) %v10898_v5, 8  ;;  %v11475_v5 = vpop.xlane.xlu1 %2603 }
 0x33c   :  { %3590 = vxpose.xlu1.b32.cont [9/16] (narrow) %v10890_v30, 8 }
 0x340   :  { %3591 = vxpose.xlu1.b32.cont [10/16] (narrow) %v10918_v52, 8 }
 0x344   :  { %3592 = vxpose.xlu1.b32.cont [11/16] (narrow) %v10904_v59, 8  ;;  %v11482_v59 = vpop.xlane.xlu1 %2609 }
 0x346   :  { %v11468_v18 = vpop.xlane.xlu0 %3246 }
 0x348   :  { %3593 = vxpose.xlu1.b32.cont [12/16] (narrow) %v10935_v54, 8  ;;  %v11490_v11 = vpop.xlane.xlu1 %2615 }
 0x34a   :  { %v2554_v39 = vpop.permute.xlu0 %2553 }
 0x34b   :  { %v2680_v53 = vsel %vm1124_vm5, %v2554_v39, 0.0 }
 0x34c   :  { %2681 = vadd.xlane.f32.xlu0 %v2680_v53  ;;  %3594 = vxpose.xlu1.b32.cont [13/16] (narrow) %v10924_v49, 8 }
 0x350   :  { %3595 = vxpose.xlu1.b32.cont [14/16] (narrow) %v10952_v23, 8  ;;  %v11496_v23 = vpop.xlane.xlu1 %2621 }
 0x352   :  { %v11478_v30 = vpop.f32.mrb[32].mxu0 }
 0x353   :  { %14953 = vst [vmem:[#allocation160_spill] sm:$0xff] %v11478_v30  ;;  %v11480_v52 = vpop.f32.mrb[33].mxu0 }
 0x354   :  { %14954 = vst [vmem:[#allocation158_spill] sm:$0xff] %v11480_v52  ;;  %3596 = vxpose.xlu1.b32.cont [15/16] (narrow) %v10937_v3, 8  ;;  %v11506_v38 = vpop.xlane.xlu1 %2627 }
 0x356   :  { %v11485_v27 = vpop.f32.mrb[34].mxu0 }
 0x357   :  { %14955 = vst [vmem:[#allocation161_spill] sm:$0xff] %v11485_v27  ;;  %v11487_v54 = vpop.f32.mrb[35].mxu0 }
 0x358   :  { %14956 = vst [vmem:[#allocation163_spill] sm:$0xff] %v11487_v54  ;;  %3597 = vxpose.xlu1.b32.end [16/16] (narrow) %v10967_v20, 8  ;;  %v11512_v33 = vpop.xlane.xlu1 %2633 }
 0x35a   :  { %v11492_v49 = vpop.f32.mrb[36].mxu0 }
 0x35b   :  { %14957 = vst [vmem:[#allocation162_spill] sm:$0xff] %v11492_v49  ;;  %v11494_v19 = vpop.f32.mrb[37].mxu0 }
 0x35c   :  { %14958 = vst [vmem:[#allocation164_spill] sm:$0xff] %v11494_v19  ;;  %v11522_v13 = vpop.xlane.xlu1 %2636 }
 0x35e   :  { %v11498_v25 = vpop.f32.mrb[38].mxu0 }
 0x35f   :  { %14959 = vst [vmem:[#allocation166_spill] sm:$0xff] %v11498_v25  ;;  %v11500_v43 = vpop.f32.mrb[39].mxu0 }
 0x360   :  { %14960 = vst [vmem:[#allocation171_spill] sm:$0xff] %v11500_v43  ;;  %v11524_v56 = vpop.xlane.xlu1 %2642 }
 0x362   :  { %v11502_v0 = vpop.f32.mrb[40].mxu0 }
 0x363   :  { %14961 = vst [vmem:[#allocation139_spill] sm:$0xff] %v11502_v0  ;;  %v11504_v3 = vpop.f32.mrb[41].mxu0 }
 0x364   :  { %14962 = vst [vmem:[#allocation145_spill] sm:$0xff] %v11504_v3  ;;  %v11527_v9 = vpop.xlane.xlu1 %2648 }
 0x366   :  { %v11508_v10 = vpop.f32.mrb[42].mxu0 }
 0x367   :  { %14963 = vst [vmem:[#allocation151_spill] sm:$0xff] %v11508_v10  ;;  %v11510_v20 = vpop.f32.mrb[43].mxu0 }
 0x368   :  { %14964 = vst [vmem:[#allocation165_spill] sm:$0xff] %v11510_v20 }
 0x36a   :  { %v11514_v4 = vpop.f32.mrb[44].mxu0 }
 0x36b   :  { %14965 = vst [vmem:[#allocation167_spill] sm:$0xff] %v11514_v4  ;;  %v11516_v39 = vpop.f32.mrb[45].mxu0 }
 0x36c   :  { %14966 = vst [vmem:[#allocation169_spill] sm:$0xff] %v11516_v39  ;;  %v2718_v39 = vrot.slane %v11465_v57, %v11073_v21 }
 0x36e   :  { %v11518_v53 = vpop.f32.mrb[46].mxu0 }
 0x36f   :  { %14967 = vst [vmem:[#allocation174_spill] sm:$0xff] %v11518_v53  ;;  %v11520_v24 = vpop.f32.mrb[47].mxu0  ;;  %v11533_v53 = vpop.xlane.xlu1 %2654 }
 0x370   :  { %14968 = vst [vmem:[#allocation137_spill] sm:$0xff] %v11520_v24  ;;  %14970 = vst [vmem:[#allocation135_spill] sm:$0xff] %v11533_v53 }
 0x373   :  { %v11544_v3 = vpop.xlane.xlu1 %2660 }
 0x379   :  { %3614 = vxpose.xlu0.b32.start [1/16] (narrow) %v14969_v2, 8 }
 0x37b   :  { %v2592_v46 = vpop.xlane.xlu0 %2591 }
 0x37c   :  { %v2722_v61 = vrot.slane %v2592_v46, %v11076_v22 }
 0x37d   :  { %3615 = vxpose.xlu0.b32.cont [2/16] (narrow) %v14930_v36, 8 }
 0x37e   :  { %v2723_v17 = vsel %vm1890_vm7, %v2722_v61, %v2718_v39  ;;  %v2742_v61 = vrot.slane %v11475_v5, %v11145_v55 }
 0x37f   :  { %v2595_v4 = vpop.xlane.xlu0 %2594 }
 0x380   :  { %v2727_v20 = vrot.slane %v2595_v4, %v11092_v26 }
 0x381   :  { %3616 = vxpose.xlu0.b32.cont [3/16] (narrow) %v14931_v40, 8 }
 0x382   :  { %v2728_v2 = vsel %vm1897_vm8, %v2727_v20, %v2723_v17 }
 0x383   :  { %v2601_v58 = vpop.xlane.xlu0 %2600  ;;  %v2733_v10 = vsel %vm14565_vm9, %v2732_v50, %v2728_v2 }
 0x384   :  { %v2737_v36 = vrot.slane %v2601_v58, %v11127_v31 }
 0x385   :  { %3617 = vxpose.xlu0.b32.cont [4/16] (narrow) %v14933_v1, 8  ;;  %v2752_v1 = vrot.slane %v11482_v59, %v11178_v37 }
 0x386   :  { %v2738_v53 = vsel %vm1911_vm3, %v2737_v36, %v2733_v10  ;;  %v11560_v10 = vpop.xlane.xlu1 %2666 }
 0x387   :  { %v11549_v40 = vpop.xlane.xlu0 %2606  ;;  %v2743_v20 = vsel %vm1918_vm10, %v2742_v61, %v2738_v53  ;;  %14971 = vst [vmem:[#allocation142_spill] sm:$0xff] %v11560_v10 }
 0x388   :  { %v2747_v17 = vrot.slane %v11549_v40, %v11161_v7 }
 0x389   :  { %3618 = vxpose.xlu0.b32.cont [5/16] (narrow) %v14934_v14, 8  ;;  %v2762_v14 = vrot.slane %v11490_v11, %v11213_v35 }
 0x38a   :  { %v2748_v50 = vsel %vm1925_vm11, %v2747_v17, %v2743_v20  ;;  %v11575_v10 = vpop.xlane.xlu1 %2672 }
 0x38b   :  { %v11558_v39 = vpop.xlane.xlu0 %2612  ;;  %v2753_v36 = vsel %vm14599_vm12, %v2752_v1, %v2748_v50  ;;  %14972 = vst [vmem:[#allocation141_spill] sm:$0xff] %v11575_v10 }
 0x38c   :  { %v2757_v2 = vrot.slane %v11558_v39, %v11195_v15 }
 0x38d   :  { %3619 = vxpose.xlu0.b32.cont [6/16] (narrow) %v14936_v60, 8  ;;  %v2772_v60 = vrot.slane %v11496_v23, %v11237_v16 }
 0x38e   :  { %v2758_v53 = vsel %vm14598_vm13, %v2757_v2, %v2753_v36  ;;  %v11589_v10 = vpop.xlane.xlu1 %2678 }
 0x38f   :  { %v11569_v61 = vpop.xlane.xlu0 %2618  ;;  %v2763_v20 = vsel %vm14597_vm14, %v2762_v14, %v2758_v53  ;;  %14976 = vst [vmem:[#allocation147_spill] sm:$0xff] %v11589_v10 }
 0x390   :  { %v2767_v17 = vrot.slane %v11569_v61, %v11225_v42 }
 0x391   :  { %3620 = vxpose.xlu0.b32.cont [7/16] (narrow) %v11061_v51, 8  ;;  %v2782_v51 = vrot.slane %v11506_v38, %v11259_v34 }
 0x392   :  { %v2768_v50 = vsel %vm14973_vm1, %v2767_v17, %v2763_v20  ;;  %v2792_v20 = vrot.slane %v11512_v33, %v11280_v45 }
 0x393   :  { %v11580_v1 = vpop.xlane.xlu0 %2624  ;;  %v2773_v36 = vsel %vm14974_vm4, %v2772_v60, %v2768_v50 }
 0x394   :  { %v2777_v2 = vrot.slane %v11580_v1, %v11247_v41 }
 0x395   :  { %3621 = vxpose.xlu0.b32.cont [8/16] (narrow) %v11059_v28, 8  ;;  %v2926_v28 = vmul.f32 2.0, %v11478_v30 }
 0x396   :  { %v2778_v53 = vsel %vm14975_vm6, %v2777_v2, %v2773_v36  ;;  %v2925_v2 = vmul.f32 2.0, %v11480_v52  ;;  %v2928_v36 = vmul.f32 2.0, %v11485_v27 }
 0x397   :  { %v2631_v14 = vpop.xlane.xlu0 %2630  ;;  %v2783_v16 = vsel %vm14606_vm2, %v2782_v51, %v2778_v53  ;;  %v2927_v53 = vmul.f32 2.0, %v11487_v54  ;;  %v14990_v54 = vld [vmem:[#allocation191_spill] sm:$0xff] }
 0x398   :  { %v2787_v17 = vrot.slane %v2631_v14, %v11269_v32 }
 0x399   :  { %3622 = vxpose.xlu0.b32.cont [9/16] (narrow) %v11197_v12, 8 }
 0x39a   :  { %v2788_v50 = vsel %vm14605_vm0, %v2787_v17, %v2783_v16  ;;  %v2929_v17 = vmul.f32 2.0, %v11494_v19 }
 0x39b   :  { %v11599_v60 = vsel %vm14604_vm15, %v2792_v20, %v2788_v50  ;;  %v11618_v50 = vadd.f32 1.6e-14, %v11468_v18 }
 0x39c   :  { %v3598_v34 = vpop.trf.xlu1  ;;  %v2893_v10 = vadd.f32 %v11599_v60, %v11465_v57  ;;  %v2894_v45 = vadd.f32 %v11599_v60, %v2592_v46  ;;  %v2895_v16 = vadd.f32 %v11599_v60, %v2595_v4  ;;  %v2896_v12 = vadd.f32 %v11599_v60, %v11470_v8 }
 0x39d   :  { %3623 = vxpose.xlu0.b32.cont [10/16] (narrow) %v11303_v62, 8  ;;  %8119 = vmatmul.mubr.f32.vlgmr.msra.gmra.mrb[48].mxu0 %v3598_v34  ;;  %v2897_v51 = vadd.f32 %v11599_v60, %v2601_v58  ;;  %v11615_v46 = vsub.s32 0, %v11053_v29  ;;  %v14978_v34 = vld [vmem:[#allocation5_spill] sm:$0xff] }
 0x39e   :  { %8873 = vmatpush3.bf16.msra.mxu0 %v10119_v44  ;;  %v2957_v20 = vsub.f32 %v2893_v10, %v2925_v2  ;;  %v2958_v57 = vsub.f32 %v2894_v45, %v2926_v28  ;;  %v2959_v62 = vsub.f32 %v2895_v16, %v2927_v53  ;;  %v2960_v4 = vsub.f32 %v2896_v12, %v2928_v36  ;;  %v11633_v10 = vpop.xlane.xlu0 %2639  ;;  %v14979_v28 = vld [vmem:[#allocation6_spill] sm:$0xff] }
 0x39f   :  { %14977 = vst [vmem:[#allocation146_spill] sm:$0xff] %v11615_v46  ;;  %8875 = vmatprep.subr.bf16.mxu0 %v14978_v34  ;;  %v2961_v58 = vsub.f32 %v2897_v51, %v2929_v17  ;;  %v3477_v18 = vrot.slane %v11618_v50, %v11615_v46  ;;  %v2907_v36 = vadd.f32 %v11599_v60, %v2631_v14  ;;  %v11646_v53 = vsub.s32 1, %v11053_v29  ;;  %v14981_v14 = vld [vmem:[#allocation7_spill] sm:$0xff] }
 0x3a0   :  { %v11621_v27 = vmax.f32 %v2957_v20, 0.0  ;;  %v11623_v8 = vmax.f32 %v2958_v57, 0.0  ;;  %v11626_v44 = vmax.f32 %v2959_v62, 0.0  ;;  %v11629_v45 = vmax.f32 %v2960_v4, 0.0 }
 0x3a1   :  { %3624 = vxpose.xlu0.b32.cont [11/16] (narrow) %v11249_v63, 8  ;;  %v11638_v2 = vmax.f32 %v2961_v58, 0.0  ;;  %v2898_v63 = vadd.f32 %v11599_v60, %v11475_v5  ;;  %14980 = vst [vmem:[#allocation150_spill] sm:$0xff] %v11646_v53  ;;  %v2930_v16 = vmul.f32 2.0, %v11492_v49  ;;  %v2801_v12 = vrot.slane %v11633_v10, %v11076_v22 }
 0x3a2   :  { %8877 = vmatpush3.bf16.msra.mxu0 %v14978_v34  ;;  %9357 = vrsqrt.f32 %v11621_v27  ;;  %v2939_v5 = vmul.f32 2.0, %v11520_v24  ;;  %v2931_v17 = vmul.f32 2.0, %v11500_v43  ;;  %v11659_v57 = vpop.xlane.xlu0 %2645  ;;  %v2899_v34 = vadd.f32 %v11599_v60, %v11549_v40  ;;  %v14986_v40 = vld [vmem:[#allocation190_spill] sm:$0xff] }
 0x3a3   :  { %8879 = vmatprep.subr.bf16.mxu0 %v14979_v28  ;;  %9359 = vrsqrt.f32 %v11623_v8  ;;  %v2962_v51 = vsub.f32 %v2898_v63, %v2930_v16  ;;  %v2806_v4 = vrot.slane %v11524_v56, %v11092_v26  ;;  %v14982_v63 = vld [vmem:[#allocation8_spill] sm:$0xff]  ;;  %v14983_v16 = vld [vmem:[#allocation145_spill] sm:$0xff]  ;;  %vm3251_vm1 = vcmp.eq.f32.partialorder %v11621_v27, inf }
 0x3a4   :  { %9361 = vrsqrt.f32 %v11626_v44  ;;  %v2971_v20 = vsub.f32 %v2907_v36, %v2939_v5  ;;  %v2963_v36 = vsub.f32 %v2899_v34, %v2931_v17  ;;  %v11682_v5 = vmul.f32 2.0, %v14983_v16 }
 0x3a5   :  { %3625 = vxpose.xlu0.b32.cont [12/16] (narrow) %v11320_v6, 8  ;;  %9363 = vrsqrt.f32 %v11629_v45  ;;  %v2797_v6 = vrot.slane %v11522_v13, %v11073_v21  ;;  %v2900_v34 = vadd.f32 %v11599_v60, %v11482_v59  ;;  %vm3253_vm4 = vcmp.eq.f32.partialorder %v11621_v27, 0.0 }
 0x3a6   :  { %8881 = vmatpush3.bf16.msra.mxu0 %v14979_v28  ;;  %9365 = vrcp.f32 %v3477_v18  ;;  %v11670_v18 = vmax.f32 %v2962_v51, 0.0  ;;  %v11673_v28 = vmul.f32 2.0, %v11498_v25  ;;  %v11690_v24 = vmax.f32 %v2971_v20, 0.0 }
 0x3a7   :  { %8883 = vmatprep.subr.bf16.mxu0 %v14981_v14  ;;  %9367 = vrsqrt.f32 %v11638_v2  ;;  %v2802_v58 = vsel %vm1890_vm7, %v2801_v12, %v2797_v6  ;;  %v14984_v12 = vld [vmem:[#allocation151_spill] sm:$0xff]  ;;  %v11696_v17 = vmax.f32 %v2963_v36, 0.0  ;;  %v2811_v51 = vrot.slane %v11659_v57, %v11111_v48 }
 0x3a8   :  { %v11685_v6 = vmul.f32 2.0, %v14984_v12  ;;  %9369 = vrsqrt.f32 %v11670_v18  ;;  %v2807_v46 = vsel %vm1897_vm8, %v2806_v4, %v2802_v58  ;;  %v11708_v58 = vpop.xlane.xlu0 %2651  ;;  %v3254_v59 = vand.u32 2147483648, %v11621_v27 }
 0x3a9   :  { %3626 = vxpose.xlu0.b32.cont [13/16] (narrow) %v11288_v47, 8  ;;  %v11676_v47 = vmul.f32 2.0, %v11502_v0  ;;  %vm3258_vm6 = vcmp.eq.f32.partialorder %v11623_v8, inf  ;;  %9371 = vrsqrt.f32 %v11696_v17  ;;  %v2901_v49 = vadd.f32 %v11599_v60, %v11558_v39 }
 0x3aa   :  { %8885 = vmatpush3.bf16.msra.mxu0 %v14981_v14  ;;  %v14985_v14 = vld [vmem:[#allocation135_spill] sm:$0xff]  ;;  %v11731_v30 = vsel %vm14565_vm9, %v2811_v51, %v2807_v46  ;;  %v3268_v46 = vand.u32 2147483648, %v11626_v44  ;;  %vm3272_vm9 = vcmp.eq.f32.partialorder %v11629_v45, inf }
 0x3ab   :  { %8887 = vmatprep.subr.bf16.mxu0 %v14982_v63 }
 0x3ac   :  { %v9358_v62 = vpop.eup %9357 }
 0x3ad   :  { %3627 = vxpose.xlu0.b32.cont [14/16] (narrow) %v14986_v40, 8  ;;  %v11694_v0 = vpop.f32.mrb[32].mxu1  ;;  %v9360_v12 = vpop.eup %9359  ;;  %v3250_v20 = vmul.f32 %v9358_v62, %v11621_v27  ;;  %v14989_v40 = vld [vmem:[#allocation9_spill] sm:$0xff] }
 0x3ae   :  { %14987 = vst [vmem:[#allocation156_spill] sm:$0xff] %v11694_v0  ;;  %8889 = vmatpush3.bf16.msra.mxu0 %v14982_v63  ;;  %v11703_v16 = vpop.f32.mrb[33].mxu1  ;;  %v9362_v4 = vpop.eup %9361  ;;  %v3257_v36 = vmul.f32 %v9360_v12, %v11623_v8  ;;  %v3261_v63 = vand.u32 2147483648, %v11623_v8 }
 0x3af   :  { %14988 = vst [vmem:[#allocation5_spill] sm:$0xff] %v11703_v16  ;;  %8891 = vmatprep.subr.bf16.mxu0 %v14989_v40  ;;  %v9364_v25 = vpop.eup %9363  ;;  %v3252_v62 = vsel %vm3251_vm1, %v11621_v27, %v3250_v20  ;;  %v3264_v43 = vmul.f32 %v9362_v4, %v11626_v44  ;;  %v2964_v4 = vsub.f32 %v2900_v34, %v11673_v28  ;;  %vm3260_vm1 = vcmp.eq.f32.partialorder %v11623_v8, 0.0  ;;  %v9595_v28 = vld [vmem:[%s14730_s25] sm:$0xff] }
 0x3b0   :  { %v11720_v19 = vpop.eup %9365  ;;  %v3255_v12 = vsel %vm3253_vm4, %v3254_v59, %v3252_v62  ;;  %v3259_v26 = vsel %vm3258_vm6, %v11623_v8, %v3257_v36  ;;  %v3271_v20 = vmul.f32 %v9364_v25, %v11629_v45  ;;  %v14993_v59 = vld [vmem:[#allocation10_spill] sm:$0xff]  ;;  %vm3265_vm4 = vcmp.eq.f32.partialorder %v11626_v44, inf }
 0x3b1   :  { %3628 = vxpose.xlu0.b32.cont [15/16] (narrow) %v14990_v54, 8  ;;  %v11723_v48 = vpop.f32.mrb[34].mxu1  ;;  %v9368_v52 = vpop.eup %9367  ;;  %v3485_v27 = vmul.f32 %v11720_v19, %v3255_v12  ;;  %v3262_v25 = vsel %vm3260_vm1, %v3261_v63, %v3259_v26  ;;  %vm3267_vm6 = vcmp.eq.f32.partialorder %v11626_v44, 0.0  ;;  %v3266_v34 = vsel %vm3265_vm4, %v11626_v44, %v3264_v43  ;;  %v14996_v26 = vld [vmem:[#allocation192_spill] sm:$0xff] }
 0x3b2   :  { %14991 = vst [vmem:[#allocation6_spill] sm:$0xff] %v11723_v48  ;;  %8893 = vmatpush3.bf16.msra.mxu0 %v14989_v40  ;;  %v11736_v54 = vpop.f32.mrb[35].mxu1  ;;  %v2965_v8 = vsub.f32 %v2901_v49, %v11682_v5  ;;  %v3269_v36 = vsel %vm3267_vm6, %v3268_v46, %v3266_v34  ;;  %v3273_v63 = vsel %vm3272_vm9, %v11629_v45, %v3271_v20  ;;  %v11757_v12 = vmax.f32 %v2964_v4, 0.0  ;;  %v9370_v39 = vpop.eup %9369 }
 0x3b3   :  { %14992 = vst [vmem:[#allocation7_spill] sm:$0xff] %v11736_v54  ;;  %8895 = vmatprep.subr.bf16.mxu0 %v14993_v59  ;;  %v11747_v51 = vmul.f32 %v9595_v28, %v3485_v27  ;;  %v3278_v62 = vmul.f32 %v9368_v52, %v11638_v2  ;;  %v3486_v49 = vmul.f32 %v11720_v19, %v3262_v25  ;;  %vm3274_vm1 = vcmp.eq.f32.partialorder %v11629_v45, 0.0  ;;  %v11767_v5 = vpop.xlane.xlu0 %2657  ;;  %v14998_v52 = vld [vmem:[#allocation11_spill] sm:$0xff]  ;;  %v9372_v22 = vpop.eup %9371 }
 0x3b4   :  { %v3275_v44 = vand.u32 2147483648, %v11629_v45  ;;  %vm3279_vm4 = vcmp.eq.f32.partialorder %v11638_v2, inf  ;;  %vm3281_vm9 = vcmp.eq.f32.partialorder %v11638_v2, 0.0  ;;  %v3282_v20 = vand.u32 2147483648, %v11638_v2 }
 0x3b5   :  { %14994 = vst [vmem:[#allocation8_spill] sm:$0xff] %v11747_v51  ;;  %v11752_v40 = vpop.f32.mrb[36].mxu1  ;;  %3629 = vxpose.xlu0.b32.end [16/16] (narrow) %v14996_v26, 8  ;;  %8188 = vmatprep.mubr.f32.mxu0 %v11747_v51  ;;  %v2902_v4 = vadd.f32 %v11599_v60, %v11490_v11  ;;  %v2903_v27 = vadd.f32 %v11599_v60, %v11569_v61  ;;  %9373 = vrsqrt.f32 %v11757_v12  ;;  %v11782_v26 = vmax.f32 %v2965_v8, 0.0 }
 0x3b6   :  { %14995 = vst [vmem:[#allocation135_spill] sm:$0xff] %v11752_v40  ;;  %8897 = vmatpush3.bf16.msra.mxu0 %v14993_v59  ;;  %v11761_v43 = vpop.f32.mrb[37].mxu1  ;;  %v3487_v59 = vmul.f32 %v11720_v19, %v3269_v36  ;;  %v3276_v25 = vsel %vm3274_vm1, %v3275_v44, %v3273_v63  ;;  %v3280_v45 = vsel %vm3279_vm4, %v11638_v2, %v3278_v62  ;;  %v9596_v2 = vld [vmem:[%s14730_s25 + $0x8] sm:$0xff]  ;;  %vm3286_vm6 = vcmp.eq.f32.partialorder %v11670_v18, inf  ;;  %v9597_v44 = vld [vmem:[%s14730_s25 + $0x10] sm:$0xff] }
 0x3b7   :  { %14997 = vst [vmem:[#allocation190_spill] sm:$0xff] %v11761_v43  ;;  %8899 = vmatprep.subr.bf16.mxu0 %v14998_v52  ;;  %v3285_v46 = vmul.f32 %v9370_v39, %v11670_v18  ;;  %v3283_v34 = vsel %vm3281_vm9, %v3282_v20, %v3280_v45  ;;  %v2904_v11 = vadd.f32 %v11599_v60, %v11496_v23  ;;  %vm3288_vm1 = vcmp.eq.f32.partialorder %v11670_v18, 0.0 }
 0x3b8   :  { %v11792_v39 = vmul.f32 %v9596_v2, %v3486_v49  ;;  %v3289_v8 = vand.u32 2147483648, %v11670_v18  ;;  %v3488_v36 = vmul.f32 %v11720_v19, %v3276_v25  ;;  %v3489_v23 = vmul.f32 %v11720_v19, %v3283_v34 }
 0x3b9   :  { %v11779_v28 = vpop.f32.mrb[38].mxu1  ;;  %v3287_v63 = vsel %vm3286_vm6, %v11670_v18, %v3285_v46  ;;  %v3292_v62 = vmul.f32 %v9372_v22, %v11696_v17  ;;  %v11804_v49 = vmul.f32 %v9597_v44, %v3487_v59  ;;  %vm3293_vm4 = vcmp.eq.f32.partialorder %v11696_v17, inf  ;;  %v11813_v18 = vpop.xlane.xlu0 %2663  ;;  %v15005_v46 = vld [vmem:[#allocation165_spill] sm:$0xff] }
 0x3ba   :  { %14999 = vst [vmem:[#allocation9_spill] sm:$0xff] %v11779_v28  ;;  %8901 = vmatpush3.bf16.msra.mxu0 %v14998_v52  ;;  %v11787_v61 = vpop.f32.mrb[39].mxu1  ;;  %15001 = vst [vmem:[#allocation10_spill] sm:$0xff] %v11792_v39  ;;  %v3290_v52 = vsel %vm3288_vm1, %v3289_v8, %v3287_v63  ;;  %v3296_v20 = vand.u32 2147483648, %v11696_v17  ;;  %v15003_v25 = vrot.slane %v11527_v9, %v11127_v31  ;;  %vm3295_vm9 = vcmp.eq.f32.partialorder %v11696_v17, 0.0 }
 0x3bb   :  { %15000 = vst [vmem:[#allocation191_spill] sm:$0xff] %v11787_v61  ;;  %15002 = vst [vmem:[#allocation192_spill] sm:$0xff] %v11804_v49  ;;  %v3294_v59 = vsel %vm3293_vm4, %v11696_v17, %v3292_v62  ;;  %9375 = vrsqrt.f32 %v11782_v26  ;;  %v2935_v34 = vmul.f32 2.0, %v15005_v46  ;;  %v15006_v2 = vrot.slane %v11708_v58, %v11145_v55  ;;  %v9598_v17 = vld [vmem:[%s14730_s25 + $0x18] sm:$0xff] }
 0x3bc   :  { %v2817_v45 = vsel %vm1911_vm3, %v15003_v25, %v11731_v30  ;;  %9377 = vrsqrt.f32 %v11690_v24  ;;  %v3297_v63 = vsel %vm3295_vm9, %v3296_v20, %v3294_v59  ;;  %v2831_v62 = vrot.slane %v11767_v5, %v11178_v37  ;;  %v9599_v25 = vld [vmem:[%s14730_s25 + $0x20] sm:$0xff]  ;;  %v15010_v55 = vld [vmem:[#allocation167_spill] sm:$0xff] }
 0x3bd   :  { %8189 = vmatmul.mubr.f32.vlgmr.msra.gmra.mrb[50].mxu0 %v11792_v39  ;;  %v11816_v22 = vpop.f32.mrb[40].mxu1  ;;  %v2822_v30 = vsel %vm1918_vm10, %v15006_v2, %v2817_v45  ;;  %v11835_v44 = vmul.f32 %v9598_v17, %v3488_v36  ;;  %v11840_v46 = vmul.f32 %v9599_v25, %v3489_v23  ;;  %v3490_v45 = vmul.f32 %v11720_v19, %v3290_v52  ;;  %v15011_v17 = vld [vmem:[#allocation169_spill] sm:$0xff] }
 0x3be   :  { %15004 = vst [vmem:[#allocation11_spill] sm:$0xff] %v11816_v22  ;;  %8191 = vmatprep.mubr.f32.mxu0 %v11804_v49  ;;  %v11828_v8 = vpop.f32.mrb[41].mxu1  ;;  %v3491_v2 = vmul.f32 %v11720_v19, %v3297_v63  ;;  %v2966_v20 = vsub.f32 %v2902_v4, %v11676_v47  ;;  %v2967_v59 = vsub.f32 %v2903_v27, %v2935_v34  ;;  %v11847_v31 = vmul.f32 2.0, %v15010_v55  ;;  %v15013_v63 = vld [vmem:[#allocation174_spill] sm:$0xff] }
 0x3bf   :  { %15007 = vst [vmem:[#allocation193_spill] sm:$0xff] %v11828_v8  ;;  %15008 = vst [vmem:[#allocation194_spill] sm:$0xff] %v11835_v44  ;;  %v2968_v37 = vsub.f32 %v2904_v11, %v11685_v6  ;;  %v2836_v36 = vrot.slane %v11544_v3, %v11195_v15  ;;  %v2937_v21 = vmul.f32 2.0, %v15011_v17  ;;  %v2905_v52 = vadd.f32 %v11599_v60, %v11580_v1  ;;  %v9374_v25 = vpop.eup %9373 }
 0x3c0   :  { %15009 = vst [vmem:[#allocation195_spill] sm:$0xff] %v11840_v46  ;;  %v11858_v47 = vmul.f32 2.0, %v15013_v63  ;;  %v15014_v6 = vrot.slane %v14985_v14, %v11161_v7  ;;  %v11867_v11 = vmax.f32 %v2966_v20, 0.0  ;;  %v11869_v34 = vmax.f32 %v2967_v59, 0.0  ;;  %v11874_v63 = vpop.xlane.xlu0 %2669  ;;  %v9601_v20 = vld [vmem:[%s14730_s25 + $0x30] sm:$0xff] }
 0x3c1   :  { %8192 = vmatmul.mubr.f32.gmra.mrb[52].mxu0 %v11835_v44  ;;  %v11853_v23 = vpop.f32.mrb[42].mxu1  ;;  %v2841_v1 = vrot.slane %v11813_v18, %v11213_v35  ;;  %v11881_v17 = vmax.f32 %v2968_v37, 0.0  ;;  %v11886_v59 = vmul.f32 %v9601_v20, %v3491_v2  ;;  %vm3300_vm6 = vcmp.eq.f32.partialorder %v11757_v12, inf  ;;  %v15019_v2 = vld [vmem:[#allocation142_spill] sm:$0xff] }
 0x3c2   :  { %15012 = vst [vmem:[#allocation196_spill] sm:$0xff] %v11853_v23  ;;  %v2827_v4 = vsel %vm1925_vm11, %v15014_v6, %v2822_v30  ;;  %8194 = vmatprep.mubr.f32.mxu0 %v11840_v46  ;;  %v11865_v27 = vpop.f32.mrb[43].mxu1  ;;  %v9600_v30 = vld [vmem:[%s14730_s25 + $0x28] sm:$0xff]  ;;  %9379 = vrsqrt.f32 %v11867_v11  ;;  %v2969_v37 = vsub.f32 %v2905_v52, %v2937_v21  ;;  %v2846_v20 = vrot.slane %v15019_v2, %v11225_v42  ;;  %v15022_v21 = vld [vmem:[#allocation147_spill] sm:$0xff]  ;;  %v15023_v46 = vld [vmem:[#allocation184_spill] sm:$0xff] }
 0x3c3   :  { %15015 = vst [vmem:[#allocation197_spill] sm:$0xff] %v11865_v27  ;;  %v2832_v55 = vsel %vm14599_vm12, %v2831_v62, %v2827_v4  ;;  %v11879_v6 = vmul.f32 %v9600_v30, %v3490_v45  ;;  %15017 = vst [vmem:[#allocation199_spill] sm:$0xff] %v11886_v59  ;;  %v3299_v62 = vmul.f32 %v9374_v25, %v11757_v12  ;;  %v3303_v45 = vand.u32 2147483648, %v11757_v12  ;;  %v15020_v25 = vld [vmem:[#allocation141_spill] sm:$0xff] }
 0x3c4   :  { %9381 = vrsqrt.f32 %v11869_v34  ;;  %v2906_v30 = vadd.f32 %v11599_v60, %v11506_v38  ;;  %vm3302_vm1 = vcmp.eq.f32.partialorder %v11757_v12, 0.0  ;;  %v2837_v38 = vsel %vm14598_vm13, %v2836_v36, %v2832_v55  ;;  %v4152_v52 = vld [vmem:[%s14304_s7] sm:$0xff] }
 0x3c5   :  { %15016 = vst [vmem:[#allocation198_spill] sm:$0xff] %v11879_v6  ;;  %8195 = vmatmul.mubr.f32.gmra.mrb[54].mxu0 %v11879_v6  ;;  %v11892_v4 = vpop.f32.mrb[44].mxu1  ;;  %v3301_v7 = vsel %vm3300_vm6, %v11757_v12, %v3299_v62  ;;  %v9376_v29 = vpop.eup %9375  ;;  %9383 = vrsqrt.f32 %v11881_v17  ;;  %v2842_v35 = vsel %vm14597_vm14, %v2841_v1, %v2837_v38  ;;  %vm3307_vm4 = vcmp.eq.f32.partialorder %v11782_v26, inf }
 0x3c6   :  { %15018 = vst [vmem:[#allocation200_spill] sm:$0xff] %v11892_v4  ;;  %8197 = vmatprep.mubr.f32.mxu0 %v11886_v59  ;;  %v11903_v15 = vpop.f32.mrb[45].mxu1  ;;  %v3304_v6 = vsel %vm3302_vm1, %v3303_v45, %v3301_v7  ;;  %v9378_v42 = vpop.eup %9377  ;;  %v2851_v59 = vrot.slane %v11874_v63, %v15023_v46  ;;  %v3306_v62 = vmul.f32 %v9376_v29, %v11782_v26  ;;  %v3310_v7 = vand.u32 2147483648, %v11782_v26 }
 0x3c7   :  { %15021 = vst [vmem:[#allocation142_spill] sm:$0xff] %v11903_v15  ;;  %v3492_v44 = vmul.f32 %v11720_v19, %v3304_v6  ;;  %v11916_v12 = vpop.xlane.xlu0 %2675  ;;  %v11922_v55 = vmax.f32 %v2969_v37, 0.0  ;;  %v2970_v36 = vsub.f32 %v2906_v30, %v11847_v31  ;;  %v11926_v1 = vmul.f32 2.0, %v11694_v0  ;;  %v9602_v6 = vld [vmem:[%s14730_s25 + $0x38] sm:$0xff] }
 0x3c8   :  { %v3308_v45 = vsel %vm3307_vm4, %v11782_v26, %v3306_v62  ;;  %vm3309_vm9 = vcmp.eq.f32.partialorder %v11782_v26, 0.0  ;;  %v11938_v37 = vmul.f32 2.0, %v11703_v16  ;;  %vm15027_vm6 = vcmask 720512   ;;  %v15029_v62 = vld [vmem:[#allocation186_spill] sm:$0xff] }
 0x3c9   :  { %v11918_v49 = vpop.f32.mrb[46].mxu1  ;;  %v11931_v29 = vmul.f32 %v9602_v6, %v3492_v44  ;;  %v2847_v31 = vsel %vm15027_vm6, %v2846_v20, %v2842_v35  ;;  %v3311_v30 = vsel %vm3309_vm9, %v3310_v7, %v3308_v45  ;;  %9385 = vrsqrt.f32 %v11922_v55  ;;  %v4153_v44 = vld [vmem:[%s14304_s7 + $0x8] sm:$0xff] }
 0x3ca   :  { %15024 = vst [vmem:[#allocation141_spill] sm:$0xff] %v11918_v49  ;;  %v11935_v38 = vpop.f32.mrb[47].mxu1  ;;  %vm15028_vm1 = vcmask 786112   ;;  %v2861_v6 = vrot.slane %v11916_v12, %v15029_v62  ;;  %v3493_v35 = vmul.f32 %v11720_v19, %v3311_v30  ;;  %v3348_v20 = vmul.f32 %v9378_v42, %v11690_v24 }
 0x3cb   :  { %15025 = vst [vmem:[#allocation147_spill] sm:$0xff] %v11931_v29  ;;  %15026 = vst [vmem:[#allocation201_spill] sm:$0xff] %v11935_v38  ;;  %v2852_v26 = vsel %vm15028_vm1, %v2851_v59, %v2847_v31  ;;  %8198 = vmatmul.mubr.f32.gmra.mrb[56].mxu0 %v11931_v29  ;;  %vm3314_vm4 = vcmp.eq.f32.partialorder %v11867_v11, inf  ;;  %vm3316_vm9 = vcmp.eq.f32.partialorder %v11867_v11, 0.0  ;;  %v3317_v7 = vand.u32 2147483648, %v11867_v11  ;;  %v9603_v59 = vld [vmem:[%s14730_s25 + $0x40] sm:$0xff] }
 0x3cc   :  { %v11957_v45 = vmax.f32 %v2970_v36, 0.0  ;;  %v9380_v46 = vpop.eup %9379  ;;  %v11962_v31 = vmul.f32 %v9603_v59, %v3493_v35  ;;  %vm3321_vm6 = vcmp.eq.f32.partialorder %v11869_v34, inf  ;;  %v2908_v42 = vadd.f32 %v11599_v60, %v11512_v33 }
 0x3cd   :  { %v8934_v30 = vpack.c.bf16 %v4153_v44, %v4152_v52  ;;  %v3313_v16 = vmul.f32 %v9380_v46, %v11867_v11  ;;  %vm3323_vm1 = vcmp.eq.f32.partialorder %v11869_v34, 0.0  ;;  %v3324_v36 = vand.u32 2147483648, %v11869_v34 }
 0x3ce   :  { %15030 = vst [vmem:[#allocation202_spill] sm:$0xff] %v11962_v31  ;;  %v9382_v62 = vpop.eup %9381  ;;  %9387 = vrsqrt.f32 %v11957_v45  ;;  %8200 = vmatprep.mubr.f32.mxu0 %v11962_v31  ;;  %vm3328_vm14 = vcmp.eq.f32.partialorder %v11881_v17, inf  ;;  %vm3349_vm13 = vcmp.eq.f32.partialorder %v11690_v24, inf  ;;  %v2972_v33 = vsub.f32 %v2908_v42, %v11858_v47 }
 0x3cf   :  { %v3320_v35 = vmul.f32 %v9382_v62, %v11869_v34  ;;  %8935 = vmatprep.subr.bf16.mxu0 %v8934_v30  ;;  %v9384_v60 = vpop.eup %9383  ;;  %v3315_v46 = vsel %vm3314_vm4, %v11867_v11, %v3313_v16  ;;  %vm3330_vm12 = vcmp.eq.f32.partialorder %v11881_v17, 0.0  ;;  %v3350_v52 = vsel %vm3349_vm13, %v11690_v24, %v3348_v20 }
 0x3d0   :  { %v3352_v44 = vand.u32 2147483648, %v11690_v24  ;;  %8937 = vmatpush3.bf16.msra.mxu0 %v8934_v30  ;;  %v3318_v62 = vsel %vm3316_vm9, %v3317_v7, %v3315_v46  ;;  %v3327_v59 = vmul.f32 %v9384_v60, %v11881_v17  ;;  %v11988_v42 = vmax.f32 %v2972_v33, 0.0 }
 0x3d1   :  { %v3322_v47 = vsel %vm3321_vm6, %v11869_v34, %v3320_v35  ;;  %v3494_v16 = vmul.f32 %v11720_v19, %v3318_v62  ;;  %v3331_v20 = vand.u32 2147483648, %v11881_v17  ;;  %vm3351_vm13 = vcmp.eq.f32.partialorder %v11690_v24, 0.0  ;;  %v9604_v24 = vld [vmem:[%s14730_s25 + $0x48] sm:$0xff] }
 0x3d2   :  { %v3325_v0 = vsel %vm3323_vm1, %v3324_v36, %v3322_v47  ;;  %v3329_v7 = vsel %vm3328_vm14, %v11881_v17, %v3327_v59  ;;  %v3353_v30 = vsel %vm3351_vm13, %v3352_v44, %v3350_v52  ;;  %9389 = vrsqrt.f32 %v11988_v42  ;;  %v9605_v52 = vld [vmem:[%s14730_s25 + $0x50] sm:$0xff] }
 0x3d3   :  { %v3495_v11 = vmul.f32 %v11720_v19, %v3325_v0  ;;  %v9386_v35 = vpop.eup %9385  ;;  %v12001_v33 = vmul.f32 2.0, %v11723_v48  ;;  %v15031_v34 = vrot.slane %v15020_v25, %v11247_v41  ;;  %vm15032_vm4 = vcmask 851712  }
 0x3d4   :  { %v12010_v0 = vmul.f32 %v9604_v24, %v3494_v16  ;;  %v3332_v60 = vsel %vm3330_vm12, %v3331_v20, %v3329_v7  ;;  %v2943_v47 = vmul.f32 2.0, %v11736_v54  ;;  %vm3335_vm14 = vcmp.eq.f32.partialorder %v11922_v55, inf  ;;  %v9606_v7 = vld [vmem:[%s14730_s25 + $0x58] sm:$0xff] }
 0x3d5   :  { %v2857_v36 = vsel %vm15032_vm4, %v15031_v34, %v2852_v26  ;;  %v12018_v44 = vmul.f32 %v9605_v52, %v3495_v11  ;;  %v3496_v62 = vmul.f32 %v11720_v19, %v3332_v60  ;;  %v3334_v26 = vmul.f32 %v9386_v35, %v11922_v55  ;;  %v15037_v52 = vld [vmem:[#allocation188_spill] sm:$0xff] }
 0x3d6   :  { %15033 = vst [vmem:[#allocation203_spill] sm:$0xff] %v12010_v0  ;;  %v2862_v46 = vsel %vm14606_vm2, %v2861_v6, %v2857_v36  ;;  %8201 = vmatmul.mubr.f32.gmra.mrb[58].mxu0 %v12010_v0  ;;  %v3338_v17 = vand.u32 2147483648, %v11922_v55  ;;  %v3499_v6 = vmul.f32 %v11720_v19, %v3353_v30  ;;  %v2945_v59 = vmul.f32 2.0, %v11761_v43  ;;  %v15149_v43 = vld [vmem:[#allocation25_spill] sm:$0xff] }
 0x3d7   :  { %15034 = vst [vmem:[#allocation204_spill] sm:$0xff] %v12018_v44  ;;  %v2956_v16 = vmul.f32 2.0, %v11918_v49  ;;  %8203 = vmatprep.mubr.f32.mxu0 %v12018_v44  ;;  %v3336_v20 = vsel %vm3335_vm14, %v11922_v55, %v3334_v26  ;;  %vm3337_vm12 = vcmp.eq.f32.partialorder %v11922_v55, 0.0  ;;  %v12035_v35 = vmul.f32 %v9606_v7, %v3496_v62 }
 0x3d8   :  { %v9388_v11 = vpop.eup %9387  ;;  %v3339_v34 = vsel %vm3337_vm12, %v3338_v17, %v3336_v20  ;;  %vm3342_vm9 = vcmp.eq.f32.partialorder %v11957_v45, inf  ;;  %v15036_v36 = vrot.slane %v15022_v21, %v11269_v32  ;;  %vm3344_vm6 = vcmp.eq.f32.partialorder %v11957_v45, 0.0  ;;  %v9607_v17 = vld [vmem:[%s14730_s25 + $0x70] sm:$0xff] }
 0x3d9   :  { %15035 = vst [vmem:[#allocation205_spill] sm:$0xff] %v12035_v35  ;;  %v2682_v30 = vpop.xlane.xlu0 %2681  ;;  %v3497_v60 = vmul.f32 %v11720_v19, %v3339_v34  ;;  %v3341_v55 = vmul.f32 %v9388_v11, %v11957_v45  ;;  %v3345_v62 = vand.u32 2147483648, %v11957_v45  ;;  %v12051_v20 = vmul.f32 %v9607_v17, %v3499_v6 }
 0x3da   :  { %v2867_v24 = vsel %vm14605_vm0, %v15036_v36, %v2862_v46  ;;  %v2871_v26 = vrot.slane %v2682_v30, %v15037_v52  ;;  %8204 = vmatmul.mubr.f32.gmra.mrb[60].mxu0 %v12035_v35  ;;  %vm3356_vm1 = vcmp.eq.f32.partialorder %v11988_v42, inf  ;;  %vm3358_vm13 = vcmp.eq.f32.partialorder %v11988_v42, 0.0  ;;  %v9608_v46 = vld [vmem:[%s14730_s25 + $0x60] sm:$0xff] }
 0x3db   :  { %15038 = vst [vmem:[#allocation206_spill] sm:$0xff] %v12051_v20  ;;  %v12058_v11 = vmul.f32 %v9608_v46, %v3497_v60  ;;  %v3343_v7 = vsel %vm3342_vm9, %v11957_v45, %v3341_v55  ;;  %v3359_v34 = vand.u32 2147483648, %v11988_v42 }
 0x3dc   :  { %v12063_v36 = vsel %vm14604_vm15, %v2871_v26, %v2867_v24  ;;  %v3346_v49 = vsel %vm3344_vm6, %v3345_v62, %v3343_v7  ;;  %v9390_v32 = vpop.eup %9389 }
 0x3dd   :  { %15039 = vst [vmem:[#allocation207_spill] sm:$0xff] %v12058_v11  ;;  %v2924_v6 = vadd.f32 %v12063_v36, %v2682_v30  ;;  %v2909_v17 = vadd.f32 %v12063_v36, %v11522_v13  ;;  %v2910_v52 = vadd.f32 %v12063_v36, %v11633_v10  ;;  %8206 = vmatprep.mubr.f32.mxu0 %v12058_v11  ;;  %v15178_v11 = vld [vmem:[#allocation39_spill] sm:$0xff] }
 0x3de   :  { %v3498_v60 = vmul.f32 %v11720_v19, %v3346_v49  ;;  %v2911_v45 = vadd.f32 %v12063_v36, %v11524_v56  ;;  %v2912_v24 = vadd.f32 %v12063_v36, %v11659_v57  ;;  %v2913_v30 = vadd.f32 %v12063_v36, %v11527_v9  ;;  %v9609_v49 = vld [vmem:[%s14730_s25 + $0x68] sm:$0xff] }
 0x3df   :  { %v3355_v55 = vmul.f32 %v9390_v32, %v11988_v42  ;;  %v2988_v13 = vsub.f32 %v2924_v6, %v2956_v16  ;;  %v2973_v26 = vsub.f32 %v2909_v17, %v11938_v37  ;;  %v2974_v10 = vsub.f32 %v2910_v52, %v11926_v1 }
 0x3e0   :  { %v12084_v62 = vmul.f32 %v9609_v49, %v3498_v60  ;;  %v2975_v56 = vsub.f32 %v2911_v45, %v2943_v47  ;;  %v2976_v46 = vsub.f32 %v2912_v24, %v12001_v33  ;;  %v2977_v57 = vsub.f32 %v2913_v30, %v2945_v59 }
 0x3e1   :  { %v3357_v9 = vsel %vm3356_vm1, %v11988_v42, %v3355_v55  ;;  %v12090_v32 = vmax.f32 %v2988_v13, 0.0  ;;  %v12092_v16 = vmax.f32 %v2973_v26, 0.0  ;;  %v12094_v37 = vmax.f32 %v2974_v10, 0.0  ;;  %v9610_v42 = vld [vmem:[%s14730_s25 + $0x78] sm:$0xff] }
 0x3e2   :  { %15040 = vst [vmem:[#allocation208_spill] sm:$0xff] %v12084_v62  ;;  %v15041_v1 = vrot.slane %v11618_v50, %v11646_v53  ;;  %8207 = vmatmul.mubr.f32.gmra.mrb[62].mxu0 %v12084_v62  ;;  %v3360_v33 = vsel %vm3358_vm13, %v3359_v34, %v3357_v9  ;;  %v12102_v47 = vmax.f32 %v2975_v56, 0.0  ;;  %v12107_v52 = vmax.f32 %v2976_v46, 0.0 }
 0x3e3   :  { %8209 = vmatprep.mubr.f32.mxu0 %v12051_v20  ;;  %v3500_v59 = vmul.f32 %v11720_v19, %v3360_v33  ;;  %v12110_v7 = vmax.f32 %v2977_v57, 0.0  ;;  %v2946_v50 = vmul.f32 2.0, %v11752_v40  ;;  %v2948_v6 = vmul.f32 2.0, %v11779_v28  ;;  %v15136_v28 = vld [vmem:[#allocation29_spill] sm:$0xff]  ;;  %v15166_v20 = vld [vmem:[#allocation35_spill] sm:$0xff] }
 0x3e4   :  { %9391 = vrcp.f32 %v15041_v1  ;;  %v2947_v19 = vmul.f32 2.0, %v11787_v61  ;;  %v2950_v17 = vmul.f32 2.0, %v11816_v22  ;;  %v2949_v60 = vmul.f32 2.0, %v11828_v8 }
 0x3e5   :  { %9393 = vrsqrt.f32 %v12090_v32  ;;  %v12117_v34 = vmul.f32 %v9610_v42, %v3500_v59  ;;  %v12125_v45 = vmul.f32 2.0, %v11853_v23  ;;  %v12128_v24 = vmul.f32 2.0, %v11865_v27  ;;  %v15130_v27 = vld [vmem:[#allocation26_spill] sm:$0xff] }
 0x3e6   :  { %9395 = vrsqrt.f32 %v12092_v16  ;;  %v12131_v30 = vmul.f32 2.0, %v11903_v15  ;;  %vm3363_vm4 = vcmp.eq.f32.partialorder %v12092_v16, inf  ;;  %v3366_v55 = vand.u32 2147483648, %v12092_v16 }
 0x3e7   :  { %15042 = vst [vmem:[#allocation209_spill] sm:$0xff] %v12117_v34  ;;  %9397 = vrsqrt.f32 %v12094_v37  ;;  %8210 = vmatmul.mubr.f32.gmra.mrb[64].mxu0 %v12117_v34  ;;  %v2914_v13 = vadd.f32 %v12063_v36, %v11708_v58  ;;  %vm3365_vm14 = vcmp.eq.f32.partialorder %v12092_v16, 0.0  ;;  %v2915_v26 = vadd.f32 %v12063_v36, %v14985_v14 }
 0x3e8   :  { %9399 = vrsqrt.f32 %v12102_v47  ;;  %v2916_v10 = vadd.f32 %v12063_v36, %v11767_v5  ;;  %v2917_v49 = vadd.f32 %v12063_v36, %v11544_v3  ;;  %v2918_v56 = vadd.f32 %v12063_v36, %v11813_v18 }
 0x3e9   :  { %9401 = vrsqrt.f32 %v12107_v52  ;;  %vm3370_vm12 = vcmp.eq.f32.partialorder %v12094_v37, inf  ;;  %vm3372_vm9 = vcmp.eq.f32.partialorder %v12094_v37, 0.0  ;;  %v3373_v58 = vand.u32 2147483648, %v12094_v37 }
 0x3ea   :  { %9403 = vrsqrt.f32 %v12110_v7  ;;  %v2978_v46 = vsub.f32 %v2914_v13, %v2946_v50  ;;  %vm3377_vm6 = vcmp.eq.f32.partialorder %v12102_v47, inf  ;;  %v2979_v57 = vsub.f32 %v2915_v26, %v2947_v19 }
 0x3eb   :  { %v2980_v14 = vsub.f32 %v2916_v10, %v2948_v6  ;;  %v2981_v9 = vsub.f32 %v2917_v49, %v2949_v60  ;;  %vm3379_vm1 = vcmp.eq.f32.partialorder %v12102_v47, 0.0  ;;  %v3380_v3 = vand.u32 2147483648, %v12102_v47 }
 0x3ec   :  { %vm3384_vm13 = vcmp.eq.f32.partialorder %v12107_v52, inf  ;;  %v12158_v5 = vmax.f32 %v2978_v46, 0.0  ;;  %vm3386_vm15 = vcmp.eq.f32.partialorder %v12107_v52, 0.0  ;;  %v12163_v33 = vmax.f32 %v2979_v57, 0.0 }
 0x3ed   :  { %v12165_v59 = vmax.f32 %v2980_v14, 0.0  ;;  %v2982_v50 = vsub.f32 %v2918_v56, %v2950_v17  ;;  %v3387_v42 = vand.u32 2147483648, %v12107_v52  ;;  %vm3391_vm0 = vcmp.eq.f32.partialorder %v12110_v7, inf }
 0x3ee   :  { %v12153_v1 = vpop.eup %9391  ;;  %9405 = vrsqrt.f32 %v12158_v5  ;;  %v12170_v19 = vmax.f32 %v2981_v9, 0.0  ;;  %vm3393_vm2 = vcmp.eq.f32.partialorder %v12110_v7, 0.0  ;;  %v3394_v26 = vand.u32 2147483648, %v12110_v7 }
 0x3ef   :  { %v12160_v18 = vpop.eup %9393  ;;  %9407 = vrsqrt.f32 %v12163_v33  ;;  %v2919_v49 = vadd.f32 %v12063_v36, %v15019_v2  ;;  %v2920_v56 = vadd.f32 %v12063_v36, %v11874_v63  ;;  %v12186_v9 = vmax.f32 %v2982_v50, 0.0 }
 0x3f0   :  { %v9396_v6 = vpop.eup %9395  ;;  %9409 = vrsqrt.f32 %v12165_v59 }
 0x3f1   :  { %v9398_v60 = vpop.eup %9397  ;;  %v3362_v13 = vmul.f32 %v9396_v6, %v12092_v16  ;;  %v2921_v6 = vadd.f32 %v12063_v36, %v15020_v25  ;;  %9411 = vrsqrt.f32 %v12170_v19 }
 0x3f2   :  { %v9400_v10 = vpop.eup %9399  ;;  %v3369_v17 = vmul.f32 %v9398_v60, %v12094_v37  ;;  %9413 = vrsqrt.f32 %v12186_v9 }
 0x3f3   :  { %v9402_v46 = vpop.eup %9401  ;;  %v3364_v57 = vsel %vm3363_vm4, %v12092_v16, %v3362_v13  ;;  %v3376_v14 = vmul.f32 %v9400_v10, %v12102_v47  ;;  %vm3398_vm4 = vcmp.eq.f32.partialorder %v12158_v5, inf }
 0x3f4   :  { %v9404_v60 = vpop.eup %9403  ;;  %v3367_v53 = vsel %vm3365_vm14, %v3366_v55, %v3364_v57  ;;  %v3371_v63 = vsel %vm3370_vm12, %v12094_v37, %v3369_v17  ;;  %v3383_v2 = vmul.f32 %v9402_v46, %v12107_v52  ;;  %v2984_v57 = vsub.f32 %v2920_v56, %v12125_v45 }
 0x3f5   :  { %v3502_v13 = vmul.f32 %v12153_v1, %v3367_v53  ;;  %v3374_v50 = vsel %vm3372_vm9, %v3373_v58, %v3371_v63  ;;  %v3378_v25 = vsel %vm3377_vm6, %v12102_v47, %v3376_v14  ;;  %v3390_v16 = vmul.f32 %v9404_v60, %v12110_v7 }
 0x3f6   :  { %v12205_v55 = vmul.f32 %v12153_v1, %v3374_v50  ;;  %v3381_v10 = vsel %vm3379_vm1, %v3380_v3, %v3378_v25  ;;  %v3385_v17 = vsel %vm3384_vm13, %v12107_v52, %v3383_v2  ;;  %v2983_v53 = vsub.f32 %v2919_v49, %v12128_v24  ;;  %v15044_v25 = vld [vmem:[#allocation12_spill] sm:$0xff] }
 0x3f7   :  { %v12214_v37 = vmul.f32 %v12153_v1, %v3381_v10  ;;  %v3388_v58 = vsel %vm3386_vm15, %v3387_v42, %v3385_v17  ;;  %v3392_v46 = vsel %vm3391_vm0, %v12110_v7, %v3390_v16  ;;  %v2985_v24 = vsub.f32 %v2921_v6, %v12131_v30 }
 0x3f8   :  { %v12223_v47 = vmul.f32 %v12153_v1, %v3388_v58  ;;  %v3395_v3 = vsel %vm3393_vm2, %v3394_v26, %v3392_v46  ;;  %vm3400_vm15 = vcmp.eq.f32.partialorder %v12158_v5, 0.0  ;;  %v3401_v52 = vand.u32 2147483648, %v12158_v5  ;;  %v9406_v45 = vpop.eup %9405  ;;  %v9611_v26 = vld [vmem:[%s14730_s25 + $0x80] sm:$0xff] }
 0x3f9   :  { %v12230_v49 = vmul.f32 %v12153_v1, %v3395_v3  ;;  %vm3405_vm0 = vcmp.eq.f32.partialorder %v12163_v33, inf  ;;  %vm3407_vm14 = vcmp.eq.f32.partialorder %v12163_v33, 0.0  ;;  %v3408_v7 = vand.u32 2147483648, %v12163_v33  ;;  %v9408_v42 = vpop.eup %9407  ;;  %v3630_v30 = vpop.trf.xlu0 }
 0x3fa   :  { %vm3412_vm2 = vcmp.eq.f32.partialorder %v12165_v59, inf  ;;  %v12242_v56 = vmul.f32 %v9611_v26, %v3502_v13  ;;  %v3397_v14 = vmul.f32 %v9406_v45, %v12158_v5  ;;  %vm3414_vm12 = vcmp.eq.f32.partialorder %v12165_v59, 0.0  ;;  %v9410_v60 = vpop.eup %9409  ;;  %8154 = vmatmul.mubr.f32.vlgmr.msra.gmra.mrb[48].mxu1 %v3630_v30 }
 0x3fb   :  { %v12246_v6 = vmax.f32 %v2983_v53, 0.0  ;;  %v3404_v63 = vmul.f32 %v9408_v42, %v12163_v33  ;;  %v3415_v2 = vand.u32 2147483648, %v12165_v59  ;;  %vm3419_vm9 = vcmp.eq.f32.partialorder %v12170_v19, inf  ;;  %8905 = vmatpush3.bf16.msra.mxu1 %v15044_v25  ;;  %v9412_v17 = vpop.eup %9411  ;;  %v15045_v53 = vld [vmem:[#allocation13_spill] sm:$0xff] }
 0x3fc   :  { %15043 = vst [vmem:[#allocation210_spill] sm:$0xff] %v12242_v56  ;;  %v12251_v50 = vmax.f32 %v2984_v57, 0.0  ;;  %8244 = vmatprep.mubr.f32.mxu1 %v12242_v56  ;;  %v3399_v13 = vsel %vm3398_vm4, %v12158_v5, %v3397_v14  ;;  %v3411_v16 = vmul.f32 %v9410_v60, %v12165_v59  ;;  %v3422_v10 = vand.u32 2147483648, %v12170_v19  ;;  %8907 = vmatprep.subr.bf16.mxu1 %v15045_v53  ;;  %v15046_v14 = vld [vmem:[#allocation14_spill] sm:$0xff] }
 0x3fd   :  { %9415 = vrsqrt.f32 %v12246_v6  ;;  %v3402_v58 = vsel %vm3400_vm15, %v3401_v52, %v3399_v13  ;;  %v3406_v46 = vsel %vm3405_vm0, %v12163_v33, %v3404_v63  ;;  %v12267_v57 = vmax.f32 %v2985_v24, 0.0  ;;  %v4155_v13 = vld [vmem:[%s14304_s7 + $0x18] sm:$0xff] }
 0x3fe   :  { %v2922_v3 = vadd.f32 %v12063_v36, %v11916_v12  ;;  %v12272_v45 = vmul.f32 %v12153_v1, %v3402_v58  ;;  %v3409_v42 = vsel %vm3407_vm14, %v3408_v7, %v3406_v46  ;;  %v3413_v5 = vsel %vm3412_vm2, %v12165_v59, %v3411_v16 }
 0x3ff   :  { %v3418_v52 = vmul.f32 %v9412_v17, %v12170_v19  ;;  %v12281_v30 = vmul.f32 %v12153_v1, %v3409_v42  ;;  %v3416_v24 = vsel %vm3414_vm12, %v3415_v2, %v3413_v5  ;;  %9417 = vrsqrt.f32 %v12251_v50  ;;  %8909 = vmatpush3.bf16.msra.mxu1 %v15045_v53  ;;  %v15047_v17 = vld [vmem:[#allocation15_spill] sm:$0xff] }
 0x400   :  { %v2923_v12 = vadd.f32 %v12063_v36, %v15022_v21  ;;  %v12290_v33 = vmul.f32 %v12153_v1, %v3416_v24  ;;  %vm3421_vm6 = vcmp.eq.f32.partialorder %v12170_v19, 0.0  ;;  %v2954_v26 = vmul.f32 2.0, %v11892_v4  ;;  %8911 = vmatprep.subr.bf16.mxu1 %v15046_v14  ;;  %v9414_v21 = vpop.eup %9413 }
 0x401   :  { %v3420_v7 = vsel %vm3419_vm9, %v12170_v19, %v3418_v52  ;;  %v2955_v59 = vmul.f32 2.0, %v11935_v38  ;;  %9419 = vrsqrt.f32 %v12267_v57  ;;  %v3425_v63 = vmul.f32 %v9414_v21, %v12186_v9  ;;  %v4154_v19 = vld [vmem:[%s14304_s7 + $0x10] sm:$0xff] }
 0x402   :  { %v3423_v60 = vsel %vm3421_vm6, %v3422_v10, %v3420_v7  ;;  %v2986_v2 = vsub.f32 %v2922_v3, %v2954_v26  ;;  %vm3426_vm1 = vcmp.eq.f32.partialorder %v12186_v9, inf  ;;  %v3429_v16 = vand.u32 2147483648, %v12186_v9  ;;  %v15048_v26 = vld [vmem:[#allocation16_spill] sm:$0xff] }
 0x403   :  { %v12301_v36 = vmul.f32 %v12153_v1, %v3423_v60  ;;  %v2987_v25 = vsub.f32 %v2923_v12, %v2955_v59  ;;  %8913 = vmatpush3.bf16.msra.mxu1 %v15046_v14  ;;  %v3467_v10 = vmul.f32 %v12160_v18, %v12090_v32  ;;  %v3427_v53 = vsel %vm3426_vm1, %v12186_v9, %v3425_v63 }
 0x404   :  { %8915 = vmatprep.subr.bf16.mxu1 %v15047_v17  ;;  %vm3428_vm13 = vcmp.eq.f32.partialorder %v12186_v9, 0.0  ;;  %v3018_v58 = vmax.f32 %v2986_v2, 0.0  ;;  %vm3468_vm4 = vcmp.eq.f32.partialorder %v12090_v32, inf  ;;  %v8938_v5 = vpack.c.bf16 %v4155_v13, %v4154_v19  ;;  %v15049_v13 = vld [vmem:[#allocation17_spill] sm:$0xff] }
 0x405   :  { %v3019_v46 = vmax.f32 %v2987_v25, 0.0  ;;  %v3430_v42 = vsel %vm3428_vm13, %v3429_v16, %v3427_v53  ;;  %v3469_v18 = vsel %vm3468_vm4, %v12090_v32, %v3467_v10  ;;  %vm3433_vm15 = vcmp.eq.f32.partialorder %v12246_v6, inf }
 0x406   :  { %v12320_v52 = vmul.f32 %v12153_v1, %v3430_v42  ;;  %9421 = vrsqrt.f32 %v3018_v58  ;;  %v3436_v9 = vand.u32 2147483648, %v12246_v6  ;;  %v3471_v12 = vand.u32 2147483648, %v12090_v32  ;;  %8939 = vmatprep.subr.bf16.mxu0 %v8938_v5 }
 0x407   :  { %v9416_v3 = vpop.eup %9415  ;;  %8917 = vmatpush3.bf16.msra.mxu1 %v15047_v17  ;;  %9423 = vrsqrt.f32 %v3019_v46  ;;  %vm3435_vm0 = vcmp.eq.f32.partialorder %v12246_v6, 0.0  ;;  %vm3470_vm14 = vcmp.eq.f32.partialorder %v12090_v32, 0.0  ;;  %8941 = vmatpush3.bf16.msra.mxu0 %v8938_v5  ;;  %vm3440_vm2 = vcmp.eq.f32.partialorder %v12251_v50, inf  ;;  %v15050_v5 = vld [vmem:[#allocation18_spill] sm:$0xff] }
 0x408   :  { %v3432_v24 = vmul.f32 %v9416_v3, %v12246_v6  ;;  %8919 = vmatprep.subr.bf16.mxu1 %v15048_v26  ;;  %v3472_v21 = vsel %vm3470_vm14, %v3471_v12, %v3469_v18  ;;  %v3443_v25 = vand.u32 2147483648, %v12251_v50  ;;  %vm3442_vm12 = vcmp.eq.f32.partialorder %v12251_v50, 0.0 }
 0x409   :  { %v9418_v7 = vpop.eup %9417  ;;  %v12339_v19 = vmul.f32 %v12153_v1, %v3472_v21  ;;  %vm3447_vm9 = vcmp.eq.f32.partialorder %v12267_v57, inf  ;;  %v3450_v10 = vand.u32 2147483648, %v12267_v57  ;;  %vm3449_vm6 = vcmp.eq.f32.partialorder %v12267_v57, 0.0 }
 0x40a   :  { %v3434_v59 = vsel %vm3433_vm15, %v12246_v6, %v3432_v24  ;;  %v3439_v60 = vmul.f32 %v9418_v7, %v12251_v50  ;;  %vm3454_vm1 = vcmp.eq.f32.partialorder %v3018_v58, inf  ;;  %vm3456_vm13 = vcmp.eq.f32.partialorder %v3018_v58, 0.0 }
 0x40b   :  { %v3437_v14 = vsel %vm3435_vm0, %v3436_v9, %v3434_v59  ;;  %v9420_v63 = vpop.eup %9419  ;;  %8921 = vmatpush3.bf16.msra.mxu1 %v15048_v26  ;;  %v3457_v9 = vand.u32 2147483648, %v3018_v58  ;;  %vm3461_vm4 = vcmp.eq.f32.partialorder %v3019_v46, inf  ;;  %v3464_v26 = vand.u32 2147483648, %v3019_v46 }
 0x40c   :  { %v12334_v2 = vmul.f32 %v12153_v1, %v3437_v14  ;;  %v3441_v32 = vsel %vm3440_vm2, %v12251_v50, %v3439_v60  ;;  %v3446_v6 = vmul.f32 %v9420_v63, %v12267_v57  ;;  %8923 = vmatprep.subr.bf16.mxu1 %v15049_v13  ;;  %vm3463_vm15 = vcmp.eq.f32.partialorder %v3019_v46, 0.0 }
 0x40d   :  { %v3444_v16 = vsel %vm3442_vm12, %v3443_v25, %v3441_v32  ;;  %v9612_v25 = vld [vmem:[%s14730_s25 + $0x88] sm:$0xff]  ;;  %v9613_v32 = vld [vmem:[%s14730_s25 + $0x90] sm:$0xff]  ;;  %vm15068_vm0 = vcmask 261120  }
 0x40e   :  { %v3513_v17 = vmul.f32 %v12153_v1, %v3444_v16  ;;  %v3448_v53 = vsel %vm3447_vm9, %v12267_v57, %v3446_v6  ;;  %v15051_v57 = vld [vmem:[#allocation19_spill] sm:$0xff]  ;;  %vm15069_vm14 = vmmov %vm15068_vm0 }
 0x40f   :  { %v3451_v3 = vsel %vm3449_vm6, %v3450_v10, %v3448_v53  ;;  %8925 = vmatpush3.bf16.msra.mxu1 %v15049_v13  ;;  %vm15070_vm2 = vmmov %vm15068_vm0 }
 0x410   :  { %v3514_v50 = vmul.f32 %v12153_v1, %v3451_v3  ;;  %v9422_v42 = vpop.eup %9421  ;;  %8927 = vmatprep.subr.bf16.mxu1 %v15050_v5  ;;  %vm15071_vm12 = vmmov %vm15068_vm0 }
 0x411   :  { %v9424_v24 = vpop.eup %9423  ;;  %v3453_v18 = vmul.f32 %v9422_v42, %v3018_v58  ;;  %vm15072_vm9 = vmmov %vm15068_vm0 }
 0x412   :  { %v3460_v12 = vmul.f32 %v9424_v24, %v3019_v46  ;;  %vm15073_vm6 = vmmov %vm15068_vm0 }
 0x413   :  { %8929 = vmatpush3.bf16.msra.mxu1 %v15050_v5  ;;  %v3455_v7 = vsel %vm3454_vm1, %v3018_v58, %v3453_v18  ;;  %v12363_v58 = vmul.f32 %v9612_v25, %v12205_v55  ;;  %v9615_v55 = vld [vmem:[%s14730_s25 + $0xa0] sm:$0xff]  ;;  %vm15074_vm1 = vmmov %vm15068_vm0 }
 0x414   :  { %8931 = vmatprep.subr.bf16.mxu1 %v15051_v57  ;;  %v3458_v59 = vsel %vm3456_vm13, %v3457_v9, %v3455_v7  ;;  %v3462_v14 = vsel %vm3461_vm4, %v3019_v46, %v3460_v12  ;;  %v12369_v46 = vmul.f32 %v9613_v32, %v12214_v37  ;;  %v12383_v13 = vmul.f32 %v9615_v55, %v12230_v49  ;;  %v9616_v37 = vld [vmem:[%s14730_s25 + $0xa8] sm:$0xff]  ;;  %v9618_v49 = vld [vmem:[%s14730_s25 + $0xb8] sm:$0xff]  ;;  %vm15075_vm13 = vmmov %vm15068_vm0 }
 0x415   :  { %v3515_v60 = vmul.f32 %v12153_v1, %v3458_v59  ;;  %v3465_v21 = vsel %vm3463_vm15, %v3464_v26, %v3462_v14  ;;  %15052 = vst [vmem:[#allocation12_spill] sm:$0xff] %v12363_v58  ;;  %v12391_v16 = vmul.f32 %v9616_v37, %v12272_v45  ;;  %v12405_v53 = vmul.f32 %v9618_v49, %v12290_v33  ;;  %v9619_v45 = vld [vmem:[%s14730_s25 + $0xc0] sm:$0xff]  ;;  %v9621_v33 = vld [vmem:[%s14730_s25 + $0xd0] sm:$0xff]  ;;  %v4517_v14 = vld [vmem:[%s14306_s9 + $0x8] sm:$0xff] }
 0x416   :  { %v3516_v63 = vmul.f32 %v12153_v1, %v3465_v21  ;;  %15053 = vst [vmem:[#allocation13_spill] sm:$0xff] %v12369_v46  ;;  %v9614_v1 = vld [vmem:[%s14730_s25 + $0x98] sm:$0xff]  ;;  %15055 = vst [vmem:[#allocation15_spill] sm:$0xff] %v12383_v13  ;;  %v12411_v3 = vmul.f32 %v9619_v45, %v12301_v36  ;;  %v12425_v5 = vmul.f32 %v9621_v33, %v12334_v2  ;;  %v9624_v2 = vld [vmem:[%s14730_s25 + $0xe8] sm:$0xff] }
 0x417   :  { %8933 = vmatpush3.bf16.msra.mxu1 %v15051_v57  ;;  %v12377_v6 = vmul.f32 %v9614_v1, %v12223_v47  ;;  %15056 = vst [vmem:[#allocation16_spill] sm:$0xff] %v12391_v16  ;;  %v9617_v47 = vld [vmem:[%s14730_s25 + $0xb0] sm:$0xff]  ;;  %15058 = vst [vmem:[#allocation18_spill] sm:$0xff] %v12405_v53  ;;  %v9622_v36 = vld [vmem:[%s14730_s25 + $0xd8] sm:$0xff]  ;;  %v12444_v9 = vmul.f32 %v9624_v2, %v3515_v60 }
 0x418   :  { %v12397_v10 = vmul.f32 %v9617_v47, %v12281_v30  ;;  %15059 = vst [vmem:[#allocation19_spill] sm:$0xff] %v12411_v3  ;;  %v9620_v30 = vld [vmem:[%s14730_s25 + $0xc8] sm:$0xff]  ;;  %15061 = vst [vmem:[#allocation212_spill] sm:$0xff] %v12425_v5  ;;  %v12432_v24 = vmul.f32 %v9622_v36, %v3513_v17  ;;  %v9625_v17 = vld [vmem:[%s14730_s25 + $0xf0] sm:$0xff] }
 0x419   :  { %15054 = vst [vmem:[#allocation14_spill] sm:$0xff] %v12377_v6  ;;  %v12419_v42 = vmul.f32 %v9620_v30, %v12320_v52  ;;  %v9623_v52 = vld [vmem:[%s14730_s25 + $0xe0] sm:$0xff]  ;;  %15064 = vst [vmem:[#allocation215_spill] sm:$0xff] %v12444_v9  ;;  %v12449_v12 = vmul.f32 %v9625_v17, %v3516_v63 }
 0x41a   :  { %8245 = vmatmul.mubr.f32.vlgmr.msra.gmra.mrb[50].mxu1 %v12363_v58  ;;  %15057 = vst [vmem:[#allocation17_spill] sm:$0xff] %v12397_v10  ;;  %15062 = vst [vmem:[#allocation213_spill] sm:$0xff] %v12432_v24  ;;  %v12437_v18 = vmul.f32 %v9623_v52, %v3514_v50  ;;  %v9626_v50 = vld [vmem:[%s14730_s25 + $0xf8] sm:$0xff]  ;;  %v4516_v59 = vld [vmem:[%s14306_s9] sm:$0xff] }
 0x41b   :  { %8247 = vmatprep.mubr.f32.mxu1 %v12369_v46  ;;  %15060 = vst [vmem:[#allocation211_spill] sm:$0xff] %v12419_v42  ;;  %15065 = vst [vmem:[#allocation216_spill] sm:$0xff] %v12449_v12  ;;  %v12457_v7 = vmul.f32 %v9626_v50, %v12339_v19  ;;  %v8942_v60 = vpack.c.bf16 %v4517_v14, %v4516_v59  ;;  %v4519_v59 = vld [vmem:[%s14306_s9 + $0x18] sm:$0xff] }
 0x41c   :  { %15063 = vst [vmem:[#allocation214_spill] sm:$0xff] %v12437_v18  ;;  %vm15076_vm4 = vmmov %vm15068_vm0 }
 0x41d   :  { %15066 = vst [vmem:[#allocation217_spill] sm:$0xff] %v12457_v7  ;;  %8943 = vmatprep.subr.bf16.mxu1 %v8942_v60  ;;  %vm15077_vm15 = vmmov %vm15068_vm0 }
 0x41e   :  { %8248 = vmatmul.mubr.f32.gmra.mrb[52].mxu1 %v12377_v6 }
 0x41f   :  { %8250 = vmatprep.mubr.f32.mxu1 %v12383_v13  ;;  %8945 = vmatpush3.bf16.msra.mxu1 %v8942_v60 }
 0x422   :  { %8251 = vmatmul.mubr.f32.gmra.mrb[54].mxu1 %v12391_v16 }
 0x423   :  { %8253 = vmatprep.mubr.f32.mxu1 %v12397_v10 }
 0x426   :  { %8254 = vmatmul.mubr.f32.gmra.mrb[56].mxu1 %v12405_v53 }
 0x427   :  { %8256 = vmatprep.mubr.f32.mxu1 %v12411_v3 }
 0x42a   :  { %8257 = vmatmul.mubr.f32.gmra.mrb[58].mxu1 %v12419_v42 }
 0x42b   :  { %8259 = vmatprep.mubr.f32.mxu1 %v12425_v5  ;;  %v15184_v5 = vld [vmem:[#allocation45_spill] sm:$0xff] }
 0x42e   :  { %8260 = vmatmul.mubr.f32.gmra.mrb[60].mxu1 %v12432_v24 }
 0x42f   :  { %8262 = vmatprep.mubr.f32.mxu1 %v12437_v18  ;;  %v15172_v18 = vld [vmem:[#allocation37_spill] sm:$0xff] }
 0x432   :  { %8263 = vmatmul.mubr.f32.gmra.mrb[62].mxu1 %v12444_v9 }
 0x433   :  { %8265 = vmatprep.mubr.f32.mxu1 %v12449_v12  ;;  %v15160_v12 = vld [vmem:[#allocation31_spill] sm:$0xff] }
 0x436   :  { %8266 = vmatmul.mubr.f32.gmra.mrb[64].mxu1 %v12457_v7 }
 0x470   :  { %v12460_v26 = vpop.f32.mrb[48].mxu0 }
 0x471   :  { %15067 = vst [vmem:[#allocation218_spill] sm:$0xff] %v12460_v26  ;;  %v8120_v57 = vpop.f32.mrb[49].mxu0 }
 0x472   :  { %v4518_v57 = vld [vmem:[%s14306_s9 + $0x10] sm:$0xff] }
 0x473   :  { %v8946_v60 = vpack.c.bf16 %v4519_v59, %v4518_v57 }
 0x475   :  { %8947 = vmatprep.subr.bf16.mxu1 %v8946_v60 }
 0x476   :  { %8949 = vmatpush3.bf16.msra.mxu1 %v8946_v60  ;;  %v15098_v60 = vld [vmem:[#allocation40_spill] sm:$0xff] }
 0x490   :  { %v8190_v21 = vpop.f32.mrb[50].mxu0 }
 0x491   :  { %v3928_v63 = vpop.f32.mrb[51].mxu0 }
 0x492   :  { %8276 = vmatprep.mubr.msk.f32.mxu0 %vm15068_vm0, %v3928_v63 }
 0x493   :  { %8277 = vmatmul.mubr.msk.f32.vlgmr.msra.gmra.mrb[66].mxu0 %vm15069_vm14, %v8190_v21  ;;  %vm15078_vm14 = vmmov %vm15068_vm0 }
 0x494   :  { %v8193_v19 = vpop.f32.mrb[52].mxu0 }
 0x495   :  { %v3938_v25 = vpop.f32.mrb[53].mxu0 }
 0x496   :  { %8279 = vmatprep.mubr.msk.f32.mxu0 %vm15070_vm2, %v3938_v25  ;;  %vm15079_vm2 = vmmov %vm15068_vm0 }
 0x497   :  { %8280 = vmatmul.mubr.msk.f32.gmra.mrb[68].mxu0 %vm15071_vm12, %v8193_v19  ;;  %vm15080_vm12 = vmmov %vm15068_vm0 }
 0x498   :  { %v8196_v32 = vpop.f32.mrb[54].mxu0 }
 0x499   :  { %v3948_v1 = vpop.f32.mrb[55].mxu0 }
 0x49a   :  { %8282 = vmatprep.mubr.msk.f32.mxu0 %vm15072_vm9, %v3948_v1  ;;  %vm15081_vm9 = vmmov %vm15068_vm0 }
 0x49b   :  { %8283 = vmatmul.mubr.msk.f32.gmra.mrb[70].mxu0 %vm15073_vm6, %v8196_v32  ;;  %vm15082_vm6 = vmmov %vm15068_vm0 }
 0x49e   :  { %v8199_v55 = vpop.f32.mrb[56].mxu0 }
 0x49f   :  { %v3958_v37 = vpop.f32.mrb[57].mxu0 }
 0x4a0   :  { %8285 = vmatprep.mubr.msk.f32.mxu0 %vm15074_vm1, %v3958_v37  ;;  %vm15084_vm1 = vmmov %vm15068_vm0 }
 0x4a1   :  { %8286 = vmatmul.mubr.msk.f32.gmra.mrb[72].mxu0 %vm15075_vm13, %v8199_v55  ;;  %vm15085_vm13 = vmmov %vm15068_vm0 }
 0x4a9   :  { %v8202_v47 = vpop.f32.mrb[58].mxu0 }
 0x4aa   :  { %v3968_v49 = vpop.f32.mrb[59].mxu0 }
 0x4ab   :  { %8288 = vmatprep.mubr.msk.f32.mxu0 %vm15076_vm4, %v3968_v49  ;;  %vm15086_vm4 = vmmov %vm15068_vm0 }
 0x4ac   :  { %8289 = vmatmul.mubr.msk.f32.gmra.mrb[74].mxu0 %vm15077_vm15, %v8202_v47  ;;  %vm15087_vm15 = vmmov %vm15068_vm0 }
 0x4ad   :  { %v8205_v45 = vpop.f32.mrb[60].mxu0 }
 0x4ae   :  { %v3978_v30 = vpop.f32.mrb[61].mxu0 }
 0x4af   :  { %8291 = vmatprep.mubr.msk.f32.mxu0 %vm15068_vm0, %v3978_v30 }
 0x4b0   :  { %8292 = vmatmul.mubr.msk.f32.gmra.mrb[76].mxu0 %vm15078_vm14, %v8205_v45  ;;  %vm15088_vm14 = vmmov %vm15068_vm0 }
 0x4b5   :  { %v8208_v33 = vpop.f32.mrb[62].mxu0 }
 0x4b6   :  { %v3988_v36 = vpop.f32.mrb[63].mxu0 }
 0x4b7   :  { %8294 = vmatprep.mubr.msk.f32.mxu0 %vm15079_vm2, %v3988_v36  ;;  %vm15089_vm2 = vmmov %vm15068_vm0 }
 0x4b8   :  { %8295 = vmatmul.mubr.msk.f32.gmra.mrb[78].mxu0 %vm15080_vm12, %v8208_v33  ;;  %vm15090_vm12 = vmmov %vm15068_vm0 }
 0x4ba   :  { %v8211_v52 = vpop.f32.mrb[64].mxu0 }
 0x4bb   :  { %v3998_v2 = vpop.f32.mrb[65].mxu0 }
 0x4bc   :  { %8297 = vmatprep.mubr.msk.f32.mxu0 %vm15081_vm9, %v3998_v2  ;;  %vm15091_vm9 = vmmov %vm15068_vm0  ;;  %v12511_v2 = vld [vmem:[%s14305_s8] ss:$0 sm:$0xff] }
 0x4bd   :  { %8298 = vmatmul.mubr.msk.f32.gmra.mrb[80].mxu0 %vm15082_vm6, %v8211_v52  ;;  %vm15092_vm6 = vmmov %vm15068_vm0 }
 0x4cd   :  { %v12484_v17 = vpop.f32.mrb[48].mxu1 }
 0x4ce   :  { %15083 = vst [vmem:[#allocation219_spill] sm:$0xff] %v12484_v17  ;;  %v8155_v50 = vpop.f32.mrb[49].mxu1  ;;  %v15155_v17 = vld [vmem:[#allocation27_spill] sm:$0xff] }
 0x4ed   :  { %v8246_v14 = vpop.f32.mrb[50].mxu1 }
 0x4ee   :  { %v4073_v21 = vpop.f32.mrb[51].mxu1 }
 0x4ef   :  { %8300 = vmatprep.mubr.msk.f32.mxu0 %vm15084_vm1, %v4073_v21  ;;  %vm15093_vm1 = vmmov %vm15068_vm0 }
 0x4f0   :  { %8301 = vmatmul.mubr.msk.f32.gmra.mrb[82].mxu0 %vm15085_vm13, %v8246_v14  ;;  %vm15094_vm13 = vmmov %vm15068_vm0 }
 0x4f1   :  { %v8249_v63 = vpop.f32.mrb[52].mxu1 }
 0x4f2   :  { %v4083_v19 = vpop.f32.mrb[53].mxu1 }
 0x4f3   :  { %8303 = vmatprep.mubr.msk.f32.mxu0 %vm15086_vm4, %v4083_v19  ;;  %vm15095_vm4 = vmmov %vm15068_vm0 }
 0x4f4   :  { %8304 = vmatmul.mubr.msk.f32.gmra.mrb[84].mxu0 %vm15087_vm15, %v8249_v63  ;;  %vm15096_vm15 = vmmov %vm15068_vm0  ;;  %v15099_v63 = vld [vmem:[#allocation42_spill] sm:$0xff] }
 0x4f5   :  { %v8252_v25 = vpop.f32.mrb[54].mxu1 }
 0x4f6   :  { %v4093_v32 = vpop.f32.mrb[55].mxu1 }
 0x4f7   :  { %8306 = vmatprep.mubr.msk.f32.mxu0 %vm15068_vm0, %v4093_v32  ;;  %v15100_v32 = vld [vmem:[#allocation21_spill] sm:$0xff] }
 0x4f8   :  { %8307 = vmatmul.mubr.msk.f32.gmra.mrb[86].mxu0 %vm15088_vm14, %v8252_v25  ;;  %vm15097_vm14 = vmmov %vm15068_vm0 }
 0x4f9   :  { %v8255_v1 = vpop.f32.mrb[56].mxu1 }
 0x4fa   :  { %v4103_v55 = vpop.f32.mrb[57].mxu1 }
 0x4fb   :  { %8309 = vmatprep.mubr.msk.f32.mxu0 %vm15089_vm2, %v4103_v55  ;;  %vm15102_vm2 = vmmov %vm15068_vm0 }
 0x4fc   :  { %8310 = vmatmul.mubr.msk.f32.gmra.mrb[88].mxu0 %vm15090_vm12, %v8255_v1  ;;  %vm15104_vm12 = vmmov %vm15068_vm0 }
 0x4fd   :  { %v8258_v37 = vpop.f32.mrb[58].mxu1 }
 0x4fe   :  { %v4113_v47 = vpop.f32.mrb[59].mxu1 }
 0x4ff   :  { %8312 = vmatprep.mubr.msk.f32.mxu0 %vm15091_vm9, %v4113_v47  ;;  %v15101_v47 = vld [vmem:[#allocation20_spill] sm:$0xff]  ;;  %vm15108_vm9 = vmmov %vm15068_vm0 }
 0x500   :  { %8313 = vmatmul.mubr.msk.f32.gmra.mrb[90].mxu0 %vm15092_vm6, %v8258_v37  ;;  %vm15110_vm6 = vmmov %vm15068_vm0 }
 0x501   :  { %v8261_v49 = vpop.f32.mrb[60].mxu1 }
 0x502   :  { %v4123_v45 = vpop.f32.mrb[61].mxu1 }
 0x503   :  { %8315 = vmatprep.mubr.msk.f32.mxu0 %vm15093_vm1, %v4123_v45  ;;  %vm15114_vm1 = vmmov %vm15068_vm0 }
 0x504   :  { %8316 = vmatmul.mubr.msk.f32.gmra.mrb[92].mxu0 %vm15094_vm13, %v8261_v49  ;;  %vm15115_vm13 = vmmov %vm15068_vm0 }
 0x505   :  { %v8264_v30 = vpop.f32.mrb[62].mxu1 }
 0x506   :  { %v4133_v33 = vpop.f32.mrb[63].mxu1 }
 0x507   :  { %8318 = vmatprep.mubr.msk.f32.mxu0 %vm15095_vm4, %v4133_v33  ;;  %vm15120_vm4 = vmmov %vm15068_vm0 }
 0x508   :  { %8319 = vmatmul.mubr.msk.f32.gmra.mrb[94].mxu0 %vm15096_vm15, %v8264_v30  ;;  %v15103_v30 = vld [vmem:[#allocation43_spill] sm:$0xff]  ;;  %vm15121_vm15 = vmmov %vm15068_vm0 }
 0x509   :  { %v8267_v36 = vpop.f32.mrb[64].mxu1 }
 0x50a   :  { %v4143_v52 = vpop.f32.mrb[65].mxu1 }
 0x50b   :  { %8321 = vmatprep.mubr.msk.f32.mxu0 %vm15068_vm0, %v4143_v52 }
 0x50c   :  { %8322 = vmatmul.mubr.msk.f32.gmra.mrb[96].mxu0 %vm15097_vm14, %v8267_v36  ;;  %v15105_v36 = vld [vmem:[#allocation44_spill] sm:$0xff]  ;;  %vm15127_vm14 = vmmov %vm15068_vm0 }
 0x566   :  { %v8278_v50 = vpop.f32.mrb[66].mxu0 }
 0x567   :  { %v4331_v57 = vadd.f32 %v8278_v50, %v12511_v2  ;;  %v4325_v59 = vpop.f32.mrb[67].mxu0 }
 0x568   :  { %v4326_v14 = vadd.f32 %v12511_v2, %v4325_v59  ;;  %v15106_v59 = vld [vmem:[#allocation30_spill] sm:$0xff] }
 0x569   :  { %v4485_v21 = vadd.f32 %v4331_v57, %v15098_v60 }
 0x56a   :  { %v4484_v19 = vadd.f32 %v4326_v14, %v15099_v63  ;;  %v8281_v25 = vpop.f32.mrb[68].mxu0 }
 0x56b   :  { %v5234_v1 = vmul.f32 %v4485_v21, %v15100_v32  ;;  %v4341_v55 = vadd.f32 %v8281_v25, %v12511_v2  ;;  %v4335_v37 = vpop.f32.mrb[69].mxu0  ;;  %v15107_v25 = vld [vmem:[#allocation28_spill] sm:$0xff] }
 0x56c   :  { %v5233_v49 = vmul.f32 %v4484_v19, %v15101_v47  ;;  %v4336_v45 = vadd.f32 %v12511_v2, %v4335_v37  ;;  %8332 = vmatprep.mubr.msk.f32.mxu1 %vm15102_vm2, %v4484_v19  ;;  %v15109_v19 = vld [vmem:[#allocation47_spill] sm:$0xff]  ;;  %vm15131_vm2 = vmmov %vm15068_vm0 }
 0x56d   :  { %v4487_v33 = vadd.f32 %v4341_v55, %v15103_v30  ;;  %8333 = vmatmul.mubr.msk.f32.vlgmr.msra.gmra.mrb[66].mxu1 %vm15104_vm12, %v4485_v21  ;;  %v15111_v21 = vld [vmem:[#allocation48_spill] sm:$0xff]  ;;  %v15113_v30 = vld [vmem:[#allocation22_spill] sm:$0xff]  ;;  %vm15132_vm12 = vmmov %vm15068_vm0 }
 0x56e   :  { %v4486_v52 = vadd.f32 %v4336_v45, %v15105_v36  ;;  %v8284_v50 = vpop.f32.mrb[70].mxu0  ;;  %v8950_v57 = vpack.c.bf16 %v5234_v1, %v5233_v49  ;;  %v15112_v49 = vld [vmem:[#allocation32_spill] sm:$0xff] }
 0x56f   :  { %v5236_v14 = vmul.f32 %v4487_v33, %v15106_v59  ;;  %v4351_v60 = vadd.f32 %v8284_v50, %v12511_v2  ;;  %v4345_v63 = vpop.f32.mrb[71].mxu0 }
 0x570   :  { %v5235_v38 = vmul.f32 %v4486_v52, %v15107_v25  ;;  %v4346_v4 = vadd.f32 %v12511_v2, %v4345_v63  ;;  %8335 = vmatprep.mubr.msk.f32.mxu1 %vm15108_vm9, %v4486_v52  ;;  %8951 = vmatprep.subr.bf16.mxu0 %v8950_v57  ;;  %vm15137_vm9 = vmmov %vm15068_vm0 }
 0x571   :  { %v4489_v55 = vadd.f32 %v4351_v60, %v15109_v19  ;;  %8336 = vmatmul.mubr.msk.f32.gmra.mrb[68].mxu1 %vm15110_vm6, %v4487_v33  ;;  %8953 = vmatpush3.bf16.msra.mxu0 %v8950_v57  ;;  %v15116_v57 = vld [vmem:[#allocation50_spill] sm:$0xff]  ;;  %vm15138_vm6 = vmmov %vm15068_vm0 }
 0x572   :  { %v4488_v37 = vadd.f32 %v4346_v4, %v15111_v21  ;;  %v8954_v1 = vpack.c.bf16 %v5236_v14, %v5235_v38  ;;  %v15117_v38 = vld [vmem:[#allocation52_spill] sm:$0xff]  ;;  %v15118_v19 = vld [vmem:[#allocation34_spill] sm:$0xff] }
 0x573   :  { %v5238_v45 = vmul.f32 %v4489_v55, %v15112_v49 }
 0x574   :  { %v5237_v36 = vmul.f32 %v4488_v37, %v15113_v30  ;;  %8338 = vmatprep.mubr.msk.f32.mxu1 %vm15114_vm1, %v4488_v37  ;;  %8955 = vmatprep.subr.bf16.mxu0 %v8954_v1  ;;  %v8287_v50 = vpop.f32.mrb[72].mxu0  ;;  %v15119_v37 = vld [vmem:[#allocation23_spill] sm:$0xff]  ;;  %vm15143_vm1 = vmmov %vm15068_vm0 }
 0x575   :  { %8339 = vmatmul.mubr.msk.f32.gmra.mrb[70].mxu1 %vm15115_vm13, %v4489_v55  ;;  %8957 = vmatpush3.bf16.msra.mxu0 %v8954_v1  ;;  %v4361_v52 = vadd.f32 %v8287_v50, %v12511_v2  ;;  %v4355_v60 = vpop.f32.mrb[73].mxu0  ;;  %vm15144_vm13 = vmmov %vm15068_vm0 }
 0x576   :  { %v8958_v63 = vpack.c.bf16 %v5238_v45, %v5237_v36  ;;  %v4356_v33 = vadd.f32 %v12511_v2, %v4355_v60 }
 0x577   :  { %v4491_v4 = vadd.f32 %v4361_v52, %v15116_v57  ;;  %v15122_v52 = vld [vmem:[#allocation53_spill] sm:$0xff] }
 0x578   :  { %8959 = vmatprep.subr.bf16.mxu0 %v8958_v63  ;;  %v4490_v14 = vadd.f32 %v4356_v33, %v15117_v38  ;;  %v15124_v38 = vld [vmem:[#allocation36_spill] sm:$0xff] }
 0x579   :  { %8961 = vmatpush3.bf16.msra.mxu0 %v8958_v63  ;;  %v5240_v21 = vmul.f32 %v4491_v4, %v15118_v19  ;;  %v15123_v63 = vld [vmem:[#allocation55_spill] sm:$0xff] }
 0x57a   :  { %v5239_v41 = vmul.f32 %v4490_v14, %v15119_v37  ;;  %8341 = vmatprep.mubr.msk.f32.mxu1 %vm15120_vm4, %v4490_v14  ;;  %vm15150_vm4 = vmmov %vm15068_vm0 }
 0x57b   :  { %8342 = vmatmul.mubr.msk.f32.gmra.mrb[72].mxu1 %vm15121_vm15, %v4491_v4  ;;  %v15125_v4 = vld [vmem:[#allocation24_spill] sm:$0xff]  ;;  %vm15152_vm15 = vmmov %vm15068_vm0 }
 0x57c   :  { %v8962_v55 = vpack.c.bf16 %v5240_v21, %v5239_v41 }
 0x57e   :  { %8963 = vmatprep.subr.bf16.mxu0 %v8962_v55 }
 0x57f   :  { %v8290_v1 = vpop.f32.mrb[74].mxu0  ;;  %8965 = vmatpush3.bf16.msra.mxu0 %v8962_v55  ;;  %v15126_v55 = vld [vmem:[#allocation59_spill] sm:$0xff] }
 0x580   :  { %v4371_v45 = vadd.f32 %v8290_v1, %v12511_v2  ;;  %v4365_v36 = vpop.f32.mrb[75].mxu0 }
 0x581   :  { %v4366_v50 = vadd.f32 %v12511_v2, %v4365_v36  ;;  %v15128_v36 = vld [vmem:[#allocation60_spill] sm:$0xff] }
 0x582   :  { %v4493_v60 = vadd.f32 %v4371_v45, %v15122_v52 }
 0x583   :  { %v4492_v33 = vadd.f32 %v4366_v50, %v15123_v63  ;;  %v8293_v57 = vpop.f32.mrb[76].mxu0  ;;  %v15129_v50 = vld [vmem:[#allocation41_spill] sm:$0xff] }
 0x584   :  { %v5242_v15 = vmul.f32 %v4493_v60, %v15124_v38  ;;  %v4381_v14 = vadd.f32 %v8293_v57, %v12511_v2  ;;  %v4375_v23 = vpop.f32.mrb[77].mxu0 }
 0x585   :  { %v5241_v41 = vmul.f32 %v4492_v33, %v15125_v4  ;;  %v4376_v21 = vadd.f32 %v12511_v2, %v4375_v23  ;;  %8344 = vmatprep.mubr.msk.f32.mxu1 %vm15068_vm0, %v4492_v33 }
 0x586   :  { %v4495_v1 = vadd.f32 %v4381_v14, %v15126_v55  ;;  %8345 = vmatmul.mubr.msk.f32.gmra.mrb[74].mxu1 %vm15127_vm14, %v4493_v60  ;;  %v15133_v55 = vld [vmem:[#allocation62_spill] sm:$0xff]  ;;  %vm15157_vm14 = vmmov %vm15068_vm0 }
 0x587   :  { %v4494_v45 = vadd.f32 %v4376_v21, %v15128_v36  ;;  %v8966_v52 = vpack.c.bf16 %v5242_v15, %v5241_v41  ;;  %v15134_v15 = vld [vmem:[#allocation65_spill] sm:$0xff]  ;;  %v15135_v36 = vld [vmem:[#allocation51_spill] sm:$0xff] }
 0x588   :  { %v5244_v63 = vmul.f32 %v4495_v1, %v15129_v50 }
 0x589   :  { %v5243_v22 = vmul.f32 %v4494_v45, %v15130_v27  ;;  %8347 = vmatprep.mubr.msk.f32.mxu1 %vm15131_vm2, %v4494_v45  ;;  %8967 = vmatprep.subr.bf16.mxu0 %v8966_v52  ;;  %vm15161_vm2 = vmmov %vm15068_vm0 }
 0x58a   :  { %8348 = vmatmul.mubr.msk.f32.gmra.mrb[76].mxu1 %vm15132_vm12, %v4495_v1  ;;  %8969 = vmatpush3.bf16.msra.mxu0 %v8966_v52  ;;  %vm15163_vm12 = vmmov %vm15068_vm0 }
 0x58b   :  { %v8296_v57 = vpop.f32.mrb[78].mxu0  ;;  %v8970_v14 = vpack.c.bf16 %v5244_v63, %v5243_v22  ;;  %v15139_v63 = vld [vmem:[#allocation67_spill] sm:$0xff] }
 0x58c   :  { %v4391_v23 = vadd.f32 %v8296_v57, %v12511_v2  ;;  %v4385_v33 = vpop.f32.mrb[79].mxu0 }
 0x58d   :  { %v4386_v60 = vadd.f32 %v12511_v2, %v4385_v33  ;;  %8971 = vmatprep.subr.bf16.mxu0 %v8970_v14  ;;  %v15140_v33 = vld [vmem:[#allocation68_spill] sm:$0xff] }
 0x58e   :  { %v4497_v21 = vadd.f32 %v4391_v23, %v15133_v55  ;;  %8973 = vmatpush3.bf16.msra.mxu0 %v8970_v14  ;;  %v15141_v14 = vld [vmem:[#allocation63_spill] sm:$0xff] }
 0x58f   :  { %v4496_v41 = vadd.f32 %v4386_v60, %v15134_v15  ;;  %v15142_v15 = vld [vmem:[#allocation33_spill] sm:$0xff] }
 0x590   :  { %v5246_v8 = vmul.f32 %v4497_v21, %v15135_v36  ;;  %v8299_v45 = vpop.f32.mrb[80].mxu0 }
 0x591   :  { %v5245_v61 = vmul.f32 %v4496_v41, %v15136_v28  ;;  %v4401_v1 = vadd.f32 %v8299_v45, %v12511_v2  ;;  %v4395_v52 = vpop.f32.mrb[81].mxu0  ;;  %8350 = vmatprep.mubr.msk.f32.mxu1 %vm15137_vm9, %v4496_v41  ;;  %vm15167_vm9 = vmmov %vm15068_vm0 }
 0x592   :  { %v4396_v22 = vadd.f32 %v12511_v2, %v4395_v52  ;;  %8351 = vmatmul.mubr.msk.f32.gmra.mrb[78].mxu1 %vm15138_vm6, %v4497_v21  ;;  %v12579_v21 = vpack.c.bf16 %v11792_v39, %v11747_v51  ;;  %v15146_v52 = vld [vmem:[#allocation71_spill] sm:$0xff]  ;;  %vm15169_vm6 = vmmov %vm15068_vm0 }
 0x593   :  { %v4499_v57 = vadd.f32 %v4401_v1, %v15139_v63  ;;  %v8974_v23 = vpack.c.bf16 %v5246_v8, %v5245_v61  ;;  %v15147_v63 = vld [vmem:[#allocation73_spill] sm:$0xff] }
 0x594   :  { %v4498_v60 = vadd.f32 %v4396_v22, %v15140_v33  ;;  %15145 = vst [vmem:[#allocation40_spill] sm:$0xff] %v12579_v21 }
 0x595   :  { %v5248_v55 = vmul.f32 %v4499_v57, %v15141_v14  ;;  %8975 = vmatprep.subr.bf16.mxu0 %v8974_v23 }
 0x596   :  { %v5247_v40 = vmul.f32 %v4498_v60, %v15142_v15  ;;  %8353 = vmatprep.mubr.msk.f32.mxu1 %vm15143_vm1, %v4498_v60  ;;  %8977 = vmatpush3.bf16.msra.mxu0 %v8974_v23  ;;  %vm15173_vm1 = vmmov %vm15068_vm0 }
 0x597   :  { %8354 = vmatmul.mubr.msk.f32.gmra.mrb[80].mxu1 %vm15144_vm13, %v4499_v57  ;;  %vm15175_vm13 = vmmov %vm15068_vm0 }
 0x598   :  { %v8978_v41 = vpack.c.bf16 %v5248_v55, %v5247_v40  ;;  %v15148_v40 = vld [vmem:[#allocation38_spill] sm:$0xff] }
 0x59a   :  { %8979 = vmatprep.subr.bf16.mxu0 %v8978_v41 }
 0x59b   :  { %8981 = vmatpush3.bf16.msra.mxu0 %v8978_v41 }
 0x59c   :  { %9015 = vmatprep.subr.bf16.mxu0 %v12579_v21 }
 0x5c3   :  { %v8302_v61 = vpop.f32.mrb[82].mxu0 }
 0x5c4   :  { %v4411_v8 = vadd.f32 %v8302_v61, %v12511_v2  ;;  %v4405_v45 = vpop.f32.mrb[83].mxu0  ;;  %v15151_v61 = vld [vmem:[#allocation75_spill] sm:$0xff] }
 0x5c5   :  { %v4406_v1 = vadd.f32 %v12511_v2, %v4405_v45  ;;  %v15153_v45 = vld [vmem:[#allocation77_spill] sm:$0xff] }
 0x5c6   :  { %v4501_v22 = vadd.f32 %v4411_v8, %v15146_v52 }
 0x5c7   :  { %v4500_v23 = vadd.f32 %v4406_v1, %v15147_v63  ;;  %v8305_v57 = vpop.f32.mrb[84].mxu0  ;;  %v15154_v63 = vld [vmem:[#allocation46_spill] sm:$0xff] }
 0x5c8   :  { %v5250_v33 = vmul.f32 %v4501_v22, %v15148_v40  ;;  %v4421_v60 = vadd.f32 %v8305_v57, %v12511_v2  ;;  %v4415_v55 = vpop.f32.mrb[85].mxu0 }
 0x5c9   :  { %v5249_v41 = vmul.f32 %v4500_v23, %v15149_v43  ;;  %v4416_v48 = vadd.f32 %v12511_v2, %v4415_v55  ;;  %8356 = vmatprep.mubr.msk.f32.mxu1 %vm15150_vm4, %v4500_v23  ;;  %v15156_v23 = vld [vmem:[#allocation79_spill] sm:$0xff]  ;;  %vm15179_vm4 = vmmov %vm15068_vm0 }
 0x5ca   :  { %v4503_v54 = vadd.f32 %v4421_v60, %v15151_v61  ;;  %8357 = vmatmul.mubr.msk.f32.gmra.mrb[82].mxu1 %vm15152_vm15, %v4501_v22  ;;  %v15158_v22 = vld [vmem:[#allocation80_spill] sm:$0xff]  ;;  %vm15181_vm15 = vmmov %vm15068_vm0 }
 0x5cb   :  { %v4502_v8 = vadd.f32 %v4416_v48, %v15153_v45  ;;  %v8308_v52 = vpop.f32.mrb[86].mxu0  ;;  %v8982_v1 = vpack.c.bf16 %v5250_v33, %v5249_v41  ;;  %v15159_v41 = vld [vmem:[#allocation58_spill] sm:$0xff] }
 0x5cc   :  { %v5252_v39 = vmul.f32 %v4503_v54, %v15154_v63  ;;  %v4431_v51 = vadd.f32 %v8308_v52, %v12511_v2  ;;  %v4425_v57 = vpop.f32.mrb[87].mxu0 }
 0x5cd   :  { %v5251_v26 = vmul.f32 %v4502_v8, %v15155_v17  ;;  %v4426_v7 = vadd.f32 %v12511_v2, %v4425_v57  ;;  %8359 = vmatprep.mubr.msk.f32.mxu1 %vm15068_vm0, %v4502_v8  ;;  %8983 = vmatprep.subr.bf16.mxu1 %v8982_v1 }
 0x5ce   :  { %v4505_v60 = vadd.f32 %v4431_v51, %v15156_v23  ;;  %8360 = vmatmul.mubr.msk.f32.gmra.mrb[84].mxu1 %vm15157_vm14, %v4503_v54  ;;  %v15162_v51 = vld [vmem:[#allocation83_spill] sm:$0xff]  ;;  %v15164_v54 = vld [vmem:[#allocation84_spill] sm:$0xff]  ;;  %vm15186_vm14 = vmmov %vm15068_vm0 }
 0x5cf   :  { %v4504_v48 = vadd.f32 %v4426_v7, %v15158_v22  ;;  %8985 = vmatpush3.bf16.msra.mxu1 %v8982_v1  ;;  %v8311_v33 = vpop.f32.mrb[88].mxu0  ;;  %v8986_v55 = vpack.c.bf16 %v5252_v39, %v5251_v26  ;;  %v15165_v1 = vld [vmem:[#allocation70_spill] sm:$0xff] }
 0x5d0   :  { %v5254_v61 = vmul.f32 %v4505_v60, %v15159_v41  ;;  %v4441_v45 = vadd.f32 %v8311_v33, %v12511_v2  ;;  %v4435_v52 = vpop.f32.mrb[89].mxu0 }
 0x5d1   :  { %v5253_v34 = vmul.f32 %v4504_v48, %v15160_v12  ;;  %v4436_v57 = vadd.f32 %v12511_v2, %v4435_v52  ;;  %8362 = vmatprep.mubr.msk.f32.mxu1 %vm15161_vm2, %v4504_v48  ;;  %8987 = vmatprep.subr.bf16.mxu1 %v8986_v55  ;;  %v15168_v48 = vld [vmem:[#allocation86_spill] sm:$0xff]  ;;  %vm15190_vm2 = vmmov %vm15068_vm0 }
 0x5d2   :  { %v4507_v8 = vadd.f32 %v4441_v45, %v15162_v51  ;;  %8363 = vmatmul.mubr.msk.f32.gmra.mrb[86].mxu1 %vm15163_vm12, %v4505_v60  ;;  %v15170_v60 = vld [vmem:[#allocation88_spill] sm:$0xff]  ;;  %vm15191_vm12 = vmmov %vm15068_vm0 }
 0x5d3   :  { %v4506_v7 = vadd.f32 %v4436_v57, %v15164_v54  ;;  %8989 = vmatpush3.bf16.msra.mxu1 %v8986_v55  ;;  %v8314_v39 = vpop.f32.mrb[90].mxu0  ;;  %v8990_v26 = vpack.c.bf16 %v5254_v61, %v5253_v34  ;;  %v15171_v57 = vld [vmem:[#allocation76_spill] sm:$0xff] }
 0x5d4   :  { %v5256_v23 = vmul.f32 %v4507_v8, %v15165_v1  ;;  %v4451_v22 = vadd.f32 %v8314_v39, %v12511_v2  ;;  %v4445_v33 = vpop.f32.mrb[91].mxu0 }
 0x5d5   :  { %v5255_v9 = vmul.f32 %v4506_v7, %v15166_v20  ;;  %v4446_v52 = vadd.f32 %v12511_v2, %v4445_v33  ;;  %8365 = vmatprep.mubr.msk.f32.mxu1 %vm15167_vm9, %v4506_v7  ;;  %8991 = vmatprep.subr.bf16.mxu1 %v8990_v26  ;;  %v15174_v7 = vld [vmem:[#allocation89_spill] sm:$0xff]  ;;  %vm4848_vm9 = vcmask 130048  }
 0x5d6   :  { %v4509_v45 = vadd.f32 %v4451_v22, %v15168_v48  ;;  %8366 = vmatmul.mubr.msk.f32.gmra.mrb[88].mxu1 %vm15169_vm6, %v4507_v8  ;;  %v15176_v8 = vld [vmem:[#allocation90_spill] sm:$0xff] }
 0x5d7   :  { %v4508_v55 = vadd.f32 %v4446_v52, %v15170_v60  ;;  %8993 = vmatpush3.bf16.msra.mxu1 %v8990_v26  ;;  %v8317_v34 = vpop.f32.mrb[92].mxu0  ;;  %v8994_v61 = vpack.c.bf16 %v5256_v23, %v5255_v9  ;;  %v15177_v52 = vld [vmem:[#allocation82_spill] sm:$0xff] }
 0x5d8   :  { %v5258_v51 = vmul.f32 %v4509_v45, %v15171_v57  ;;  %v4461_v54 = vadd.f32 %v8317_v34, %v12511_v2  ;;  %v4455_v39 = vpop.f32.mrb[93].mxu0 }
 0x5d9   :  { %v5257_v62 = vmul.f32 %v4508_v55, %v15172_v18  ;;  %v4456_v33 = vadd.f32 %v12511_v2, %v4455_v39  ;;  %8368 = vmatprep.mubr.msk.f32.mxu1 %vm15173_vm1, %v4508_v55  ;;  %8995 = vmatprep.subr.bf16.mxu1 %v8994_v61  ;;  %v15180_v55 = vld [vmem:[#allocation93_spill] sm:$0xff] }
 0x5da   :  { %v4511_v22 = vadd.f32 %v4461_v54, %v15174_v7  ;;  %8369 = vmatmul.mubr.msk.f32.gmra.mrb[90].mxu1 %vm15175_vm13, %v4509_v45  ;;  %v15182_v45 = vld [vmem:[#allocation94_spill] sm:$0xff] }
 0x5db   :  { %v4510_v26 = vadd.f32 %v4456_v33, %v15176_v8  ;;  %8997 = vmatpush3.bf16.msra.mxu1 %v8994_v61  ;;  %v8320_v9 = vpop.f32.mrb[94].mxu0  ;;  %v8998_v23 = vpack.c.bf16 %v5258_v51, %v5257_v62  ;;  %v15183_v33 = vld [vmem:[#allocation87_spill] sm:$0xff] }
 0x5dc   :  { %v5260_v48 = vmul.f32 %v4511_v22, %v15177_v52  ;;  %v4471_v60 = vadd.f32 %v8320_v9, %v12511_v2  ;;  %v4465_v34 = vpop.f32.mrb[95].mxu0 }
 0x5dd   :  { %v5259_v24 = vmul.f32 %v4510_v26, %v15178_v11  ;;  %v4466_v39 = vadd.f32 %v12511_v2, %v4465_v34  ;;  %8371 = vmatprep.mubr.msk.f32.mxu1 %vm15179_vm4, %v4510_v26  ;;  %8999 = vmatprep.subr.bf16.mxu1 %v8998_v23  ;;  %v15185_v26 = vld [vmem:[#allocation97_spill] sm:$0xff] }
 0x5de   :  { %v4513_v54 = vadd.f32 %v4471_v60, %v15180_v55  ;;  %8372 = vmatmul.mubr.msk.f32.gmra.mrb[92].mxu1 %vm15181_vm15, %v4511_v22  ;;  %v15187_v22 = vld [vmem:[#allocation98_spill] sm:$0xff]  ;;  %v15189_v55 = vld [vmem:[#allocation49_spill] sm:$0xff] }
 0x5df   :  { %v4512_v61 = vadd.f32 %v4466_v39, %v15182_v45  ;;  %9001 = vmatpush3.bf16.msra.mxu1 %v8998_v23  ;;  %v8323_v62 = vpop.f32.mrb[96].mxu0  ;;  %v9002_v51 = vpack.c.bf16 %v5260_v48, %v5259_v24  ;;  %v15188_v48 = vld [vmem:[#allocation92_spill] sm:$0xff] }
 0x5e0   :  { %v5262_v7 = vmul.f32 %v4513_v54, %v15183_v33  ;;  %v4481_v8 = vadd.f32 %v8323_v62, %v12511_v2  ;;  %v4475_v9 = vpop.f32.mrb[97].mxu0 }
 0x5e1   :  { %v5261_v35 = vmul.f32 %v4512_v61, %v15184_v5  ;;  %v4476_v34 = vadd.f32 %v12511_v2, %v4475_v9  ;;  %8374 = vmatprep.mubr.msk.f32.mxu1 %vm15068_vm0, %v4512_v61  ;;  %9003 = vmatprep.subr.bf16.mxu1 %v9002_v51  ;;  %v12648_v61 = vpack.c.bf16 %v12363_v58, %v12242_v56 }
 0x5e2   :  { %v4515_v60 = vadd.f32 %v4481_v8, %v15185_v26  ;;  %8375 = vmatmul.mubr.msk.f32.gmra.mrb[94].mxu1 %vm15186_vm14, %v4513_v54 }
 0x5e3   :  { %v4514_v23 = vadd.f32 %v4476_v34, %v15187_v22  ;;  %9005 = vmatpush3.bf16.msra.mxu1 %v9002_v51  ;;  %v9006_v24 = vpack.c.bf16 %v5262_v7, %v5261_v35  ;;  %15192 = vst [vmem:[#allocation42_spill] sm:$0xff] %v12648_v61  ;;  %v12654_v35 = vld [vmem:[%s14307_s10] ss:$0 sm:$0xff]  ;;  %s9688_s10 = smov 32  }
 0x5e4   :  { %v5264_v39 = vmul.f32 %v4515_v60, %v15188_v48 }
 0x5e5   :  { %v5263_v45 = vmul.f32 %v4514_v23, %v15189_v55  ;;  %8377 = vmatprep.mubr.msk.f32.mxu1 %vm15190_vm2, %v4514_v23  ;;  %9007 = vmatprep.subr.bf16.mxu1 %v9006_v24 }
 0x5e6   :  { %8378 = vmatmul.mubr.msk.f32.gmra.mrb[96].mxu1 %vm15191_vm12, %v4515_v60 }
 0x5e7   :  { %9009 = vmatpush3.bf16.msra.mxu1 %v9006_v24  ;;  %v9010_v2 = vpack.c.bf16 %v5264_v39, %v5263_v45 }
 0x5e9   :  { %9011 = vmatprep.subr.bf16.mxu1 %v9010_v2 }
 0x5eb   :  { %9013 = vmatpush3.bf16.msra.mxu1 %v9010_v2 }
 0x5ec   :  { %9047 = vmatprep.subr.bf16.mxu1 %v12648_v61 }
 0x640   :  { %v8334_v54 = vpop.f32.mrb[66].mxu1 }
 0x641   :  { %v12657_v62 = vadd.f32 %v8334_v54, %v12654_v35  ;;  %v4689_v51 = vpop.f32.mrb[67].mxu1 }
 0x642   :  { %v12660_v7 = vadd.f32 %v12654_v35, %v4689_v51 }
 0x643   :  { %v4852_v8 = vsel %vm4848_vm9, %v12657_v62, -inf }
 0x644   :  { %4853 = vmax.xlane.f32.xlu1 %v4852_v8  ;;  %v8337_v9 = vpop.f32.mrb[68].mxu1  ;;  %v4849_v34 = vsel %vm4848_vm9, %v12660_v7, -inf }
 0x645   :  { %v12667_v26 = vadd.f32 %v8337_v9, %v12654_v35  ;;  %v4699_v60 = vpop.f32.mrb[69].mxu1  ;;  %4850 = vmax.xlane.f32.xlu0 %v4849_v34 }
 0x646   :  { %v12670_v22 = vadd.f32 %v12654_v35, %v4699_v60 }
 0x647   :  { %v4858_v23 = vsel %vm4848_vm9, %v12667_v26, -inf }
 0x648   :  { %4859 = vmax.xlane.f32.xlu1 %v4858_v23  ;;  %v8340_v24 = vpop.f32.mrb[70].mxu1  ;;  %v4855_v2 = vsel %vm4848_vm9, %v12670_v22, -inf }
 0x649   :  { %v4709_v39 = vpop.f32.mrb[71].mxu1  ;;  %v12675_v45 = vadd.f32 %v8340_v24, %v12654_v35 }
 0x64a   :  { %v12680_v54 = vadd.f32 %v12654_v35, %v4709_v39 }
 0x64b   :  { %v4864_v8 = vsel %vm4848_vm9, %v12675_v45, -inf }
 0x64c   :  { %4856 = vmax.xlane.f32.xlu1 %v4855_v2  ;;  %v4861_v60 = vsel %vm4848_vm9, %v12680_v54, -inf }
 0x64e   :  { %v8343_v51 = vpop.f32.mrb[72].mxu1 }
 0x64f   :  { %v4719_v9 = vpop.f32.mrb[73].mxu1  ;;  %v12685_v34 = vadd.f32 %v8343_v51, %v12654_v35 }
 0x650   :  { %4865 = vmax.xlane.f32.xlu1 %v4864_v8  ;;  %v12690_v23 = vadd.f32 %v12654_v35, %v4719_v9 }
 0x651   :  { %v4870_v24 = vsel %vm4848_vm9, %v12685_v34, -inf }
 0x652   :  { %v4867_v51 = vsel %vm4848_vm9, %v12690_v23, -inf }
 0x654   :  { %4862 = vmax.xlane.f32.xlu1 %v4861_v60 }
 0x658   :  { %4871 = vmax.xlane.f32.xlu1 %v4870_v24 }
 0x659   :  { %v8346_v39 = vpop.f32.mrb[74].mxu1 }
 0x65a   :  { %v12695_v2 = vadd.f32 %v8346_v39, %v12654_v35  ;;  %v4729_v56 = vpop.f32.mrb[75].mxu1 }
 0x65b   :  { %v12700_v58 = vadd.f32 %v12654_v35, %v4729_v56 }
 0x65c   :  { %4868 = vmax.xlane.f32.xlu1 %v4867_v51  ;;  %v4876_v9 = vsel %vm4848_vm9, %v12695_v2, -inf }
 0x65d   :  { %v8349_v8 = vpop.f32.mrb[76].mxu1  ;;  %v4873_v39 = vsel %vm4848_vm9, %v12700_v58, -inf }
 0x65e   :  { %v4739_v60 = vpop.f32.mrb[77].mxu1  ;;  %v12705_v24 = vadd.f32 %v8349_v8, %v12654_v35 }
 0x65f   :  { %v12710_v51 = vadd.f32 %v12654_v35, %v4739_v60 }
 0x660   :  { %4877 = vmax.xlane.f32.xlu1 %v4876_v9  ;;  %v4882_v56 = vsel %vm4848_vm9, %v12705_v24, -inf }
 0x661   :  { %v4879_v8 = vsel %vm4848_vm9, %v12710_v51, -inf }
 0x664   :  { %4874 = vmax.xlane.f32.xlu1 %v4873_v39 }
 0x665   :  { %v8352_v44 = vpop.f32.mrb[78].mxu1 }
 0x666   :  { %v4749_v42 = vpop.f32.mrb[79].mxu1  ;;  %v12715_v0 = vadd.f32 %v8352_v44, %v12654_v35 }
 0x667   :  { %v12720_v39 = vadd.f32 %v12654_v35, %v4749_v42 }
 0x668   :  { %4883 = vmax.xlane.f32.xlu1 %v4882_v56  ;;  %v4888_v60 = vsel %vm4848_vm9, %v12715_v0, -inf }
 0x669   :  { %v4885_v56 = vsel %vm4848_vm9, %v12720_v39, -inf }
 0x66a   :  { %v8355_v3 = vpop.f32.mrb[80].mxu1 }
 0x66b   :  { %v4759_v9 = vpop.f32.mrb[81].mxu1  ;;  %v12725_v31 = vadd.f32 %v8355_v3, %v12654_v35 }
 0x66c   :  { %4880 = vmax.xlane.f32.xlu1 %v4879_v8  ;;  %v12730_v44 = vadd.f32 %v12654_v35, %v4759_v9 }
 0x66d   :  { %v4894_v8 = vsel %vm4848_vm9, %v12725_v31, -inf }
 0x66e   :  { %v4891_v42 = vsel %vm4848_vm9, %v12730_v44, -inf }
 0x670   :  { %4889 = vmax.xlane.f32.xlu1 %v4888_v60 }
 0x674   :  { %4886 = vmax.xlane.f32.xlu1 %v4885_v56 }
 0x678   :  { %4895 = vmax.xlane.f32.xlu1 %v4894_v8 }
 0x67c   :  { %4892 = vmax.xlane.f32.xlu1 %v4891_v42 }
 0x69d   :  { %v8358_v53 = vpop.f32.mrb[82].mxu1 }
 0x69e   :  { %v12737_v60 = vadd.f32 %v8358_v53, %v12654_v35  ;;  %v4769_v3 = vpop.f32.mrb[83].mxu1 }
 0x69f   :  { %v12740_v10 = vadd.f32 %v12654_v35, %v4769_v3 }
 0x6a0   :  { %v4900_v9 = vsel %vm4848_vm9, %v12737_v60, -inf }
 0x6a1   :  { %v8361_v56 = vpop.f32.mrb[84].mxu1  ;;  %4901 = vmax.xlane.f32.xlu0 %v4900_v9  ;;  %v4897_v42 = vsel %vm4848_vm9, %v12740_v10, -inf }
 0x6a2   :  { %v4779_v29 = vpop.f32.mrb[85].mxu1  ;;  %v12745_v8 = vadd.f32 %v8361_v56, %v12654_v35 }
 0x6a3   :  { %v12750_v13 = vadd.f32 %v12654_v35, %v4779_v29 }
 0x6a4   :  { %v4906_v3 = vsel %vm4848_vm9, %v12745_v8, -inf }
 0x6a5   :  { %v8364_v16 = vpop.f32.mrb[86].mxu1  ;;  %4898 = vmax.xlane.f32.xlu0 %v4897_v42  ;;  %v4903_v56 = vsel %vm4848_vm9, %v12750_v13, -inf }
 0x6a6   :  { %v4789_v53 = vpop.f32.mrb[87].mxu1  ;;  %v12755_v9 = vadd.f32 %v8364_v16, %v12654_v35 }
 0x6a7   :  { %v12760_v42 = vadd.f32 %v12654_v35, %v4789_v53 }
 0x6a8   :  { %v4912_v29 = vsel %vm4848_vm9, %v12755_v9, -inf }
 0x6a9   :  { %v8367_v6 = vpop.f32.mrb[88].mxu1  ;;  %4907 = vmax.xlane.f32.xlu0 %v4906_v3  ;;  %v4909_v16 = vsel %vm4848_vm9, %v12760_v42, -inf }
 0x6aa   :  { %v4799_v46 = vpop.f32.mrb[89].mxu1  ;;  %v12765_v3 = vadd.f32 %v8367_v6, %v12654_v35 }
 0x6ac   :  { %v4918_v53 = vsel %vm4848_vm9, %v12765_v3, -inf }
 0x6ad   :  { %v8370_v61 = vpop.f32.mrb[90].mxu1  ;;  %4904 = vmax.xlane.f32.xlu0 %v4903_v56  ;;  %v12770_v56 = vadd.f32 %v12654_v35, %v4799_v46 }
 0x6ae   :  { %v4809_v21 = vpop.f32.mrb[91].mxu1  ;;  %v12778_v6 = vadd.f32 %v8370_v61, %v12654_v35 }
 0x6af   :  { %v4915_v28 = vsel %vm4848_vm9, %v12770_v56, -inf }
 0x6b1   :  { %v8373_v14 = vpop.f32.mrb[92].mxu1  ;;  %4913 = vmax.xlane.f32.xlu0 %v4912_v29 }
 0x6b2   :  { %v4819_v48 = vpop.f32.mrb[93].mxu1 }
 0x6b5   :  { %v8376_v15 = vpop.f32.mrb[94].mxu1  ;;  %4910 = vmax.xlane.f32.xlu0 %v4909_v16  ;;  %v12785_v16 = vadd.f32 %v12654_v35, %v4809_v21 }
 0x6b6   :  { %v4829_v55 = vpop.f32.mrb[95].mxu1 }
 0x6b7   :  { %v4921_v61 = vsel %vm4848_vm9, %v12785_v16, -inf  ;;  %v12800_v21 = vadd.f32 %v12654_v35, %v4829_v55 }
 0x6b9   :  { %v8379_v36 = vpop.f32.mrb[96].mxu1  ;;  %4919 = vmax.xlane.f32.xlu0 %v4918_v53  ;;  %v4924_v53 = vsel %vm4848_vm9, %v12778_v6, -inf }
 0x6ba   :  { %v4839_v33 = vpop.f32.mrb[97].mxu1  ;;  %v12812_v55 = vadd.f32 %v8379_v36, %v12654_v35 }
 0x6bb   :  { %v12775_v29 = vadd.f32 %v12654_v35, %v4839_v33  ;;  %v12790_v33 = vadd.f32 %v8373_v14, %v12654_v35  ;;  %v12805_v14 = vadd.f32 %v8376_v15, %v12654_v35 }
 0x6bd   :  { %4916 = vmax.xlane.f32.xlu0 %v4915_v28  ;;  %v4939_v46 = vsel %vm4848_vm9, %v12775_v29, -inf  ;;  %v12795_v28 = vadd.f32 %v12654_v35, %v4819_v48 }
 0x6be   :  { %4940 = vmax.xlane.f32.xlu1 %v4939_v46  ;;  %v4930_v46 = vsel %vm4848_vm9, %v12790_v33, -inf }
 0x6c1   :  { %4925 = vmax.xlane.f32.xlu0 %v4924_v53  ;;  %v4927_v53 = vsel %vm4848_vm9, %v12795_v28, -inf }
 0x6c5   :  { %4922 = vmax.xlane.f32.xlu0 %v4921_v61  ;;  %v4933_v61 = vsel %vm4848_vm9, %v12800_v21, -inf }
 0x6c9   :  { %4931 = vmax.xlane.f32.xlu0 %v4930_v46 }
 0x6cd   :  { %4928 = vmax.xlane.f32.xlu0 %v4927_v53  ;;  %v4936_v53 = vsel %vm4848_vm9, %v12805_v14, -inf }
 0x6d1   :  { %v4854_v5 = vpop.xlane.xlu1 %4853  ;;  %4934 = vmax.xlane.f32.xlu0 %v4933_v61 }
 0x6d2   :  { %v4946_v48 = vsub.f32 %v12657_v62, %v4854_v5  ;;  %v4851_v50 = vpop.xlane.xlu0 %4850  ;;  %v4942_v5 = vsel %vm4848_vm9, %v12812_v55, -inf }
 0x6d3   :  { %v4945_v46 = vsub.f32 %v12660_v7, %v4851_v50 }
 0x6d4   :  { %v4979_v52 = vmul.f32 1.442695, %v4946_v48 }
 0x6d5   :  { %v4977_v11 = vmul.f32 1.442695, %v4945_v46  ;;  %v4860_v15 = vpop.xlane.xlu1 %4859  ;;  %4937 = vmax.xlane.f32.xlu0 %v4936_v53 }
 0x6d6   :  { %9425 = vpow2.f32 %v4979_v52  ;;  %v4948_v27 = vsub.f32 %v12667_v26, %v4860_v15 }
 0x6d7   :  { %9427 = vpow2.f32 %v4977_v11 }
 0x6d8   :  { %v4983_v61 = vmul.f32 1.442695, %v4948_v27 }
 0x6d9   :  { %v4857_v62 = vpop.xlane.xlu1 %4856  ;;  %4943 = vmax.xlane.f32.xlu0 %v4942_v5 }
 0x6da   :  { %9429 = vpow2.f32 %v4983_v61  ;;  %v4947_v50 = vsub.f32 %v12670_v22, %v4857_v62 }
 0x6dc   :  { %v4981_v36 = vmul.f32 1.442695, %v4947_v50 }
 0x6dd   :  { %v4866_v35 = vpop.xlane.xlu1 %4865 }
 0x6de   :  { %9431 = vpow2.f32 %v4981_v36  ;;  %v4950_v7 = vsub.f32 %v12675_v45, %v4866_v35 }
 0x6e0   :  { %v12821_v48 = vpop.eup %9425  ;;  %v4987_v52 = vmul.f32 1.442695, %v4950_v7 }
 0x6e1   :  { %v12823_v46 = vpop.eup %9427  ;;  %v4863_v11 = vpop.xlane.xlu1 %4862  ;;  %v5044_v27 = vsel %vm4848_vm9, %v12821_v48, 0.0 }
 0x6e2   :  { %9433 = vpow2.f32 %v4987_v52  ;;  %v4949_v26 = vsub.f32 %v12680_v54, %v4863_v11  ;;  %5045 = vadd.xlane.f32.xlu0 %v5044_v27  ;;  %v5041_v22 = vsel %vm4848_vm9, %v12823_v46, 0.0 }
 0x6e3   :  { %5042 = vadd.xlane.f32.xlu1 %v5041_v22 }
 0x6e4   :  { %v12830_v53 = vpop.eup %9429  ;;  %v4985_v45 = vmul.f32 1.442695, %v4949_v26 }
 0x6e5   :  { %v4872_v15 = vpop.xlane.xlu1 %4871  ;;  %v5050_v61 = vsel %vm4848_vm9, %v12830_v53, 0.0 }
 0x6e6   :  { %9435 = vpow2.f32 %v4985_v45  ;;  %v4952_v5 = vsub.f32 %v12685_v34, %v4872_v15 }
 0x6e7   :  { %5051 = vadd.xlane.f32.xlu1 %v5050_v61 }
 0x6e8   :  { %v12835_v62 = vpop.eup %9431  ;;  %v4991_v50 = vmul.f32 1.442695, %v4952_v5 }
 0x6e9   :  { %v4869_v54 = vpop.xlane.xlu1 %4868  ;;  %v5047_v36 = vsel %vm4848_vm9, %v12835_v62, 0.0 }
 0x6ea   :  { %9437 = vpow2.f32 %v4991_v50  ;;  %v4951_v35 = vsub.f32 %v12690_v23, %v4869_v54 }
 0x6eb   :  { %5048 = vadd.xlane.f32.xlu1 %v5047_v36 }
 0x6ec   :  { %v12840_v7 = vpop.eup %9433  ;;  %v4989_v52 = vmul.f32 1.442695, %v4951_v35 }
 0x6ed   :  { %v4878_v11 = vpop.xlane.xlu1 %4877  ;;  %v5056_v27 = vsel %vm4848_vm9, %v12840_v7, 0.0 }
 0x6ee   :  { %9439 = vpow2.f32 %v4989_v52  ;;  %v4954_v34 = vsub.f32 %v12695_v2, %v4878_v11 }
 0x6ef   :  { %5057 = vadd.xlane.f32.xlu1 %v5056_v27 }
 0x6f0   :  { %v12845_v26 = vpop.eup %9435  ;;  %v4995_v22 = vmul.f32 1.442695, %v4954_v34 }
 0x6f1   :  { %v4875_v45 = vpop.xlane.xlu1 %4874  ;;  %v5053_v15 = vsel %vm4848_vm9, %v12845_v26, 0.0 }
 0x6f2   :  { %9441 = vpow2.f32 %v4995_v22  ;;  %v4953_v23 = vsub.f32 %v12700_v58, %v4875_v45 }
 0x6f3   :  { %5054 = vadd.xlane.f32.xlu1 %v5053_v15 }
 0x6f4   :  { %v12850_v61 = vpop.eup %9437  ;;  %v4993_v5 = vmul.f32 1.442695, %v4953_v23 }
 0x6f5   :  { %v4884_v50 = vpop.xlane.xlu1 %4883  ;;  %v5062_v54 = vsel %vm4848_vm9, %v12850_v61, 0.0 }
 0x6f6   :  { %9443 = vpow2.f32 %v4993_v5  ;;  %v4956_v2 = vsub.f32 %v12705_v24, %v4884_v50 }
 0x6f7   :  { %5063 = vadd.xlane.f32.xlu1 %v5062_v54 }
 0x6f8   :  { %v12855_v36 = vpop.eup %9439  ;;  %v4999_v35 = vmul.f32 1.442695, %v4956_v2 }
 0x6f9   :  { %v4881_v52 = vpop.xlane.xlu1 %4880  ;;  %v5059_v11 = vsel %vm4848_vm9, %v12855_v36, 0.0 }
 0x6fa   :  { %9445 = vpow2.f32 %v4999_v35  ;;  %v4955_v58 = vsub.f32 %v12710_v51, %v4881_v52 }
 0x6fb   :  { %5060 = vadd.xlane.f32.xlu1 %v5059_v11 }
 0x6fc   :  { %v12860_v27 = vpop.eup %9441  ;;  %v4997_v34 = vmul.f32 1.442695, %v4955_v58 }
 0x6fd   :  { %v4890_v22 = vpop.xlane.xlu1 %4889  ;;  %v5068_v45 = vsel %vm4848_vm9, %v12860_v27, 0.0 }
 0x6fe   :  { %9447 = vpow2.f32 %v4997_v34  ;;  %v4958_v24 = vsub.f32 %v12715_v0, %v4890_v22 }
 0x6ff   :  { %5069 = vadd.xlane.f32.xlu1 %v5068_v45 }
 0x700   :  { %v12865_v15 = vpop.eup %9443  ;;  %v5003_v23 = vmul.f32 1.442695, %v4958_v24 }
 0x701   :  { %v4887_v5 = vpop.xlane.xlu1 %4886  ;;  %v5065_v50 = vsel %vm4848_vm9, %v12865_v15, 0.0 }
 0x702   :  { %9449 = vpow2.f32 %v5003_v23  ;;  %v4957_v51 = vsub.f32 %v12720_v39, %v4887_v5 }
 0x703   :  { %5066 = vadd.xlane.f32.xlu1 %v5065_v50 }
 0x704   :  { %v12870_v54 = vpop.eup %9445  ;;  %v5001_v2 = vmul.f32 1.442695, %v4957_v51 }
 0x705   :  { %v4896_v35 = vpop.xlane.xlu1 %4895  ;;  %v5074_v52 = vsel %vm4848_vm9, %v12870_v54, 0.0 }
 0x706   :  { %9451 = vpow2.f32 %v5001_v2  ;;  %v4960_v0 = vsub.f32 %v12725_v31, %v4896_v35 }
 0x707   :  { %5075 = vadd.xlane.f32.xlu1 %v5074_v52 }
 0x708   :  { %v12875_v11 = vpop.eup %9447  ;;  %v5007_v58 = vmul.f32 1.442695, %v4960_v0 }
 0x709   :  { %v4893_v34 = vpop.xlane.xlu1 %4892  ;;  %v5071_v22 = vsel %vm4848_vm9, %v12875_v11, 0.0 }
 0x70a   :  { %9453 = vpow2.f32 %v5007_v58  ;;  %v4959_v39 = vsub.f32 %v12730_v44, %v4893_v34 }
 0x70b   :  { %5072 = vadd.xlane.f32.xlu1 %v5071_v22 }
 0x70c   :  { %v12880_v45 = vpop.eup %9449  ;;  %v5005_v24 = vmul.f32 1.442695, %v4959_v39 }
 0x70d   :  { %15193 = vst [vmem:[#allocation21_spill] sm:$0xff] %v12880_v45  ;;  %v5080_v23 = vsel %vm4848_vm9, %v12880_v45, 0.0 }
 0x70e   :  { %9455 = vpow2.f32 %v5005_v24 }
 0x70f   :  { %5081 = vadd.xlane.f32.xlu1 %v5080_v23 }
 0x710   :  { %v12884_v31 = vpop.eup %9451 }
 0x711   :  { %15194 = vst [vmem:[#allocation20_spill] sm:$0xff] %v12884_v31  ;;  %v5077_v5 = vsel %vm4848_vm9, %v12884_v31, 0.0 }
 0x713   :  { %5078 = vadd.xlane.f32.xlu1 %v5077_v5 }
 0x714   :  { %v12888_v50 = vpop.eup %9453 }
 0x715   :  { %15195 = vst [vmem:[#allocation43_spill] sm:$0xff] %v12888_v50  ;;  %v5086_v44 = vsel %vm4848_vm9, %v12888_v50, 0.0 }
 0x717   :  { %5087 = vadd.xlane.f32.xlu1 %v5086_v44 }
 0x718   :  { %v12892_v51 = vpop.eup %9455 }
 0x719   :  { %15196 = vst [vmem:[#allocation44_spill] sm:$0xff] %v12892_v51  ;;  %v5083_v2 = vsel %vm4848_vm9, %v12892_v51, 0.0 }
 0x71b   :  { %5084 = vadd.xlane.f32.xlu1 %v5083_v2 }
 0x72e   :  { %v4902_v35 = vpop.xlane.xlu0 %4901 }
 0x72f   :  { %v4962_v52 = vsub.f32 %v12737_v60, %v4902_v35 }
 0x731   :  { %v5011_v0 = vmul.f32 1.442695, %v4962_v52 }
 0x732   :  { %v4899_v58 = vpop.xlane.xlu0 %4898 }
 0x733   :  { %9457 = vpow2.f32 %v5011_v0  ;;  %v4961_v34 = vsub.f32 %v12740_v10, %v4899_v58 }
 0x735   :  { %v5009_v22 = vmul.f32 1.442695, %v4961_v34 }
 0x736   :  { %v4908_v39 = vpop.xlane.xlu0 %4907 }
 0x737   :  { %9459 = vpow2.f32 %v5009_v22  ;;  %v4964_v24 = vsub.f32 %v12745_v8, %v4908_v39 }
 0x739   :  { %v5015_v23 = vmul.f32 1.442695, %v4964_v24 }
 0x73a   :  { %v4905_v5 = vpop.xlane.xlu0 %4904 }
 0x73b   :  { %9461 = vpow2.f32 %v5015_v23  ;;  %v4963_v44 = vsub.f32 %v12750_v13, %v4905_v5 }
 0x73d   :  { %v12900_v50 = vpop.eup %9457  ;;  %v5013_v2 = vmul.f32 1.442695, %v4963_v44 }
 0x73e   :  { %v4914_v51 = vpop.xlane.xlu0 %4913  ;;  %v5092_v60 = vsel %vm4848_vm9, %v12900_v50, 0.0 }
 0x73f   :  { %9463 = vpow2.f32 %v5013_v2  ;;  %v4966_v10 = vsub.f32 %v12755_v9, %v4914_v51  ;;  %5093 = vadd.xlane.f32.xlu0 %v5092_v60 }
 0x741   :  { %v12905_v35 = vpop.eup %9459  ;;  %v5019_v52 = vmul.f32 1.442695, %v4966_v10 }
 0x742   :  { %v4911_v8 = vpop.xlane.xlu0 %4910  ;;  %v5089_v0 = vsel %vm4848_vm9, %v12905_v35, 0.0 }
 0x743   :  { %9465 = vpow2.f32 %v5019_v52  ;;  %v4965_v13 = vsub.f32 %v12760_v42, %v4911_v8  ;;  %5090 = vadd.xlane.f32.xlu0 %v5089_v0 }
 0x745   :  { %v12910_v58 = vpop.eup %9461  ;;  %v5017_v34 = vmul.f32 1.442695, %v4965_v13 }
 0x746   :  { %v4920_v22 = vpop.xlane.xlu0 %4919  ;;  %v5098_v39 = vsel %vm4848_vm9, %v12910_v58, 0.0 }
 0x747   :  { %9467 = vpow2.f32 %v5017_v34  ;;  %v4968_v9 = vsub.f32 %v12765_v3, %v4920_v22  ;;  %5099 = vadd.xlane.f32.xlu0 %v5098_v39 }
 0x749   :  { %v12915_v51 = vpop.eup %9463  ;;  %v5023_v24 = vmul.f32 1.442695, %v4968_v9 }
 0x74a   :  { %v4917_v23 = vpop.xlane.xlu0 %4916  ;;  %v5095_v5 = vsel %vm4848_vm9, %v12915_v51, 0.0 }
 0x74b   :  { %9469 = vpow2.f32 %v5023_v24  ;;  %v4967_v42 = vsub.f32 %v12770_v56, %v4917_v23  ;;  %v4941_v44 = vpop.xlane.xlu1 %4940  ;;  %5096 = vadd.xlane.f32.xlu0 %v5095_v5 }
 0x74c   :  { %v4975_v2 = vsub.f32 %v12775_v29, %v4941_v44 }
 0x74d   :  { %v12921_v60 = vpop.eup %9465  ;;  %v5021_v10 = vmul.f32 1.442695, %v4967_v42 }
 0x74e   :  { %v5037_v52 = vmul.f32 1.442695, %v4975_v2  ;;  %v4926_v3 = vpop.xlane.xlu0 %4925  ;;  %v5104_v8 = vsel %vm4848_vm9, %v12921_v60, 0.0 }
 0x74f   :  { %9471 = vpow2.f32 %v5021_v10  ;;  %v4970_v0 = vsub.f32 %v12778_v6, %v4926_v3  ;;  %5105 = vadd.xlane.f32.xlu0 %v5104_v8 }
 0x750   :  { %9473 = vpow2.f32 %v5037_v52 }
 0x751   :  { %v12926_v13 = vpop.eup %9467  ;;  %v5027_v56 = vmul.f32 1.442695, %v4970_v0 }
 0x752   :  { %v4923_v34 = vpop.xlane.xlu0 %4922  ;;  %v5101_v29 = vsel %vm4848_vm9, %v12926_v13, 0.0 }
 0x753   :  { %9475 = vpow2.f32 %v5027_v56  ;;  %v4969_v22 = vsub.f32 %v12785_v16, %v4923_v34  ;;  %5102 = vadd.xlane.f32.xlu0 %v5101_v29 }
 0x755   :  { %v12931_v39 = vpop.eup %9469  ;;  %v5025_v9 = vmul.f32 1.442695, %v4969_v22 }
 0x756   :  { %v4932_v24 = vpop.xlane.xlu0 %4931  ;;  %v5110_v6 = vsel %vm4848_vm9, %v12931_v39, 0.0 }
 0x757   :  { %9477 = vpow2.f32 %v5025_v9  ;;  %v4972_v23 = vsub.f32 %v12790_v33, %v4932_v24  ;;  %5111 = vadd.xlane.f32.xlu0 %v5110_v6 }
 0x759   :  { %v12936_v5 = vpop.eup %9471  ;;  %v5031_v42 = vmul.f32 1.442695, %v4972_v23 }
 0x75a   :  { %v12938_v44 = vpop.eup %9473  ;;  %v4929_v2 = vpop.xlane.xlu0 %4928  ;;  %v5107_v16 = vsel %vm4848_vm9, %v12936_v5, 0.0 }
 0x75b   :  { %15197 = vst [vmem:[#allocation30_spill] sm:$0xff] %v12938_v44  ;;  %9479 = vpow2.f32 %v5031_v42  ;;  %v4971_v10 = vsub.f32 %v12795_v28, %v4929_v2  ;;  %5108 = vadd.xlane.f32.xlu0 %v5107_v16  ;;  %v5131_v52 = vsel %vm4848_vm9, %v12938_v44, 0.0 }
 0x75c   :  { %5132 = vadd.xlane.f32.xlu1 %v5131_v52 }
 0x75d   :  { %v12945_v3 = vpop.eup %9475  ;;  %v5029_v33 = vmul.f32 1.442695, %v4971_v10 }
 0x75e   :  { %v4935_v8 = vpop.xlane.xlu0 %4934  ;;  %v5116_v0 = vsel %vm4848_vm9, %v12945_v3, 0.0 }
 0x75f   :  { %9481 = vpow2.f32 %v5029_v33  ;;  %v4973_v56 = vsub.f32 %v12800_v21, %v4935_v8  ;;  %5117 = vadd.xlane.f32.xlu0 %v5116_v0 }
 0x761   :  { %v12950_v34 = vpop.eup %9477  ;;  %v5033_v29 = vmul.f32 1.442695, %v4973_v56 }
 0x762   :  { %v4938_v28 = vpop.xlane.xlu0 %4937  ;;  %v5113_v22 = vsel %vm4848_vm9, %v12950_v34, 0.0 }
 0x763   :  { %9483 = vpow2.f32 %v5033_v29  ;;  %v4974_v9 = vsub.f32 %v12805_v14, %v4938_v28  ;;  %5114 = vadd.xlane.f32.xlu0 %v5113_v22 }
 0x765   :  { %v12955_v24 = vpop.eup %9479  ;;  %v5035_v6 = vmul.f32 1.442695, %v4974_v9 }
 0x766   :  { %v4944_v23 = vpop.xlane.xlu0 %4943  ;;  %v5122_v42 = vsel %vm4848_vm9, %v12955_v24, 0.0 }
 0x767   :  { %9485 = vpow2.f32 %v5035_v6  ;;  %v4976_v21 = vsub.f32 %v12812_v55, %v4944_v23  ;;  %5123 = vadd.xlane.f32.xlu0 %v5122_v42 }
 0x769   :  { %v12960_v2 = vpop.eup %9481  ;;  %v5039_v16 = vmul.f32 1.442695, %v4976_v21 }
 0x76a   :  { %v5119_v10 = vsel %vm4848_vm9, %v12960_v2, 0.0 }
 0x76b   :  { %9487 = vpow2.f32 %v5039_v16  ;;  %5120 = vadd.xlane.f32.xlu0 %v5119_v10 }
 0x76d   :  { %v12964_v14 = vpop.eup %9483 }
 0x76e   :  { %v5125_v52 = vsel %vm4848_vm9, %v12964_v14, 0.0 }
 0x76f   :  { %5126 = vadd.xlane.f32.xlu0 %v5125_v52  ;;  %v5046_v23 = vpop.xlane.xlu0 %5045 }
 0x770   :  { %v5043_v56 = vpop.xlane.xlu1 %5042 }
 0x771   :  { %v12968_v33 = vpop.eup %9485  ;;  %9489 = vrcp.f32 %v5043_v56 }
 0x772   :  { %15198 = vst [vmem:[#allocation28_spill] sm:$0xff] %v12968_v33  ;;  %v5128_v55 = vsel %vm4848_vm9, %v12968_v33, 0.0 }
 0x773   :  { %5129 = vadd.xlane.f32.xlu0 %v5128_v55 }
 0x774   :  { %v5052_v29 = vpop.xlane.xlu1 %5051 }
 0x775   :  { %v12972_v8 = vpop.eup %9487 }
 0x776   :  { %15199 = vst [vmem:[#allocation47_spill] sm:$0xff] %v12972_v8  ;;  %v5134_v0 = vsel %vm4848_vm9, %v12972_v8, 0.0 }
 0x777   :  { %5135 = vadd.xlane.f32.xlu0 %v5134_v0 }
 0x778   :  { %v5049_v28 = vpop.xlane.xlu1 %5048 }
 0x77b   :  { %v9490_v55 = vpop.eup %9489 }
 0x77c   :  { %v5058_v22 = vpop.xlane.xlu1 %5057  ;;  %v5138_v33 = vmul.f32 %v9490_v55, %v12823_v46 }
 0x780   :  { %v5055_v9 = vpop.xlane.xlu1 %5054 }
 0x784   :  { %v5064_v6 = vpop.xlane.xlu1 %5063 }
 0x788   :  { %v5061_v42 = vpop.xlane.xlu1 %5060 }
 0x78c   :  { %v12976_v10 = vpop.xlane.xlu1 %5069 }
 0x790   :  { %v5067_v0 = vpop.xlane.xlu1 %5066 }
 0x7cc   :  { %v5094_v21 = vpop.xlane.xlu0 %5093 }
 0x7cd   :  { %9491 = vrcp.f32 %v5094_v21 }
 0x7ce   :  { %9493 = vrcp.f32 %v5046_v23 }
 0x7d0   :  { %v5091_v16 = vpop.xlane.xlu0 %5090 }
 0x7d1   :  { %9495 = vrcp.f32 %v5091_v16 }
 0x7d2   :  { %9497 = vrcp.f32 %v5049_v28  ;;  %v12983_v28 = vmul.f32 %v5138_v33, %v15101_v47 }
 0x7d4   :  { %v5100_v52 = vpop.xlane.xlu0 %5099 }
 0x7d5   :  { %9499 = vrcp.f32 %v5100_v52 }
 0x7d6   :  { %9501 = vrcp.f32 %v5052_v29  ;;  %v12985_v29 = vpop.xlane.xlu1 %5075 }
 0x7d7   :  { %v9492_v44 = vpop.eup %9491 }
 0x7d8   :  { %v5097_v8 = vpop.xlane.xlu0 %5096  ;;  %v9494_v45 = vpop.eup %9493  ;;  %v5172_v56 = vmul.f32 %v9492_v44, %v12900_v50 }
 0x7d9   :  { %9503 = vrcp.f32 %v5097_v8  ;;  %v5140_v16 = vmul.f32 %v9494_v45, %v12821_v48 }
 0x7da   :  { %9505 = vrcp.f32 %v5055_v9  ;;  %v12991_v46 = vmul.f32 %v5172_v56, %v15148_v40  ;;  %v5073_v44 = vpop.xlane.xlu1 %5072 }
 0x7db   :  { %v9496_v31 = vpop.eup %9495  ;;  %v12996_v47 = vmul.f32 %v5140_v16, %v15100_v32 }
 0x7dc   :  { %v5170_v23 = vmul.f32 %v9496_v31, %v12905_v35  ;;  %v5106_v21 = vpop.xlane.xlu0 %5105  ;;  %v9498_v8 = vpop.eup %9497 }
 0x7dd   :  { %9507 = vrcp.f32 %v5106_v21  ;;  %v5142_v45 = vmul.f32 %v9498_v8, %v12835_v62  ;;  %v9253_v9 = vpack.i.bf16 %v12991_v46, %v12996_v47 }
 0x7de   :  { %v12988_v52 = vmul.f32 %v5170_v23, %v15149_v43  ;;  %9509 = vrcp.f32 %v5058_v22  ;;  %v5082_v21 = vpop.xlane.xlu1 %5081 }
 0x7df   :  { %v9500_v35 = vpop.eup %9499  ;;  %v13005_v56 = vmul.f32 %v5142_v45, %v15107_v25 }
 0x7e0   :  { %v5103_v50 = vpop.xlane.xlu0 %5102  ;;  %v9251_v31 = vpack.i.bf16 %v12988_v52, %v12983_v28  ;;  %v9502_v48 = vpop.eup %9501  ;;  %v5176_v33 = vmul.f32 %v9500_v35, %v12910_v58 }
 0x7e1   :  { %9511 = vrcp.f32 %v5103_v50  ;;  %v5144_v55 = vmul.f32 %v9502_v48, %v12830_v53 }
 0x7e2   :  { %9252 = vxpose.xlu1.b32.start [1/16] (narrow) %v9251_v31, 16  ;;  %9513 = vrcp.f32 %v5061_v42  ;;  %v13011_v58 = vmul.f32 %v5176_v33, %v15154_v63 }
 0x7e3   :  { %v9504_v43 = vpop.eup %9503  ;;  %v13016_v25 = vmul.f32 %v5144_v55, %v15106_v59 }
 0x7e4   :  { %v5174_v40 = vmul.f32 %v9504_v43, %v12915_v51  ;;  %v5112_v22 = vpop.xlane.xlu0 %5111  ;;  %v9506_v62 = vpop.eup %9505 }
 0x7e5   :  { %9515 = vrcp.f32 %v5112_v22  ;;  %v9257_v50 = vpack.i.bf16 %v13011_v58, %v13016_v25 }
 0x7e6   :  { %v13008_v32 = vmul.f32 %v5174_v40, %v15155_v17  ;;  %9254 = vxpose.xlu1.b32.cont [2/16] (narrow) %v9253_v9, 16  ;;  %9517 = vrcp.f32 %v5064_v6  ;;  %v5146_v17 = vmul.f32 %v9506_v62, %v12845_v26 }
 0x7e7   :  { %v9508_v42 = vpop.eup %9507 }
 0x7e8   :  { %v5109_v51 = vpop.xlane.xlu0 %5108  ;;  %v9255_v23 = vpack.i.bf16 %v13008_v32, %v13005_v56  ;;  %v9510_v53 = vpop.eup %9509  ;;  %v5180_v6 = vmul.f32 %v9508_v42, %v12921_v60  ;;  %v13025_v35 = vmul.f32 %v5146_v17, %v15113_v30 }
 0x7e9   :  { %9519 = vrcp.f32 %v5109_v51  ;;  %v5148_v31 = vmul.f32 %v9510_v53, %v12840_v7  ;;  %v5079_v60 = vpop.xlane.xlu1 %5078 }
 0x7ea   :  { %9256 = vxpose.xlu1.b32.cont [3/16] (narrow) %v9255_v23, 16  ;;  %9521 = vrcp.f32 %v5067_v0  ;;  %15200 = vst [vmem:[#allocation48_spill] sm:$0xff] %v13025_v35 }
 0x7eb   :  { %v9512_v16 = vpop.eup %9511  ;;  %v13037_v45 = vmul.f32 %v5148_v31, %v15112_v49 }
 0x7ec   :  { %v5178_v63 = vmul.f32 %v9512_v16, %v12926_v13  ;;  %v5118_v8 = vpop.xlane.xlu0 %5117  ;;  %v9514_v26 = vpop.eup %9513  ;;  %v13032_v13 = vmul.f32 %v5180_v6, %v15159_v41 }
 0x7ed   :  { %9523 = vrcp.f32 %v5118_v8  ;;  %15201 = vst [vmem:[#allocation32_spill] sm:$0xff] %v13037_v45  ;;  %v5088_v49 = vpop.xlane.xlu1 %5087 }
 0x7ee   :  { %v13028_v59 = vmul.f32 %v5178_v63, %v15160_v12  ;;  %9258 = vxpose.xlu1.b32.cont [4/16] (narrow) %v9257_v50, 16  ;;  %9525 = vrcp.f32 %v12976_v10  ;;  %v5150_v12 = vmul.f32 %v9514_v26, %v12855_v36  ;;  %v9261_v40 = vpack.i.bf16 %v13032_v13, %v13037_v45 }
 0x7ef   :  { %v9516_v7 = vpop.eup %9515 }
 0x7f0   :  { %v5115_v48 = vpop.xlane.xlu0 %5114  ;;  %v9259_v0 = vpack.i.bf16 %v13028_v59, %v13025_v35  ;;  %v9518_v30 = vpop.eup %9517  ;;  %v5184_v10 = vmul.f32 %v9516_v7, %v12931_v39  ;;  %v13046_v9 = vmul.f32 %v5150_v12, %v15119_v37  ;;  %v15208_v7 = vld [vmem:[#allocation39_spill] sm:$0xff] }
 0x7f1   :  { %9527 = vrcp.f32 %v5115_v48  ;;  %v5152_v22 = vmul.f32 %v9518_v30, %v12850_v61  ;;  %v5085_v23 = vpop.xlane.xlu1 %5084 }
 0x7f2   :  { %9260 = vxpose.xlu1.b32.cont [5/16] (narrow) %v9259_v0, 16  ;;  %9529 = vrcp.f32 %v5073_v44  ;;  %15202 = vst [vmem:[#allocation22_spill] sm:$0xff] %v13046_v9  ;;  %v13053_v39 = vmul.f32 %v5184_v10, %v15165_v1  ;;  %v15206_v0 = vld [vmem:[#allocation26_spill] sm:$0xff] }
 0x7f3   :  { %v9520_v43 = vpop.eup %9519  ;;  %v13058_v62 = vmul.f32 %v5152_v22, %v15118_v19 }
 0x7f4   :  { %v5182_v33 = vmul.f32 %v9520_v43, %v12936_v5  ;;  %v5124_v41 = vpop.xlane.xlu0 %5123  ;;  %v9522_v36 = vpop.eup %9521 }
 0x7f5   :  { %9531 = vrcp.f32 %v5124_v41  ;;  %15203 = vst [vmem:[#allocation50_spill] sm:$0xff] %v13058_v62  ;;  %v9265_v53 = vpack.i.bf16 %v13053_v39, %v13058_v62  ;;  %v5133_v6 = vpop.xlane.xlu1 %5132  ;;  %v15214_v41 = vld [vmem:[#allocation20_spill] sm:$0xff] }
 0x7f6   :  { %v13049_v55 = vmul.f32 %v5182_v33, %v15166_v20  ;;  %9262 = vxpose.xlu1.b32.cont [6/16] (narrow) %v9261_v40, 16  ;;  %9533 = vrcp.f32 %v12985_v29  ;;  %v5154_v20 = vmul.f32 %v9522_v36, %v12865_v15  ;;  %v15215_v36 = vld [vmem:[#allocation45_spill] sm:$0xff] }
 0x7f7   :  { %v9524_v61 = vpop.eup %9523 }
 0x7f8   :  { %v5121_v5 = vpop.xlane.xlu0 %5120  ;;  %v9263_v44 = vpack.i.bf16 %v13049_v55, %v13046_v9  ;;  %v9526_v37 = vpop.eup %9525  ;;  %v5188_v29 = vmul.f32 %v9524_v61, %v12945_v3  ;;  %v13067_v19 = vmul.f32 %v5154_v20, %v15125_v4  ;;  %v15218_v20 = vld [vmem:[#allocation21_spill] sm:$0xff] }
 0x7f9   :  { %9535 = vrcp.f32 %v5121_v5  ;;  %v5156_v17 = vmul.f32 %v9526_v37, %v12860_v27 }
 0x7fa   :  { %9264 = vxpose.xlu1.b32.cont [7/16] (narrow) %v9263_v44, 16  ;;  %9537 = vrcp.f32 %v5079_v60  ;;  %15204 = vst [vmem:[#allocation52_spill] sm:$0xff] %v13067_v19  ;;  %v13073_v3 = vmul.f32 %v5188_v29, %v15171_v57  ;;  %v15217_v44 = vld [vmem:[#allocation28_spill] sm:$0xff] }
 0x7fb   :  { %v9528_v51 = vpop.eup %9527  ;;  %v13078_v4 = vmul.f32 %v5156_v17, %v15124_v38 }
 0x7fc   :  { %v5186_v1 = vmul.f32 %v9528_v51, %v12950_v34  ;;  %v5127_v42 = vpop.xlane.xlu0 %5126  ;;  %v9530_v16 = vpop.eup %9529 }
 0x7fd   :  { %9539 = vrcp.f32 %v5127_v42  ;;  %15205 = vst [vmem:[#allocation34_spill] sm:$0xff] %v13078_v4  ;;  %v9269_v26 = vpack.i.bf16 %v13073_v3, %v13078_v4 }
 0x7fe   :  { %v13070_v15 = vmul.f32 %v5186_v1, %v15172_v18  ;;  %9266 = vxpose.xlu1.b32.cont [8/16] (narrow) %v9265_v53, 16  ;;  %9541 = vrcp.f32 %v5082_v21  ;;  %v5158_v18 = vmul.f32 %v9530_v16, %v12875_v11  ;;  %v15221_v1 = vld [vmem:[#allocation30_spill] sm:$0xff]  ;;  %v15222_v53 = vld [vmem:[#allocation87_spill] sm:$0xff] }
 0x7ff   :  { %v9532_v8 = vpop.eup %9531 }
 0x800   :  { %v5130_v34 = vpop.xlane.xlu0 %5129  ;;  %v9267_v63 = vpack.i.bf16 %v13070_v15, %v13067_v19  ;;  %v9534_v27 = vpop.eup %9533  ;;  %v5192_v21 = vmul.f32 %v9532_v8, %v12955_v24  ;;  %v13087_v38 = vmul.f32 %v5158_v18, %v15206_v0  ;;  %v15210_v24 = vld [vmem:[#allocation82_spill] sm:$0xff]  ;;  %v15226_v8 = vld [vmem:[#allocation44_spill] sm:$0xff]  ;;  %v15231_v0 = vld [vmem:[#allocation33_spill] sm:$0xff] }
 0x801   :  { %9543 = vrcp.f32 %v5130_v34  ;;  %v5160_v48 = vmul.f32 %v9534_v27, %v12870_v54  ;;  %v15212_v54 = vld [vmem:[#allocation41_spill] sm:$0xff]  ;;  %v15224_v34 = vld [vmem:[#allocation51_spill] sm:$0xff] }
 0x802   :  { %9268 = vxpose.xlu1.b32.cont [9/16] (narrow) %v9267_v63, 16  ;;  %9545 = vrcp.f32 %v5133_v6  ;;  %15207 = vst [vmem:[#allocation23_spill] sm:$0xff] %v13087_v38  ;;  %v13093_v12 = vmul.f32 %v5192_v21, %v15210_v24 }
 0x803   :  { %v9536_v50 = vpop.eup %9535  ;;  %9547 = vrcp.f32 %v5085_v23  ;;  %v13099_v33 = vmul.f32 %v5160_v48, %v15212_v54 }
 0x804   :  { %v5190_v57 = vmul.f32 %v9536_v50, %v12960_v2  ;;  %v5136_v31 = vpop.xlane.xlu0 %5135  ;;  %v9538_v60 = vpop.eup %9537  ;;  %15211 = vst [vmem:[#allocation55_spill] sm:$0xff] %v13093_v12  ;;  %v15227_v50 = vld [vmem:[#allocation49_spill] sm:$0xff] }
 0x805   :  { %9549 = vrcp.f32 %v5136_v31  ;;  %15213 = vst [vmem:[#allocation36_spill] sm:$0xff] %v13099_v33  ;;  %v5162_v40 = vmul.f32 %v9538_v60, %v15214_v41  ;;  %v15230_v60 = vld [vmem:[#allocation43_spill] sm:$0xff]  ;;  %v15237_v41 = vld [vmem:[#allocation57_spill] sm:$0xff] }
 0x806   :  { %v13090_v11 = vmul.f32 %v5190_v57, %v15208_v7  ;;  %9270 = vxpose.xlu1.b32.cont [10/16] (narrow) %v9269_v26, 16  ;;  %9551 = vrcp.f32 %v5088_v49  ;;  %v15219_v49 = vld [vmem:[#allocation29_spill] sm:$0xff]  ;;  %v15229_v57 = vld [vmem:[#allocation47_spill] sm:$0xff] }
 0x807   :  { %v9540_v30 = vpop.eup %9539  ;;  %v13110_v23 = vmul.f32 %v5162_v40, %v15219_v49  ;;  %v15238_v40 = vld [vmem:[#allocation95_spill] sm:$0xff]  ;;  %v15240_v49 = vld [vmem:[#allocation194_spill] sm:$0xff] }
 0x808   :  { %15209 = vst [vmem:[#allocation53_spill] sm:$0xff] %v13090_v11  ;;  %v5194_v2 = vmul.f32 %v9540_v30, %v12964_v14  ;;  %v9271_v43 = vpack.i.bf16 %v13090_v11, %v13087_v38  ;;  %v9542_v10 = vpop.eup %9541  ;;  %v9273_v14 = vpack.i.bf16 %v13093_v12, %v13099_v33  ;;  %v15233_v30 = vld [vmem:[#allocation92_spill] sm:$0xff] }
 0x809   :  { %v5164_v51 = vmul.f32 %v9542_v10, %v15218_v20  ;;  %15220 = vst [vmem:[#allocation59_spill] sm:$0xff] %v13110_v23 }
 0x80a   :  { %9272 = vxpose.xlu1.b32.cont [11/16] (narrow) %v9271_v43, 16  ;;  %v13103_v5 = vmul.f32 %v5194_v2, %v15215_v36  ;;  %v15235_v43 = vld [vmem:[#allocation63_spill] sm:$0xff] }
 0x80b   :  { %v9544_v22 = vpop.eup %9543  ;;  %v13119_v63 = vmul.f32 %v5164_v51, %v15224_v34  ;;  %v15239_v51 = vld [vmem:[#allocation192_spill] sm:$0xff]  ;;  %v15245_v34 = vld [vmem:[#allocation195_spill] sm:$0xff] }
 0x80c   :  { %15216 = vst [vmem:[#allocation24_spill] sm:$0xff] %v13103_v5  ;;  %v5196_v61 = vmul.f32 %v9544_v22, %v15217_v44  ;;  %v9546_v37 = vpop.eup %9545  ;;  %v9275_v16 = vpack.i.bf16 %v13103_v5, %v13110_v23  ;;  %v1592_v22 = vmul.f32 %v15238_v40, %v15237_v41  ;;  %v15255_v41 = vld [vmem:[#allocation19_spill] sm:$0xff] }
 0x80d   :  { %v9548_v29 = vpop.eup %9547  ;;  %v5198_v42 = vmul.f32 %v9546_v37, %v15221_v1  ;;  %15225 = vst [vmem:[#allocation62_spill] sm:$0xff] %v13119_v63  ;;  %v15241_v1 = vld [vmem:[#allocation40_spill] sm:$0xff]  ;;  %v15256_v40 = vld [vmem:[#allocation211_spill] sm:$0xff] }
 0x80e   :  { %9274 = vxpose.xlu1.b32.cont [12/16] (narrow) %v9273_v14, 16  ;;  %v13114_v17 = vmul.f32 %v5196_v61, %v15222_v53  ;;  %v5166_v27 = vmul.f32 %v9548_v29, %v15226_v8  ;;  %v9018_v29 = vpack.c.bf16 %v15240_v49, %v15239_v51  ;;  %v15243_v53 = vld [vmem:[#allocation13_spill] sm:$0xff]  ;;  %v15246_v8 = vld [vmem:[#allocation198_spill] sm:$0xff] }
 0x80f   :  { %v9550_v6 = vpop.eup %9549  ;;  %v13123_v21 = vmul.f32 %v5198_v42, %v15227_v50  ;;  %v15242_v42 = vld [vmem:[#allocation42_spill] sm:$0xff]  ;;  %v15248_v50 = vld [vmem:[#allocation16_spill] sm:$0xff] }
 0x810   :  { %15223 = vst [vmem:[#allocation60_spill] sm:$0xff] %v13114_v17  ;;  %v9552_v18 = vpop.eup %9551  ;;  %v5200_v31 = vmul.f32 %v9550_v6, %v15229_v57  ;;  %v9277_v26 = vpack.i.bf16 %v13114_v17, %v13119_v63  ;;  %v13130_v7 = vmul.f32 %v5166_v27, %v15231_v0  ;;  %v9022_v27 = vpack.c.bf16 %v15246_v8, %v15245_v34  ;;  %v15252_v0 = vld [vmem:[#allocation18_spill] sm:$0xff]  ;;  %v15268_v8 = vld [vmem:[#allocation217_spill] sm:$0xff] }
 0x811   :  { %15228 = vst [vmem:[#allocation65_spill] sm:$0xff] %v13123_v21  ;;  %v5168_v48 = vmul.f32 %v9552_v18, %v15230_v60  ;;  %v15247_v18 = vld [vmem:[#allocation15_spill] sm:$0xff] }
 0x812   :  { %9276 = vxpose.xlu1.b32.cont [13/16] (narrow) %v9275_v16, 16  ;;  %15232 = vst [vmem:[#allocation67_spill] sm:$0xff] %v13130_v7  ;;  %v13133_v24 = vmul.f32 %v5200_v31, %v15233_v30  ;;  %v9279_v2 = vpack.i.bf16 %v13123_v21, %v13130_v7  ;;  %v15244_v16 = vld [vmem:[#allocation14_spill] sm:$0xff]  ;;  %v9054_v57 = vpack.c.bf16 %v15248_v50, %v15247_v18  ;;  %v15249_v31 = vld [vmem:[#allocation199_spill] sm:$0xff] }
 0x813   :  { %v13138_v10 = vmul.f32 %v5168_v48, %v15235_v43  ;;  %v9050_v6 = vpack.c.bf16 %v15244_v16, %v15243_v53  ;;  %v15251_v48 = vld [vmem:[#allocation17_spill] sm:$0xff]  ;;  %v15254_v43 = vld [vmem:[#allocation203_spill] sm:$0xff] }
 0x814   :  { %15234 = vst [vmem:[#allocation68_spill] sm:$0xff] %v13133_v24  ;;  %v9058_v30 = vpack.c.bf16 %v15252_v0, %v15251_v48 }
 0x815   :  { %15236 = vst [vmem:[#allocation71_spill] sm:$0xff] %v13138_v10  ;;  %v9281_v54 = vpack.i.bf16 %v13133_v24, %v13138_v10 }
 0x816   :  { %9278 = vxpose.xlu1.b32.cont [14/16] (narrow) %v9277_v26, 16  ;;  %v15250_v26 = vld [vmem:[#allocation147_spill] sm:$0xff] }
 0x817   :  { %v9026_v60 = vpack.c.bf16 %v15250_v26, %v15249_v31  ;;  %v15264_v26 = vld [vmem:[#allocation215_spill] sm:$0xff] }
 0x81a   :  { %9280 = vxpose.xlu1.b32.cont [15/16] (narrow) %v9279_v2, 16  ;;  %v15253_v2 = vld [vmem:[#allocation202_spill] sm:$0xff] }
 0x81e   :  { %9282 = vxpose.xlu1.b32.end [16/16] (narrow) %v9281_v54, 16  ;;  %v9030_v54 = vpack.c.bf16 %v15254_v43, %v15253_v2  ;;  %v15263_v2 = vld [vmem:[#allocation214_spill] sm:$0xff] }
 0x81f   :  { %v9070_v31 = vpack.c.bf16 %v15264_v26, %v15263_v2 }
 0x83c   :  { %1657 = vrot.lane.b32.xlu1 %v1592_v22, %s9684_s6  ;;  %v9062_v22 = vpack.c.bf16 %v15256_v40, %v15255_v41 }
 0x862   :  { %v9283_v36 = vpop.trf.xlu1 }
 0x863   :  { %v13145_v44 = vunpack.i.l.bf16 %v9283_v36  ;;  %v13147_v61 = vunpack.i.h.bf16 %v9283_v36  ;;  %v15257_v36 = vld [vmem:[#allocation204_spill] sm:$0xff] }
 0x865   :  { %8412 = vmatprep.mubr.f32.mxu0 %v13145_v44  ;;  %8447 = vmatprep.mubr.f32.mxu1 %v13147_v61 }
 0x866   :  { %v9288_v14 = vpop.trf.xlu1 }
 0x867   :  { %v13151_v37 = vunpack.i.h.bf16 %v9288_v14  ;;  %v13153_v20 = vunpack.i.l.bf16 %v9288_v14  ;;  %v15258_v14 = vld [vmem:[#allocation205_spill] sm:$0xff] }
 0x869   :  { %8413 = vmatmul.mubr.f32.vlgmr.msra.gmra.mrb[98].mxu0 %v13153_v20  ;;  %8448 = vmatmul.mubr.f32.vlgmr.msra.gmra.mrb[98].mxu1 %v13151_v37 }
 0x86a   :  { %9017 = vmatpush3.bf16.msra.mxu0 %v15241_v1  ;;  %9049 = vmatpush3.bf16.msra.mxu1 %v15242_v42  ;;  %v15259_v1 = vld [vmem:[#allocation212_spill] sm:$0xff]  ;;  %v15260_v42 = vld [vmem:[#allocation213_spill] sm:$0xff] }
 0x86b   :  { %9019 = vmatprep.subr.bf16.mxu0 %v9018_v29  ;;  %8482 = vmatprep.mubr.f32.mxu0 %v13145_v44 }
 0x86c   :  { %9051 = vmatprep.subr.bf16.mxu1 %v9050_v6  ;;  %8517 = vmatprep.mubr.f32.mxu1 %v13147_v61 }
 0x86e   :  { %9021 = vmatpush3.bf16.msra.mxu0 %v9018_v29  ;;  %9053 = vmatpush3.bf16.msra.mxu1 %v9050_v6  ;;  %v9034_v29 = vpack.c.bf16 %v15258_v14, %v15257_v36  ;;  %v9066_v6 = vpack.c.bf16 %v15260_v42, %v15259_v1  ;;  %v15267_v36 = vld [vmem:[#allocation216_spill] sm:$0xff] }
 0x86f   :  { %9023 = vmatprep.subr.bf16.mxu0 %v9022_v27  ;;  %9055 = vmatprep.subr.bf16.mxu1 %v9054_v57  ;;  %v9074_v34 = vpack.c.bf16 %v15268_v8, %v15267_v36 }
 0x872   :  { %9025 = vmatpush3.bf16.msra.mxu0 %v9022_v27  ;;  %9057 = vmatpush3.bf16.msra.mxu1 %v9054_v57  ;;  %v15261_v27 = vld [vmem:[#allocation207_spill] sm:$0xff]  ;;  %v15262_v57 = vld [vmem:[#allocation208_spill] sm:$0xff] }
 0x873   :  { %9027 = vmatprep.subr.bf16.mxu0 %v9026_v60  ;;  %9059 = vmatprep.subr.bf16.mxu1 %v9058_v30  ;;  %v9038_v43 = vpack.c.bf16 %v15262_v57, %v15261_v27 }
 0x876   :  { %9029 = vmatpush3.bf16.msra.mxu0 %v9026_v60  ;;  %9061 = vmatpush3.bf16.msra.mxu1 %v9058_v30  ;;  %v15265_v60 = vld [vmem:[#allocation206_spill] sm:$0xff]  ;;  %v15266_v30 = vld [vmem:[#allocation209_spill] sm:$0xff] }
 0x877   :  { %9031 = vmatprep.subr.bf16.mxu0 %v9030_v54  ;;  %9063 = vmatprep.subr.bf16.mxu1 %v9062_v22  ;;  %v9042_v14 = vpack.c.bf16 %v15266_v30, %v15265_v60 }
 0x87a   :  { %9033 = vmatpush3.bf16.msra.mxu0 %v9030_v54  ;;  %9065 = vmatpush3.bf16.msra.mxu1 %v9062_v22  ;;  %v13191_v54 = vpack.c.bf16 %v12996_v47, %v12983_v28  ;;  %v13195_v22 = vpack.c.bf16 %v12991_v46, %v12988_v52 }
 0x87b   :  { %9035 = vmatprep.subr.bf16.mxu0 %v9034_v29  ;;  %9067 = vmatprep.subr.bf16.mxu1 %v9066_v6 }
 0x87e   :  { %9037 = vmatpush3.bf16.msra.mxu0 %v9034_v29  ;;  %9069 = vmatpush3.bf16.msra.mxu1 %v9066_v6  ;;  %v9090_v29 = vpack.c.bf16 %v13058_v62, %v13046_v9  ;;  %v9122_v6 = vpack.c.bf16 %v13053_v39, %v13049_v55  ;;  %v9098_v62 = vpack.c.bf16 %v13099_v33, %v13087_v38 }
 0x87f   :  { %9039 = vmatprep.subr.bf16.mxu0 %v9038_v43  ;;  %9071 = vmatprep.subr.bf16.mxu1 %v9070_v31  ;;  %v9130_v9 = vpack.c.bf16 %v13093_v12, %v13090_v11  ;;  %v9106_v33 = vpack.c.bf16 %v13138_v10, %v13130_v7  ;;  %v9138_v38 = vpack.c.bf16 %v13133_v24, %v13123_v21 }
 0x882   :  { %9041 = vmatpush3.bf16.msra.mxu0 %v9038_v43  ;;  %9073 = vmatpush3.bf16.msra.mxu1 %v9070_v31  ;;  %v13203_v31 = vpack.c.bf16 %v13016_v25, %v13005_v56  ;;  %v13207_v43 = vpack.c.bf16 %v13011_v58, %v13008_v32 }
 0x883   :  { %9043 = vmatprep.subr.bf16.mxu0 %v9042_v14  ;;  %9075 = vmatprep.subr.bf16.mxu1 %v9074_v34 }
 0x886   :  { %9045 = vmatpush3.bf16.msra.mxu0 %v9042_v14  ;;  %9077 = vmatpush3.bf16.msra.mxu1 %v9074_v34  ;;  %v13215_v34 = vpack.c.bf16 %v13037_v45, %v13025_v35  ;;  %v13219_v14 = vpack.c.bf16 %v13032_v13, %v13028_v59  ;;  %v9094_v45 = vpack.c.bf16 %v13078_v4, %v13067_v19 }
 0x887   :  { %9079 = vmatprep.subr.bf16.mxu0 %v13191_v54  ;;  %9111 = vmatprep.subr.bf16.mxu1 %v13195_v22  ;;  %v9126_v35 = vpack.c.bf16 %v13073_v3, %v13070_v15  ;;  %v9102_v4 = vpack.c.bf16 %v13119_v63, %v13110_v23  ;;  %v9134_v19 = vpack.c.bf16 %v13114_v17, %v13103_v5 }
 0x889   :  { %8483 = vmatmul.mubr.f32.vlgmr.msra.gmra.mrb[100].mxu0 %v13153_v20  ;;  %8518 = vmatmul.mubr.f32.vlgmr.msra.gmra.mrb[100].mxu1 %v13151_v37 }
 0x88a   :  { %9081 = vmatpush3.bf16.msra.mxu0 %v13191_v54  ;;  %9113 = vmatpush3.bf16.msra.mxu1 %v13195_v22 }
 0x88b   :  { %9083 = vmatprep.subr.bf16.mxu0 %v13203_v31  ;;  %9115 = vmatprep.subr.bf16.mxu1 %v13207_v43 }
 0x88e   :  { %9085 = vmatpush3.bf16.msra.mxu0 %v13203_v31  ;;  %9117 = vmatpush3.bf16.msra.mxu1 %v13207_v43 }
 0x88f   :  { %9087 = vmatprep.subr.bf16.mxu0 %v13215_v34  ;;  %9119 = vmatprep.subr.bf16.mxu1 %v13219_v14 }
 0x892   :  { %9089 = vmatpush3.bf16.msra.mxu0 %v13215_v34  ;;  %9121 = vmatpush3.bf16.msra.mxu1 %v13219_v14 }
 0x893   :  { %9091 = vmatprep.subr.bf16.mxu0 %v9090_v29  ;;  %9123 = vmatprep.subr.bf16.mxu1 %v9122_v6 }
 0x896   :  { %9093 = vmatpush3.bf16.msra.mxu0 %v9090_v29  ;;  %9125 = vmatpush3.bf16.msra.mxu1 %v9122_v6 }
 0x897   :  { %9095 = vmatprep.subr.bf16.mxu0 %v9094_v45  ;;  %9127 = vmatprep.subr.bf16.mxu1 %v9126_v35 }
 0x89a   :  { %9097 = vmatpush3.bf16.msra.mxu0 %v9094_v45  ;;  %9129 = vmatpush3.bf16.msra.mxu1 %v9126_v35 }
 0x89b   :  { %9099 = vmatprep.subr.bf16.mxu0 %v9098_v62  ;;  %9131 = vmatprep.subr.bf16.mxu1 %v9130_v9 }
 0x89e   :  { %9101 = vmatpush3.bf16.msra.mxu0 %v9098_v62  ;;  %9133 = vmatpush3.bf16.msra.mxu1 %v9130_v9 }
 0x89f   :  { %9103 = vmatprep.subr.bf16.mxu0 %v9102_v4  ;;  %9135 = vmatprep.subr.bf16.mxu1 %v9134_v19 }
 0x8a2   :  { %9105 = vmatpush3.bf16.msra.mxu0 %v9102_v4  ;;  %9137 = vmatpush3.bf16.msra.mxu1 %v9134_v19 }
 0x8a3   :  { %9107 = vmatprep.subr.bf16.mxu0 %v9106_v33  ;;  %9139 = vmatprep.subr.bf16.mxu1 %v9138_v38 }
 0x8a6   :  { %9109 = vmatpush3.bf16.msra.mxu0 %v9106_v33  ;;  %9141 = vmatpush3.bf16.msra.mxu1 %v9138_v38 }
 0x8a7   :  { %9143 = vmatprep.subr.bf16.mxu0 %v13191_v54  ;;  %9175 = vmatprep.subr.bf16.mxu1 %v13195_v22 }
 0x93c   :  { %v13249_v63 = vpop.f32.mrb[98].mxu0  ;;  %v13251_v23 = vpop.f32.mrb[98].mxu1 }
 0x93d   :  { %v13253_v17 = vpop.f32.mrb[99].mxu0  ;;  %v13255_v10 = vpop.f32.mrb[99].mxu1 }
 0x93e   :  { %v9206_v7 = vpack.c.bf16 %v13249_v63, %v13253_v17  ;;  %v13261_v24 = vpack.c.bf16 %v13251_v23, %v13255_v10 }
 0x95c   :  { %v8484_v21 = vpop.f32.mrb[100].mxu0  ;;  %v8519_v5 = vpop.f32.mrb[100].mxu1 }
 0x95d   :  { %v5545_v12 = vpop.f32.mrb[101].mxu0  ;;  %v5620_v11 = vpop.f32.mrb[101].mxu1 }
 0x95e   :  { %8552 = vmatprep.mubr.f32.mxu0 %v5545_v12  ;;  %8587 = vmatprep.mubr.f32.mxu1 %v5620_v11 }
 0x95f   :  { %8553 = vmatmul.mubr.f32.vlgmr.msra.gmra.mrb[102].mxu0 %v8484_v21  ;;  %8588 = vmatmul.mubr.f32.vlgmr.msra.gmra.mrb[102].mxu1 %v8519_v5 }
 0x960   :  { %9145 = vmatpush3.bf16.msra.mxu0 %v13191_v54  ;;  %9177 = vmatpush3.bf16.msra.mxu1 %v13195_v22 }
 0x961   :  { %9147 = vmatprep.subr.bf16.mxu0 %v13203_v31  ;;  %8622 = vmatprep.mubr.f32.mxu0 %v13145_v44 }
 0x962   :  { %9179 = vmatprep.subr.bf16.mxu1 %v13207_v43  ;;  %8657 = vmatprep.mubr.f32.mxu1 %v13147_v61 }
 0x964   :  { %9149 = vmatpush3.bf16.msra.mxu0 %v13203_v31  ;;  %9181 = vmatpush3.bf16.msra.mxu1 %v13207_v43 }
 0x965   :  { %9151 = vmatprep.subr.bf16.mxu0 %v13215_v34  ;;  %9183 = vmatprep.subr.bf16.mxu1 %v13219_v14 }
 0x968   :  { %9153 = vmatpush3.bf16.msra.mxu0 %v13215_v34  ;;  %9185 = vmatpush3.bf16.msra.mxu1 %v13219_v14 }
 0x969   :  { %9155 = vmatprep.subr.bf16.mxu0 %v9090_v29  ;;  %9187 = vmatprep.subr.bf16.mxu1 %v9122_v6 }
 0x96c   :  { %9157 = vmatpush3.bf16.msra.mxu0 %v9090_v29  ;;  %9189 = vmatpush3.bf16.msra.mxu1 %v9122_v6 }
 0x96d   :  { %9159 = vmatprep.subr.bf16.mxu0 %v9094_v45  ;;  %9191 = vmatprep.subr.bf16.mxu1 %v9126_v35 }
 0x970   :  { %9161 = vmatpush3.bf16.msra.mxu0 %v9094_v45  ;;  %9193 = vmatpush3.bf16.msra.mxu1 %v9126_v35  ;;  %v15269_v35 = vld [vmem:[#allocation170_spill] sm:$0xff] }
 0x971   :  { %9163 = vmatprep.subr.bf16.mxu0 %v9098_v62  ;;  %9195 = vmatprep.subr.bf16.mxu1 %v9130_v9  ;;  %v5779_v45 = vadd.s32 8, %v15269_v35 }
 0x974   :  { %9165 = vmatpush3.bf16.msra.mxu0 %v9098_v62  ;;  %9197 = vmatpush3.bf16.msra.mxu1 %v9130_v9  ;;  %v15270_v62 = vld [vmem:[#allocation168_spill] sm:$0xff]  ;;  %v15271_v9 = vmov 0.0  }
 0x975   :  { %9167 = vmatprep.subr.bf16.mxu0 %v9102_v4  ;;  %9199 = vmatprep.subr.bf16.mxu1 %v9134_v19  ;;  %vm5780_vm6 = vcmp.eq.s32.totalorder %v5779_v45, %v15270_v62  ;;  %vm3819_vm1 = vcmp.eq.s32.totalorder %v15269_v35, %v15270_v62  ;;  %v15278_v62 = vld [vmem:[#allocation218_spill] sm:$0xff] }
 0x978   :  { %9169 = vmatpush3.bf16.msra.mxu0 %v9102_v4  ;;  %9201 = vmatpush3.bf16.msra.mxu1 %v9134_v19  ;;  %v13283_v19 = vsel %vm5780_vm6, 1.0, %v15271_v9  ;;  %v13286_v4 = vsel %vm3819_vm1, 1.0, %v15271_v9  ;;  %vm15296_vm1 = vmmov 0  }
 0x979   :  { %9171 = vmatprep.subr.bf16.mxu0 %v9106_v33  ;;  %9203 = vmatprep.subr.bf16.mxu1 %v9138_v38  ;;  %v6556_v11 = vsub.f32 1.0, %v13286_v4 }
 0x97c   :  { %9173 = vmatpush3.bf16.msra.mxu0 %v9106_v33  ;;  %9205 = vmatpush3.bf16.msra.mxu1 %v9138_v38  ;;  %v6557_v38 = vsub.f32 1.0, %v13283_v19 }
 0x97d   :  { %9207 = vmatprep.subr.bf16.mxu0 %v9206_v7 }
 0x97f   :  { %8623 = vmatmul.mubr.f32.vlgmr.msra.gmra.mrb[104].mxu0 %v13153_v20  ;;  %8658 = vmatmul.mubr.f32.vlgmr.msra.gmra.mrb[104].mxu1 %v13151_v37 }
 0x980   :  { %9209 = vmatpush3.bf16.msra.mxu0 %v9206_v7 }
 0x981   :  { %9211 = vmatprep.subr.bf16.mxu0 %v13261_v24 }
 0xa32   :  { %v13290_v12 = vpop.f32.mrb[102].mxu0  ;;  %v13292_v33 = vpop.f32.mrb[102].mxu1 }
 0xa33   :  { %15272 = vst [vmem:[#allocation73_spill] sm:$0xff] %v13290_v12  ;;  %15273 = vst [vmem:[#allocation38_spill] sm:$0xff] %v13292_v33  ;;  %v13295_v5 = vmul.f32 %v13290_v12, %v6557_v38  ;;  %v13297_v21 = vpop.f32.mrb[103].mxu0  ;;  %v13299_v7 = vpop.f32.mrb[103].mxu1  ;;  %v13312_v54 = vmul.f32 %v13292_v33, %v6557_v38  ;;  %v3786_v38 = vmul.f32 %v15278_v62, %v15278_v62 }
 0xa34   :  { %15274 = vst [vmem:[#allocation25_spill] sm:$0xff] %v13297_v21  ;;  %15275 = vst [vmem:[#allocation75_spill] sm:$0xff] %v13299_v7  ;;  %v13302_v44 = vmul.f32 %v6556_v11, %v13297_v21  ;;  %v13307_v37 = vmul.f32 %v6556_v11, %v13299_v7 }
 0xa35   :  { %v6565_v61 = vsel %vm4848_vm9, %v13295_v5, 0.0  ;;  %v6571_v31 = vsel %vm4848_vm9, %v13312_v54, 0.0 }
 0xa36   :  { %6566 = vadd.xlane.f32.xlu0 %v6565_v61  ;;  %v6562_v20 = vsel %vm4848_vm9, %v13302_v44, 0.0  ;;  %v6568_v22 = vsel %vm4848_vm9, %v13307_v37, 0.0  ;;  %v15280_v61 = vld [vmem:[#allocation54_spill] sm:$0xff] }
 0xa3a   :  { %6563 = vadd.xlane.f32.xlu0 %v6562_v20  ;;  %v15281_v20 = vld [vmem:[#allocation56_spill] sm:$0xff] }
 0xa3e   :  { %6569 = vadd.xlane.f32.xlu0 %v6568_v22  ;;  %v1591_v22 = vmul.f32 %v15281_v20, %v15280_v61 }
 0xa42   :  { %6572 = vadd.xlane.f32.xlu0 %v6571_v31  ;;  %v15282_v31 = vld [vmem:[#allocation66_spill] sm:$0xff] }
 0xa52   :  { %v13318_v43 = vpop.f32.mrb[104].mxu0  ;;  %v13320_v34 = vpop.f32.mrb[104].mxu1 }
 0xa53   :  { %15276 = vst [vmem:[#allocation77_spill] sm:$0xff] %v13318_v43  ;;  %v13322_v14 = vpop.f32.mrb[105].mxu0  ;;  %v13324_v29 = vpop.f32.mrb[105].mxu1  ;;  %v6432_v35 = vmul.f32 %v13318_v43, %v13318_v43 }
 0xa54   :  { %15277 = vst [vmem:[#allocation46_spill] sm:$0xff] %v13322_v14  ;;  %v6431_v6 = vmul.f32 %v13322_v14, %v13322_v14  ;;  %v15291_v14 = vld [vmem:[#allocation10_spill] sm:$0xff] }
 0xa56   :  { %v6435_v45 = vsel %vm4848_vm9, %v6431_v6, 0.0  ;;  %v15283_v6 = vld [vmem:[#allocation99_spill] sm:$0xff] }
 0xa58   :  { %6826 = vrot.lane.b32.xlu0 %v13253_v17, %s9688_s10  ;;  %v6438_v17 = vsel %vm4848_vm9, %v6432_v35, 0.0  ;;  %v15284_v35 = vld [vmem:[#allocation64_spill] sm:$0xff] }
 0xa5c   :  { %6828 = vrot.lane.b32.xlu0 %v13249_v63, %s9688_s10  ;;  %v15279_v63 = vld [vmem:[#allocation219_spill] sm:$0xff] }
 0xa60   :  { %6830 = vrot.lane.b32.xlu0 %v13255_v10, %s9688_s10  ;;  %v3787_v10 = vmul.f32 %v15279_v63, %v15279_v63 }
 0xa62   :  { %v3791_v11 = vsel %vm1124_vm5, %v3787_v10, 0.0  ;;  %v15288_v10 = vld [vmem:[#allocation72_spill] sm:$0xff] }
 0xa64   :  { %6832 = vrot.lane.b32.xlu0 %v13251_v23, %s9688_s10  ;;  %v3788_v23 = vsel %vm1124_vm5, %v3786_v38, 0.0  ;;  %v15286_v38 = vld [vmem:[#allocation78_spill] sm:$0xff] }
 0xa83   :  { %6436 = vadd.xlane.f32.xlu0 %v6435_v45  ;;  %v1593_v45 = vmul.f32 %v15283_v6, %v15282_v31 }
 0xa87   :  { %6439 = vadd.xlane.f32.xlu0 %v6438_v17  ;;  %v15285_v17 = vld [vmem:[#allocation103_spill] sm:$0xff] }
 0xa88   :  { %v1594_v33 = vmul.f32 %v15285_v17, %v15284_v35 }
 0xa8b   :  { %3789 = vadd.xlane.f32.xlu0 %v3788_v23  ;;  %v15287_v23 = vld [vmem:[#allocation107_spill] sm:$0xff] }
 0xa8c   :  { %v1595_v63 = vmul.f32 %v15287_v23, %v15286_v38 }
 0xa8f   :  { %3792 = vadd.xlane.f32.xlu0 %v3791_v11  ;;  %v15289_v11 = vld [vmem:[#allocation111_spill] sm:$0xff] }
 0xa90   :  { %v1596_v61 = vmul.f32 %v15289_v11, %v15288_v10 }
 0xaa5   :  { %1655 = vrot.lane.b32.xlu0 %v1591_v22, %s9684_s6 }
 0xaa9   :  { %1659 = vrot.lane.b32.xlu0 %v1593_v45, %s9684_s6 }
 0xaad   :  { %1661 = vrot.lane.b32.xlu0 %v1594_v33, %s9684_s6 }
 0xab1   :  { %1663 = vrot.lane.b32.xlu0 %v1595_v63, %s9684_s6 }
 0xab5   :  { %1665 = vrot.lane.b32.xlu0 %v1596_v61, %s9684_s6  ;;  %v15290_v61 = vld [vmem:[#allocation8_spill] sm:$0xff] }
 0xac3   :  { %v6567_v20 = vpop.xlane.xlu0 %6566 }
 0xac4   :  { %v6575_v22 = vadd.f32 1e-15, %v6567_v20 }
 0xac6   :  { %9553 = vrsqrt.f32 %v6575_v22  ;;  %vm6587_vm13 = vcmp.eq.f32.partialorder %v6575_v22, inf  ;;  %v6590_v63 = vand.u32 2147483648, %v6575_v22  ;;  %vm6589_vm4 = vcmp.eq.f32.partialorder %v6575_v22, 0.0 }
 0xac7   :  { %v6564_v31 = vpop.xlane.xlu0 %6563 }
 0xac8   :  { %v6574_v6 = vadd.f32 1e-15, %v6564_v31 }
 0xaca   :  { %9555 = vrsqrt.f32 %v6574_v6  ;;  %vm6580_vm15 = vcmp.eq.f32.partialorder %v6574_v6, inf  ;;  %v6583_v31 = vand.u32 2147483648, %v6574_v6  ;;  %vm6582_vm0 = vcmp.eq.f32.partialorder %v6574_v6, 0.0 }
 0xacb   :  { %v6570_v45 = vpop.xlane.xlu0 %6569 }
 0xacc   :  { %v6576_v35 = vadd.f32 1e-15, %v6570_v45 }
 0xace   :  { %9557 = vrsqrt.f32 %v6576_v35  ;;  %vm6594_vm14 = vcmp.eq.f32.partialorder %v6576_v35, inf  ;;  %vm6596_vm2 = vcmp.eq.f32.partialorder %v6576_v35, 0.0 }
 0xacf   :  { %v6573_v33 = vpop.xlane.xlu0 %6572 }
 0xad0   :  { %v9554_v17 = vpop.eup %9553  ;;  %v6577_v62 = vadd.f32 1e-15, %v6573_v33 }
 0xad1   :  { %v6586_v38 = vmul.f32 %v9554_v17, %v6575_v22 }
 0xad2   :  { %9559 = vrsqrt.f32 %v6577_v62  ;;  %vm6601_vm12 = vcmp.eq.f32.partialorder %v6577_v62, inf  ;;  %vm6603_vm6 = vcmp.eq.f32.partialorder %v6577_v62, 0.0 }
 0xad3   :  { %v6588_v23 = vsel %vm6587_vm13, %v6575_v22, %v6586_v38  ;;  %v6597_v22 = vand.u32 2147483648, %v6576_v35  ;;  %vm2158_vm13 = vcmask 58368  }
 0xad4   :  { %v9556_v10 = vpop.eup %9555  ;;  %v6591_v11 = vsel %vm6589_vm4, %v6590_v63, %v6588_v23  ;;  %5827 = vadd.xlane.f32.xlu0 %v15290_v61  ;;  %v15292_v63 = vld [vmem:[#allocation172_spill] sm:$0xff]  ;;  %vm15297_vm4 = vcmask 1041409  }
 0xad5   :  { %v6579_v20 = vmul.f32 %v9556_v10, %v6574_v6  ;;  %v6607_v12 = vadd.f32 1e-15, %v6591_v11  ;;  %v15293_v10 = vld [vmem:[#allocation173_spill] sm:$0xff] }
 0xad7   :  { %v6581_v7 = vsel %vm6580_vm15, %v6574_v6, %v6579_v20  ;;  %9561 = vrcp.f32 %v6607_v12  ;;  %v6629_v11 = vrot.slane %v6607_v12, %v15293_v10  ;;  %v15294_v20 = vld [vmem:[#allocation12_spill] sm:$0xff]  ;;  %vm6857_vm15 = vcmask 523264  }
 0xad8   :  { %v9558_v45 = vpop.eup %9557  ;;  %v6584_v21 = vsel %vm6582_vm0, %v6583_v31, %v6581_v7  ;;  %5829 = vadd.xlane.f32.xlu0 %v15291_v14  ;;  %vm15359_vm0 = vcmask 261120  }
 0xad9   :  { %v6606_v33 = vadd.f32 1e-15, %v6584_v21  ;;  %v6593_v17 = vmul.f32 %v9558_v45, %v6576_v35  ;;  %v6604_v21 = vand.u32 2147483648, %v6577_v62 }
 0xadb   :  { %v6595_v38 = vsel %vm6594_vm14, %v6576_v35, %v6593_v17  ;;  %9563 = vrcp.f32 %v6606_v33  ;;  %v6625_v23 = vrot.slane %v6606_v33, %v15292_v63  ;;  %vm15360_vm14 = vmmov %vm15359_vm0 }
 0xadc   :  { %v9560_v61 = vpop.eup %9559  ;;  %v6598_v43 = vsel %vm6596_vm2, %v6597_v22, %v6595_v38  ;;  %5861 = vadd.xlane.f32.xlu0 %v15294_v20  ;;  %v15295_v20 = vmov 0.0|0.0   ;;  %vm15361_vm2 = vmmov %vm15359_vm0 }
 0xadd   :  { %v6600_v6 = vmul.f32 %v9560_v61, %v6577_v62  ;;  %v6630_v7 = vsel %vm1890_vm7, %v6629_v11, %v6625_v23  ;;  %v6608_v14 = vadd.f32 1e-15, %v6598_v43 }
 0xade   :  { %9565 = vrcp.f32 %v6630_v7 }
 0xadf   :  { %v6602_v31 = vsel %vm6601_vm12, %v6577_v62, %v6600_v6  ;;  %9567 = vrcp.f32 %v6608_v14  ;;  %v6634_v12 = vrot.slane %v6608_v14, %v15292_v63  ;;  %vm15362_vm12 = vmmov %vm15359_vm0 }
 0xae0   :  { %v6605_v45 = vsel %vm6603_vm6, %v6604_v21, %v6602_v31  ;;  %5863 = vadd.xlane.f32.xlu0 %v15243_v53  ;;  %v15299_v21 = vld [vmem:[#allocation126_spill] sm:$0xff]  ;;  %vm15393_vm6 = vmmov %vm15359_vm0 }
 0xae1   :  { %v6609_v35 = vadd.f32 1e-15, %v6605_v45  ;;  %v9562_v17 = vpop.eup %9561  ;;  %v15302_v45 = vld [vmem:[#allocation85_spill] sm:$0xff] }
 0xae2   :  { %v6613_v62 = vmul.f32 %v9562_v17, %v13295_v5 }
 0xae3   :  { %9569 = vrcp.f32 %v6609_v35  ;;  %v6638_v33 = vrot.slane %v6609_v35, %v15293_v10 }
 0xae4   :  { %5865 = vadd.xlane.f32.xlu0 %v15244_v16 }
 0xae5   :  { %v9564_v22 = vpop.eup %9563  ;;  %v6639_v43 = vsel %vm1890_vm7, %v6638_v33, %v6634_v12  ;;  %v15303_v12 = vld [vmem:[#allocation101_spill] sm:$0xff] }
 0xae6   :  { %v6611_v38 = vmul.f32 %v9564_v22, %v13302_v44  ;;  %9571 = vrcp.f32 %v6639_v43  ;;  %v15304_v33 = vld [vmem:[#allocation113_spill] sm:$0xff]  ;;  %v15305_v22 = vld [vmem:[#allocation195_spill] sm:$0xff]  ;;  %v15306_v43 = vld [vmem:[#allocation102_spill] sm:$0xff] }
 0xae7   :  { %v1597_v17 = vmul.f32 %v15304_v33, %v15303_v12  ;;  %v6848_v12 = vld [vmem:[%s14308_s11 + $0x30] sm:$0xff]  ;;  %v6849_v33 = vld [vmem:[%s14308_s11 + $0x38] sm:$0xff] }
 0xae8   :  { %v9566_v23 = vpop.eup %9565  ;;  %5867 = vadd.xlane.f32.xlu0 %v15247_v18 }
 0xae9   :  { %v6655_v53 = vmul.f32 %v9566_v23, %v6611_v38  ;;  %v6656_v11 = vmul.f32 %v9566_v23, %v6613_v62  ;;  %v9568_v61 = vpop.eup %9567  ;;  %v15307_v38 = vld [vmem:[#allocation117_spill] sm:$0xff] }
 0xaea   :  { %v6615_v5 = vmul.f32 %v9568_v61, %v13307_v37  ;;  %v1598_v62 = vmul.f32 %v15307_v38, %v15306_v43  ;;  %v15309_v23 = vld [vmem:[#allocation105_spill] sm:$0xff]  ;;  %v15321_v43 = vld [vmem:[#allocation115_spill] sm:$0xff] }
 0xaeb   :  { %8664 = vmatprep.mubr.msk.f32.mxu0 %vm4848_vm9, %v6655_v53  ;;  %v15310_v53 = vld [vmem:[#allocation121_spill] sm:$0xff]  ;;  %v15322_v38 = vld [vmem:[#allocation119_spill] sm:$0xff] }
 0xaec   :  { %8665 = vmatmul.mubr.msk.f32.vlgmr.msra.gmra.mrb[106].mxu0 %vm4848_vm9, %v6656_v11  ;;  %5869 = vadd.xlane.f32.xlu0 %v15248_v50  ;;  %v1599_v11 = vmul.f32 %v15310_v53, %v15309_v23  ;;  %v15312_v61 = vld [vmem:[#allocation109_spill] sm:$0xff]  ;;  %v15324_v23 = vld [vmem:[#allocation116_spill] sm:$0xff] }
 0xaed   :  { %v9570_v16 = vpop.eup %9569  ;;  %9213 = vmatpush3.bf16.msra.mxu0 %v13261_v24  ;;  %v13385_v24 = vpop.permute.xlu0 %6826  ;;  %v15325_v53 = vld [vmem:[#allocation132_spill] sm:$0xff] }
 0xaee   :  { %v6617_v44 = vmul.f32 %v9570_v16, %v13312_v54  ;;  %9230 = vmatprep.subr.bf16.mxu0 %v15295_v20  ;;  %v15313_v16 = vld [vmem:[#allocation124_spill] sm:$0xff] }
 0xaf0   :  { %v9572_v6 = vpop.eup %9571  ;;  %5871 = vadd.xlane.f32.xlu0 %v15251_v48 }
 0xaf1   :  { %v6658_v18 = vmul.f32 %v9572_v6, %v6615_v5  ;;  %v6659_v7 = vmul.f32 %v9572_v6, %v6617_v44  ;;  %v13388_v50 = vpop.permute.xlu0 %6828  ;;  %v1600_v44 = vmul.f32 %v15313_v16, %v15312_v61  ;;  %v15314_v5 = vld [vmem:[#allocation147_spill] sm:$0xff]  ;;  %v6842_v6 = vld [vmem:[%s14308_s11] sm:$0xff] }
 0xaf2   :  { %v15327_v61 = vld [vmem:[#allocation120_spill] sm:$0xff] }
 0xaf3   :  { %8671 = vmatprep.mubr.msk.f32.mxu0 %vm4848_vm9, %v6658_v18  ;;  %v6843_v18 = vld [vmem:[%s14308_s11 + $0x8] sm:$0xff]  ;;  %v15328_v16 = vld [vmem:[#allocation128_spill] sm:$0xff] }
 0xaf4   :  { %8672 = vmatmul.mubr.msk.f32.vlgmr.msra.gmra.mrb[108].mxu0 %vm4848_vm9, %v6659_v7  ;;  %5873 = vadd.xlane.f32.xlu0 %v15252_v0  ;;  %v6844_v7 = vld [vmem:[%s14308_s11 + $0x10] sm:$0xff] }
 0xaf5   :  { %8704 = vmatprep.mubr.msk.f32.mxu0 %vm15296_vm1, %v15271_v9  ;;  %v13392_v48 = vpop.permute.xlu0 %6830 }
 0xaf8   :  { %5875 = vadd.xlane.f32.xlu0 %v15255_v41 }
 0xaf9   :  { %v13395_v0 = vpop.permute.xlu0 %6832 }
 0xafc   :  { %5877 = vadd.xlane.f32.xlu0 %v15256_v40 }
 0xb00   :  { %5879 = vadd.xlane.f32.xlu0 %v15259_v1 }
 0xb04   :  { %5881 = vadd.xlane.f32.xlu0 %v15260_v42 }
 0xb08   :  { %5883 = vadd.xlane.f32.xlu0 %v15263_v2 }
 0xb0c   :  { %5885 = vadd.xlane.f32.xlu0 %v15264_v26  ;;  %v15298_v26 = vld [vmem:[#allocation210_spill] sm:$0xff] }
 0xb10   :  { %v13398_v37 = vpop.xlane.xlu0 %6436  ;;  %5887 = vadd.xlane.f32.xlu0 %v15267_v36  ;;  %v15300_v36 = vld [vmem:[#allocation69_spill] sm:$0xff] }
 0xb11   :  { %v1608_v31 = vmul.f32 %v15300_v36, %v15299_v21  ;;  %v6847_v21 = vld [vmem:[%s14308_s11 + $0x28] sm:$0xff] }
 0xb12   :  { %v15317_v36 = vld [vmem:[#allocation202_spill] sm:$0xff] }
 0xb14   :  { %v13401_v41 = vpop.xlane.xlu0 %6439  ;;  %5889 = vadd.xlane.f32.xlu0 %v15268_v8  ;;  %v15301_v8 = vld [vmem:[#allocation152_spill] sm:$0xff] }
 0xb15   :  { %v1611_v35 = vmul.f32 %v15302_v45, %v15301_v8  ;;  %v15318_v8 = vld [vmem:[#allocation136_spill] sm:$0xff]  ;;  %v15319_v45 = vld [vmem:[#allocation130_spill] sm:$0xff] }
 0xb18   :  { %v3790_v40 = vpop.xlane.xlu0 %3789 }
 0xb19   :  { %v3799_v42 = vrot.slane %v3790_v40, %v15292_v63  ;;  %v9214_v40 = vpack.c.bf16 %v6843_v18, %v6842_v6  ;;  %v15329_v6 = vld [vmem:[#allocation123_spill] sm:$0xff]  ;;  %v15330_v18 = vld [vmem:[#allocation133_spill] sm:$0xff] }
 0xb1b   :  { %9215 = vmatprep.subr.bf16.mxu1 %v9214_v40 }
 0xb1c   :  { %v3793_v1 = vpop.xlane.xlu0 %3792  ;;  %9217 = vmatpush3.bf16.msra.mxu1 %v9214_v40 }
 0xb1d   :  { %v3803_v54 = vrot.slane %v3793_v1, %v15292_v63  ;;  %v6845_v1 = vld [vmem:[%s14308_s11 + $0x18] sm:$0xff] }
 0xb1f   :  { %v3804_v2 = vsel %vm15297_vm4, %v3803_v54, %v3799_v42  ;;  %v15315_v42 = vld [vmem:[#allocation110_spill] sm:$0xff]  ;;  %v15316_v54 = vld [vmem:[#allocation127_spill] sm:$0xff]  ;;  %vm15395_vm4 = vmmov %vm15359_vm0 }
 0xb20   :  { %v3806_v14 = vsel %vm2158_vm13, %v3804_v2, 0.0  ;;  %v1601_v2 = vmul.f32 %v15316_v54, %v15315_v42  ;;  %v15331_v54 = vld [vmem:[#allocation144_spill] sm:$0xff] }
 0xb21   :  { %3807 = vadd.xlane.f32.xlu1 %v3806_v14  ;;  %v9218_v14 = vpack.c.bf16 %v6845_v1, %v6844_v7  ;;  %v1606_v7 = vmul.f32 %v15330_v18, %v15329_v6 }
 0xb23   :  { %9219 = vmatprep.subr.bf16.mxu1 %v9218_v14 }
 0xb24   :  { %9221 = vmatpush3.bf16.msra.mxu1 %v9218_v14 }
 0xb25   :  { %5859 = vadd.xlane.f32.xlu1 %v15298_v26  ;;  %v6846_v26 = vld [vmem:[%s14308_s11 + $0x20] sm:$0xff] }
 0xb29   :  { %5831 = vadd.xlane.f32.xlu1 %v15239_v51  ;;  %v15308_v51 = vld [vmem:[#allocation198_spill] sm:$0xff] }
 0xb2a   :  { %1689 = vrot.lane.b32.xlu0 %v1608_v31, %s9684_s6  ;;  %v9222_v31 = vpack.c.bf16 %v6847_v21, %v6846_v26  ;;  %v15334_v21 = vld [vmem:[#allocation74_spill] sm:$0xff] }
 0xb2c   :  { %9223 = vmatprep.subr.bf16.mxu1 %v9222_v31 }
 0xb2d   :  { %5833 = vadd.xlane.f32.xlu1 %v15240_v49  ;;  %v15311_v49 = vld [vmem:[#allocation199_spill] sm:$0xff]  ;;  %9225 = vmatpush3.bf16.msra.mxu1 %v9222_v31 }
 0xb2e   :  { %1695 = vrot.lane.b32.xlu0 %v1611_v35, %s9684_s6  ;;  %v1602_v35 = vmul.f32 %v15319_v45, %v15318_v8  ;;  %v15336_v8 = vld [vmem:[#allocation81_spill] sm:$0xff] }
 0xb31   :  { %5835 = vadd.xlane.f32.xlu1 %v15305_v22  ;;  %v9226_v22 = vpack.c.bf16 %v6849_v33, %v6848_v12  ;;  %v15337_v12 = vld [vmem:[#allocation134_spill] sm:$0xff]  ;;  %v15338_v33 = vld [vmem:[#allocation91_spill] sm:$0xff] }
 0xb32   :  { %1667 = vrot.lane.b32.xlu0 %v1597_v17, %s9684_s6  ;;  %v15320_v17 = vld [vmem:[#allocation203_spill] sm:$0xff] }
 0xb33   :  { %9227 = vmatprep.subr.bf16.mxu1 %v9226_v22 }
 0xb34   :  { %9229 = vmatpush3.bf16.msra.mxu1 %v9226_v22  ;;  %v15339_v22 = vld [vmem:[#allocation153_spill] sm:$0xff] }
 0xb35   :  { %5837 = vadd.xlane.f32.xlu1 %v15308_v51  ;;  %v15323_v51 = vld [vmem:[#allocation204_spill] sm:$0xff] }
 0xb36   :  { %1669 = vrot.lane.b32.xlu0 %v1598_v62, %s9684_s6  ;;  %v1603_v62 = vmul.f32 %v15322_v38, %v15321_v43  ;;  %v15340_v43 = vld [vmem:[#allocation96_spill] sm:$0xff] }
 0xb37   :  { %v1613_v38 = vmul.f32 %v15340_v43, %v15339_v22  ;;  %v15355_v43 = vld [vmem:[#allocation159_spill] sm:$0xff] }
 0xb39   :  { %5839 = vadd.xlane.f32.xlu1 %v15311_v49  ;;  %v15326_v49 = vld [vmem:[#allocation205_spill] sm:$0xff] }
 0xb3a   :  { %1671 = vrot.lane.b32.xlu0 %v1599_v11, %s9684_s6  ;;  %v1604_v11 = vmul.f32 %v15325_v53, %v15324_v23  ;;  %v15342_v23 = vld [vmem:[#allocation100_spill] sm:$0xff] }
 0xb3d   :  { %5841 = vadd.xlane.f32.xlu1 %v15314_v5  ;;  %v1656_v5 = vpop.permute.xlu0 %1655 }
 0xb3e   :  { %1673 = vrot.lane.b32.xlu0 %v1600_v44, %s9684_s6  ;;  %v1605_v44 = vmul.f32 %v15328_v16, %v15327_v61  ;;  %v15344_v61 = vld [vmem:[#allocation104_spill] sm:$0xff] }
 0xb41   :  { %5843 = vadd.xlane.f32.xlu1 %v15317_v36  ;;  %v13480_v40 = vpop.permute.xlu0 %1659 }
 0xb42   :  { %1675 = vrot.lane.b32.xlu0 %v1601_v2, %s9684_s6  ;;  %v15332_v2 = vld [vmem:[#allocation61_spill] sm:$0xff] }
 0xb43   :  { %v1607_v14 = vmul.f32 %v15332_v2, %v15331_v54  ;;  %v15348_v54 = vld [vmem:[#allocation112_spill] sm:$0xff] }
 0xb45   :  { %5845 = vadd.xlane.f32.xlu1 %v15320_v17  ;;  %v13484_v1 = vpop.permute.xlu0 %1661  ;;  %v1612_v17 = vmul.f32 %v15338_v33, %v15337_v12  ;;  %v15353_v12 = vld [vmem:[#allocation148_spill] sm:$0xff]  ;;  %v15354_v33 = vld [vmem:[#allocation125_spill] sm:$0xff] }
 0xb46   :  { %1677 = vrot.lane.b32.xlu0 %v1602_v35, %s9684_s6 }
 0xb49   :  { %5847 = vadd.xlane.f32.xlu1 %v15323_v51  ;;  %v13487_v42 = vpop.permute.xlu0 %1663  ;;  %v15341_v51 = vld [vmem:[#allocation138_spill] sm:$0xff] }
 0xb4a   :  { %1679 = vrot.lane.b32.xlu0 %v1603_v62, %s9684_s6  ;;  %v1614_v53 = vmul.f32 %v15342_v23, %v15341_v51  ;;  %v15357_v23 = vld [vmem:[#allocation106_spill] sm:$0xff] }
 0xb4d   :  { %5849 = vadd.xlane.f32.xlu1 %v15326_v49  ;;  %v15343_v49 = vld [vmem:[#allocation154_spill] sm:$0xff] }
 0xb4e   :  { %1681 = vrot.lane.b32.xlu0 %v1604_v11, %s9684_s6  ;;  %v1615_v16 = vmul.f32 %v15344_v61, %v15343_v49 }
 0xb51   :  { %5851 = vadd.xlane.f32.xlu1 %v15261_v27  ;;  %v13489_v27 = vpop.permute.xlu0 %1665 }
 0xb52   :  { %1683 = vrot.lane.b32.xlu0 %v1605_v44, %s9684_s6  ;;  %v15345_v44 = vld [vmem:[#allocation140_spill] sm:$0xff] }
 0xb55   :  { %5853 = vadd.xlane.f32.xlu1 %v15262_v57  ;;  %v15333_v57 = vld [vmem:[#allocation149_spill] sm:$0xff] }
 0xb56   :  { %1685 = vrot.lane.b32.xlu0 %v1606_v7, %s9684_s6  ;;  %v1609_v36 = vmul.f32 %v15334_v21, %v15333_v57  ;;  %v15347_v7 = vld [vmem:[#allocation155_spill] sm:$0xff]  ;;  %v15350_v21 = vld [vmem:[#allocation114_spill] sm:$0xff] }
 0xb57   :  { %v1617_v2 = vmul.f32 %v15348_v54, %v15347_v7  ;;  %v15349_v57 = vld [vmem:[#allocation143_spill] sm:$0xff] }
 0xb59   :  { %5855 = vadd.xlane.f32.xlu1 %v15265_v60  ;;  %v1751_v60 = vsel %vm1124_vm5, %v1656_v5, 0.0  ;;  %v15346_v5 = vld [vmem:[#allocation108_spill] sm:$0xff] }
 0xb5a   :  { %v1616_v6 = vmul.f32 %v15346_v5, %v15345_v44  ;;  %v1658_v44 = vpop.permute.xlu1 %1657 }
 0xb5d   :  { %5857 = vadd.xlane.f32.xlu1 %v15266_v30  ;;  %v15335_v30 = vld [vmem:[#allocation129_spill] sm:$0xff] }
 0xb5e   :  { %v1610_v45 = vmul.f32 %v15336_v8, %v15335_v30  ;;  %v15352_v30 = vld [vmem:[#allocation122_spill] sm:$0xff] }
 0xb61   :  { %v13493_v26 = vpop.xlane.xlu0 %5827 }
 0xb65   :  { %v13498_v31 = vpop.xlane.xlu0 %5829 }
 0xb69   :  { %v13505_v35 = vpop.xlane.xlu0 %5861 }
 0xb6d   :  { %v13512_v62 = vpop.xlane.xlu0 %5863 }
 0xb6e   :  { %1687 = vrot.lane.b32.xlu1 %v1607_v14, %s9684_s6 }
 0xb71   :  { %v13518_v11 = vpop.xlane.xlu0 %5865 }
 0xb72   :  { %1691 = vrot.lane.b32.xlu1 %v1609_v36, %s9684_s6  ;;  %v1618_v36 = vmul.f32 %v15350_v21, %v15349_v57 }
 0xb75   :  { %1752 = vadd.xlane.f32.xlu0 %v1751_v60  ;;  %v13525_v18 = vpop.xlane.xlu0 %5867  ;;  %v15351_v60 = vld [vmem:[#allocation157_spill] sm:$0xff] }
 0xb76   :  { %1693 = vrot.lane.b32.xlu1 %v1610_v45, %s9684_s6  ;;  %v1619_v8 = vmul.f32 %v15352_v30, %v15351_v60 }
 0xb79   :  { %v13531_v14 = vpop.xlane.xlu0 %5869 }
 0xb7a   :  { %1697 = vrot.lane.b32.xlu1 %v1612_v17, %s9684_s6  ;;  %v1620_v17 = vmul.f32 %v15354_v33, %v15353_v12 }
 0xb7d   :  { %v13538_v45 = vpop.xlane.xlu0 %5871 }
 0xb7e   :  { %1699 = vrot.lane.b32.xlu1 %v1613_v38, %s9684_s6  ;;  %v15356_v38 = vld [vmem:[#allocation131_spill] sm:$0xff] }
 0xb7f   :  { %v1621_v51 = vmul.f32 %v15356_v38, %v15355_v43  ;;  %v1754_v43 = vsel %vm1124_vm5, %v1658_v44, 0.0 }
 0xb81   :  { %v13544_v22 = vpop.xlane.xlu0 %5873 }
 0xb82   :  { %1701 = vrot.lane.b32.xlu1 %v1614_v53, %s9684_s6  ;;  %v15358_v53 = vld [vmem:[#allocation189_spill] sm:$0xff] }
 0xb83   :  { %v1622_v49 = vmul.f32 %v15358_v53, %v15357_v23 }
 0xb85   :  { %v13551_v61 = vpop.xlane.xlu0 %5875 }
 0xb86   :  { %1703 = vrot.lane.b32.xlu1 %v1615_v16, %s9684_s6 }
 0xb89   :  { %v13554_v16 = vpop.xlane.xlu0 %5877 }
 0xb8a   :  { %1705 = vrot.lane.b32.xlu1 %v1616_v6, %s9684_s6 }
 0xb8d   :  { %v13556_v5 = vpop.xlane.xlu0 %5879 }
 0xb8e   :  { %1707 = vrot.lane.b32.xlu1 %v1617_v2, %s9684_s6 }
 0xb91   :  { %v13560_v54 = vpop.xlane.xlu0 %5881 }
 0xb92   :  { %1709 = vrot.lane.b32.xlu1 %v1618_v36, %s9684_s6 }
 0xb95   :  { %v13562_v57 = vpop.xlane.xlu0 %5883 }
 0xb96   :  { %1711 = vrot.lane.b32.xlu1 %v1619_v8, %s9684_s6 }
 0xb99   :  { %v13568_v30 = vpop.xlane.xlu0 %5885 }
 0xb9a   :  { %1713 = vrot.lane.b32.xlu1 %v1620_v17, %s9684_s6 }
 0xb9d   :  { %v13579_v38 = vpop.xlane.xlu0 %5887 }
 0xb9e   :  { %1715 = vrot.lane.b32.xlu1 %v1621_v51, %s9684_s6 }
 0xba1   :  { %v13593_v44 = vpop.xlane.xlu0 %5889 }
 0xba2   :  { %1717 = vrot.lane.b32.xlu1 %v1622_v49, %s9684_s6 }
 0xbae   :  { %v13558_v6 = vpop.xlane.xlu1 %3807 }
 0xbb2   :  { %v5860_v7 = vpop.xlane.xlu1 %5859 }
 0xbb6   :  { %v5832_v2 = vpop.xlane.xlu1 %5831 }
 0xbba   :  { %v13564_v21 = vpop.xlane.xlu1 %5833 }
 0xbbe   :  { %v13566_v36 = vpop.xlane.xlu1 %5835 }
 0xbbf   :  { %v8666_v60 = vpop.f32.mrb[106].mxu0 }
 0xbc0   :  { %v6732_v8 = vpop.f32.mrb[107].mxu0  ;;  %v6839_v33 = vsel %vm15360_vm14, %v8666_v60, %v13388_v50  ;;  %v1757_v50 = vsel %vm1124_vm5, %v13480_v40, 0.0  ;;  %vm15402_vm14 = vmmov %vm15361_vm2 }
 0xbc1   :  { %v6838_v12 = vsel %vm15359_vm0, %v6732_v8, %v13385_v24  ;;  %v5891_v8 = vadd.f32 1e-15, %v13493_v26  ;;  %v1766_v26 = vsel %vm1124_vm5, %v13489_v27, 0.0  ;;  %vm15401_vm0 = vcmask 523712  }
 0xbc2   :  { %8690 = vmatprep.mubr.msk.f32.mxu1 %vm6857_vm15, %v6838_v12  ;;  %v13575_v17 = vpop.xlane.xlu1 %5837 }
 0xbc3   :  { %8691 = vmatmul.mubr.msk.f32.vlgmr.msra.gmra.mrb[106].mxu1 %vm6857_vm15, %v6839_v33  ;;  %v5923_v40 = vmul.f32 %v5891_v8, %v12983_v28  ;;  %v1763_v33 = vsel %vm1124_vm5, %v13487_v42, 0.0 }
 0xbc6   :  { %1755 = vadd.xlane.f32.xlu1 %v1754_v43  ;;  %v13581_v51 = vpop.xlane.xlu1 %5839  ;;  %v1690_v43 = vpop.permute.xlu0 %1689 }
 0xbc7   :  { %v8673_v23 = vpop.f32.mrb[108].mxu0 }
 0xbc8   :  { %v6813_v53 = vpop.f32.mrb[109].mxu0  ;;  %v6841_v49 = vsel %vm15362_vm12, %v8673_v23, %v13395_v0  ;;  %v5907_v0 = vadd.f32 1e-15, %v5860_v7  ;;  %vm15403_vm12 = vcmask 589312  }
 0xbc9   :  { %v6840_v24 = vsel %vm15361_vm2, %v6813_v53, %v13392_v48  ;;  %v1760_v48 = vsel %vm1124_vm5, %v13484_v1, 0.0  ;;  %v5955_v1 = vmul.f32 %v5923_v40, %v12983_v28 }
 0xbca   :  { %8693 = vmatprep.mubr.msk.f32.mxu1 %vm6857_vm15, %v6840_v24  ;;  %v13590_v60 = vpop.xlane.xlu1 %5841  ;;  %1758 = vadd.xlane.f32.xlu1 %v1757_v50  ;;  %v5939_v53 = vmul.f32 %v5907_v0, %v12988_v52  ;;  %v1696_v50 = vpop.permute.xlu0 %1695 }
 0xbcb   :  { %8694 = vmatmul.mubr.msk.f32.gmra.mrb[108].mxu1 %vm6857_vm15, %v6841_v49  ;;  %v5893_v49 = vadd.f32 1e-15, %v5832_v2  ;;  %v5987_v7 = vsel %vm4848_vm9, %v5955_v1, 0.0  ;;  %vm15397_vm15 = vcmask 261312  }
 0xbcc   :  { %v5971_v42 = vmul.f32 %v5939_v53, %v12988_v52 }
 0xbce   :  { %v13598_v12 = vpop.xlane.xlu1 %5843  ;;  %1761 = vadd.xlane.f32.xlu1 %v1760_v48  ;;  %v5925_v48 = vmul.f32 %v5893_v49, %v13005_v56  ;;  %v6035_v0 = vsel %vm4848_vm9, %v5971_v42, 0.0  ;;  %v1802_v42 = vsel %vm1124_vm5, %v1690_v43, 0.0 }
 0xbd0   :  { %v5957_v40 = vmul.f32 %v5925_v48, %v13005_v56  ;;  %v5892_v48 = vadd.f32 1e-15, %v13498_v31 }
 0xbd2   :  { %v13603_v23 = vpop.xlane.xlu1 %5845  ;;  %1764 = vadd.xlane.f32.xlu1 %v1763_v33  ;;  %v1668_v33 = vpop.permute.xlu0 %1667  ;;  %v5993_v52 = vsel %vm4848_vm9, %v5957_v40, 0.0 }
 0xbd3   :  { %v1769_v28 = vsel %vm1124_vm5, %v1668_v33, 0.0 }
 0xbd6   :  { %v13609_v24 = vpop.xlane.xlu1 %5847  ;;  %1767 = vadd.xlane.f32.xlu1 %v1766_v26 }
 0xbda   :  { %v13613_v8 = vpop.xlane.xlu1 %5849  ;;  %5988 = vadd.xlane.f32.xlu1 %v5987_v7 }
 0xbde   :  { %v13617_v27 = vpop.xlane.xlu1 %5851  ;;  %6036 = vadd.xlane.f32.xlu1 %v6035_v0 }
 0xbe2   :  { %v13621_v2 = vpop.xlane.xlu1 %5853  ;;  %1770 = vadd.xlane.f32.xlu1 %v1769_v28  ;;  %v5910_v28 = vadd.f32 1e-15, %v13518_v11  ;;  %v5911_v11 = vadd.f32 1e-15, %v13525_v18 }
 0xbe4   :  { %v5942_v43 = vmul.f32 %v5910_v28, %v13011_v58 }
 0xbe6   :  { %v13624_v53 = vpop.xlane.xlu1 %5855  ;;  %5994 = vadd.xlane.f32.xlu1 %v5993_v52  ;;  %v5924_v52 = vmul.f32 %v5892_v48, %v12996_v47  ;;  %v5974_v48 = vmul.f32 %v5942_v43, %v13011_v58 }
 0xbe8   :  { %v5956_v31 = vmul.f32 %v5924_v52, %v12996_v47 }
 0xbea   :  { %v13626_v26 = vpop.xlane.xlu1 %5857  ;;  %v5990_v28 = vsel %vm4848_vm9, %v5956_v31, 0.0 }
 0xbee   :  { %v1688_v1 = vpop.permute.xlu1 %1687 }
 0xbef   :  { %v1799_v49 = vsel %vm1124_vm5, %v1688_v1, 0.0  ;;  %v5908_v1 = vadd.f32 1e-15, %v13505_v35  ;;  %v5909_v35 = vadd.f32 1e-15, %v13512_v62 }
 0xbf0   :  { %1800 = vadd.xlane.f32.xlu0 %v1799_v49 }
 0xbf1   :  { %v5941_v18 = vmul.f32 %v5909_v35, %v13008_v32 }
 0xbf2   :  { %v1692_v7 = vpop.permute.xlu1 %1691 }
 0xbf3   :  { %v1805_v56 = vsel %vm1124_vm5, %v1692_v7, 0.0  ;;  %v5940_v7 = vmul.f32 %v5908_v1, %v12991_v46  ;;  %v6044_v1 = vsel %vm4848_vm9, %v5974_v48, 0.0 }
 0xbf4   :  { %1803 = vadd.xlane.f32.xlu0 %v1802_v42  ;;  %v1811_v42 = vsel %vm1124_vm5, %v1696_v50, 0.0  ;;  %v5943_v50 = vmul.f32 %v5911_v11, %v13028_v59 }
 0xbf5   :  { %v5972_v47 = vmul.f32 %v5940_v7, %v12991_v46  ;;  %v5973_v7 = vmul.f32 %v5941_v18, %v13008_v32  ;;  %v5894_v32 = vadd.f32 1e-15, %v13564_v21 }
 0xbf6   :  { %v1694_v0 = vpop.permute.xlu1 %1693  ;;  %v5975_v62 = vmul.f32 %v5943_v50, %v13028_v59 }
 0xbf7   :  { %v1808_v40 = vsel %vm1124_vm5, %v1694_v0, 0.0  ;;  %v6038_v58 = vsel %vm4848_vm9, %v5972_v47, 0.0  ;;  %v6041_v11 = vsel %vm4848_vm9, %v5973_v7, 0.0  ;;  %v5926_v47 = vmul.f32 %v5894_v32, %v13016_v25 }
 0xbf8   :  { %1806 = vadd.xlane.f32.xlu0 %v1805_v56  ;;  %v6047_v46 = vsel %vm4848_vm9, %v5975_v62, 0.0 }
 0xbf9   :  { %v5958_v62 = vmul.f32 %v5926_v47, %v13016_v25  ;;  %v5896_v25 = vadd.f32 1e-15, %v13575_v17 }
 0xbfa   :  { %v1698_v33 = vpop.permute.xlu1 %1697 }
 0xbfb   :  { %v1814_v0 = vsel %vm1124_vm5, %v1698_v33, 0.0  ;;  %v5912_v33 = vadd.f32 1e-15, %v13531_v14  ;;  %v5913_v14 = vadd.f32 1e-15, %v13538_v45  ;;  %v5996_v7 = vsel %vm4848_vm9, %v5958_v62, 0.0 }
 0xbfc   :  { %1809 = vadd.xlane.f32.xlu0 %v1808_v40 }
 0xbfd   :  { %v5945_v48 = vmul.f32 %v5913_v14, %v13049_v55 }
 0xbfe   :  { %v1700_v49 = vpop.permute.xlu1 %1699 }
 0xbff   :  { %v5977_v21 = vmul.f32 %v5945_v48, %v13049_v55 }
 0xc00   :  { %1812 = vadd.xlane.f32.xlu0 %v1811_v42  ;;  %v5944_v42 = vmul.f32 %v5912_v33, %v13032_v13 }
 0xc02   :  { %v1702_v56 = vpop.permute.xlu1 %1701  ;;  %v5976_v59 = vmul.f32 %v5944_v42, %v13032_v13  ;;  %v6433_v13 = vmul.f32 %v13324_v29, %v13324_v29 }
 0xc03   :  { %v1820_v40 = vsel %vm1124_vm5, %v1702_v56, 0.0  ;;  %v1817_v56 = vsel %vm1124_vm5, %v1700_v49, 0.0  ;;  %v6434_v49 = vmul.f32 %v13320_v34, %v13320_v34 }
 0xc04   :  { %1815 = vadd.xlane.f32.xlu0 %v1814_v0  ;;  %1821 = vadd.xlane.f32.xlu1 %v1820_v40  ;;  %v1670_v40 = vpop.permute.xlu0 %1669  ;;  %v6050_v35 = vsel %vm4848_vm9, %v5976_v59, 0.0  ;;  %v6441_v18 = vsel %vm4848_vm9, %v6433_v13, 0.0 }
 0xc05   :  { %v1772_v45 = vsel %vm1124_vm5, %v1670_v40, 0.0  ;;  %v5916_v40 = vadd.f32 1e-15, %v13554_v16 }
 0xc06   :  { %v1704_v52 = vpop.permute.xlu1 %1703 }
 0xc07   :  { %v1823_v43 = vsel %vm1124_vm5, %v1704_v52, 0.0 }
 0xc08   :  { %5991 = vadd.xlane.f32.xlu0 %v5990_v28  ;;  %6045 = vadd.xlane.f32.xlu1 %v6044_v1  ;;  %v6444_v28 = vsel %vm4848_vm9, %v6434_v49, 0.0  ;;  %v5914_v1 = vadd.f32 1e-15, %v13544_v22  ;;  %v5915_v22 = vadd.f32 1e-15, %v13551_v61  ;;  %v1672_v14 = vpop.permute.xlu0 %1671  ;;  %v15364_v49 = vld [vmem:[#allocation32_spill] sm:$0xff] }
 0xc0a   :  { %v1706_v31 = vpop.permute.xlu1 %1705  ;;  %v5946_v33 = vmul.f32 %v5914_v1, %v13053_v39  ;;  %v6973_v1 = vld [vmem:[%s14310_s13] sm:$0xff] }
 0xc0b   :  { %v1826_v0 = vsel %vm1124_vm5, %v1706_v31, 0.0 }
 0xc0c   :  { %6039 = vadd.xlane.f32.xlu0 %v6038_v58  ;;  %1824 = vadd.xlane.f32.xlu1 %v1823_v43  ;;  %v5895_v58 = vadd.f32 1e-15, %v13566_v36  ;;  %v6053_v43 = vsel %vm4848_vm9, %v5977_v21, 0.0  ;;  %v5978_v31 = vmul.f32 %v5946_v33, %v13053_v39  ;;  %v5947_v36 = vmul.f32 %v5915_v22, %v13070_v15  ;;  %v1674_v17 = vpop.permute.xlu0 %1673  ;;  %v6976_v21 = vld [vmem:[%s14310_s13 + $0x18] sm:$0xff]  ;;  %v15365_v33 = vld [vmem:[#allocation22_spill] sm:$0xff] }
 0xc0d   :  { %v5928_v39 = vmul.f32 %v5896_v25, %v15364_v49 }
 0xc0e   :  { %v1708_v50 = vpop.permute.xlu1 %1707 }
 0xc0f   :  { %v1829_v52 = vsel %vm1124_vm5, %v1708_v50, 0.0  ;;  %v5897_v50 = vadd.f32 1e-15, %v13581_v51  ;;  %v5960_v16 = vmul.f32 %v5928_v39, %v15364_v49  ;;  %v6975_v51 = vld [vmem:[%s14310_s13 + $0x10] sm:$0xff]  ;;  %v5899_v39 = vadd.f32 1e-15, %v13598_v12 }
 0xc10   :  { %1818 = vadd.xlane.f32.xlu0 %v1817_v56  ;;  %6048 = vadd.xlane.f32.xlu1 %v6047_v46  ;;  %v15363_v56 = vld [vmem:[#allocation48_spill] sm:$0xff]  ;;  %v1676_v22 = vpop.permute.xlu0 %1675  ;;  %v5918_v12 = vadd.f32 1e-15, %v13560_v54 }
 0xc11   :  { %v5927_v46 = vmul.f32 %v5895_v58, %v15363_v56  ;;  %v5929_v58 = vmul.f32 %v5897_v50, %v15365_v33  ;;  %v6002_v62 = vsel %vm4848_vm9, %v5960_v16, 0.0 }
 0xc12   :  { %v1710_v42 = vpop.permute.xlu1 %1709 }
 0xc13   :  { %v1832_v55 = vsel %vm1124_vm5, %v1710_v42, 0.0  ;;  %v5959_v61 = vmul.f32 %v5927_v46, %v15363_v56  ;;  %v5898_v56 = vadd.f32 1e-15, %v13590_v60 }
 0xc14   :  { %6042 = vadd.xlane.f32.xlu0 %v6041_v11  ;;  %1827 = vadd.xlane.f32.xlu1 %v1826_v0  ;;  %v6056_v11 = vsel %vm4848_vm9, %v5978_v31, 0.0  ;;  %v1775_v0 = vsel %vm1124_vm5, %v1672_v14, 0.0  ;;  %v15366_v14 = vld [vmem:[#allocation50_spill] sm:$0xff]  ;;  %v1678_v60 = vpop.permute.xlu0 %1677 }
 0xc15   :  { %v5999_v32 = vsel %vm4848_vm9, %v5959_v61, 0.0  ;;  %v15367_v61 = vld [vmem:[#allocation160_spill] sm:$0xff] }
 0xc16   :  { %v1712_v59 = vpop.permute.xlu1 %1711 }
 0xc17   :  { %v1835_v48 = vsel %vm1124_vm5, %v1712_v59, 0.0 }
 0xc18   :  { %6051 = vadd.xlane.f32.xlu1 %v6050_v35  ;;  %1773 = vadd.xlane.f32.xlu0 %v1772_v45  ;;  %v5979_v35 = vmul.f32 %v5947_v36, %v13070_v15  ;;  %v5948_v45 = vmul.f32 %v5916_v40, %v13073_v3  ;;  %v6974_v15 = vld [vmem:[%s14310_s13 + $0x8] sm:$0xff]  ;;  %v5930_v36 = vmul.f32 %v5898_v56, %v15366_v14  ;;  %v1680_v16 = vpop.permute.xlu0 %1679  ;;  %v5919_v56 = vadd.f32 1e-15, %v13562_v57  ;;  %v9630_v57 = vld [vmem:[%s14730_s25 + $0x98] sm:$0xff] }
 0xc19   :  { %v15368_v40 = vld [vmem:[#allocation53_spill] sm:$0xff] }
 0xc1a   :  { %v6059_v13 = vsel %vm4848_vm9, %v5979_v35, 0.0  ;;  %v1714_v47 = vpop.permute.xlu1 %1713  ;;  %v5980_v42 = vmul.f32 %v5948_v45, %v13073_v3  ;;  %v5917_v3 = vadd.f32 1e-15, %v13556_v5  ;;  %v1784_v5 = vsel %vm1124_vm5, %v1678_v60, 0.0  ;;  %v15369_v35 = vld [vmem:[#allocation156_spill] sm:$0xff] }
 0xc1b   :  { %v15370_v45 = vld [vmem:[#allocation52_spill] sm:$0xff] }
 0xc1c   :  { %1830 = vadd.xlane.f32.xlu1 %v1829_v52  ;;  %6445 = vadd.xlane.f32.xlu0 %v6444_v28  ;;  %v1778_v28 = vsel %vm1124_vm5, %v1674_v17, 0.0  ;;  %v9231_v52 = vpack.c.bf16 %v6974_v15, %v6973_v1  ;;  %v6062_v46 = vsel %vm4848_vm9, %v5980_v42, 0.0  ;;  %v5949_v49 = vmul.f32 %v5917_v3, %v15368_v40  ;;  %v1682_v54 = vpop.permute.xlu0 %1681  ;;  %v15373_v42 = vld [vmem:[#allocation7_spill] sm:$0xff] }
 0xc1d   :  { %v5931_v50 = vmul.f32 %v5899_v39, %v15370_v45  ;;  %v5900_v1 = vadd.f32 1e-15, %v13603_v23  ;;  %v9629_v23 = vld [vmem:[%s14730_s25 + $0x90] sm:$0xff] }
 0xc1e   :  { %9232 = vmatpush3.bf16.msra.mxu0 %v9231_v52  ;;  %v1716_v31 = vpop.permute.xlu1 %1715  ;;  %v15376_v39 = vld [vmem:[#allocation158_spill] sm:$0xff] }
 0xc1f   :  { %9233 = vmatprep.subr.bf16.mxu0 %v15295_v20  ;;  %v1841_v25 = vsel %vm1124_vm5, %v1716_v31, 0.0  ;;  %v5963_v52 = vmul.f32 %v5931_v50, %v15370_v45  ;;  %v15374_v31 = vld [vmem:[#allocation24_spill] sm:$0xff]  ;;  %v15379_v50 = vld [vmem:[#allocation5_spill] sm:$0xff] }
 0xc20   :  { %6054 = vadd.xlane.f32.xlu1 %v6053_v43  ;;  %6442 = vadd.xlane.f32.xlu0 %v6441_v18  ;;  %v9234_v18 = vpack.c.bf16 %v6976_v21, %v6975_v51  ;;  %v1838_v43 = vsel %vm1124_vm5, %v1714_v47, 0.0  ;;  %v1787_v47 = vsel %vm1124_vm5, %v1680_v16, 0.0  ;;  %v15371_v21 = vld [vmem:[#allocation55_spill] sm:$0xff]  ;;  %v5951_v3 = vmul.f32 %v5919_v56, %v15374_v31  ;;  %v9632_v45 = vld [vmem:[%s14730_s25 + $0x80] sm:$0xff]  ;;  %v15380_v16 = vld [vmem:[#allocation190_spill] sm:$0xff] }
 0xc21   :  { %v15383_v56 = vld [vmem:[#allocation68_spill] sm:$0xff] }
 0xc22   :  { %9235 = vmatpush3.bf16.msra.mxu0 %v9234_v18  ;;  %v1718_v51 = vpop.permute.xlu1 %1717  ;;  %v5950_v18 = vmul.f32 %v5918_v12, %v15371_v21 }
 0xc23   :  { %9236 = vmatprep.subr.bf16.mxu0 %v15295_v20 }
 0xc24   :  { %1833 = vadd.xlane.f32.xlu1 %v1832_v55  ;;  %5997 = vadd.xlane.f32.xlu0 %v5996_v7  ;;  %v1781_v55 = vsel %vm1124_vm5, %v1676_v22, 0.0  ;;  %v5961_v7 = vmul.f32 %v5929_v58, %v15365_v33  ;;  %v15372_v33 = vld [vmem:[#allocation34_spill] sm:$0xff]  ;;  %v2181_v22 = vmul.f32 %v9629_v23, %v15373_v42 }
 0xc25   :  { %v5932_v58 = vmul.f32 %v5900_v1, %v15372_v33  ;;  %v5921_v1 = vadd.f32 1e-15, %v13579_v38  ;;  %v9634_v38 = vld [vmem:[%s14730_s25 + $0xa8] sm:$0xff] }
 0xc28   :  { %6057 = vadd.xlane.f32.xlu1 %v6056_v11  ;;  %1776 = vadd.xlane.f32.xlu0 %v1775_v0  ;;  %v6005_v11 = vsel %vm4848_vm9, %v5961_v7, 0.0  ;;  %v9627_v0 = vld [vmem:[%s14730_s25 + $0x8] sm:$0xff]  ;;  %v5964_v7 = vmul.f32 %v5932_v58, %v15372_v33 }
 0xc29   :  { %v2164_v59 = vmul.f32 %v9627_v0, %v15367_v61  ;;  %v5920_v0 = vadd.f32 1e-15, %v13568_v30  ;;  %v5901_v61 = vadd.f32 1e-15, %v13609_v24 }
 0xc2c   :  { %1836 = vadd.xlane.f32.xlu1 %v1835_v48  ;;  %6000 = vadd.xlane.f32.xlu0 %v5999_v32  ;;  %v5962_v48 = vmul.f32 %v5930_v36, %v15366_v14  ;;  %v9628_v32 = vld [vmem:[%s14730_s25 + $0x88] sm:$0xff]  ;;  %v6014_v36 = vsel %vm4848_vm9, %v5964_v7, 0.0  ;;  %v9635_v7 = vld [vmem:[%s14730_s25 + $0xb0] sm:$0xff] }
 0xc2d   :  { %v2180_v17 = vmul.f32 %v9628_v32, %v15369_v35  ;;  %v15378_v35 = vld [vmem:[#allocation23_spill] sm:$0xff] }
 0xc30   :  { %6060 = vadd.xlane.f32.xlu1 %v6059_v13  ;;  %1779 = vadd.xlane.f32.xlu0 %v1778_v28  ;;  %v6008_v13 = vsel %vm4848_vm9, %v5962_v48, 0.0  ;;  %v5981_v28 = vmul.f32 %v5949_v49, %v15368_v40  ;;  %v5983_v40 = vmul.f32 %v5951_v3, %v15374_v31  ;;  %v9631_v49 = vld [vmem:[%s14730_s25] sm:$0xff]  ;;  %v15384_v31 = vld [vmem:[#allocation191_spill] sm:$0xff] }
 0xc31   :  { %v15377_v48 = vld [vmem:[#allocation60_spill] sm:$0xff]  ;;  %v2185_v3 = vmul.f32 %v9635_v7, %v15384_v31 }
 0xc32   :  { %v6065_v15 = vsel %vm4848_vm9, %v5981_v28, 0.0  ;;  %v5952_v32 = vmul.f32 %v5920_v0, %v15377_v48  ;;  %v6071_v30 = vsel %vm4848_vm9, %v5983_v40, 0.0  ;;  %v9633_v28 = vld [vmem:[%s14730_s25 + $0xa0] sm:$0xff] }
 0xc33   :  { %v2183_v12 = vmul.f32 %v9633_v28, %v15380_v16  ;;  %v9640_v28 = vld [vmem:[%s14730_s25 + $0xd8] sm:$0xff] }
 0xc34   :  { %1839 = vadd.xlane.f32.xlu1 %v1838_v43  ;;  %6003 = vadd.xlane.f32.xlu0 %v6002_v62  ;;  %v1844_v43 = vsel %vm1124_vm5, %v1718_v51, 0.0  ;;  %v6011_v62 = vsel %vm4848_vm9, %v5963_v52, 0.0  ;;  %v15381_v52 = vld [vmem:[#allocation65_spill] sm:$0xff]  ;;  %v15389_v16 = vld [vmem:[#allocation196_spill] sm:$0xff] }
 0xc35   :  { %v5953_v51 = vmul.f32 %v5921_v1, %v15381_v52 }
 0xc37   :  { %v5985_v42 = vmul.f32 %v5953_v51, %v15381_v52  ;;  %v15390_v52 = vld [vmem:[#allocation142_spill] sm:$0xff] }
 0xc38   :  { %6063 = vadd.xlane.f32.xlu1 %v6062_v46  ;;  %1782 = vadd.xlane.f32.xlu0 %v1781_v55  ;;  %v1790_v46 = vsel %vm1124_vm5, %v1682_v54, 0.0  ;;  %v5982_v55 = vmul.f32 %v5950_v18, %v15371_v21  ;;  %v5922_v54 = vadd.f32 1e-15, %v13593_v44 }
 0xc3a   :  { %v6068_v14 = vsel %vm4848_vm9, %v5982_v55, 0.0  ;;  %v6077_v55 = vsel %vm4848_vm9, %v5985_v42, 0.0 }
 0xc3c   :  { %1842 = vadd.xlane.f32.xlu1 %v1841_v25  ;;  %6006 = vadd.xlane.f32.xlu0 %v6005_v11  ;;  %v1684_v25 = vpop.permute.xlu0 %1683  ;;  %v15375_v11 = vld [vmem:[#allocation6_spill] sm:$0xff] }
 0xc3d   :  { %v2182_v60 = vmul.f32 %v9630_v57, %v15375_v11  ;;  %v9636_v57 = vld [vmem:[%s14730_s25 + $0xb8] sm:$0xff]  ;;  %v15385_v11 = vld [vmem:[#allocation9_spill] sm:$0xff] }
 0xc40   :  { %2197 = vadd.xlane.f32.xlu1 %v2164_v59  ;;  %1785 = vadd.xlane.f32.xlu0 %v1784_v5  ;;  %v1793_v59 = vsel %vm1124_vm5, %v1684_v25, 0.0  ;;  %v2163_v5 = vmul.f32 %v9631_v49, %v15376_v39  ;;  %v1686_v58 = vpop.permute.xlu0 %1685 }
 0xc41   :  { %v1796_v23 = vsel %vm1124_vm5, %v1686_v58, 0.0 }
 0xc44   :  { %2229 = vadd.xlane.f32.xlu1 %v2180_v17  ;;  %6009 = vadd.xlane.f32.xlu0 %v6008_v13  ;;  %v5933_v17 = vmul.f32 %v5901_v61, %v15378_v35  ;;  %v2179_v13 = vmul.f32 %v9632_v45, %v15379_v50  ;;  %v13819_v0 = vpop.xlane.xlu0 %1752  ;;  %v9637_v61 = vld [vmem:[%s14730_s25 + $0xc0] sm:$0xff] }
 0xc45   :  { %v15388_v45 = vld [vmem:[#allocation197_spill] sm:$0xff] }
 0xc48   :  { %6066 = vadd.xlane.f32.xlu1 %v6065_v15  ;;  %1788 = vadd.xlane.f32.xlu0 %v1787_v47  ;;  %v5984_v15 = vmul.f32 %v5952_v32, %v15377_v48  ;;  %v5965_v47 = vmul.f32 %v5933_v17, %v15378_v35  ;;  %v15387_v48 = vld [vmem:[#allocation11_spill] sm:$0xff] }
 0xc4a   :  { %v6074_v18 = vsel %vm4848_vm9, %v5984_v15, 0.0  ;;  %v6017_v33 = vsel %vm4848_vm9, %v5965_v47, 0.0  ;;  %v9641_v47 = vld [vmem:[%s14730_s25 + $0xe0] sm:$0xff] }
 0xc4b   :  { %v2191_v51 = vmul.f32 %v9641_v47, %v15390_v52 }
 0xc4c   :  { %1845 = vadd.xlane.f32.xlu1 %v1844_v43  ;;  %6012 = vadd.xlane.f32.xlu0 %v6011_v62  ;;  %v15382_v43 = vld [vmem:[#allocation135_spill] sm:$0xff] }
 0xc4d   :  { %v2184_v62 = vmul.f32 %v9634_v38, %v15382_v43  ;;  %v7382_v43 = vld [vmem:[%s14309_s12] ss:$0 sm:$0xff] }
 0xc50   :  { %2231 = vadd.xlane.f32.xlu1 %v2181_v22  ;;  %1791 = vadd.xlane.f32.xlu0 %v1790_v46  ;;  %v5954_v46 = vmul.f32 %v5922_v54, %v15383_v56 }
 0xc53   :  { %v13776_v24 = vpop.xlane.xlu1 %1755 }
 0xc54   :  { %6069 = vadd.xlane.f32.xlu1 %v6068_v14  ;;  %6015 = vadd.xlane.f32.xlu0 %v6014_v36  ;;  %v5986_v14 = vmul.f32 %v5954_v46, %v15383_v56 }
 0xc56   :  { %v6080_v36 = vsel %vm4848_vm9, %v5986_v14, 0.0  ;;  %v15392_v14 = vld [vmem:[#allocation176_spill] sm:$0xff] }
 0xc57   :  { %v13790_v21 = vpop.xlane.xlu1 %1758 }
 0xc58   :  { %2233 = vadd.xlane.f32.xlu1 %v2182_v60  ;;  %1794 = vadd.xlane.f32.xlu0 %v1793_v59  ;;  %v2186_v60 = vmul.f32 %v9636_v57, %v15385_v11  ;;  %v15386_v59 = vld [vmem:[#allocation193_spill] sm:$0xff] }
 0xc59   :  { %v2187_v40 = vmul.f32 %v9637_v61, %v15386_v59  ;;  %v15394_v61 = vld [vmem:[#allocation177_spill] sm:$0xff] }
 0xc5b   :  { %v13801_v22 = vpop.xlane.xlu1 %1761 }
 0xc5c   :  { %6072 = vadd.xlane.f32.xlu1 %v6071_v30  ;;  %2195 = vadd.xlane.f32.xlu0 %v2163_v5  ;;  %v9638_v5 = vld [vmem:[%s14730_s25 + $0xc8] sm:$0xff]  ;;  %v9639_v30 = vld [vmem:[%s14730_s25 + $0xd0] sm:$0xff] }
 0xc5d   :  { %v2188_v32 = vmul.f32 %v9638_v5, %v15387_v48  ;;  %v2189_v50 = vmul.f32 %v9639_v30, %v15388_v45  ;;  %v15396_v48 = vld [vmem:[#allocation178_spill] sm:$0xff] }
 0xc5f   :  { %v13809_v44 = vpop.xlane.xlu1 %1764 }
 0xc60   :  { %2235 = vadd.xlane.f32.xlu1 %v2183_v12  ;;  %2227 = vadd.xlane.f32.xlu0 %v2179_v13  ;;  %v2190_v12 = vmul.f32 %v9640_v28, %v15389_v16  ;;  %v15398_v16 = vld [vmem:[#allocation180_spill] sm:$0xff] }
 0xc63   :  { %v13813_v25 = vpop.xlane.xlu1 %1767 }
 0xc64   :  { %6075 = vadd.xlane.f32.xlu1 %v6074_v18  ;;  %6018 = vadd.xlane.f32.xlu0 %v6017_v33 }
 0xc67   :  { %v13825_v49 = vpop.xlane.xlu1 %5988 }
 0xc68   :  { %2237 = vadd.xlane.f32.xlu1 %v2184_v62  ;;  %1797 = vadd.xlane.f32.xlu0 %v1796_v23 }
 0xc6b   :  { %v13831_v35 = vpop.xlane.xlu1 %6036 }
 0xc6c   :  { %6078 = vadd.xlane.f32.xlu1 %v6077_v55  ;;  %v15391_v55 = vld [vmem:[#allocation175_spill] sm:$0xff] }
 0xc6f   :  { %v13841_v1 = vpop.xlane.xlu1 %1770 }
 0xc70   :  { %2239 = vadd.xlane.f32.xlu1 %v2185_v3 }
 0xc73   :  { %v13847_v18 = vpop.xlane.xlu1 %5994 }
 0xc74   :  { %6081 = vadd.xlane.f32.xlu1 %v6080_v36 }
 0xc78   :  { %2241 = vadd.xlane.f32.xlu1 %v2186_v60 }
 0xc7c   :  { %2243 = vadd.xlane.f32.xlu1 %v2187_v40 }
 0xc7d   :  { %v1801_v39 = vpop.xlane.xlu0 %1800 }
 0xc7e   :  { %v1993_v3 = vrot.slane %v1801_v39, %v15292_v63 }
 0xc80   :  { %2245 = vadd.xlane.f32.xlu1 %v2188_v32 }
 0xc81   :  { %v1804_v17 = vpop.xlane.xlu0 %1803 }
 0xc82   :  { %v1997_v42 = vrot.slane %v1804_v17, %v15293_v10 }
 0xc84   :  { %2247 = vadd.xlane.f32.xlu1 %v2189_v50  ;;  %v1998_v5 = vsel %vm1890_vm7, %v1997_v42, %v1993_v3  ;;  %v6197_v3 = vrot.slane %v13831_v35, %v15292_v63 }
 0xc85   :  { %v1807_v13 = vpop.xlane.xlu0 %1806 }
 0xc86   :  { %v2002_v7 = vrot.slane %v1807_v13, %v15391_v55 }
 0xc88   :  { %2249 = vadd.xlane.f32.xlu1 %v2190_v12  ;;  %v2003_v30 = vsel %vm1897_vm8, %v2002_v7, %v1998_v5  ;;  %v15404_v5 = vld [vmem:[#allocation182_spill] sm:$0xff] }
 0xc89   :  { %v1810_v15 = vpop.xlane.xlu0 %1809 }
 0xc8a   :  { %v2007_v36 = vrot.slane %v1810_v15, %v15392_v14  ;;  %v15399_v15 = vld [vmem:[#allocation179_spill] sm:$0xff] }
 0xc8c   :  { %2251 = vadd.xlane.f32.xlu1 %v2191_v51  ;;  %v2008_v45 = vsel %vm15397_vm15, %v2007_v36, %v2003_v30 }
 0xc8d   :  { %v1813_v33 = vpop.xlane.xlu0 %1812 }
 0xc8e   :  { %v2012_v59 = vrot.slane %v1813_v33, %v15394_v61 }
 0xc90   :  { %v2013_v28 = vsel %vm1911_vm3, %v2012_v59, %v2008_v45 }
 0xc91   :  { %v1822_v58 = vpop.xlane.xlu1 %1821  ;;  %v1816_v38 = vpop.xlane.xlu0 %1815 }
 0xc92   :  { %v2017_v32 = vrot.slane %v1816_v38, %v15396_v48  ;;  %v2027_v12 = vrot.slane %v1822_v58, %v15398_v16 }
 0xc94   :  { %v2018_v51 = vsel %vm1918_vm10, %v2017_v32, %v2013_v28 }
 0xc95   :  { %v6046_v62 = vpop.xlane.xlu1 %6045  ;;  %v13852_v54 = vpop.xlane.xlu0 %5991 }
 0xc96   :  { %v8692_v23 = vpop.f32.mrb[106].mxu1 }
 0xc97   :  { %v6942_v56 = vadd.f32 %v8692_v23, %v7382_v43  ;;  %v6936_v46 = vpop.f32.mrb[107].mxu1 }
 0xc98   :  { %v6937_v31 = vadd.f32 %v7382_v43, %v6936_v46 }
 0xc99   :  { %v6956_v57 = vsel %vm15393_vm6, %v6942_v56, 0.0  ;;  %v1825_v11 = vpop.xlane.xlu1 %1824  ;;  %v6040_v60 = vpop.xlane.xlu0 %6039  ;;  %v15400_v56 = vld [vmem:[#allocation181_spill] sm:$0xff]  ;;  %vm15405_vm6 = vcmask 654912  }
 0xc9a   :  { %v6955_v40 = vsel %vm15395_vm4, %v6937_v31, 0.0  ;;  %v6201_v38 = vrot.slane %v6040_v60, %v15293_v10  ;;  %v2032_v46 = vrot.slane %v1825_v11, %v15400_v56  ;;  %vm15406_vm4 = vmmov %vm15397_vm15  ;;  %vm15408_vm15 = vcmask 720512  }
 0xc9b   :  { %v6957_v17 = vadd.f32 %v6956_v57, %v6955_v40 }
 0xc9c   :  { %v6202_v30 = vsel %vm1890_vm7, %v6201_v38, %v6197_v3  ;;  %v15407_v3 = vld [vmem:[#allocation183_spill] sm:$0xff] }
 0xc9d   :  { %v6958_v39 = vrot.slane %v6957_v17, 4  ;;  %v6049_v50 = vpop.xlane.xlu1 %6048  ;;  %v1819_v13 = vpop.xlane.xlu0 %1818 }
 0xc9e   :  { %v2022_v47 = vrot.slane %v1819_v13, %v15399_v15  ;;  %v8695_v52 = vpop.f32.mrb[108].mxu1  ;;  %v6216_v45 = vrot.slane %v6049_v50, %v15394_v61  ;;  %v6458_v50 = vrot.slane %v13401_v41, %v15293_v10  ;;  %v1889_v41 = vrot.slane %v13776_v24, %v15293_v10  ;;  %v15409_v24 = vld [vmem:[#allocation36_spill] sm:$0xff] }
 0xc9f   :  { %v6959_v33 = vadd.f32 %v6958_v39, %v6957_v17  ;;  %v6952_v23 = vadd.f32 %v8695_v52, %v7382_v43  ;;  %v6946_v42 = vpop.f32.mrb[109].mxu1  ;;  %v6211_v17 = vrot.slane %v6046_v62, %v15392_v14 }
 0xca0   :  { %v2023_v7 = vsel %vm1925_vm11, %v2022_v47, %v2018_v51  ;;  %v6947_v31 = vadd.f32 %v7382_v43, %v6946_v42 }
 0xca1   :  { %v2028_v58 = vsel %vm15401_vm0, %v2027_v12, %v2023_v7  ;;  %v6965_v36 = vsel %vm15402_vm14, %v6952_v23, 0.0  ;;  %v1828_v57 = vpop.xlane.xlu1 %1827  ;;  %v6043_v59 = vpop.xlane.xlu0 %6042  ;;  %v6960_v43 = vrot.slane %v6959_v33, 2  ;;  %vm5823_vm0 = vcmask 123904  }
 0xca2   :  { %v6964_v40 = vsel %vm15361_vm2, %v6947_v31, 0.0  ;;  %v2033_v60 = vsel %vm15403_vm12, %v2032_v46, %v2028_v58  ;;  %v2037_v32 = vrot.slane %v1828_v57, %v15404_v5  ;;  %v6206_v11 = vrot.slane %v6043_v59, %v15391_v55 }
 0xca3   :  { %v6966_v35 = vadd.f32 %v6965_v36, %v6964_v40  ;;  %v6961_v23 = vadd.f32 %v6960_v43, %v6959_v33  ;;  %v6454_v36 = vrot.slane %v13398_v37, %v15292_v63  ;;  %v5902_v40 = vadd.f32 1e-15, %v13613_v8 }
 0xca4   :  { %v2038_v39 = vsel %vm15405_vm6, %v2037_v32, %v2033_v60  ;;  %v6207_v13 = vsel %vm1897_vm8, %v6206_v11, %v6202_v30  ;;  %v1884_v60 = vrot.slane %v13819_v0, %v15292_v63  ;;  %v1896_v37 = vrot.slane %v13790_v21, %v15391_v55  ;;  %vm15414_vm6 = vmmov %vm15406_vm4 }
 0xca5   :  { %v6967_v28 = vrot.slane %v6966_v35, 4  ;;  %v6212_v12 = vsel %vm15406_vm4, %v6211_v17, %v6207_v13  ;;  %v6052_v47 = vpop.xlane.xlu1 %6051  ;;  %v13886_v52 = vpop.xlane.xlu0 %1773  ;;  %v6962_v57 = vrot.slane %v6961_v23, 1  ;;  %v6459_v43 = vsel %vm1890_vm7, %v6458_v50, %v6454_v36 }
 0xca6   :  { %v6217_v51 = vsel %vm1911_vm3, %v6216_v45, %v6212_v12  ;;  %v6221_v62 = vrot.slane %v6052_v47, %v15396_v48  ;;  %v1903_v0 = vrot.slane %v13801_v22, %v15392_v14  ;;  %v5934_v13 = vmul.f32 %v5902_v40, %v15409_v24 }
 0xca7   :  { %v6968_v42 = vadd.f32 %v6967_v28, %v6966_v35  ;;  %v6963_v45 = vadd.f32 %v6962_v57, %v6961_v23  ;;  %v1910_v28 = vrot.slane %v13809_v44, %v15394_v61  ;;  %v1891_v47 = vsel %vm1890_vm7, %v1889_v41, %v1884_v60  ;;  %v9642_v57 = vld [vmem:[%s14730_s25 + $0x10] sm:$0xff] }
 0xca8   :  { %v6222_v38 = vsel %vm1918_vm10, %v6221_v62, %v6217_v51  ;;  %v1917_v51 = vrot.slane %v13813_v25, %v15396_v48  ;;  %vm15410_vm14 = vcmask 1041409   ;;  %v1898_v50 = vsel %vm1897_vm8, %v1896_v37, %v1891_v47 }
 0xca9   :  { %v6969_v46 = vrot.slane %v6968_v42, 2  ;;  %v1831_v7 = vpop.xlane.xlu1 %1830  ;;  %v6446_v31 = vpop.xlane.xlu0 %6445  ;;  %vm15411_vm2 = vmmov %vm15410_vm14  ;;  %v1924_v44 = vrot.slane %v13841_v1, %v15399_v15  ;;  %vm15413_vm12 = vcmask 261120   ;;  %v6122_v25 = vrot.slane %v13852_v54, %v15293_v10 }
 0xcaa   :  { %v2042_v58 = vrot.slane %v1831_v7, %v15407_v3  ;;  %v6467_v30 = vrot.slane %v6446_v31, %v15293_v10  ;;  %v1905_v31 = vsel %vm15414_vm6, %v1903_v0, %v1898_v50  ;;  %vm15415_vm4 = vcmask 786112  }
 0xcab   :  { %v6970_v59 = vadd.f32 %v6969_v46, %v6968_v42  ;;  %v15412_v46 = vld [vmem:[#allocation184_spill] sm:$0xff]  ;;  %v1912_v1 = vsel %vm1911_vm3, %v1910_v28, %v1905_v31  ;;  %v5903_v60 = vadd.f32 1e-15, %v13617_v27 }
 0xcac   :  { %v2043_v33 = vsel %vm15408_vm15, %v2042_v58, %v2038_v39  ;;  %v1931_v58 = vrot.slane %v13886_v52, %v15398_v16  ;;  %v1919_v54 = vsel %vm1918_vm10, %v1917_v51, %v1912_v1  ;;  %v6118_v52 = vrot.slane %v13825_v49, %v15292_v63 }
 0xcad   :  { %v6971_v32 = vrot.slane %v6970_v59, 1  ;;  %v6055_v11 = vpop.xlane.xlu1 %6054  ;;  %v6443_v17 = vpop.xlane.xlu0 %6442  ;;  %v6127_v49 = vrot.slane %v13847_v18, %v15391_v55 }
 0xcae   :  { %v6226_v8 = vrot.slane %v6055_v11, %v15399_v15  ;;  %v6463_v35 = vrot.slane %v6443_v17, %v15292_v63  ;;  %v5966_v17 = vmul.f32 %v5934_v13, %v15409_v24  ;;  %v15421_v13 = vld [vmem:[#allocation185_spill] sm:$0xff] }
 0xcaf   :  { %v6972_v39 = vadd.f32 %v6971_v32, %v6970_v59  ;;  %v15416_v59 = vld [vmem:[#allocation163_spill] sm:$0xff] }
 0xcb0   :  { %v6227_v12 = vsel %vm1925_vm11, %v6226_v8, %v6222_v38  ;;  %v6468_v21 = vsel %vm1890_vm7, %v6467_v30, %v6463_v35  ;;  %v2165_v40 = vmul.f32 %v9642_v57, %v15416_v59  ;;  %v15420_v35 = vld [vmem:[#allocation59_spill] sm:$0xff]  ;;  %v6020_v47 = vsel %vm4848_vm9, %v5966_v17, 0.0  ;;  %v15427_v57 = vld [vmem:[#allocation62_spill] sm:$0xff] }
 0xcb1   :  { %v1834_v62 = vpop.xlane.xlu1 %1833  ;;  %v5998_v42 = vpop.xlane.xlu0 %5997  ;;  %v6986_v22 = vsel %vm15410_vm14, %v6972_v39, %v6963_v45  ;;  %v6469_v23 = vsel %vm15411_vm2, %v6468_v21, %v6459_v43  ;;  %v6123_v43 = vsel %vm1890_vm7, %v6122_v25, %v6118_v52  ;;  %vm15419_vm14 = vcmask 589312   ;;  %vm15422_vm2 = vmmov %vm15414_vm6 }
 0xcb2   :  { %v2047_v38 = vrot.slane %v1834_v62, %v15412_v46  ;;  %8705 = vmatmul.mubr.msk.f32.vlgmr.msra.gmra.mrb[110].mxu0 %vm15413_vm12, %v6986_v22  ;;  %v6471_v7 = vsel %vm5823_vm0, %v6469_v23, 0.0  ;;  %v6132_v27 = vrot.slane %v5998_v42, %v15392_v14  ;;  %v5935_v0 = vmul.f32 %v5903_v60, %v15420_v35  ;;  %v9643_v62 = vld [vmem:[%s14730_s25 + $0x18] sm:$0xff]  ;;  %v15424_v42 = vld [vmem:[#allocation161_spill] sm:$0xff]  ;;  %vm15425_vm6 = vmmov %vm15419_vm14 }
 0xcb3   :  { %6472 = vadd.xlane.f32.xlu0 %v6471_v7  ;;  %8715 = vmatprep.mubr.msk.f32.mxu0 %vm15296_vm1, %v15271_v9  ;;  %v1926_v9 = vsel %vm1925_vm11, %v1924_v44, %v1919_v54  ;;  %vm15417_vm1 = vcmask 523712   ;;  %v6128_v24 = vsel %vm1897_vm8, %v6127_v49, %v6123_v43  ;;  %vm15423_vm12 = vcmask 851712  }
 0xcb4   :  { %v2048_v36 = vsel %vm15415_vm4, %v2047_v38, %v2043_v33  ;;  %v1933_v37 = vsel %vm15417_vm1, %v1931_v58, %v1926_v9  ;;  %vm15418_vm15 = vmmov %vm15417_vm1  ;;  %v6133_v51 = vsel %vm15422_vm2, %v6132_v27, %v6128_v24  ;;  %v2166_v22 = vmul.f32 %v9643_v62, %v15424_v42  ;;  %v15430_v9 = vld [vmem:[#allocation164_spill] sm:$0xff]  ;;  %v15434_v24 = vld [vmem:[#allocation187_spill] sm:$0xff] }
 0xcb5   :  { %v6058_v41 = vpop.xlane.xlu1 %6057  ;;  %v1777_v32 = vpop.xlane.xlu0 %1776  ;;  %v5904_v44 = vadd.f32 1e-15, %v13621_v2  ;;  %v5967_v31 = vmul.f32 %v5935_v0, %v15420_v35  ;;  %vm15426_vm4 = vcmask 654912   ;;  %vm15429_vm1 = vcmask 917312  }
 0xcb6   :  { %v6231_v11 = vrot.slane %v6058_v41, %v15398_v16  ;;  %v1938_v33 = vrot.slane %v1777_v32, %v15400_v56  ;;  %v9644_v32 = vld [vmem:[%s14730_s25 + $0x20] sm:$0xff]  ;;  %v5905_v43 = vadd.f32 1e-15, %v13624_v53  ;;  %vm15435_vm2 = vcmask 982912  }
 0xcb7   :  { %2199 = vadd.xlane.f32.xlu0 %v2165_v40  ;;  %v5936_v59 = vmul.f32 %v5904_v44, %v15427_v57  ;;  %v15428_v40 = vld [vmem:[#allocation186_spill] sm:$0xff]  ;;  %v6023_v2 = vsel %vm4848_vm9, %v5967_v31, 0.0 }
 0xcb8   :  { %v6232_v30 = vsel %vm15418_vm15, %v6231_v11, %v6227_v12  ;;  %v1940_v8 = vsel %vm15419_vm14, %v1938_v33, %v1933_v37  ;;  %v2167_v11 = vmul.f32 %v9644_v32, %v15430_v9  ;;  %vm15431_vm15 = vmmov %vm15426_vm4  ;;  %vm15432_vm14 = vcmask 720512  }
 0xcb9   :  { %v1837_v45 = vpop.xlane.xlu1 %1836  ;;  %v6001_v39 = vpop.xlane.xlu0 %6000  ;;  %v5968_v49 = vmul.f32 %v5936_v59, %v15427_v57  ;;  %v15440_v59 = vld [vmem:[#allocation171_spill] sm:$0xff] }
 0xcba   :  { %v2052_v28 = vrot.slane %v1837_v45, %v15421_v13  ;;  %v6137_v21 = vrot.slane %v6001_v39, %v15394_v61  ;;  %v15433_v45 = vld [vmem:[#allocation67_spill] sm:$0xff] }
 0xcbb   :  { %6021 = vadd.xlane.f32.xlu0 %v6020_v47  ;;  %v5937_v39 = vmul.f32 %v5905_v43, %v15433_v45  ;;  %v6026_v53 = vsel %vm4848_vm9, %v5968_v49, 0.0  ;;  %v15443_v43 = vld [vmem:[#allocation188_spill] sm:$0xff] }
 0xcbc   :  { %v2053_v18 = vsel %vm15423_vm12, %v2052_v28, %v2048_v36  ;;  %v6138_v12 = vsel %vm1911_vm3, %v6137_v21, %v6133_v51  ;;  %vm15437_vm12 = vcmask 786112  }
 0xcbd   :  { %v6061_v23 = vpop.xlane.xlu1 %6060  ;;  %v1780_v50 = vpop.xlane.xlu0 %1779  ;;  %v5969_v44 = vmul.f32 %v5937_v39, %v15433_v45 }
 0xcbe   :  { %v6236_v38 = vrot.slane %v6061_v23, %v15400_v56  ;;  %v1945_v7 = vrot.slane %v1780_v50, %v15404_v5  ;;  %v5906_v23 = vadd.f32 1e-15, %v13626_v26  ;;  %v9646_v26 = vld [vmem:[%s14730_s25 + $0x30] sm:$0xff] }
 0xcbf   :  { %2201 = vadd.xlane.f32.xlu0 %v2166_v22 }
 0xcc0   :  { %v6237_v25 = vsel %vm15425_vm6, %v6236_v38, %v6232_v30  ;;  %v1947_v58 = vsel %vm15426_vm4, %v1945_v7, %v1940_v8  ;;  %vm15439_vm6 = vcmask 523712   ;;  %vm15441_vm4 = vmmov %vm15432_vm14 }
 0xcc1   :  { %v1840_v1 = vpop.xlane.xlu1 %1839  ;;  %v6004_v36 = vpop.xlane.xlu0 %6003 }
 0xcc2   :  { %v2057_v60 = vrot.slane %v1840_v1, %v15428_v40  ;;  %v6142_v54 = vrot.slane %v6004_v36, %v15396_v48  ;;  %v6029_v36 = vsel %vm4848_vm9, %v5969_v44, 0.0 }
 0xcc3   :  { %6024 = vadd.xlane.f32.xlu0 %v6023_v2 }
 0xcc4   :  { %v2058_v52 = vsel %vm15429_vm1, %v2057_v60, %v2053_v18  ;;  %v6143_v41 = vsel %vm1918_vm10, %v6142_v54, %v6138_v12  ;;  %v9645_v18 = vld [vmem:[%s14730_s25 + $0x28] sm:$0xff]  ;;  %v2169_v60 = vmul.f32 %v9646_v26, %v15440_v59  ;;  %vm15442_vm1 = vcmask 851712   ;;  %v9650_v26 = vld [vmem:[%s14730_s25 + $0x50] sm:$0xff] }
 0xcc5   :  { %v6064_v33 = vpop.xlane.xlu1 %6063  ;;  %v1783_v17 = vpop.xlane.xlu0 %1782  ;;  %v15436_v12 = vld [vmem:[#allocation162_spill] sm:$0xff]  ;;  %v15452_v59 = vld [vmem:[#allocation165_spill] sm:$0xff] }
 0xcc6   :  { %v6241_v37 = vrot.slane %v6064_v33, %v15404_v5  ;;  %v1952_v27 = vrot.slane %v1783_v17, %v15407_v3  ;;  %v2168_v62 = vmul.f32 %v9645_v18, %v15436_v12  ;;  %v15448_v18 = vld [vmem:[#allocation145_spill] sm:$0xff] }
 0xcc7   :  { %2203 = vadd.xlane.f32.xlu0 %v2167_v11 }
 0xcc8   :  { %v6242_v30 = vsel %vm15431_vm15, %v6241_v37, %v6237_v25  ;;  %v1954_v8 = vsel %vm15432_vm14, %v1952_v27, %v1947_v58  ;;  %v15438_v25 = vld [vmem:[#allocation71_spill] sm:$0xff]  ;;  %vm15444_vm15 = vcmask 589312   ;;  %vm15445_vm14 = vcmask 1048512  }
 0xcc9   :  { %v1843_v35 = vpop.xlane.xlu1 %1842  ;;  %v6007_v0 = vpop.xlane.xlu0 %6006  ;;  %v5938_v58 = vmul.f32 %v5906_v23, %v15438_v25 }
 0xcca   :  { %v2062_v28 = vrot.slane %v1843_v35, %v15434_v24  ;;  %v6147_v21 = vrot.slane %v6007_v0, %v15399_v15  ;;  %v15446_v0 = vld [vmem:[#allocation166_spill] sm:$0xff] }
 0xccb   :  { %6027 = vadd.xlane.f32.xlu0 %v6026_v53  ;;  %v5970_v32 = vmul.f32 %v5938_v58, %v15438_v25 }
 0xccc   :  { %v2063_v47 = vsel %vm15435_vm2, %v2062_v28, %v2058_v52  ;;  %v6148_v51 = vsel %vm1925_vm11, %v6147_v21, %v6143_v41  ;;  %vm15447_vm2 = vcmask 917312  }
 0xccd   :  { %v13998_v42 = vpop.xlane.xlu1 %2197  ;;  %v1786_v22 = vpop.xlane.xlu0 %1785  ;;  %v6032_v49 = vsel %vm4848_vm9, %v5970_v32, 0.0 }
 0xcce   :  { %v1959_v50 = vrot.slane %v1786_v22, %v15412_v46 }
 0xccf   :  { %2205 = vadd.xlane.f32.xlu0 %v2168_v62 }
 0xcd0   :  { %v1961_v38 = vsel %vm15437_vm12, %v1959_v50, %v1954_v8 }
 0xcd1   :  { %v14004_v7 = vpop.xlane.xlu1 %2229  ;;  %v6010_v31 = vpop.xlane.xlu0 %6009 }
 0xcd2   :  { %v6152_v1 = vrot.slane %v6010_v31, %v15398_v16  ;;  %v15450_v31 = vld [vmem:[#allocation139_spill] sm:$0xff] }
 0xcd3   :  { %6030 = vadd.xlane.f32.xlu0 %v6029_v36 }
 0xcd4   :  { %v6153_v57 = vsel %vm15439_vm6, %v6152_v1, %v6148_v51  ;;  %v9648_v51 = vld [vmem:[%s14730_s25 + $0x40] sm:$0xff]  ;;  %vm15449_vm6 = vcmask 654912  }
 0xcd5   :  { %v6067_v54 = vpop.xlane.xlu1 %6066  ;;  %v1789_v2 = vpop.xlane.xlu0 %1788 }
 0xcd6   :  { %v6246_v52 = vrot.slane %v6067_v54, %v15407_v3  ;;  %v1966_v41 = vrot.slane %v1789_v2, %v15421_v13 }
 0xcd7   :  { %2207 = vadd.xlane.f32.xlu0 %v2169_v60  ;;  %v2173_v60 = vmul.f32 %v9650_v26, %v15452_v59 }
 0xcd8   :  { %v6247_v9 = vsel %vm15441_vm4, %v6246_v52, %v6242_v30  ;;  %v1968_v11 = vsel %vm15442_vm1, %v1966_v41, %v1961_v38  ;;  %v9647_v30 = vld [vmem:[%s14730_s25 + $0x38] sm:$0xff]  ;;  %v9649_v38 = vld [vmem:[%s14730_s25 + $0x48] sm:$0xff]  ;;  %vm15451_vm4 = vcmask 982912   ;;  %v2298_v52 = vrot.slane %v13998_v42, %v15293_v10 }
 0xcd9   :  { %v1846_v33 = vpop.xlane.xlu1 %1845  ;;  %v6013_v17 = vpop.xlane.xlu0 %6012  ;;  %v2170_v45 = vmul.f32 %v9647_v30, %v15446_v0  ;;  %v2172_v25 = vmul.f32 %v9649_v38, %v15450_v31  ;;  %v2377_v42 = vrot.slane %v14004_v7, %v15293_v10  ;;  %v9653_v38 = vld [vmem:[%s14730_s25 + $0x68] sm:$0xff]  ;;  %v15458_v31 = vld [vmem:[#allocation167_spill] sm:$0xff] }
 0xcda   :  { %v2067_v37 = vrot.slane %v1846_v33, %v15443_v43  ;;  %v6157_v27 = vrot.slane %v6013_v17, %v15400_v56  ;;  %v9651_v33 = vld [vmem:[%s14730_s25 + $0x58] sm:$0xff] }
 0xcdb   :  { %6033 = vadd.xlane.f32.xlu0 %v6032_v49  ;;  %v15453_v17 = vld [vmem:[#allocation151_spill] sm:$0xff] }
 0xcdc   :  { %v6158_v8 = vsel %vm15444_vm15, %v6157_v27, %v6153_v57  ;;  %v14024_v35 = vsel %vm15445_vm14, %v2067_v37, %v2063_v47  ;;  %v2171_v47 = vmul.f32 %v9648_v51, %v15448_v18  ;;  %v2174_v37 = vmul.f32 %v9651_v33, %v15453_v17  ;;  %vm15456_vm14 = vmmov %vm15447_vm2 }
 0xcdd   :  { %v2232_v39 = vpop.xlane.xlu1 %2231  ;;  %v1792_v28 = vpop.xlane.xlu0 %1791  ;;  %vm15455_vm15 = vcmask 261312  }
 0xcde   :  { %v1973_v21 = vrot.slane %v1792_v28, %v15428_v40  ;;  %v2382_v30 = vrot.slane %v2232_v39, %v15391_v55  ;;  %v9652_v28 = vld [vmem:[%s14730_s25 + $0x60] sm:$0xff] }
 0xcdf   :  { %2209 = vadd.xlane.f32.xlu0 %v2170_v45 }
 0xce0   :  { %v1975_v53 = vsel %vm15447_vm2, %v1973_v21, %v1968_v11  ;;  %v15454_v21 = vld [vmem:[#allocation169_spill] sm:$0xff]  ;;  %vm15457_vm2 = vcmask 720512  }
 0xce1   :  { %v6070_v12 = vpop.xlane.xlu1 %6069  ;;  %v6016_v62 = vpop.xlane.xlu0 %6015 }
 0xce2   :  { %v6251_v22 = vrot.slane %v6070_v12, %v15412_v46  ;;  %v6162_v23 = vrot.slane %v6016_v62, %v15404_v5 }
 0xce3   :  { %2211 = vadd.xlane.f32.xlu0 %v2171_v47 }
 0xce4   :  { %v6252_v50 = vsel %vm15437_vm12, %v6251_v22, %v6247_v9  ;;  %v6163_v44 = vsel %vm15449_vm6, %v6162_v23, %v6158_v8  ;;  %vm15459_vm12 = vcmask 1048512   ;;  %vm15460_vm6 = vcmask 1041409  }
 0xce5   :  { %v2234_v58 = vpop.xlane.xlu1 %2233  ;;  %v1795_v1 = vpop.xlane.xlu0 %1794 }
 0xce6   :  { %v1980_v36 = vrot.slane %v1795_v1, %v15434_v24  ;;  %v2387_v0 = vrot.slane %v2234_v58, %v15392_v14 }
 0xce7   :  { %2213 = vadd.xlane.f32.xlu0 %v2172_v25  ;;  %v2176_v25 = vmul.f32 %v9653_v38, %v15458_v31 }
 0xce8   :  { %v1982_v57 = vsel %vm15451_vm4, %v1980_v36, %v1975_v53  ;;  %v2175_v53 = vmul.f32 %v9652_v28, %v15454_v21 }
 0xce9   :  { %v6073_v54 = vpop.xlane.xlu1 %6072  ;;  %v2196_v2 = vpop.xlane.xlu0 %2195 }
 0xcea   :  { %v6256_v41 = vrot.slane %v6073_v54, %v15421_v13  ;;  %v2294_v32 = vrot.slane %v2196_v2, %v15292_v63 }
 0xceb   :  { %2215 = vadd.xlane.f32.xlu0 %v2173_v60 }
 0xcec   :  { %v6257_v9 = vsel %vm15442_vm1, %v6256_v41, %v6252_v50  ;;  %v14056_v11 = vsel %vm1890_vm7, %v2298_v52, %v2294_v32  ;;  %vm15461_vm1 = vmmov %vm15459_vm12 }
 0xced   :  { %v2236_v27 = vpop.xlane.xlu1 %2235  ;;  %v2228_v49 = vpop.xlane.xlu0 %2227 }
 0xcee   :  { %v2373_v8 = vrot.slane %v2228_v49, %v15292_v63  ;;  %v2392_v51 = vrot.slane %v2236_v27, %v15394_v61 }
 0xcef   :  { %2217 = vadd.xlane.f32.xlu0 %v2174_v37 }
 0xcf0   :  { %v2378_v45 = vsel %vm1890_vm7, %v2377_v42, %v2373_v8 }
 0xcf1   :  { %v2383_v18 = vsel %vm1897_vm8, %v2382_v30, %v2378_v45  ;;  %v6076_v7 = vpop.xlane.xlu1 %6075  ;;  %v6019_v47 = vpop.xlane.xlu0 %6018  ;;  %v7062_v30 = vld [vmem:[%s14312_s15 + $0x10] sm:$0xff] }
 0xcf2   :  { %v6261_v12 = vrot.slane %v6076_v7, %v15428_v40  ;;  %v6167_v39 = vrot.slane %v6019_v47, %v15407_v3  ;;  %v2388_v62 = vsel %vm15455_vm15, %v2387_v0, %v2383_v18  ;;  %vm15462_vm15 = vcmask 523712   ;;  %v7063_v0 = vld [vmem:[%s14312_s15 + $0x18] sm:$0xff] }
 0xcf3   :  { %2219 = vadd.xlane.f32.xlu0 %v2175_v53  ;;  %v2393_v22 = vsel %vm1911_vm3, %v2392_v51, %v2388_v62  ;;  %v9240_v28 = vpack.c.bf16 %v7063_v0, %v7062_v30 }
 0xcf4   :  { %v6262_v23 = vsel %vm15456_vm14, %v6261_v12, %v6257_v9  ;;  %v6168_v50 = vsel %vm15457_vm2, %v6167_v39, %v6163_v44  ;;  %vm15463_vm14 = vcmask 589312   ;;  %vm15464_vm2 = vcmask 654912  }
 0xcf5   :  { %v2238_v58 = vpop.xlane.xlu1 %2237  ;;  %v1798_v1 = vpop.xlane.xlu0 %1797 }
 0xcf6   :  { %v2397_v36 = vrot.slane %v2238_v58, %v15396_v48  ;;  %v1987_v26 = vrot.slane %v1798_v1, %v15443_v43 }
 0xcf7   :  { %2221 = vadd.xlane.f32.xlu0 %v2176_v25 }
 0xcf8   :  { %v2398_v59 = vsel %vm1918_vm10, %v2397_v36, %v2393_v22  ;;  %v1989_v60 = vsel %vm15459_vm12, %v1987_v26, %v1982_v57  ;;  %v7060_v57 = vld [vmem:[%s14312_s15] sm:$0xff]  ;;  %vm15465_vm12 = vcmask 720512  }
 0xcf9   :  { %v6079_v54 = vpop.xlane.xlu1 %6078  ;;  %v14090_v44 = vsel %vm15460_vm6, %v14024_v35, %v1989_v60  ;;  %v7061_v35 = vld [vmem:[%s14312_s15 + $0x8] sm:$0xff]  ;;  %vm15466_vm6 = vcmask 786112  }
 0xcfa   :  { %v6266_v2 = vrot.slane %v6079_v54, %v15434_v24  ;;  %v9237_v37 = vpack.c.bf16 %v7061_v35, %v7060_v57  ;;  %v15470_v57 = vld [vmem:[#allocation150_spill] sm:$0xff] }
 0xcfc   :  { %v6267_v52 = vsel %vm15451_vm4, %v6266_v2, %v6262_v23  ;;  %9238 = vmatpush3.bf16.msra.mxu0 %v9237_v37  ;;  %vm15467_vm4 = vmmov %vm15466_vm6 }
 0xcfd   :  { %v2240_v41 = vpop.xlane.xlu1 %2239  ;;  %9239 = vmatprep.subr.bf16.mxu0 %v15295_v20 }
 0xcfe   :  { %v2402_v32 = vrot.slane %v2240_v41, %v15399_v15 }
 0xd00   :  { %v2403_v9 = vsel %vm1925_vm11, %v2402_v32, %v2398_v59  ;;  %9241 = vmatpush3.bf16.msra.mxu0 %v9240_v28  ;;  %v6484_v28 = vmul.f32 0.25, %v13283_v19 }
 0xd01   :  { %v6082_v33 = vpop.xlane.xlu1 %6081 }
 0xd02   :  { %v6271_v17 = vrot.slane %v6082_v33, %v15443_v43  ;;  %v15469_v33 = vld [vmem:[#allocation146_spill] sm:$0xff] }
 0xd04   :  { %v14104_v27 = vsel %vm15461_vm1, %v6271_v17, %v6267_v52 }
 0xd05   :  { %v2242_v49 = vpop.xlane.xlu1 %2241 }
 0xd06   :  { %v2407_v42 = vrot.slane %v2242_v49, %v15398_v16 }
 0xd08   :  { %v2408_v8 = vsel %vm15462_vm15, %v2407_v42, %v2403_v9 }
 0xd09   :  { %v2244_v45 = vpop.xlane.xlu1 %2243 }
 0xd0a   :  { %v2412_v21 = vrot.slane %v2244_v45, %v15400_v56 }
 0xd0c   :  { %v2413_v53 = vsel %vm15463_vm14, %v2412_v21, %v2408_v8  ;;  %vm15468_vm14 = vcmask 261312   ;;  %v6483_v21 = vmul.f32 0.25, %v13286_v4 }
 0xd0d   :  { %v2246_v51 = vpop.xlane.xlu1 %2245 }
 0xd0e   :  { %v2417_v20 = vrot.slane %v2246_v51, %v15404_v5 }
 0xd10   :  { %v2418_v18 = vsel %vm15464_vm2, %v2417_v20, %v2413_v53  ;;  %vm15472_vm2 = vcmask 917312  }
 0xd11   :  { %v2248_v7 = vpop.xlane.xlu1 %2247 }
 0xd12   :  { %v2422_v47 = vrot.slane %v2248_v7, %v15407_v3  ;;  %v15474_v7 = vld [vmem:[#allocation46_spill] sm:$0xff] }
 0xd14   :  { %v2423_v12 = vsel %vm15465_vm12, %v2422_v47, %v2418_v18  ;;  %v15473_v18 = vld [vmem:[#allocation77_spill] sm:$0xff]  ;;  %vm15479_vm12 = vcmask 523712  }
 0xd15   :  { %v2250_v39 = vpop.xlane.xlu1 %2249 }
 0xd16   :  { %v2427_v62 = vrot.slane %v2250_v39, %v15412_v46 }
 0xd18   :  { %v14123_v22 = vsel %vm15466_vm6, %v2427_v62, %v2423_v12  ;;  %vm15482_vm6 = vcmask 589312  }
 0xd40   :  { %v6473_v23 = vpop.xlane.xlu0 %6472 }
 0xd41   :  { %9573 = vrsqrt.f32 %v6473_v23  ;;  %vm6476_vm1 = vcmp.eq.f32.partialorder %v6473_v23, inf  ;;  %v6479_v54 = vand.u32 2147483648, %v6473_v23  ;;  %vm6478_vm15 = vcmp.eq.f32.partialorder %v6473_v23, 0.0 }
 0xd44   :  { %v2200_v38 = vpop.xlane.xlu0 %2199 }
 0xd45   :  { %v2303_v31 = vrot.slane %v2200_v38, %v15391_v55 }
 0xd47   :  { %v2304_v25 = vsel %vm1897_vm8, %v2303_v31, %v14056_v11  ;;  %vm15471_vm8 = vcmask 851712  }
 0xd48   :  { %v6022_v58 = vpop.xlane.xlu0 %6021 }
 0xd49   :  { %v6172_v1 = vrot.slane %v6022_v58, %v15412_v46 }
 0xd4b   :  { %v9574_v36 = vpop.eup %9573  ;;  %v6173_v26 = vsel %vm15467_vm4, %v6172_v1, %v6168_v50  ;;  %vm15484_vm4 = vcmask 654912  }
 0xd4c   :  { %v6475_v59 = vmul.f32 %v9574_v36, %v6473_v23  ;;  %v2202_v60 = vpop.xlane.xlu0 %2201 }
 0xd4d   :  { %v2308_v2 = vrot.slane %v2202_v60, %v15392_v14 }
 0xd4e   :  { %v6477_v52 = vsel %vm6476_vm1, %v6473_v23, %v6475_v59  ;;  %vm15485_vm1 = vcmask 720512  }
 0xd4f   :  { %v6480_v41 = vsel %vm6478_vm15, %v6479_v54, %v6477_v52  ;;  %v2309_v55 = vsel %vm15468_vm14, %v2308_v2, %v2304_v25  ;;  %vm15486_vm15 = vcmask 786112   ;;  %vm15487_vm14 = vmmov %vm15471_vm8 }
 0xd50   :  { %v6481_v32 = vmax.f32 %v6480_v41, 1e-20  ;;  %v6025_v9 = vpop.xlane.xlu0 %6024 }
 0xd51   :  { %v6177_v11 = vrot.slane %v6025_v9, %v15421_v13  ;;  %v9654_v9 = vld [vmem:[%s14730_s25 + $0x70] sm:$0xff] }
 0xd52   :  { %v6489_v17 = vrot.slane %v6481_v32, %v15469_v33  ;;  %v6493_v35 = vrot.slane %v6481_v32, %v15470_v57 }
 0xd53   :  { %v6178_v50 = vsel %vm15471_vm8, %v6177_v11, %v6173_v26  ;;  %v15477_v11 = vld [vmem:[#allocation137_spill] sm:$0xff]  ;;  %vm15488_vm8 = vcmask 261120  }
 0xd54   :  { %9575 = vrcp.f32 %v6489_v17  ;;  %v2204_v37 = vpop.xlane.xlu0 %2203  ;;  %v2177_v17 = vmul.f32 %v9654_v9, %v15477_v11 }
 0xd55   :  { %9577 = vrcp.f32 %v6493_v35  ;;  %v2313_v14 = vrot.slane %v2204_v37, %v15394_v61 }
 0xd56   :  { %9579 = vrsqrt.f32 %v13558_v6 }
 0xd57   :  { %v2314_v49 = vsel %vm1911_vm3, %v2313_v14, %v2309_v55  ;;  %vm15475_vm3 = vcmask 982912  }
 0xd58   :  { %v6028_v42 = vpop.xlane.xlu0 %6027 }
 0xd59   :  { %v6182_v8 = vrot.slane %v6028_v42, %v15428_v40  ;;  %v15480_v42 = vld [vmem:[#allocation174_spill] sm:$0xff] }
 0xd5b   :  { %v6183_v30 = vsel %vm15472_vm2, %v6182_v8, %v6178_v50 }
 0xd5c   :  { %v2206_v0 = vpop.xlane.xlu0 %2205 }
 0xd5d   :  { %v2318_v45 = vrot.slane %v2206_v0, %v15396_v48  ;;  %v15481_v0 = vld [vmem:[#allocation25_spill] sm:$0xff] }
 0xd5e   :  { %v9576_v53 = vpop.eup %9575 }
 0xd5f   :  { %v9578_v51 = vpop.eup %9577  ;;  %v2319_v20 = vsel %vm1918_vm10, %v2318_v45, %v2314_v49  ;;  %v6498_v61 = vmul.f32 %v9576_v53, %v15473_v18  ;;  %v6497_v47 = vmul.f32 %v9576_v53, %v15474_v7  ;;  %vm15476_vm10 = vcmask 1048512   ;;  %v9655_v49 = vld [vmem:[%s14730_s25 + $0x78] sm:$0xff] }
 0xd60   :  { %v6031_v12 = vpop.xlane.xlu0 %6030  ;;  %v6501_v39 = vmul.f32 %v9578_v51, %v13320_v34  ;;  %v6500_v62 = vmul.f32 %v9578_v51, %v13324_v29  ;;  %v2178_v8 = vmul.f32 %v9655_v49, %v15480_v42  ;;  %v5783_v45 = vmul.f32 %v13286_v4, %v15481_v0 }
 0xd61   :  { %v6187_v23 = vrot.slane %v6031_v12, %v15434_v24  ;;  %v6503_v48 = vsub.f32 %v6498_v61, %v6484_v28  ;;  %v6502_v38 = vsub.f32 %v6497_v47, %v6483_v21 }
 0xd62   :  { %v6505_v31 = vsub.f32 %v6501_v39, %v6484_v28  ;;  %v6504_v25 = vsub.f32 %v6500_v62, %v6483_v21 }
 0xd63   :  { %v6188_v58 = vsel %vm15475_vm3, %v6187_v23, %v6183_v30  ;;  %v6507_v1 = vmul.f32 %v6503_v48, %v6503_v48  ;;  %v6506_v36 = vmul.f32 %v6502_v38, %v6502_v38  ;;  %v7387_v38 = vld [vmem:[%s14311_s14] ss:$0 sm:$0xff]  ;;  %vm15491_vm3 = vcmask 917312  }
 0xd64   :  { %v2208_v26 = vpop.xlane.xlu0 %2207  ;;  %v6509_v59 = vmul.f32 %v6505_v31, %v6505_v31  ;;  %v6508_v2 = vmul.f32 %v6504_v25, %v6504_v25 }
 0xd65   :  { %v2323_v60 = vrot.slane %v2208_v26, %v15399_v15  ;;  %v6513_v54 = vsel %vm4848_vm9, %v6507_v1, 0.0  ;;  %v6510_v34 = vsel %vm4848_vm9, %v6506_v36, 0.0  ;;  %v15489_v1 = vld [vmem:[#allocation118_spill] sm:$0xff] }
 0xd66   :  { %6514 = vadd.xlane.f32.xlu1 %v6513_v54  ;;  %6511 = vadd.xlane.f32.xlu0 %v6510_v34  ;;  %v6519_v55 = vsel %vm4848_vm9, %v6509_v59, 0.0  ;;  %v6516_v32 = vsel %vm4848_vm9, %v6508_v2, 0.0 }
 0xd67   :  { %v2324_v29 = vsel %vm1925_vm11, %v2323_v60, %v2319_v20  ;;  %vm15478_vm11 = vcmask 1041409   ;;  %v5787_v20 = vsel %vm4848_vm9, %v5783_v45, 0.0  ;;  %v3814_v45 = vand.u32 2147483648, %v13558_v6 }
 0xd68   :  { %v6034_v52 = vpop.xlane.xlu0 %6033  ;;  %vm15490_vm2 = vmmov %vm15478_vm11 }
 0xd69   :  { %v6192_v41 = vrot.slane %v6034_v52, %v15443_v43 }
 0xd6a   :  { %6520 = vadd.xlane.f32.xlu1 %v6519_v55  ;;  %6517 = vadd.xlane.f32.xlu0 %v6516_v32 }
 0xd6b   :  { %v6193_v15 = vsel %vm15476_vm10, %v6192_v41, %v6188_v58  ;;  %vm15492_vm10 = vcmask 982912  }
 0xd6c   :  { %v2210_v35 = vpop.xlane.xlu0 %2209  ;;  %v14164_v50 = vsel %vm15478_vm11, %v14104_v27, %v6193_v15  ;;  %vm15493_vm11 = vcmask 1048512  }
 0xd6d   :  { %v2328_v37 = vrot.slane %v2210_v35, %v15398_v16  ;;  %v15483_v16 = vld [vmem:[#allocation75_spill] sm:$0xff] }
 0xd6e   :  { %2223 = vadd.xlane.f32.xlu0 %v2177_v17  ;;  %v5785_v53 = vmul.f32 %v13286_v4, %v15483_v16 }
 0xd6f   :  { %v2329_v14 = vsel %vm15479_vm12, %v2328_v37, %v2324_v29  ;;  %vm3811_vm12 = vcmp.eq.f32.partialorder %v13558_v6, inf }
 0xd70   :  { %v2212_v30 = vpop.xlane.xlu0 %2211  ;;  %v5793_v47 = vsel %vm4848_vm9, %v5785_v53, 0.0 }
 0xd71   :  { %v2333_v28 = vrot.slane %v2212_v30, %v15400_v56 }
 0xd72   :  { %2225 = vadd.xlane.f32.xlu0 %v2178_v8  ;;  %v9580_v8 = vpop.eup %9579 }
 0xd73   :  { %v2334_v27 = vsel %vm15482_vm6, %v2333_v28, %v2329_v14  ;;  %v3810_v30 = vmul.f32 %v9580_v8, %v13558_v6  ;;  %vm3813_vm6 = vcmp.eq.f32.partialorder %v13558_v6, 0.0 }
 0xd74   :  { %v2214_v21 = vpop.xlane.xlu0 %2213 }
 0xd75   :  { %v2338_v51 = vrot.slane %v2214_v21, %v15404_v5  ;;  %v3812_v0 = vsel %vm3811_vm12, %v13558_v6, %v3810_v30  ;;  %v7389_v21 = vld [vmem:[%s14313_s16] ss:$0 sm:$0xff]  ;;  %v9656_v6 = vld [vmem:[%s14730_s25 + $0xe8] sm:$0xff]  ;;  %vm7158_vm12 = vcmask 39936  }
 0xd76   :  { %5788 = vadd.xlane.f32.xlu0 %v5787_v20  ;;  %v3815_v28 = vsel %vm3813_vm6, %v3814_v45, %v3812_v0  ;;  %vm7160_vm6 = vcmask 48128  }
 0xd77   :  { %v2339_v18 = vsel %vm15484_vm4, %v2338_v51, %v2334_v27  ;;  %v3816_v27 = vmax.f32 %v3815_v28, 1e-20  ;;  %vm7144_vm4 = vcmask 25600  }
 0xd78   :  { %v2216_v61 = vpop.xlane.xlu0 %2215 }
 0xd79   :  { %v2343_v7 = vrot.slane %v2216_v61, %v15407_v3  ;;  %v3826_v16 = vrot.slane %v3816_v27, %v15469_v33  ;;  %v9657_v33 = vld [vmem:[%s14730_s25 + $0xf0] sm:$0xff] }
 0xd7a   :  { %5794 = vadd.xlane.f32.xlu0 %v5793_v47 }
 0xd7b   :  { %v2344_v56 = vsel %vm15485_vm1, %v2343_v7, %v2339_v18  ;;  %9581 = vrcp.f32 %v3826_v16  ;;  %v3830_v18 = vrot.slane %v3816_v27, %v15470_v57  ;;  %v15494_v7 = vld [vmem:[#allocation200_spill] sm:$0xff]  ;;  %vm15501_vm1 = vcmask 1041408  }
 0xd7c   :  { %v2218_v12 = vpop.xlane.xlu0 %2217  ;;  %v2192_v47 = vmul.f32 %v9656_v6, %v15494_v7  ;;  %v9658_v57 = vld [vmem:[%s14730_s25 + $0xf8] sm:$0xff]  ;;  %s9689_s25 = smov [#allocation2]  }
 0xd7d   :  { %v2348_v39 = vrot.slane %v2218_v12, %v15412_v46  ;;  %v14194_v46 = vpop.xlane.xlu1 %2251  ;;  %9583 = vrcp.f32 %v3830_v18  ;;  %s7171_s13 = sshll.u32 %s9689_s25, 4  ;;  %s7172_s13 = int_to_ptr.vmem [resolvable:$true] %s7171_s13 }
 0xd7e   :  { %s9659_s18 = scalar_lea.vmem %s7172_s13, 32  ;;  %p9664_p1 = scmp.lt.s32.totalorder %s7172_s13, %s7172_s13 }
 0xd7f   :  { %v2349_v62 = vsel %vm15486_vm15, %v2348_v39, %v2344_v56  ;;  %v15495_v56 = vld [vmem:[#allocation201_spill] sm:$0xff]  ;;  %vm15504_vm15 = vmmov %vm15492_vm10  ;;  %p9660_p0 = scmp.ne.s32.totalorder %s7172_s13, %s9659_s18  ;;  %p9665_p2 = scmp.lt.s32.totalorder %s9659_s18, %s9659_s18 }
 0xd80   :  { %v2220_v23 = vpop.xlane.xlu0 %2219  ;;  %v2193_v12 = vmul.f32 %v9657_v33, %v15495_v56 }
 0xd81   :  { %v2353_v5 = vrot.slane %v2220_v23, %v15421_v13  ;;  %p9666_p3 = por %p9665_p2, %p9664_p1 }
 0xd83   :  { %v2354_v48 = vsel %vm15487_vm14, %v2353_v5, %v2349_v62  ;;  %v15496_v62 = vld [vmem:[#allocation141_spill] sm:$0xff]  ;;  %p9667_p4 = pnand %p9666_p3, %p9660_p0 }
 0xd84   :  { %v2222_v36 = vpop.xlane.xlu0 %2221  ;;  %v2194_v23 = vmul.f32 %v9658_v57, %v15496_v62  ;;  %v15497_v5 = vld [vmem:[#allocation73_spill] sm:$0xff] }
 0xd85   :  { %v7055_v3 = vpop.f32.mrb[110].mxu0  ;;  %v2358_v41 = vrot.slane %v2222_v36, %v15428_v40  ;;  %v9582_v39 = vpop.eup %9581 }
 0xd86   :  { %v7056_v31 = vadd.f32 %v7387_v38, %v7055_v3  ;;  %v8706_v25 = vpop.f32.mrb[111].mxu0  ;;  %v15498_v38 = vld [vmem:[#allocation218_spill] sm:$0xff] }
 0xd87   :  { %v2359_v35 = vsel %vm15491_vm3, %v2358_v41, %v2354_v48  ;;  %v5784_v48 = vmul.f32 %v15497_v5, %v13283_v19  ;;  %v3834_v3 = vmul.f32 %v9582_v39, %v15498_v38  ;;  %v15499_v25 = vld [vmem:[#allocation38_spill] sm:$0xff] }
 0xd88   :  { %v7059_v58 = vmax.f32 %v7056_v31, 0.0  ;;  %v9584_v31 = vpop.eup %9583 }
 0xd89   :  { %v3837_v36 = vsub.f32 %v3834_v3, %v13286_v4 }
 0xd8a   :  { %8716 = vmatmul.mubr.msk.f32.vlgmr.msra.gmra.mrb[112].mxu0 %vm15488_vm8, %v7059_v58  ;;  %v5786_v58 = vmul.f32 %v15499_v25, %v13283_v19  ;;  %vm15506_vm8 = vmmov %vm15490_vm2 }
 0xd90   :  { %2155 = vrot.lane.b32.xlu0 %v15489_v1, %s9684_s6  ;;  %v5790_v1 = vsel %vm4848_vm9, %v5784_v48, 0.0 }
 0xdf3   :  { %v6515_v26 = vpop.xlane.xlu1 %6514  ;;  %v6512_v59 = vpop.xlane.xlu0 %6511 }
 0xdf4   :  { %v6533_v60 = vrot.slane %v6515_v26, %v15293_v10  ;;  %v6529_v54 = vrot.slane %v6512_v59, %v15292_v63  ;;  %v15500_v26 = vld [vmem:[#allocation219_spill] sm:$0xff] }
 0xdf5   :  { %v3836_v59 = vmul.f32 %v9584_v31, %v15500_v26 }
 0xdf6   :  { %v6534_v55 = vsel %vm1890_vm7, %v6533_v60, %v6529_v54  ;;  %v5796_v54 = vsel %vm4848_vm9, %v5786_v58, 0.0  ;;  %vm15503_vm9 = vmmov %vm15491_vm3 }
 0xdf7   :  { %v6521_v34 = vpop.xlane.xlu1 %6520  ;;  %v6518_v2 = vpop.xlane.xlu0 %6517  ;;  %vm15508_vm3 = vmmov %vm15501_vm1 }
 0xdf8   :  { %v6542_v29 = vrot.slane %v6521_v34, %v15293_v10  ;;  %v6538_v52 = vrot.slane %v6518_v2, %v15292_v63  ;;  %v3839_v34 = vmul.f32 %v3837_v36, %v3837_v36  ;;  %v3838_v2 = vsub.f32 %v3836_v59, %v13286_v4 }
 0xdfa   :  { %v6543_v32 = vsel %vm1890_vm7, %v6542_v29, %v6538_v52  ;;  %v3841_v52 = vsel %vm1124_vm5, %v3839_v34, 0.0  ;;  %v3840_v41 = vmul.f32 %v3838_v2, %v3838_v2 }
 0xdfb   :  { %v2224_v15 = vpop.xlane.xlu0 %2223  ;;  %v6544_v9 = vsel %vm15490_vm2, %v6543_v32, %v6534_v55  ;;  %vm15507_vm2 = vmmov %vm15501_vm1 }
 0xdfc   :  { %v2363_v11 = vrot.slane %v2224_v15, %v15434_v24  ;;  %v6546_v17 = vsel %vm5823_vm0, %v6544_v9, 0.0  ;;  %v3844_v19 = vsel %vm1124_vm5, %v3840_v41, 0.0  ;;  %v2073_v15 = vsel %vm15501_vm1, %v14090_v44, 0.0  ;;  %vm15502_vm5 = vmmov %vm15487_vm14 }
 0xdfd   :  { %6547 = vadd.xlane.f32.xlu0 %v6546_v17  ;;  %vm15505_vm14 = vmmov %vm15493_vm11 }
 0xdfe   :  { %v2364_v37 = vsel %vm15492_vm10, %v2363_v11, %v2359_v35  ;;  %v2432_v35 = vrot.slane %v14194_v46, %v15421_v13  ;;  %v6275_v46 = vsel %vm15507_vm2, %v14164_v50, 0.0  ;;  %vm15509_vm10 = vmmov %vm15506_vm8 }
 0xdff   :  { %v2226_v14 = vpop.xlane.xlu0 %2225 }
 0xe00   :  { %v2368_v49 = vrot.slane %v2226_v14, %v15443_v43  ;;  %v2433_v8 = vsel %vm15502_vm5, %v2432_v35, %v14123_v22 }
 0xe02   :  { %v14210_v42 = vsel %vm15493_vm11, %v2368_v49, %v2364_v37  ;;  %vm15510_vm11 = vmmov %vm15506_vm8 }
 0xe03   :  { %v5789_v60 = vpop.xlane.xlu0 %5788 }
 0xe07   :  { %v5795_v29 = vpop.xlane.xlu0 %5794 }
 0xe08   :  { %v5815_v16 = vrot.slane %v5795_v29, %v15292_v63 }
 0xe0b   :  { %v2156_v55 = vpop.permute.xlu0 %2155 }
 0xe0c   :  { %v2159_v32 = vsel %vm2158_vm13, %v2156_v55, 0.0 }
 0xe5d   :  { %v7140_v53 = vpop.f32.mrb[112].mxu0 }
 0xe5e   :  { %v7141_v51 = vadd.f32 %v7389_v21, %v7140_v53  ;;  %v8717_v20 = vpop.f32.mrb[113].mxu0 }
 0xe60   :  { %v7145_v61 = vsel %vm7144_vm4, %v7141_v51, -inf }
 0xe61   :  { %7146 = vmax.xlane.f32.xlu1 %v7145_v61 }
 0xe65   :  { %2253 = vadd.xlane.f32.xlu1 %v2192_v47 }
 0xe69   :  { %2255 = vadd.xlane.f32.xlu1 %v2193_v12 }
 0xe6d   :  { %2257 = vadd.xlane.f32.xlu1 %v2194_v23 }
 0xe71   :  { %5791 = vadd.xlane.f32.xlu1 %v5790_v1 }
 0xe75   :  { %5797 = vadd.xlane.f32.xlu1 %v5796_v54 }
 0xe79   :  { %3842 = vadd.xlane.f32.xlu1 %v3841_v52 }
 0xe7d   :  { %3845 = vadd.xlane.f32.xlu1 %v3844_v19 }
 0xe81   :  { %2160 = vadd.xlane.f32.xlu1 %v2159_v32 }
 0xe85   :  { %2074 = vadd.xlane.f32.xlu1 %v2073_v15 }
 0xe8a   :  { %v6548_v62 = vpop.xlane.xlu0 %6547 }
 0xe8b   :  { %v6554_v52 = vand.u32 2147483648, %v6548_v62  ;;  %vm6553_vm1 = vcmp.eq.f32.partialorder %v6548_v62, 0.0 }
 0xeee   :  { %v7147_v9 = vpop.xlane.xlu1 %7146 }
 0xeef   :  { %v14251_v11 = vsub.f32 %v7141_v51, %v7147_v9 }
 0xef1   :  { %v7149_v4 = vmul.f32 1.442695, %v14251_v11 }
 0xef2   :  { %v2254_v17 = vpop.xlane.xlu1 %2253 }
 0xef3   :  { %9585 = vpow2.f32 %v7149_v4  ;;  %v2437_v14 = vrot.slane %v2254_v17, %v15428_v40 }
 0xef4   :  { %9587 = vrsqrt.f32 %v6548_v62 }
 0xef5   :  { %v2438_v30 = vsel %vm15503_vm9, %v2437_v14, %v2433_v8 }
 0xef6   :  { %v2256_v37 = vpop.xlane.xlu1 %2255 }
 0xef7   :  { %v2442_v49 = vrot.slane %v2256_v37, %v15434_v24 }
 0xef9   :  { %v2443_v45 = vsel %vm15504_vm15, %v2442_v49, %v2438_v30 }
 0xefa   :  { %v2258_v44 = vpop.xlane.xlu1 %2257 }
 0xefb   :  { %v2447_v0 = vrot.slane %v2258_v44, %v15443_v43  ;;  %v5806_v43 = vrot.slane %v5789_v60, %v15292_v63 }
 0xefd   :  { %v9586_v28 = vpop.eup %9585  ;;  %v2448_v27 = vsel %vm15505_vm14, %v2447_v0, %v2443_v45 }
 0xefe   :  { %v5792_v21 = vpop.xlane.xlu1 %5791  ;;  %v7151_v13 = vsel %vm7144_vm4, %v9586_v28, 0.0  ;;  %v2449_v40 = vsel %vm15506_vm8, %v2448_v27, %v14210_v42  ;;  %vm7162_vm4 = vcmask 56320  }
 0xeff   :  { %7152 = vadd.xlane.f32.xlu1 %v7151_v13  ;;  %v5810_v24 = vrot.slane %v5792_v21, %v15293_v10  ;;  %v2451_v42 = vsel %vm15508_vm3, %v2449_v40, 0.0 }
 0xf01   :  { %v5811_v51 = vsel %vm1890_vm7, %v5810_v24, %v5806_v43 }
 0xf02   :  { %v5798_v22 = vpop.xlane.xlu1 %5797 }
 0xf03   :  { %v5819_v53 = vrot.slane %v5798_v22, %v15293_v10  ;;  %6276 = vadd.xlane.f32.xlu1 %v6275_v46 }
 0xf05   :  { %v5820_v20 = vsel %vm1890_vm7, %v5819_v53, %v5815_v16  ;;  %vm6551_vm7 = vcmp.eq.f32.partialorder %v6548_v62, inf }
 0xf06   :  { %v3843_v18 = vpop.xlane.xlu1 %3842  ;;  %v5821_v61 = vsel %vm15509_vm10, %v5820_v20, %v5811_v51 }
 0xf07   :  { %2452 = vadd.xlane.f32.xlu1 %v2451_v42  ;;  %v5824_v50 = vsel %vm5823_vm0, %v5821_v61, 0.0  ;;  %v3852_v7 = vrot.slane %v3843_v18, %v15292_v63  ;;  %vm15511_vm0 = vcmask 31744  }
 0xf0a   :  { %v3846_v6 = vpop.xlane.xlu1 %3845 }
 0xf0b   :  { %v3856_v47 = vrot.slane %v3846_v6, %v15292_v63  ;;  %5825 = vadd.xlane.f32.xlu1 %v5824_v50  ;;  %v9588_v63 = vpop.eup %9587 }
 0xf0c   :  { %v6550_v36 = vmul.f32 %v9588_v63, %v6548_v62 }
 0xf0d   :  { %v3857_v10 = vsel %vm15510_vm11, %v3856_v47, %v3852_v7 }
 0xf0e   :  { %v3859_v33 = vsel %vm2158_vm13, %v3857_v10, 0.0  ;;  %v2161_v56 = vpop.xlane.xlu1 %2160  ;;  %v6552_v29 = vsel %vm6551_vm7, %v6548_v62, %v6550_v36 }
 0xf0f   :  { %3860 = vadd.xlane.f32.xlu1 %v3859_v33  ;;  %v2162_v39 = vmul.f32 1e-15, %v2161_v56  ;;  %v6555_v32 = vsel %vm6553_vm1, %v6554_v52, %v6552_v29 }
 0xf12   :  { %v2075_v12 = vpop.xlane.xlu1 %2074 }
 0xf13   :  { %v2454_v57 = vadd.f32 %v2162_v39, %v2075_v12 }
 0xf15   :  { %v2456_v23 = vadd.f32 1e-15, %v2454_v57 }
 0xf8c   :  { %v7153_v5 = vpop.xlane.xlu1 %7152 }
 0xf8d   :  { %9589 = vlog2.f32 %v7153_v5 }
 0xf8e   :  { %9591 = vrcp.f32 %v2456_v23 }
 0xf90   :  { %v6277_v48 = vpop.xlane.xlu1 %6276 }
 0xf91   :  { %9593 = vrcp.f32 %v6277_v48 }
 0xf94   :  { %v2453_v38 = vpop.xlane.xlu1 %2452 }
 0xf95   :  { %v2455_v3 = vsub.f32 %v2454_v57, %v2453_v38 }
 0xf97   :  { %v9590_v31 = vpop.eup %9589 }
 0xf98   :  { %v7155_v25 = vmul.f32 0.6931472, %v9590_v31  ;;  %v5826_v58 = vpop.xlane.xlu1 %5825  ;;  %v9592_v1 = vpop.eup %9591 }
 0xf99   :  { %v2458_v59 = vmul.f32 %v9592_v1, %v2455_v3 }
 0xf9a   :  { %v7156_v26 = vsub.f32 %v14251_v11, %v7155_v25 }
 0xf9b   :  { %v9594_v60 = vpop.eup %9593 }
 0xf9c   :  { %v6279_v54 = vmul.f32 %v9594_v60, %v5826_v58  ;;  %v7157_v34 = vsel %vm15511_vm0, %v7156_v26, %v2458_v59  ;;  %v3861_v2 = vpop.xlane.xlu1 %3860 }
 0xf9d   :  { %v7159_v19 = vsel %vm7158_vm12, %v7157_v34, %v3861_v2 }
 0xf9e   :  { %v6280_v41 = vsub.f32 0.0, %v6279_v54 }
 0xfa0   :  { %v7161_v55 = vsel %vm7160_vm6, %v7159_v19, %v6280_v41 }
 0xfa1   :  { %v7163_v15 = vsel %vm7162_vm4, %v7161_v55, %v6555_v32 }
 0xfa2   :  { %7164 = vst.msk [vmem:[#allocation2] sm:$0x3] %vm2158_vm13, %v7163_v15 }
 0xfa3   :  { %9670 = shalt.err (!%p9667_p4)
}
 0xfa4   :  { %s9671_s3 = scalar_lea.hbm %s14314_s17, 32 }
 0xfa5   :  { %p9672_p5 = scmp.ne.s32.totalorder %s14314_s17, %s9671_s3  ;;  %p9675_p6 = scmp.lt.u32.totalorder %s9671_s3, %s14314_s17 }
 0xfa7   :  { %p9677_p7 = pnand %p9675_p6, %p9672_p5 }
 0xfa9   :  { %9680 = shalt.err (!%p9677_p7)
}
 0xfaa   :  { %7174 = dma.vmem_to_hbm [thread:$0]  %s7172_s13, 32, %s14314_s17, [#allocation3]  }
 0xfab   :  { %9681 = dma.done.wait [#allocation3], 32  }
 0xfac   :  { %9682 = vsyncadd [#allocation3], 4294967264 }
 0xfad   :  { %7178 = vsyncpa [#allocation3], 1 }

</bundles_post_ra>
